<compile_context>
chip_gen: v7x
topology: tpu7x:2x2x1
jax: 0.10.0
libtpu: 0.0.40
codegen_flags: <defaults>
</compile_context>

<pallas_src>
import functools

import numpy as np
import jax
import jax.numpy as jnp
from jax.experimental import pallas as pl
from jax.experimental.pallas import tpu as pltpu


_LN_EPS = 1e-5
_BN_EPS = 1e-5
_SQRT_HALF = 0.7071067811865476
_MM_DTYPE = jnp.bfloat16          # matmul-operand dtype (accumulation is f32)


# ----------------------------------------------------------------------------
# In-kernel math helpers (traced inside the Pallas kernel)
# ----------------------------------------------------------------------------

def _erf(x):
    # Abramowitz & Stegun 7.1.26, |err| <= 1.5e-7; exp/mul/add/select only.
    a1, a2, a3, a4, a5 = (0.254829592, -0.284496736, 1.421413741,
                          -1.453152027, 1.061405429)
    p = 0.3275911
    pos = x >= 0.0
    ax = jnp.where(pos, x, -x)
    sgn = jnp.where(pos, 1.0, -1.0)
    t = 1.0 / (1.0 + p * ax)
    poly = ((((a5 * t + a4) * t + a3) * t + a2) * t + a1) * t
    return sgn * (1.0 - poly * jnp.exp(-ax * ax))


def _gelu_exact(x):
    return 0.5 * x * (1.0 + _erf(x * _SQRT_HALF))


def _sum_leading(y):
    """Tree-sum over a small static leading axis (shallow dependency chain)."""
    parts = [y[t] for t in range(y.shape[0])]
    while len(parts) > 1:
        nxt = []
        for i in range(0, len(parts) - 1, 2):
            nxt.append(parts[i] + parts[i + 1])
        if len(parts) % 2:
            nxt.append(parts[-1])
        parts = nxt
    return parts[0]


# ----------------------------------------------------------------------------
# Single fused kernel: pos-add + 4 transformer blocks + norm_post + classifier
# ----------------------------------------------------------------------------

def _fused_forward_kernel(a_ref, b_ref, pos_ref,
                          qkw_ref, vpw_ref, fc1w_ref, fc2w_ref,
                          vecc_ref, fc1b_ref,
                          lnp_ref, sv1_ref, sv2_ref,
                          w1_ref, so1_ref, w2_ref, so2_ref, w3_ref, b3_ref,
                          out_ref):
    a = a_ref[0]                      # (N, C) f32
    b = b_ref[0]
    N, C = a.shape
    H = qkw_ref.shape[1]              # num heads

    def ln(x, w, bias):
        mu = jnp.mean(x, axis=-1, keepdims=True)
        xc = x - mu
        var = jnp.mean(xc * xc, axis=-1, keepdims=True)
        return xc * jax.lax.rsqrt(var + _LN_EPS) * w + bias

    def mm(x, w):                     # 2-D matmul, bf16 operands, f32 acc
        return jnp.dot(x.astype(_MM_DTYPE), w,
                       preferred_element_type=jnp.float32)

    def bmm(x, w):                    # (B,M,K) x (B,K,L) -> (B,M,L)
        return jax.lax.dot_general(x, w, (((2,), (1,)), ((0,), (0,))),
                                   preferred_element_type=jnp.float32)

    def bmm_t(x, y):                  # (B,M,K) x (B,L,K) -> (B,M,L)
        return jax.lax.dot_general(x, y, (((2,), (2,)), ((0,), (0,))),
                                   preferred_element_type=jnp.float32)

    def attention(nq, nk, nv, qkw, vpw, pb):
        # QK_h = scale*Wq_h@Wk_h^T and VP_h = Wv_h@Wp_h folded on host, so all
        # matmuls here contract/emit full C=32 lanes (no D=4 MXU passes).
        nqb = jnp.broadcast_to(nq.astype(_MM_DTYPE)[None], (H, N, C))
        nkb = nqb if nk is nq else jnp.broadcast_to(
            nk.astype(_MM_DTYPE)[None], (H, N, C))
        if nv is nq:
            nvb = nqb
        elif nv is nk:
            nvb = nkb
        else:
            nvb = jnp.broadcast_to(nv.astype(_MM_DTYPE)[None], (H, N, C))
        t = bmm(nqb, qkw)                                  # (H,N,C)
        s = bmm_t(t.astype(_MM_DTYPE), nkb)                # (H,N,N) scaled scores
        s = s - jnp.max(s, axis=-1, keepdims=True)
        e = jnp.exp(s)
        p = e * pl.reciprocal(jnp.sum(e, axis=-1, keepdims=True), approx=True)
        z = bmm(nvb, vpw)                                  # (H,N,C)
        y = bmm(p.astype(_MM_DTYPE), z.astype(_MM_DTYPE))  # (H,N,C)
        return _sum_leading(y) + pb                        # (N,C); proj folded

    def block(xq, xk, xv, i):
        vc = vecc_ref[i]                                   # (6, C)
        n1w, n1b = vc[0:1, :], vc[1:2, :]
        pb = vc[2:3, :]
        n2w, n2b = vc[3:4, :], vc[4:5, :]
        f2b = vc[5:6, :]
        nq = ln(xq, n1w, n1b)
        nk = nq if xk is xq else ln(xk, n1w, n1b)
        nv = nq if xv is xq else (nk if xv is xk else ln(xv, n1w, n1b))
        x = xq + attention(nq, nk, nv, qkw_ref[i], vpw_ref[i], pb)
        hmid = mm(ln(x, n2w, n2b), fc1w_ref[i]) + fc1b_ref[i]
        hmid = _gelu_exact(hmid)                           # f32 GELU in-kernel
        return x + mm(hmid, fc2w_ref[i]) + f2b

    # ---- transformer trunk (all resident in VMEM/vregs) ----
    x = (a - b) + pos_ref[0]
    x = block(x, a, b, 0)             # Block_X(x, a, b)
    x = block(x, x, x, 1)             # Block(x)
    x = block(x, b, a, 2)             # Block_X(x, b, a)
    x = block(x, x, x, 3)             # Block(x)

    lnp = lnp_ref[...]
    xn = ln(x, lnp[0:1, :], lnp[1:2, :])                   # (N, C), incl. cls

    # ---- classifier: 3x3 convs as batched matmuls over the 9 taps ----
    def conv3x3(inp, sv3, w3d):
        # inp (T, Cin) f32; sv3 (9, HW, T) 0/1 shift tensor (padding=1, and
        # cls-token drop folded in for layer 1); w3d (9, Cin, Cout).
        # out = sum_t (S_t @ inp) @ W_t
        T, cin = inp.shape
        inp_b = jnp.broadcast_to(inp.astype(_MM_DTYPE)[None], (9, T, cin))
        z = bmm(sv3, inp_b)                                # (9, HW, Cin)
        y = bmm(z.astype(_MM_DTYPE), w3d)                  # (9, HW, Cout)
        return _sum_leading(y)                             # (HW, Cout)

    so1 = so1_ref[...]
    so2 = so2_ref[...]
    y = conv3x3(xn, sv1_ref[...], w1_ref[...])
    y = jnp.maximum(y * so1[0:1, :] + so1[1:2, :], 0.0)    # conv bias+BN+ReLU
    y = conv3x3(y, sv2_ref[...], w2_ref[...])
    y = jnp.maximum(y * so2[0:1, :] + so2[1:2, :], 0.0)
    out_ref[0] = mm(y, w3_ref[...]) + b3_ref[...]          # (HW, 128-padded)


# ----------------------------------------------------------------------------
# pallas_call wrapper
# ----------------------------------------------------------------------------

def forward(params, a, b, *, height, width, num_classes):
    B, N, C = a.shape
    hw = height * width
    outp = params["b3"].shape[-1]                          # lane-padded classes

    act = pl.BlockSpec((1, N, C), lambda i: (i, 0, 0))

    def const_spec(arr):
        nd = arr.ndim
        return pl.BlockSpec(arr.shape, lambda i, _nd=nd: (0,) * _nd)

    weights = (params["pos"], params["qk_w"], params["vp_w"],
               params["fc1_w"], params["fc2_w"], params["vec_c"],
               params["fc1_b"], params["ln_post"], params["sv1"],
               params["sv2"], params["w1"], params["so1"], params["w2"],
               params["so2"], params["w3"], params["b3"])

    out = pl.pallas_call(
        _fused_forward_kernel,
        out_shape=jax.ShapeDtypeStruct((B, hw, outp), jnp.float32),
        grid=(B,),
        in_specs=[act, act] + [const_spec(w) for w in weights],
        out_specs=pl.BlockSpec((1, hw, outp), lambda i: (i, 0, 0)),
        compiler_params=pltpu.CompilerParams(
            dimension_semantics=("parallel",)),
    )(a, b, *weights)

    logits = out[:, :, :num_classes]                       # drop lane padding
    return logits.reshape(B, height, width, num_classes).transpose(0, 3, 1, 2)


# ----------------------------------------------------------------------------
# Parameter init (torch-layout shapes) + one-time host-side packing
# ----------------------------------------------------------------------------

def init_params(key, C, H, W, num_classes):
    keys = iter(jax.random.split(key, 80))

    def rnd(shape, scale=0.02):
        return jax.random.normal(next(keys), shape, jnp.float32) * scale

    def block_params():
        return dict(
            norm1_w=1.0 + rnd((C,), 0.1), norm1_b=rnd((C,), 0.05),
            qkv_w=rnd((3 * C, C)),                          # qkv_bias=False
            proj_w=rnd((C, C)), proj_b=rnd((C,), 0.05),
            norm2_w=1.0 + rnd((C,), 0.1), norm2_b=rnd((C,), 0.05),
            fc1_w=rnd((4 * C, C)), fc1_b=rnd((4 * C,), 0.05),
            fc2_w=rnd((C, 4 * C)), fc2_b=rnd((C,), 0.05),
        )

    def bn_params(ch):
        return dict(g=1.0 + rnd((ch,), 0.1), b=rnd((ch,), 0.05),
                    m=rnd((ch,), 0.1), v=1.0 + jnp.abs(rnd((ch,), 0.2)))

    bn1, bn2 = bn_params(256), bn_params(128)
    return dict(
        pos=rnd((1, H * W + 1, C)),
        blocks=[block_params() for _ in range(4)],
        norm_post_w=1.0 + rnd((C,), 0.1), norm_post_b=rnd((C,), 0.05),
        conv1_w=rnd((256, C, 3, 3)), conv1_b=rnd((256,), 0.05),
        bn1_g=bn1["g"], bn1_b=bn1["b"], bn1_m=bn1["m"], bn1_v=bn1["v"],
        conv2_w=rnd((128, 256, 3, 3)), conv2_b=rnd((128,), 0.05),
        bn2_g=bn2["g"], bn2_b=bn2["b"], bn2_m=bn2["m"], bn2_v=bn2["v"],
        conv3_w=rnd((num_classes, 128, 1, 1)), conv3_b=rnd((num_classes,), 0.05),
    )


def _shift_tensor(h, w, lead_pad):
    """(9, h*w, h*w+lead_pad) 0/1 tensor: tap t selects each row-major grid
    position's padded-by-1 3x3 neighbour; the first `lead_pad` columns (the
    cls token) are never selected, folding the cls drop into the matmul."""
    hw = h * w
    mats = np.zeros((9, hw, hw + lead_pad), np.float32)
    for ky in range(3):
        for kx in range(3):
            t = ky * 3 + kx
            for i in range(h):
                for j in range(w):
                    ii, jj = i + ky - 1, j + kx - 1
                    if 0 <= ii < h and 0 <= jj < w:
                        mats[t, i * w + j, lead_pad + ii * w + jj] = 1.0
    return mats


def prepack_params(p, *, num_heads, height, width):
    """One-time packing: per-head QK / V-proj folds, BN fold, bf16 matmul
    weights, packed per-channel vectors, lane-padded classifier output."""
    C = p["norm_post_w"].shape[0]
    H = num_heads
    D = C // H
    scale = D ** -0.5
    f32 = lambda t: jnp.asarray(t, jnp.float32)
    bf = lambda t: jnp.asarray(t, _MM_DTYPE)

    qk_l, vp_l, fc1w_l, fc2w_l, vecc_l, fc1b_l = [], [], [], [], [], []
    for bp in p["blocks"]:
        qkv = f32(bp["qkv_w"])                             # (3C, C) torch layout
        wq, wk, wv = qkv[0:C].T, qkv[C:2 * C].T, qkv[2 * C:3 * C].T  # x @ w
        wp = f32(bp["proj_w"]).T                           # (C, C)
        qk = jnp.stack([scale * (wq[:, h * D:(h + 1) * D]
                                 @ wk[:, h * D:(h + 1) * D].T)
                        for h in range(H)])                # (H, C, C)
        vp = jnp.stack([wv[:, h * D:(h + 1) * D]
                        @ wp[h * D:(h + 1) * D, :]
                        for h in range(H)])                # (H, C, C)
        qk_l.append(qk)
        vp_l.append(vp)
        fc1w_l.append(f32(bp["fc1_w"]).T)                  # (C, 4C)
        fc2w_l.append(f32(bp["fc2_w"]).T)                  # (4C, C)
        vecc_l.append(jnp.stack([f32(bp["norm1_w"]), f32(bp["norm1_b"]),
                                 f32(bp["proj_b"]),
                                 f32(bp["norm2_w"]), f32(bp["norm2_b"]),
                                 f32(bp["fc2_b"])]))       # (6, C)
        fc1b_l.append(f32(bp["fc1_b"]).reshape(1, -1))     # (1, 4C)

    def bn_fold(conv_b, g, beta, mean, var):
        mult = f32(g) / jnp.sqrt(f32(var) + _BN_EPS)
        add = (f32(conv_b) - f32(mean)) * mult + f32(beta)
        return jnp.stack([mult, add])                      # (2, Cout)

    def pack_conv(w):                                      # (Co,Ci,3,3)->(9,Ci,Co)
        co, ci = w.shape[0], w.shape[1]
        return jnp.transpose(f32(w), (2, 3, 1, 0)).reshape(9, ci, co)

    nc = p["conv3_w"].shape[0]
    outp = max(128, ((nc + 127) // 128) * 128)             # lane-dense output
    w3 = f32(p["conv3_w"]).reshape(nc, -1).T               # (128, nc)
    w3 = jnp.zeros((w3.shape[0], outp), jnp.float32).at[:, :nc].set(w3)
    b3 = jnp.zeros((1, outp), jnp.float32).at[0, :nc].set(f32(p["conv3_b"]))

    # TODO(synk): BatchNorm uses running statistics (eval mode); training-mode
    # batch statistics are not implemented.
    # TODO(synk): shift tensors are O((H*W)^2); for large grids switch the 3x3
    # shifts to pltpu.roll + boundary masks so they stay inside v7x VMEM.
    return dict(
        pos=f32(p["pos"]),
        qk_w=bf(jnp.stack(qk_l)), vp_w=bf(jnp.stack(vp_l)),
        fc1_w=bf(jnp.stack(fc1w_l)), fc2_w=bf(jnp.stack(fc2w_l)),
        vec_c=jnp.stack(vecc_l), fc1_b=jnp.stack(fc1b_l),
        ln_post=jnp.stack([f32(p["norm_post_w"]), f32(p["norm_post_b"])]),
        sv1=bf(_shift_tensor(height, width, 1)),           # (9, HW, HW+1)
        sv2=bf(_shift_tensor(height, width, 0)),           # (9, HW, HW)
        w1=bf(pack_conv(p["conv1_w"])),
        so1=bn_fold(p["conv1_b"], p["bn1_g"], p["bn1_b"], p["bn1_m"], p["bn1_v"]),
        w2=bf(pack_conv(p["conv2_w"])),
        so2=bn_fold(p["conv2_b"], p["bn2_g"], p["bn2_b"], p["bn2_m"], p["bn2_v"]),
        w3=bf(w3), b3=b3,
    )


# ----------------------------------------------------------------------------
# Pure-JAX (XLA, f32) reference of the PyTorch module, for correctness check
# ----------------------------------------------------------------------------

def reference_forward(p, a, b, *, num_heads, height, width):
    C = p["norm_post_w"].shape[0]
    H = num_heads
    D = C // H
    scale = D ** -0.5

    def ln(x, w, bias):
        mu = jnp.mean(x, axis=-1, keepdims=True)
        var = jnp.mean((x - mu) ** 2, axis=-1, keepdims=True)
        return (x - mu) * jax.lax.rsqrt(var + _LN_EPS) * w + bias

    def attn(bp, xq, xk, xv):
        B, Nq, _ = xq.shape
        qkv_w = bp["qkv_w"]

        def head_proj(x, lo):
            y = x @ qkv_w[lo:lo + C].T
            return y.reshape(B, -1, H, D).transpose(0, 2, 1, 3)

        q, k, v = head_proj(xq, 0), head_proj(xk, C), head_proj(xv, 2 * C)
        s = jnp.einsum("bhnd,bhmd->bhnm", q, k) * scale
        pr = jax.nn.softmax(s, axis=-1)
        o = jnp.einsum("bhnm,bhmd->bhnd", pr, v)
        o = o.transpose(0, 2, 1, 3).reshape(B, Nq, C)
        return o @ bp["proj_w"].T + bp["proj_b"]

    def mlp(bp, x):
        h1 = jax.nn.gelu(x @ bp["fc1_w"].T + bp["fc1_b"], approximate=False)
        return h1 @ bp["fc2_w"].T + bp["fc2_b"]

    def block(bp, xq, xk, xv):
        n1 = lambda t: ln(t, bp["norm1_w"], bp["norm1_b"])
        x = xq + attn(bp, n1(xq), n1(xk), n1(xv))
        return x + mlp(bp, ln(x, bp["norm2_w"], bp["norm2_b"]))

    x = (a - b) + p["pos"]
    blks = p["blocks"]
    x = block(blks[0], x, a, b)
    x = block(blks[1], x, x, x)
    x = block(blks[2], x, b, a)
    x = block(blks[3], x, x, x)
    x = ln(x, p["norm_post_w"], p["norm_post_b"])[:, 1:]
    B = x.shape[0]
    img = x.reshape(B, height, width, C).transpose(0, 3, 1, 2)

    def conv(img, w, bconv):
        y = jax.lax.conv_general_dilated(
            img, w, (1, 1), "SAME", dimension_numbers=("NCHW", "OIHW", "NCHW"))
        return y + bconv[None, :, None, None]

    def bn_relu(y, g, beta, mean, var):
        y = (y - mean[None, :, None, None]) * jax.lax.rsqrt(
            var[None, :, None, None] + _BN_EPS)
        return jnp.maximum(y * g[None, :, None, None]
                           + beta[None, :, None, None], 0.0)

    y = bn_relu(conv(img, p["conv1_w"], p["conv1_b"]),
                p["bn1_g"], p["bn1_b"], p["bn1_m"], p["bn1_v"])
    y = bn_relu(conv(y, p["conv2_w"], p["conv2_b"]),
                p["bn2_g"], p["bn2_b"], p["bn2_m"], p["bn2_v"])
    return conv(y, p["conv3_w"], p["conv3_b"])


# ----------------------------------------------------------------------------

if __name__ == "__main__":
    EMBED, HEIGHT, WIDTH = 32, 4, 4
    NUM_CLASSES, NUM_HEADS = 2, 8
    BATCH = 2
    N_TOKENS = HEIGHT * WIDTH + 1                          # +1 cls token

    key = jax.random.PRNGKey(0)
    kp, ka, kb = jax.random.split(key, 3)
    raw = init_params(kp, EMBED, HEIGHT, WIDTH, NUM_CLASSES)
    params = prepack_params(raw, num_heads=NUM_HEADS,
                            height=HEIGHT, width=WIDTH)
    a = jax.random.normal(ka, (BATCH, N_TOKENS, EMBED), jnp.float32)
    b = jax.random.normal(kb, (BATCH, N_TOKENS, EMBED), jnp.float32)

    fwd = jax.jit(functools.partial(forward, height=HEIGHT, width=WIDTH,
                                    num_classes=NUM_CLASSES))
    logits = jax.block_until_ready(fwd(params, a, b))
    assert logits.shape == (BATCH, NUM_CLASSES, HEIGHT, WIDTH), logits.shape
    assert bool(jnp.all(jnp.isfinite(logits)))

    # Sanity check against the pure-JAX f32 reference (tolerance accounts for
    # bf16 matmul operands + approx softmax reciprocal + erf polynomial).
    ref = jax.jit(functools.partial(reference_forward, num_heads=NUM_HEADS,
                                    height=HEIGHT, width=WIDTH))(raw, a, b)
    ref = jax.block_until_ready(ref)
    err = float(jnp.max(jnp.abs(logits - ref)))
    tol = 1e-2 + 0.1 * float(jnp.max(jnp.abs(ref)))
    assert err <= tol, (err, tol)

    print("KERNEL_OK")
</pallas_src>

<mosaic_0001>
module attributes {stable_mosaic.version = 11 : i64} {
  func.func @_fused_forward_kernel(%arg0: i32, %arg1: memref<1x17x32xf32, #tpu.memory_space<vmem>>, %arg2: memref<1x17x32xf32, #tpu.memory_space<vmem>>, %arg3: memref<1x17x32xf32, #tpu.memory_space<vmem>>, %arg4: memref<4x8x32x32xbf16, #tpu.memory_space<vmem>>, %arg5: memref<4x8x32x32xbf16, #tpu.memory_space<vmem>>, %arg6: memref<4x32x128xbf16, #tpu.memory_space<vmem>>, %arg7: memref<4x128x32xbf16, #tpu.memory_space<vmem>>, %arg8: memref<4x6x32xf32, #tpu.memory_space<vmem>>, %arg9: memref<4x1x128xf32, #tpu.memory_space<vmem>>, %arg10: memref<2x32xf32, #tpu.memory_space<vmem>>, %arg11: memref<9x16x17xbf16, #tpu.memory_space<vmem>>, %arg12: memref<9x16x16xbf16, #tpu.memory_space<vmem>>, %arg13: memref<9x32x256xbf16, #tpu.memory_space<vmem>>, %arg14: memref<2x256xf32, #tpu.memory_space<vmem>>, %arg15: memref<9x256x128xbf16, #tpu.memory_space<vmem>>, %arg16: memref<2x128xf32, #tpu.memory_space<vmem>>, %arg17: memref<128x128xbf16, #tpu.memory_space<vmem>>, %arg18: memref<1x128xf32, #tpu.memory_space<vmem>>, %arg19: memref<1x16x128xf32, #tpu.memory_space<vmem>>) attributes {dimension_semantics = [#tpu.dimension_semantics<parallel>], iteration_bounds = array<i64: 2>, scalar_prefetch = 0 : i64, scratch_operands = 0 : i64, tpu.core_type = #tpu.core_type<tc>, window_params = [{transform_indices = @transform_0, window_bounds = array<i64: 1, 17, 32>}, {transform_indices = @transform_1, window_bounds = array<i64: 1, 17, 32>}, {pipeline_mode = #tpu.pipeline_mode<synchronous>, transform_indices = @transform_2, window_bounds = array<i64: 1, 17, 32>}, {pipeline_mode = #tpu.pipeline_mode<synchronous>, transform_indices = @transform_3, window_bounds = array<i64: 4, 8, 32, 32>}, {pipeline_mode = #tpu.pipeline_mode<synchronous>, transform_indices = @transform_4, window_bounds = array<i64: 4, 8, 32, 32>}, {pipeline_mode = #tpu.pipeline_mode<synchronous>, transform_indices = @transform_5, window_bounds = array<i64: 4, 32, 128>}, {pipeline_mode = #tpu.pipeline_mode<synchronous>, transform_indices = @transform_6, window_bounds = array<i64: 4, 128, 32>}, {pipeline_mode = #tpu.pipeline_mode<synchronous>, transform_indices = @transform_7, window_bounds = array<i64: 4, 6, 32>}, {pipeline_mode = #tpu.pipeline_mode<synchronous>, transform_indices = @transform_8, window_bounds = array<i64: 4, 1, 128>}, {pipeline_mode = #tpu.pipeline_mode<synchronous>, transform_indices = @transform_9, window_bounds = array<i64: 2, 32>}, {pipeline_mode = #tpu.pipeline_mode<synchronous>, transform_indices = @transform_10, window_bounds = array<i64: 9, 16, 17>}, {pipeline_mode = #tpu.pipeline_mode<synchronous>, transform_indices = @transform_11, window_bounds = array<i64: 9, 16, 16>}, {pipeline_mode = #tpu.pipeline_mode<synchronous>, transform_indices = @transform_12, window_bounds = array<i64: 9, 32, 256>}, {pipeline_mode = #tpu.pipeline_mode<synchronous>, transform_indices = @transform_13, window_bounds = array<i64: 2, 256>}, {pipeline_mode = #tpu.pipeline_mode<synchronous>, transform_indices = @transform_14, window_bounds = array<i64: 9, 256, 128>}, {pipeline_mode = #tpu.pipeline_mode<synchronous>, transform_indices = @transform_15, window_bounds = array<i64: 2, 128>}, {pipeline_mode = #tpu.pipeline_mode<synchronous>, transform_indices = @transform_16, window_bounds = array<i64: 128, 128>}, {pipeline_mode = #tpu.pipeline_mode<synchronous>, transform_indices = @transform_17, window_bounds = array<i64: 1, 128>}, {transform_indices = @transform_18, window_bounds = array<i64: 1, 16, 128>}]} {
    %c0 = arith.constant 0 : index
    %c0_0 = arith.constant 0 : index
    %c0_1 = arith.constant 0 : index
    %0 = vector.load %arg1[%c0, %c0_0, %c0_1] : memref<1x17x32xf32, #tpu.memory_space<vmem>>, vector<1x17x32xf32>
    %1 = vector.shape_cast %0 : vector<1x17x32xf32> to vector<17x32xf32>
    %c0_2 = arith.constant 0 : index
    %c0_3 = arith.constant 0 : index
    %c0_4 = arith.constant 0 : index
    %2 = vector.load %arg2[%c0_2, %c0_3, %c0_4] : memref<1x17x32xf32, #tpu.memory_space<vmem>>, vector<1x17x32xf32>
    %3 = vector.shape_cast %2 : vector<1x17x32xf32> to vector<17x32xf32>
    %4 = arith.subf %1, %3 : vector<17x32xf32>
    %c0_5 = arith.constant 0 : index
    %c0_6 = arith.constant 0 : index
    %c0_7 = arith.constant 0 : index
    %5 = vector.load %arg3[%c0_5, %c0_6, %c0_7] : memref<1x17x32xf32, #tpu.memory_space<vmem>>, vector<1x17x32xf32>
    %6 = vector.shape_cast %5 : vector<1x17x32xf32> to vector<17x32xf32>
    %7 = arith.addf %4, %6 : vector<17x32xf32>
    %c0_8 = arith.constant 0 : index
    %c0_9 = arith.constant 0 : index
    %c0_10 = arith.constant 0 : index
    %8 = vector.load %arg8[%c0_8, %c0_9, %c0_10] : memref<4x6x32xf32, #tpu.memory_space<vmem>>, vector<1x6x32xf32>
    %9 = vector.shape_cast %8 : vector<1x6x32xf32> to vector<6x32xf32>
    %10 = vector.extract_strided_slice %9 {offsets = [0, 0], sizes = [1, 32], strides = [1, 1]} : vector<6x32xf32> to vector<1x32xf32>
    %11 = vector.extract_strided_slice %9 {offsets = [1, 0], sizes = [1, 32], strides = [1, 1]} : vector<6x32xf32> to vector<1x32xf32>
    %12 = vector.extract_strided_slice %9 {offsets = [2, 0], sizes = [1, 32], strides = [1, 1]} : vector<6x32xf32> to vector<1x32xf32>
    %13 = vector.extract_strided_slice %9 {offsets = [3, 0], sizes = [1, 32], strides = [1, 1]} : vector<6x32xf32> to vector<1x32xf32>
    %14 = vector.extract_strided_slice %9 {offsets = [4, 0], sizes = [1, 32], strides = [1, 1]} : vector<6x32xf32> to vector<1x32xf32>
    %15 = vector.extract_strided_slice %9 {offsets = [5, 0], sizes = [1, 32], strides = [1, 1]} : vector<6x32xf32> to vector<1x32xf32>
    %cst = arith.constant dense<0.000000e+00> : vector<17xf32>
    %16 = vector.multi_reduction <add>, %7, %cst [1] : vector<17x32xf32> to vector<17xf32>
    %17 = vector.shape_cast %16 : vector<17xf32> to vector<17x1xf32>
    %cst_11 = arith.constant 3.200000e+01 : f32
    %18 = vector.broadcast %cst_11 : f32 to vector<17x1xf32>
    %19 = arith.divf %17, %18 : vector<17x1xf32>
    %20 = vector.broadcast %19 : vector<17x1xf32> to vector<17x32xf32>
    %21 = arith.subf %7, %20 : vector<17x32xf32>
    %22 = arith.mulf %21, %21 : vector<17x32xf32>
    %cst_12 = arith.constant dense<0.000000e+00> : vector<17xf32>
    %23 = vector.multi_reduction <add>, %22, %cst_12 [1] : vector<17x32xf32> to vector<17xf32>
    %24 = vector.shape_cast %23 : vector<17xf32> to vector<17x1xf32>
    %cst_13 = arith.constant 3.200000e+01 : f32
    %25 = vector.broadcast %cst_13 : f32 to vector<17x1xf32>
    %26 = arith.divf %24, %25 : vector<17x1xf32>
    %cst_14 = arith.constant 9.99999974E-6 : f32
    %27 = vector.broadcast %cst_14 : f32 to vector<17x1xf32>
    %28 = arith.addf %26, %27 : vector<17x1xf32>
    %29 = math.rsqrt %28 : vector<17x1xf32>
    %30 = vector.broadcast %29 : vector<17x1xf32> to vector<17x32xf32>
    %31 = arith.mulf %21, %30 : vector<17x32xf32>
    %32 = vector.broadcast %10 : vector<1x32xf32> to vector<17x32xf32>
    %33 = arith.mulf %31, %32 : vector<17x32xf32>
    %34 = vector.broadcast %11 : vector<1x32xf32> to vector<17x32xf32>
    %35 = arith.addf %33, %34 : vector<17x32xf32>
    %cst_15 = arith.constant dense<0.000000e+00> : vector<17xf32>
    %36 = vector.multi_reduction <add>, %1, %cst_15 [1] : vector<17x32xf32> to vector<17xf32>
    %37 = vector.shape_cast %36 : vector<17xf32> to vector<17x1xf32>
    %cst_16 = arith.constant 3.200000e+01 : f32
    %38 = vector.broadcast %cst_16 : f32 to vector<17x1xf32>
    %39 = arith.divf %37, %38 : vector<17x1xf32>
    %40 = vector.broadcast %39 : vector<17x1xf32> to vector<17x32xf32>
    %41 = arith.subf %1, %40 : vector<17x32xf32>
    %42 = arith.mulf %41, %41 : vector<17x32xf32>
    %cst_17 = arith.constant dense<0.000000e+00> : vector<17xf32>
    %43 = vector.multi_reduction <add>, %42, %cst_17 [1] : vector<17x32xf32> to vector<17xf32>
    %44 = vector.shape_cast %43 : vector<17xf32> to vector<17x1xf32>
    %cst_18 = arith.constant 3.200000e+01 : f32
    %45 = vector.broadcast %cst_18 : f32 to vector<17x1xf32>
    %46 = arith.divf %44, %45 : vector<17x1xf32>
    %cst_19 = arith.constant 9.99999974E-6 : f32
    %47 = vector.broadcast %cst_19 : f32 to vector<17x1xf32>
    %48 = arith.addf %46, %47 : vector<17x1xf32>
    %49 = math.rsqrt %48 : vector<17x1xf32>
    %50 = vector.broadcast %49 : vector<17x1xf32> to vector<17x32xf32>
    %51 = arith.mulf %41, %50 : vector<17x32xf32>
    %52 = vector.broadcast %10 : vector<1x32xf32> to vector<17x32xf32>
    %53 = arith.mulf %51, %52 : vector<17x32xf32>
    %54 = vector.broadcast %11 : vector<1x32xf32> to vector<17x32xf32>
    %55 = arith.addf %53, %54 : vector<17x32xf32>
    %cst_20 = arith.constant dense<0.000000e+00> : vector<17xf32>
    %56 = vector.multi_reduction <add>, %3, %cst_20 [1] : vector<17x32xf32> to vector<17xf32>
    %57 = vector.shape_cast %56 : vector<17xf32> to vector<17x1xf32>
    %cst_21 = arith.constant 3.200000e+01 : f32
    %58 = vector.broadcast %cst_21 : f32 to vector<17x1xf32>
    %59 = arith.divf %57, %58 : vector<17x1xf32>
    %60 = vector.broadcast %59 : vector<17x1xf32> to vector<17x32xf32>
    %61 = arith.subf %3, %60 : vector<17x32xf32>
    %62 = arith.mulf %61, %61 : vector<17x32xf32>
    %cst_22 = arith.constant dense<0.000000e+00> : vector<17xf32>
    %63 = vector.multi_reduction <add>, %62, %cst_22 [1] : vector<17x32xf32> to vector<17xf32>
    %64 = vector.shape_cast %63 : vector<17xf32> to vector<17x1xf32>
    %cst_23 = arith.constant 3.200000e+01 : f32
    %65 = vector.broadcast %cst_23 : f32 to vector<17x1xf32>
    %66 = arith.divf %64, %65 : vector<17x1xf32>
    %cst_24 = arith.constant 9.99999974E-6 : f32
    %67 = vector.broadcast %cst_24 : f32 to vector<17x1xf32>
    %68 = arith.addf %66, %67 : vector<17x1xf32>
    %69 = math.rsqrt %68 : vector<17x1xf32>
    %70 = vector.broadcast %69 : vector<17x1xf32> to vector<17x32xf32>
    %71 = arith.mulf %61, %70 : vector<17x32xf32>
    %72 = vector.broadcast %10 : vector<1x32xf32> to vector<17x32xf32>
    %73 = arith.mulf %71, %72 : vector<17x32xf32>
    %74 = vector.broadcast %11 : vector<1x32xf32> to vector<17x32xf32>
    %75 = arith.addf %73, %74 : vector<17x32xf32>
    %c0_25 = arith.constant 0 : index
    %c0_26 = arith.constant 0 : index
    %c0_27 = arith.constant 0 : index
    %c0_28 = arith.constant 0 : index
    %76 = vector.load %arg4[%c0_25, %c0_26, %c0_27, %c0_28] : memref<4x8x32x32xbf16, #tpu.memory_space<vmem>>, vector<1x8x32x32xbf16>
    %77 = vector.shape_cast %76 : vector<1x8x32x32xbf16> to vector<8x32x32xbf16>
    %c0_29 = arith.constant 0 : index
    %c0_30 = arith.constant 0 : index
    %c0_31 = arith.constant 0 : index
    %c0_32 = arith.constant 0 : index
    %78 = vector.load %arg5[%c0_29, %c0_30, %c0_31, %c0_32] : memref<4x8x32x32xbf16, #tpu.memory_space<vmem>>, vector<1x8x32x32xbf16>
    %79 = vector.shape_cast %78 : vector<1x8x32x32xbf16> to vector<8x32x32xbf16>
    %80 = arith.truncf %35 : vector<17x32xf32> to vector<17x32xbf16>
    %81 = vector.shape_cast %80 : vector<17x32xbf16> to vector<1x17x32xbf16>
    %82 = vector.shape_cast %81 : vector<1x17x32xbf16> to vector<1x17x32xbf16>
    %83 = vector.broadcast %82 : vector<1x17x32xbf16> to vector<8x17x32xbf16>
    %84 = arith.truncf %55 : vector<17x32xf32> to vector<17x32xbf16>
    %85 = vector.shape_cast %84 : vector<17x32xbf16> to vector<1x17x32xbf16>
    %86 = vector.shape_cast %85 : vector<1x17x32xbf16> to vector<1x17x32xbf16>
    %87 = vector.broadcast %86 : vector<1x17x32xbf16> to vector<8x17x32xbf16>
    %88 = arith.truncf %75 : vector<17x32xf32> to vector<17x32xbf16>
    %89 = vector.shape_cast %88 : vector<17x32xbf16> to vector<1x17x32xbf16>
    %90 = vector.shape_cast %89 : vector<1x17x32xbf16> to vector<1x17x32xbf16>
    %91 = vector.broadcast %90 : vector<1x17x32xbf16> to vector<8x17x32xbf16>
    %cst_33 = arith.constant dense<0.000000e+00> : vector<8x17x32xf32>
    %92 = tpu.matmul %83, %77, %cst_33 {dimension_numbers = #tpu.dot_dimension_numbers<[2], [1], [1], [2], [0, 0, 0, 1, 1, 2], [0], [0]>} : vector<8x17x32xbf16>, vector<8x32x32xbf16>, vector<8x17x32xf32> -> vector<8x17x32xf32>
    %93 = arith.truncf %92 : vector<8x17x32xf32> to vector<8x17x32xbf16>
    %cst_34 = arith.constant dense<0.000000e+00> : vector<8x17x17xf32>
    %94 = tpu.matmul %93, %87, %cst_34 {dimension_numbers = #tpu.dot_dimension_numbers<[2], [2], [1], [1], [0, 0, 0, 1, 1, 1], [0], [0]>} : vector<8x17x32xbf16>, vector<8x17x32xbf16>, vector<8x17x17xf32> -> vector<8x17x17xf32>
    %cst_35 = arith.constant dense<0xFF800000> : vector<8x17xf32>
    %95 = vector.multi_reduction <maximumf>, %94, %cst_35 [2] : vector<8x17x17xf32> to vector<8x17xf32>
    %96 = vector.shape_cast %95 : vector<8x17xf32> to vector<8x17x1xf32>
    %97 = vector.broadcast %96 : vector<8x17x1xf32> to vector<8x17x17xf32>
    %98 = arith.subf %94, %97 : vector<8x17x17xf32>
    %99 = math.exp %98 : vector<8x17x17xf32>
    %cst_36 = arith.constant dense<0.000000e+00> : vector<8x17xf32>
    %100 = vector.multi_reduction <add>, %99, %cst_36 [2] : vector<8x17x17xf32> to vector<8x17xf32>
    %101 = vector.shape_cast %100 : vector<8x17xf32> to vector<8x17x1xf32>
    %102 = tpu.reciprocal %101 {approx = true} : vector<8x17x1xf32> -> vector<8x17x1xf32>
    %103 = vector.broadcast %102 : vector<8x17x1xf32> to vector<8x17x17xf32>
    %104 = arith.mulf %99, %103 : vector<8x17x17xf32>
    %cst_37 = arith.constant dense<0.000000e+00> : vector<8x17x32xf32>
    %105 = tpu.matmul %91, %79, %cst_37 {dimension_numbers = #tpu.dot_dimension_numbers<[2], [1], [1], [2], [0, 0, 0, 1, 1, 2], [0], [0]>} : vector<8x17x32xbf16>, vector<8x32x32xbf16>, vector<8x17x32xf32> -> vector<8x17x32xf32>
    %106 = arith.truncf %104 : vector<8x17x17xf32> to vector<8x17x17xbf16>
    %107 = arith.truncf %105 : vector<8x17x32xf32> to vector<8x17x32xbf16>
    %cst_38 = arith.constant dense<0.000000e+00> : vector<8x17x32xf32>
    %108 = tpu.matmul %106, %107, %cst_38 {dimension_numbers = #tpu.dot_dimension_numbers<[2], [1], [1], [2], [0, 0, 0, 1, 1, 2], [0], [0]>} : vector<8x17x17xbf16>, vector<8x17x32xbf16>, vector<8x17x32xf32> -> vector<8x17x32xf32>
    %109 = vector.extract_strided_slice %108 {offsets = [0, 0, 0], sizes = [1, 17, 32], strides = [1, 1, 1]} : vector<8x17x32xf32> to vector<1x17x32xf32>
    %110 = vector.shape_cast %109 : vector<1x17x32xf32> to vector<17x32xf32>
    %111 = vector.extract_strided_slice %108 {offsets = [1, 0, 0], sizes = [1, 17, 32], strides = [1, 1, 1]} : vector<8x17x32xf32> to vector<1x17x32xf32>
    %112 = vector.shape_cast %111 : vector<1x17x32xf32> to vector<17x32xf32>
    %113 = vector.extract_strided_slice %108 {offsets = [2, 0, 0], sizes = [1, 17, 32], strides = [1, 1, 1]} : vector<8x17x32xf32> to vector<1x17x32xf32>
    %114 = vector.shape_cast %113 : vector<1x17x32xf32> to vector<17x32xf32>
    %115 = vector.extract_strided_slice %108 {offsets = [3, 0, 0], sizes = [1, 17, 32], strides = [1, 1, 1]} : vector<8x17x32xf32> to vector<1x17x32xf32>
    %116 = vector.shape_cast %115 : vector<1x17x32xf32> to vector<17x32xf32>
    %117 = vector.extract_strided_slice %108 {offsets = [4, 0, 0], sizes = [1, 17, 32], strides = [1, 1, 1]} : vector<8x17x32xf32> to vector<1x17x32xf32>
    %118 = vector.shape_cast %117 : vector<1x17x32xf32> to vector<17x32xf32>
    %119 = vector.extract_strided_slice %108 {offsets = [5, 0, 0], sizes = [1, 17, 32], strides = [1, 1, 1]} : vector<8x17x32xf32> to vector<1x17x32xf32>
    %120 = vector.shape_cast %119 : vector<1x17x32xf32> to vector<17x32xf32>
    %121 = vector.extract_strided_slice %108 {offsets = [6, 0, 0], sizes = [1, 17, 32], strides = [1, 1, 1]} : vector<8x17x32xf32> to vector<1x17x32xf32>
    %122 = vector.shape_cast %121 : vector<1x17x32xf32> to vector<17x32xf32>
    %123 = vector.extract_strided_slice %108 {offsets = [7, 0, 0], sizes = [1, 17, 32], strides = [1, 1, 1]} : vector<8x17x32xf32> to vector<1x17x32xf32>
    %124 = vector.shape_cast %123 : vector<1x17x32xf32> to vector<17x32xf32>
    %125 = arith.addf %110, %112 : vector<17x32xf32>
    %126 = arith.addf %114, %116 : vector<17x32xf32>
    %127 = arith.addf %118, %120 : vector<17x32xf32>
    %128 = arith.addf %122, %124 : vector<17x32xf32>
    %129 = arith.addf %125, %126 : vector<17x32xf32>
    %130 = arith.addf %127, %128 : vector<17x32xf32>
    %131 = arith.addf %129, %130 : vector<17x32xf32>
    %132 = vector.broadcast %12 : vector<1x32xf32> to vector<17x32xf32>
    %133 = arith.addf %131, %132 : vector<17x32xf32>
    %134 = arith.addf %7, %133 : vector<17x32xf32>
    %cst_39 = arith.constant dense<0.000000e+00> : vector<17xf32>
    %135 = vector.multi_reduction <add>, %134, %cst_39 [1] : vector<17x32xf32> to vector<17xf32>
    %136 = vector.shape_cast %135 : vector<17xf32> to vector<17x1xf32>
    %cst_40 = arith.constant 3.200000e+01 : f32
    %137 = vector.broadcast %cst_40 : f32 to vector<17x1xf32>
    %138 = arith.divf %136, %137 : vector<17x1xf32>
    %139 = vector.broadcast %138 : vector<17x1xf32> to vector<17x32xf32>
    %140 = arith.subf %134, %139 : vector<17x32xf32>
    %141 = arith.mulf %140, %140 : vector<17x32xf32>
    %cst_41 = arith.constant dense<0.000000e+00> : vector<17xf32>
    %142 = vector.multi_reduction <add>, %141, %cst_41 [1] : vector<17x32xf32> to vector<17xf32>
    %143 = vector.shape_cast %142 : vector<17xf32> to vector<17x1xf32>
    %cst_42 = arith.constant 3.200000e+01 : f32
    %144 = vector.broadcast %cst_42 : f32 to vector<17x1xf32>
    %145 = arith.divf %143, %144 : vector<17x1xf32>
    %cst_43 = arith.constant 9.99999974E-6 : f32
    %146 = vector.broadcast %cst_43 : f32 to vector<17x1xf32>
    %147 = arith.addf %145, %146 : vector<17x1xf32>
    %148 = math.rsqrt %147 : vector<17x1xf32>
    %149 = vector.broadcast %148 : vector<17x1xf32> to vector<17x32xf32>
    %150 = arith.mulf %140, %149 : vector<17x32xf32>
    %151 = vector.broadcast %13 : vector<1x32xf32> to vector<17x32xf32>
    %152 = arith.mulf %150, %151 : vector<17x32xf32>
    %153 = vector.broadcast %14 : vector<1x32xf32> to vector<17x32xf32>
    %154 = arith.addf %152, %153 : vector<17x32xf32>
    %c0_44 = arith.constant 0 : index
    %c0_45 = arith.constant 0 : index
    %c0_46 = arith.constant 0 : index
    %155 = vector.load %arg6[%c0_44, %c0_45, %c0_46] : memref<4x32x128xbf16, #tpu.memory_space<vmem>>, vector<1x32x128xbf16>
    %156 = vector.shape_cast %155 : vector<1x32x128xbf16> to vector<32x128xbf16>
    %157 = arith.truncf %154 : vector<17x32xf32> to vector<17x32xbf16>
    %cst_47 = arith.constant dense<0.000000e+00> : vector<17x128xf32>
    %158 = tpu.matmul %157, %156, %cst_47 {dimension_numbers = #tpu.dot_dimension_numbers<[1], [0], [0], [1], [0, 0, 1, 1], [], []>} : vector<17x32xbf16>, vector<32x128xbf16>, vector<17x128xf32> -> vector<17x128xf32>
    %c0_48 = arith.constant 0 : index
    %c0_49 = arith.constant 0 : index
    %c0_50 = arith.constant 0 : index
    %159 = vector.load %arg9[%c0_48, %c0_49, %c0_50] : memref<4x1x128xf32, #tpu.memory_space<vmem>>, vector<1x1x128xf32>
    %160 = vector.shape_cast %159 : vector<1x1x128xf32> to vector<1x128xf32>
    %161 = vector.broadcast %160 : vector<1x128xf32> to vector<17x128xf32>
    %162 = arith.addf %158, %161 : vector<17x128xf32>
    %cst_51 = arith.constant 5.000000e-01 : f32
    %163 = vector.broadcast %cst_51 : f32 to vector<17x128xf32>
    %164 = arith.mulf %163, %162 : vector<17x128xf32>
    %cst_52 = arith.constant 0.707106769 : f32
    %165 = vector.broadcast %cst_52 : f32 to vector<17x128xf32>
    %166 = arith.mulf %162, %165 : vector<17x128xf32>
    %cst_53 = arith.constant 0.000000e+00 : f32
    %167 = vector.broadcast %cst_53 : f32 to vector<17x128xf32>
    %168 = arith.cmpf oge, %166, %167 : vector<17x128xf32>
    %cst_54 = arith.constant 0.000000e+00 : f32
    %169 = vector.broadcast %cst_54 : f32 to vector<17x128xf32>
    %170 = arith.subf %169, %166 : vector<17x128xf32>
    %171 = arith.select %168, %166, %170 : vector<17x128xi1>, vector<17x128xf32>
    %cst_55 = arith.constant 1.000000e+00 : f32
    %cst_56 = arith.constant -1.000000e+00 : f32
    %172 = vector.broadcast %cst_55 : f32 to vector<17x128xf32>
    %173 = vector.broadcast %cst_56 : f32 to vector<17x128xf32>
    %174 = arith.select %168, %172, %173 : vector<17x128xi1>, vector<17x128xf32>
    %cst_57 = arith.constant 0.327591091 : f32
    %175 = vector.broadcast %cst_57 : f32 to vector<17x128xf32>
    %176 = arith.mulf %175, %171 : vector<17x128xf32>
    %cst_58 = arith.constant 1.000000e+00 : f32
    %177 = vector.broadcast %cst_58 : f32 to vector<17x128xf32>
    %178 = arith.addf %177, %176 : vector<17x128xf32>
    %cst_59 = arith.constant 1.000000e+00 : f32
    %179 = vector.broadcast %cst_59 : f32 to vector<17x128xf32>
    %180 = arith.divf %179, %178 : vector<17x128xf32>
    %cst_60 = arith.constant 1.06140542 : f32
    %181 = vector.broadcast %cst_60 : f32 to vector<17x128xf32>
    %182 = arith.mulf %181, %180 : vector<17x128xf32>
    %cst_61 = arith.constant -1.45315206 : f32
    %183 = vector.broadcast %cst_61 : f32 to vector<17x128xf32>
    %184 = arith.addf %182, %183 : vector<17x128xf32>
    %185 = arith.mulf %184, %180 : vector<17x128xf32>
    %cst_62 = arith.constant 1.42141378 : f32
    %186 = vector.broadcast %cst_62 : f32 to vector<17x128xf32>
    %187 = arith.addf %185, %186 : vector<17x128xf32>
    %188 = arith.mulf %187, %180 : vector<17x128xf32>
    %cst_63 = arith.constant -0.284496725 : f32
    %189 = vector.broadcast %cst_63 : f32 to vector<17x128xf32>
    %190 = arith.addf %188, %189 : vector<17x128xf32>
    %191 = arith.mulf %190, %180 : vector<17x128xf32>
    %cst_64 = arith.constant 0.254829586 : f32
    %192 = vector.broadcast %cst_64 : f32 to vector<17x128xf32>
    %193 = arith.addf %191, %192 : vector<17x128xf32>
    %194 = arith.mulf %193, %180 : vector<17x128xf32>
    %cst_65 = arith.constant 0.000000e+00 : f32
    %195 = vector.broadcast %cst_65 : f32 to vector<17x128xf32>
    %196 = arith.subf %195, %171 : vector<17x128xf32>
    %197 = arith.mulf %196, %171 : vector<17x128xf32>
    %198 = math.exp %197 : vector<17x128xf32>
    %199 = arith.mulf %194, %198 : vector<17x128xf32>
    %cst_66 = arith.constant 1.000000e+00 : f32
    %200 = vector.broadcast %cst_66 : f32 to vector<17x128xf32>
    %201 = arith.subf %200, %199 : vector<17x128xf32>
    %202 = arith.mulf %174, %201 : vector<17x128xf32>
    %cst_67 = arith.constant 1.000000e+00 : f32
    %203 = vector.broadcast %cst_67 : f32 to vector<17x128xf32>
    %204 = arith.addf %203, %202 : vector<17x128xf32>
    %205 = arith.mulf %164, %204 : vector<17x128xf32>
    %c0_68 = arith.constant 0 : index
    %c0_69 = arith.constant 0 : index
    %c0_70 = arith.constant 0 : index
    %206 = vector.load %arg7[%c0_68, %c0_69, %c0_70] : memref<4x128x32xbf16, #tpu.memory_space<vmem>>, vector<1x128x32xbf16>
    %207 = vector.shape_cast %206 : vector<1x128x32xbf16> to vector<128x32xbf16>
    %208 = arith.truncf %205 : vector<17x128xf32> to vector<17x128xbf16>
    %cst_71 = arith.constant dense<0.000000e+00> : vector<17x32xf32>
    %209 = tpu.matmul %208, %207, %cst_71 {dimension_numbers = #tpu.dot_dimension_numbers<[1], [0], [0], [1], [0, 0, 1, 1], [], []>} : vector<17x128xbf16>, vector<128x32xbf16>, vector<17x32xf32> -> vector<17x32xf32>
    %210 = arith.addf %134, %209 : vector<17x32xf32>
    %211 = vector.broadcast %15 : vector<1x32xf32> to vector<17x32xf32>
    %212 = arith.addf %210, %211 : vector<17x32xf32>
    %c1 = arith.constant 1 : index
    %c0_72 = arith.constant 0 : index
    %c0_73 = arith.constant 0 : index
    %213 = vector.load %arg8[%c1, %c0_72, %c0_73] : memref<4x6x32xf32, #tpu.memory_space<vmem>>, vector<1x6x32xf32>
    %214 = vector.shape_cast %213 : vector<1x6x32xf32> to vector<6x32xf32>
    %215 = vector.extract_strided_slice %214 {offsets = [0, 0], sizes = [1, 32], strides = [1, 1]} : vector<6x32xf32> to vector<1x32xf32>
    %216 = vector.extract_strided_slice %214 {offsets = [1, 0], sizes = [1, 32], strides = [1, 1]} : vector<6x32xf32> to vector<1x32xf32>
    %217 = vector.extract_strided_slice %214 {offsets = [2, 0], sizes = [1, 32], strides = [1, 1]} : vector<6x32xf32> to vector<1x32xf32>
    %218 = vector.extract_strided_slice %214 {offsets = [3, 0], sizes = [1, 32], strides = [1, 1]} : vector<6x32xf32> to vector<1x32xf32>
    %219 = vector.extract_strided_slice %214 {offsets = [4, 0], sizes = [1, 32], strides = [1, 1]} : vector<6x32xf32> to vector<1x32xf32>
    %220 = vector.extract_strided_slice %214 {offsets = [5, 0], sizes = [1, 32], strides = [1, 1]} : vector<6x32xf32> to vector<1x32xf32>
    %cst_74 = arith.constant dense<0.000000e+00> : vector<17xf32>
    %221 = vector.multi_reduction <add>, %212, %cst_74 [1] : vector<17x32xf32> to vector<17xf32>
    %222 = vector.shape_cast %221 : vector<17xf32> to vector<17x1xf32>
    %cst_75 = arith.constant 3.200000e+01 : f32
    %223 = vector.broadcast %cst_75 : f32 to vector<17x1xf32>
    %224 = arith.divf %222, %223 : vector<17x1xf32>
    %225 = vector.broadcast %224 : vector<17x1xf32> to vector<17x32xf32>
    %226 = arith.subf %212, %225 : vector<17x32xf32>
    %227 = arith.mulf %226, %226 : vector<17x32xf32>
    %cst_76 = arith.constant dense<0.000000e+00> : vector<17xf32>
    %228 = vector.multi_reduction <add>, %227, %cst_76 [1] : vector<17x32xf32> to vector<17xf32>
    %229 = vector.shape_cast %228 : vector<17xf32> to vector<17x1xf32>
    %cst_77 = arith.constant 3.200000e+01 : f32
    %230 = vector.broadcast %cst_77 : f32 to vector<17x1xf32>
    %231 = arith.divf %229, %230 : vector<17x1xf32>
    %cst_78 = arith.constant 9.99999974E-6 : f32
    %232 = vector.broadcast %cst_78 : f32 to vector<17x1xf32>
    %233 = arith.addf %231, %232 : vector<17x1xf32>
    %234 = math.rsqrt %233 : vector<17x1xf32>
    %235 = vector.broadcast %234 : vector<17x1xf32> to vector<17x32xf32>
    %236 = arith.mulf %226, %235 : vector<17x32xf32>
    %237 = vector.broadcast %215 : vector<1x32xf32> to vector<17x32xf32>
    %238 = arith.mulf %236, %237 : vector<17x32xf32>
    %239 = vector.broadcast %216 : vector<1x32xf32> to vector<17x32xf32>
    %240 = arith.addf %238, %239 : vector<17x32xf32>
    %c1_79 = arith.constant 1 : index
    %c0_80 = arith.constant 0 : index
    %c0_81 = arith.constant 0 : index
    %c0_82 = arith.constant 0 : index
    %241 = vector.load %arg4[%c1_79, %c0_80, %c0_81, %c0_82] : memref<4x8x32x32xbf16, #tpu.memory_space<vmem>>, vector<1x8x32x32xbf16>
    %242 = vector.shape_cast %241 : vector<1x8x32x32xbf16> to vector<8x32x32xbf16>
    %c1_83 = arith.constant 1 : index
    %c0_84 = arith.constant 0 : index
    %c0_85 = arith.constant 0 : index
    %c0_86 = arith.constant 0 : index
    %243 = vector.load %arg5[%c1_83, %c0_84, %c0_85, %c0_86] : memref<4x8x32x32xbf16, #tpu.memory_space<vmem>>, vector<1x8x32x32xbf16>
    %244 = vector.shape_cast %243 : vector<1x8x32x32xbf16> to vector<8x32x32xbf16>
    %245 = arith.truncf %240 : vector<17x32xf32> to vector<17x32xbf16>
    %246 = vector.shape_cast %245 : vector<17x32xbf16> to vector<1x17x32xbf16>
    %247 = vector.shape_cast %246 : vector<1x17x32xbf16> to vector<1x17x32xbf16>
    %248 = vector.broadcast %247 : vector<1x17x32xbf16> to vector<8x17x32xbf16>
    %cst_87 = arith.constant dense<0.000000e+00> : vector<8x17x32xf32>
    %249 = tpu.matmul %248, %242, %cst_87 {dimension_numbers = #tpu.dot_dimension_numbers<[2], [1], [1], [2], [0, 0, 0, 1, 1, 2], [0], [0]>} : vector<8x17x32xbf16>, vector<8x32x32xbf16>, vector<8x17x32xf32> -> vector<8x17x32xf32>
    %250 = arith.truncf %249 : vector<8x17x32xf32> to vector<8x17x32xbf16>
    %cst_88 = arith.constant dense<0.000000e+00> : vector<8x17x17xf32>
    %251 = tpu.matmul %250, %248, %cst_88 {dimension_numbers = #tpu.dot_dimension_numbers<[2], [2], [1], [1], [0, 0, 0, 1, 1, 1], [0], [0]>} : vector<8x17x32xbf16>, vector<8x17x32xbf16>, vector<8x17x17xf32> -> vector<8x17x17xf32>
    %cst_89 = arith.constant dense<0xFF800000> : vector<8x17xf32>
    %252 = vector.multi_reduction <maximumf>, %251, %cst_89 [2] : vector<8x17x17xf32> to vector<8x17xf32>
    %253 = vector.shape_cast %252 : vector<8x17xf32> to vector<8x17x1xf32>
    %254 = vector.broadcast %253 : vector<8x17x1xf32> to vector<8x17x17xf32>
    %255 = arith.subf %251, %254 : vector<8x17x17xf32>
    %256 = math.exp %255 : vector<8x17x17xf32>
    %cst_90 = arith.constant dense<0.000000e+00> : vector<8x17xf32>
    %257 = vector.multi_reduction <add>, %256, %cst_90 [2] : vector<8x17x17xf32> to vector<8x17xf32>
    %258 = vector.shape_cast %257 : vector<8x17xf32> to vector<8x17x1xf32>
    %259 = tpu.reciprocal %258 {approx = true} : vector<8x17x1xf32> -> vector<8x17x1xf32>
    %260 = vector.broadcast %259 : vector<8x17x1xf32> to vector<8x17x17xf32>
    %261 = arith.mulf %256, %260 : vector<8x17x17xf32>
    %cst_91 = arith.constant dense<0.000000e+00> : vector<8x17x32xf32>
    %262 = tpu.matmul %248, %244, %cst_91 {dimension_numbers = #tpu.dot_dimension_numbers<[2], [1], [1], [2], [0, 0, 0, 1, 1, 2], [0], [0]>} : vector<8x17x32xbf16>, vector<8x32x32xbf16>, vector<8x17x32xf32> -> vector<8x17x32xf32>
    %263 = arith.truncf %261 : vector<8x17x17xf32> to vector<8x17x17xbf16>
    %264 = arith.truncf %262 : vector<8x17x32xf32> to vector<8x17x32xbf16>
    %cst_92 = arith.constant dense<0.000000e+00> : vector<8x17x32xf32>
    %265 = tpu.matmul %263, %264, %cst_92 {dimension_numbers = #tpu.dot_dimension_numbers<[2], [1], [1], [2], [0, 0, 0, 1, 1, 2], [0], [0]>} : vector<8x17x17xbf16>, vector<8x17x32xbf16>, vector<8x17x32xf32> -> vector<8x17x32xf32>
    %266 = vector.extract_strided_slice %265 {offsets = [0, 0, 0], sizes = [1, 17, 32], strides = [1, 1, 1]} : vector<8x17x32xf32> to vector<1x17x32xf32>
    %267 = vector.shape_cast %266 : vector<1x17x32xf32> to vector<17x32xf32>
    %268 = vector.extract_strided_slice %265 {offsets = [1, 0, 0], sizes = [1, 17, 32], strides = [1, 1, 1]} : vector<8x17x32xf32> to vector<1x17x32xf32>
    %269 = vector.shape_cast %268 : vector<1x17x32xf32> to vector<17x32xf32>
    %270 = vector.extract_strided_slice %265 {offsets = [2, 0, 0], sizes = [1, 17, 32], strides = [1, 1, 1]} : vector<8x17x32xf32> to vector<1x17x32xf32>
    %271 = vector.shape_cast %270 : vector<1x17x32xf32> to vector<17x32xf32>
    %272 = vector.extract_strided_slice %265 {offsets = [3, 0, 0], sizes = [1, 17, 32], strides = [1, 1, 1]} : vector<8x17x32xf32> to vector<1x17x32xf32>
    %273 = vector.shape_cast %272 : vector<1x17x32xf32> to vector<17x32xf32>
    %274 = vector.extract_strided_slice %265 {offsets = [4, 0, 0], sizes = [1, 17, 32], strides = [1, 1, 1]} : vector<8x17x32xf32> to vector<1x17x32xf32>
    %275 = vector.shape_cast %274 : vector<1x17x32xf32> to vector<17x32xf32>
    %276 = vector.extract_strided_slice %265 {offsets = [5, 0, 0], sizes = [1, 17, 32], strides = [1, 1, 1]} : vector<8x17x32xf32> to vector<1x17x32xf32>
    %277 = vector.shape_cast %276 : vector<1x17x32xf32> to vector<17x32xf32>
    %278 = vector.extract_strided_slice %265 {offsets = [6, 0, 0], sizes = [1, 17, 32], strides = [1, 1, 1]} : vector<8x17x32xf32> to vector<1x17x32xf32>
    %279 = vector.shape_cast %278 : vector<1x17x32xf32> to vector<17x32xf32>
    %280 = vector.extract_strided_slice %265 {offsets = [7, 0, 0], sizes = [1, 17, 32], strides = [1, 1, 1]} : vector<8x17x32xf32> to vector<1x17x32xf32>
    %281 = vector.shape_cast %280 : vector<1x17x32xf32> to vector<17x32xf32>
    %282 = arith.addf %267, %269 : vector<17x32xf32>
    %283 = arith.addf %271, %273 : vector<17x32xf32>
    %284 = arith.addf %275, %277 : vector<17x32xf32>
    %285 = arith.addf %279, %281 : vector<17x32xf32>
    %286 = arith.addf %282, %283 : vector<17x32xf32>
    %287 = arith.addf %284, %285 : vector<17x32xf32>
    %288 = arith.addf %286, %287 : vector<17x32xf32>
    %289 = vector.broadcast %217 : vector<1x32xf32> to vector<17x32xf32>
    %290 = arith.addf %288, %289 : vector<17x32xf32>
    %291 = arith.addf %212, %290 : vector<17x32xf32>
    %cst_93 = arith.constant dense<0.000000e+00> : vector<17xf32>
    %292 = vector.multi_reduction <add>, %291, %cst_93 [1] : vector<17x32xf32> to vector<17xf32>
    %293 = vector.shape_cast %292 : vector<17xf32> to vector<17x1xf32>
    %cst_94 = arith.constant 3.200000e+01 : f32
    %294 = vector.broadcast %cst_94 : f32 to vector<17x1xf32>
    %295 = arith.divf %293, %294 : vector<17x1xf32>
    %296 = vector.broadcast %295 : vector<17x1xf32> to vector<17x32xf32>
    %297 = arith.subf %291, %296 : vector<17x32xf32>
    %298 = arith.mulf %297, %297 : vector<17x32xf32>
    %cst_95 = arith.constant dense<0.000000e+00> : vector<17xf32>
    %299 = vector.multi_reduction <add>, %298, %cst_95 [1] : vector<17x32xf32> to vector<17xf32>
    %300 = vector.shape_cast %299 : vector<17xf32> to vector<17x1xf32>
    %cst_96 = arith.constant 3.200000e+01 : f32
    %301 = vector.broadcast %cst_96 : f32 to vector<17x1xf32>
    %302 = arith.divf %300, %301 : vector<17x1xf32>
    %cst_97 = arith.constant 9.99999974E-6 : f32
    %303 = vector.broadcast %cst_97 : f32 to vector<17x1xf32>
    %304 = arith.addf %302, %303 : vector<17x1xf32>
    %305 = math.rsqrt %304 : vector<17x1xf32>
    %306 = vector.broadcast %305 : vector<17x1xf32> to vector<17x32xf32>
    %307 = arith.mulf %297, %306 : vector<17x32xf32>
    %308 = vector.broadcast %218 : vector<1x32xf32> to vector<17x32xf32>
    %309 = arith.mulf %307, %308 : vector<17x32xf32>
    %310 = vector.broadcast %219 : vector<1x32xf32> to vector<17x32xf32>
    %311 = arith.addf %309, %310 : vector<17x32xf32>
    %c1_98 = arith.constant 1 : index
    %c0_99 = arith.constant 0 : index
    %c0_100 = arith.constant 0 : index
    %312 = vector.load %arg6[%c1_98, %c0_99, %c0_100] : memref<4x32x128xbf16, #tpu.memory_space<vmem>>, vector<1x32x128xbf16>
    %313 = vector.shape_cast %312 : vector<1x32x128xbf16> to vector<32x128xbf16>
    %314 = arith.truncf %311 : vector<17x32xf32> to vector<17x32xbf16>
    %cst_101 = arith.constant dense<0.000000e+00> : vector<17x128xf32>
    %315 = tpu.matmul %314, %313, %cst_101 {dimension_numbers = #tpu.dot_dimension_numbers<[1], [0], [0], [1], [0, 0, 1, 1], [], []>} : vector<17x32xbf16>, vector<32x128xbf16>, vector<17x128xf32> -> vector<17x128xf32>
    %c1_102 = arith.constant 1 : index
    %c0_103 = arith.constant 0 : index
    %c0_104 = arith.constant 0 : index
    %316 = vector.load %arg9[%c1_102, %c0_103, %c0_104] : memref<4x1x128xf32, #tpu.memory_space<vmem>>, vector<1x1x128xf32>
    %317 = vector.shape_cast %316 : vector<1x1x128xf32> to vector<1x128xf32>
    %318 = vector.broadcast %317 : vector<1x128xf32> to vector<17x128xf32>
    %319 = arith.addf %315, %318 : vector<17x128xf32>
    %cst_105 = arith.constant 5.000000e-01 : f32
    %320 = vector.broadcast %cst_105 : f32 to vector<17x128xf32>
    %321 = arith.mulf %320, %319 : vector<17x128xf32>
    %cst_106 = arith.constant 0.707106769 : f32
    %322 = vector.broadcast %cst_106 : f32 to vector<17x128xf32>
    %323 = arith.mulf %319, %322 : vector<17x128xf32>
    %cst_107 = arith.constant 0.000000e+00 : f32
    %324 = vector.broadcast %cst_107 : f32 to vector<17x128xf32>
    %325 = arith.cmpf oge, %323, %324 : vector<17x128xf32>
    %cst_108 = arith.constant 0.000000e+00 : f32
    %326 = vector.broadcast %cst_108 : f32 to vector<17x128xf32>
    %327 = arith.subf %326, %323 : vector<17x128xf32>
    %328 = arith.select %325, %323, %327 : vector<17x128xi1>, vector<17x128xf32>
    %cst_109 = arith.constant 1.000000e+00 : f32
    %cst_110 = arith.constant -1.000000e+00 : f32
    %329 = vector.broadcast %cst_109 : f32 to vector<17x128xf32>
    %330 = vector.broadcast %cst_110 : f32 to vector<17x128xf32>
    %331 = arith.select %325, %329, %330 : vector<17x128xi1>, vector<17x128xf32>
    %cst_111 = arith.constant 0.327591091 : f32
    %332 = vector.broadcast %cst_111 : f32 to vector<17x128xf32>
    %333 = arith.mulf %332, %328 : vector<17x128xf32>
    %cst_112 = arith.constant 1.000000e+00 : f32
    %334 = vector.broadcast %cst_112 : f32 to vector<17x128xf32>
    %335 = arith.addf %334, %333 : vector<17x128xf32>
    %cst_113 = arith.constant 1.000000e+00 : f32
    %336 = vector.broadcast %cst_113 : f32 to vector<17x128xf32>
    %337 = arith.divf %336, %335 : vector<17x128xf32>
    %cst_114 = arith.constant 1.06140542 : f32
    %338 = vector.broadcast %cst_114 : f32 to vector<17x128xf32>
    %339 = arith.mulf %338, %337 : vector<17x128xf32>
    %cst_115 = arith.constant -1.45315206 : f32
    %340 = vector.broadcast %cst_115 : f32 to vector<17x128xf32>
    %341 = arith.addf %339, %340 : vector<17x128xf32>
    %342 = arith.mulf %341, %337 : vector<17x128xf32>
    %cst_116 = arith.constant 1.42141378 : f32
    %343 = vector.broadcast %cst_116 : f32 to vector<17x128xf32>
    %344 = arith.addf %342, %343 : vector<17x128xf32>
    %345 = arith.mulf %344, %337 : vector<17x128xf32>
    %cst_117 = arith.constant -0.284496725 : f32
    %346 = vector.broadcast %cst_117 : f32 to vector<17x128xf32>
    %347 = arith.addf %345, %346 : vector<17x128xf32>
    %348 = arith.mulf %347, %337 : vector<17x128xf32>
    %cst_118 = arith.constant 0.254829586 : f32
    %349 = vector.broadcast %cst_118 : f32 to vector<17x128xf32>
    %350 = arith.addf %348, %349 : vector<17x128xf32>
    %351 = arith.mulf %350, %337 : vector<17x128xf32>
    %cst_119 = arith.constant 0.000000e+00 : f32
    %352 = vector.broadcast %cst_119 : f32 to vector<17x128xf32>
    %353 = arith.subf %352, %328 : vector<17x128xf32>
    %354 = arith.mulf %353, %328 : vector<17x128xf32>
    %355 = math.exp %354 : vector<17x128xf32>
    %356 = arith.mulf %351, %355 : vector<17x128xf32>
    %cst_120 = arith.constant 1.000000e+00 : f32
    %357 = vector.broadcast %cst_120 : f32 to vector<17x128xf32>
    %358 = arith.subf %357, %356 : vector<17x128xf32>
    %359 = arith.mulf %331, %358 : vector<17x128xf32>
    %cst_121 = arith.constant 1.000000e+00 : f32
    %360 = vector.broadcast %cst_121 : f32 to vector<17x128xf32>
    %361 = arith.addf %360, %359 : vector<17x128xf32>
    %362 = arith.mulf %321, %361 : vector<17x128xf32>
    %c1_122 = arith.constant 1 : index
    %c0_123 = arith.constant 0 : index
    %c0_124 = arith.constant 0 : index
    %363 = vector.load %arg7[%c1_122, %c0_123, %c0_124] : memref<4x128x32xbf16, #tpu.memory_space<vmem>>, vector<1x128x32xbf16>
    %364 = vector.shape_cast %363 : vector<1x128x32xbf16> to vector<128x32xbf16>
    %365 = arith.truncf %362 : vector<17x128xf32> to vector<17x128xbf16>
    %cst_125 = arith.constant dense<0.000000e+00> : vector<17x32xf32>
    %366 = tpu.matmul %365, %364, %cst_125 {dimension_numbers = #tpu.dot_dimension_numbers<[1], [0], [0], [1], [0, 0, 1, 1], [], []>} : vector<17x128xbf16>, vector<128x32xbf16>, vector<17x32xf32> -> vector<17x32xf32>
    %367 = arith.addf %291, %366 : vector<17x32xf32>
    %368 = vector.broadcast %220 : vector<1x32xf32> to vector<17x32xf32>
    %369 = arith.addf %367, %368 : vector<17x32xf32>
    %c2 = arith.constant 2 : index
    %c0_126 = arith.constant 0 : index
    %c0_127 = arith.constant 0 : index
    %370 = vector.load %arg8[%c2, %c0_126, %c0_127] : memref<4x6x32xf32, #tpu.memory_space<vmem>>, vector<1x6x32xf32>
    %371 = vector.shape_cast %370 : vector<1x6x32xf32> to vector<6x32xf32>
    %372 = vector.extract_strided_slice %371 {offsets = [0, 0], sizes = [1, 32], strides = [1, 1]} : vector<6x32xf32> to vector<1x32xf32>
    %373 = vector.extract_strided_slice %371 {offsets = [1, 0], sizes = [1, 32], strides = [1, 1]} : vector<6x32xf32> to vector<1x32xf32>
    %374 = vector.extract_strided_slice %371 {offsets = [2, 0], sizes = [1, 32], strides = [1, 1]} : vector<6x32xf32> to vector<1x32xf32>
    %375 = vector.extract_strided_slice %371 {offsets = [3, 0], sizes = [1, 32], strides = [1, 1]} : vector<6x32xf32> to vector<1x32xf32>
    %376 = vector.extract_strided_slice %371 {offsets = [4, 0], sizes = [1, 32], strides = [1, 1]} : vector<6x32xf32> to vector<1x32xf32>
    %377 = vector.extract_strided_slice %371 {offsets = [5, 0], sizes = [1, 32], strides = [1, 1]} : vector<6x32xf32> to vector<1x32xf32>
    %cst_128 = arith.constant dense<0.000000e+00> : vector<17xf32>
    %378 = vector.multi_reduction <add>, %369, %cst_128 [1] : vector<17x32xf32> to vector<17xf32>
    %379 = vector.shape_cast %378 : vector<17xf32> to vector<17x1xf32>
    %cst_129 = arith.constant 3.200000e+01 : f32
    %380 = vector.broadcast %cst_129 : f32 to vector<17x1xf32>
    %381 = arith.divf %379, %380 : vector<17x1xf32>
    %382 = vector.broadcast %381 : vector<17x1xf32> to vector<17x32xf32>
    %383 = arith.subf %369, %382 : vector<17x32xf32>
    %384 = arith.mulf %383, %383 : vector<17x32xf32>
    %cst_130 = arith.constant dense<0.000000e+00> : vector<17xf32>
    %385 = vector.multi_reduction <add>, %384, %cst_130 [1] : vector<17x32xf32> to vector<17xf32>
    %386 = vector.shape_cast %385 : vector<17xf32> to vector<17x1xf32>
    %cst_131 = arith.constant 3.200000e+01 : f32
    %387 = vector.broadcast %cst_131 : f32 to vector<17x1xf32>
    %388 = arith.divf %386, %387 : vector<17x1xf32>
    %cst_132 = arith.constant 9.99999974E-6 : f32
    %389 = vector.broadcast %cst_132 : f32 to vector<17x1xf32>
    %390 = arith.addf %388, %389 : vector<17x1xf32>
    %391 = math.rsqrt %390 : vector<17x1xf32>
    %392 = vector.broadcast %391 : vector<17x1xf32> to vector<17x32xf32>
    %393 = arith.mulf %383, %392 : vector<17x32xf32>
    %394 = vector.broadcast %372 : vector<1x32xf32> to vector<17x32xf32>
    %395 = arith.mulf %393, %394 : vector<17x32xf32>
    %396 = vector.broadcast %373 : vector<1x32xf32> to vector<17x32xf32>
    %397 = arith.addf %395, %396 : vector<17x32xf32>
    %cst_133 = arith.constant dense<0.000000e+00> : vector<17xf32>
    %398 = vector.multi_reduction <add>, %3, %cst_133 [1] : vector<17x32xf32> to vector<17xf32>
    %399 = vector.shape_cast %398 : vector<17xf32> to vector<17x1xf32>
    %cst_134 = arith.constant 3.200000e+01 : f32
    %400 = vector.broadcast %cst_134 : f32 to vector<17x1xf32>
    %401 = arith.divf %399, %400 : vector<17x1xf32>
    %402 = vector.broadcast %401 : vector<17x1xf32> to vector<17x32xf32>
    %403 = arith.subf %3, %402 : vector<17x32xf32>
    %404 = arith.mulf %403, %403 : vector<17x32xf32>
    %cst_135 = arith.constant dense<0.000000e+00> : vector<17xf32>
    %405 = vector.multi_reduction <add>, %404, %cst_135 [1] : vector<17x32xf32> to vector<17xf32>
    %406 = vector.shape_cast %405 : vector<17xf32> to vector<17x1xf32>
    %cst_136 = arith.constant 3.200000e+01 : f32
    %407 = vector.broadcast %cst_136 : f32 to vector<17x1xf32>
    %408 = arith.divf %406, %407 : vector<17x1xf32>
    %cst_137 = arith.constant 9.99999974E-6 : f32
    %409 = vector.broadcast %cst_137 : f32 to vector<17x1xf32>
    %410 = arith.addf %408, %409 : vector<17x1xf32>
    %411 = math.rsqrt %410 : vector<17x1xf32>
    %412 = vector.broadcast %411 : vector<17x1xf32> to vector<17x32xf32>
    %413 = arith.mulf %403, %412 : vector<17x32xf32>
    %414 = vector.broadcast %372 : vector<1x32xf32> to vector<17x32xf32>
    %415 = arith.mulf %413, %414 : vector<17x32xf32>
    %416 = vector.broadcast %373 : vector<1x32xf32> to vector<17x32xf32>
    %417 = arith.addf %415, %416 : vector<17x32xf32>
    %cst_138 = arith.constant dense<0.000000e+00> : vector<17xf32>
    %418 = vector.multi_reduction <add>, %1, %cst_138 [1] : vector<17x32xf32> to vector<17xf32>
    %419 = vector.shape_cast %418 : vector<17xf32> to vector<17x1xf32>
    %cst_139 = arith.constant 3.200000e+01 : f32
    %420 = vector.broadcast %cst_139 : f32 to vector<17x1xf32>
    %421 = arith.divf %419, %420 : vector<17x1xf32>
    %422 = vector.broadcast %421 : vector<17x1xf32> to vector<17x32xf32>
    %423 = arith.subf %1, %422 : vector<17x32xf32>
    %424 = arith.mulf %423, %423 : vector<17x32xf32>
    %cst_140 = arith.constant dense<0.000000e+00> : vector<17xf32>
    %425 = vector.multi_reduction <add>, %424, %cst_140 [1] : vector<17x32xf32> to vector<17xf32>
    %426 = vector.shape_cast %425 : vector<17xf32> to vector<17x1xf32>
    %cst_141 = arith.constant 3.200000e+01 : f32
    %427 = vector.broadcast %cst_141 : f32 to vector<17x1xf32>
    %428 = arith.divf %426, %427 : vector<17x1xf32>
    %cst_142 = arith.constant 9.99999974E-6 : f32
    %429 = vector.broadcast %cst_142 : f32 to vector<17x1xf32>
    %430 = arith.addf %428, %429 : vector<17x1xf32>
    %431 = math.rsqrt %430 : vector<17x1xf32>
    %432 = vector.broadcast %431 : vector<17x1xf32> to vector<17x32xf32>
    %433 = arith.mulf %423, %432 : vector<17x32xf32>
    %434 = vector.broadcast %372 : vector<1x32xf32> to vector<17x32xf32>
    %435 = arith.mulf %433, %434 : vector<17x32xf32>
    %436 = vector.broadcast %373 : vector<1x32xf32> to vector<17x32xf32>
    %437 = arith.addf %435, %436 : vector<17x32xf32>
    %c2_143 = arith.constant 2 : index
    %c0_144 = arith.constant 0 : index
    %c0_145 = arith.constant 0 : index
    %c0_146 = arith.constant 0 : index
    %438 = vector.load %arg4[%c2_143, %c0_144, %c0_145, %c0_146] : memref<4x8x32x32xbf16, #tpu.memory_space<vmem>>, vector<1x8x32x32xbf16>
    %439 = vector.shape_cast %438 : vector<1x8x32x32xbf16> to vector<8x32x32xbf16>
    %c2_147 = arith.constant 2 : index
    %c0_148 = arith.constant 0 : index
    %c0_149 = arith.constant 0 : index
    %c0_150 = arith.constant 0 : index
    %440 = vector.load %arg5[%c2_147, %c0_148, %c0_149, %c0_150] : memref<4x8x32x32xbf16, #tpu.memory_space<vmem>>, vector<1x8x32x32xbf16>
    %441 = vector.shape_cast %440 : vector<1x8x32x32xbf16> to vector<8x32x32xbf16>
    %442 = arith.truncf %397 : vector<17x32xf32> to vector<17x32xbf16>
    %443 = vector.shape_cast %442 : vector<17x32xbf16> to vector<1x17x32xbf16>
    %444 = vector.shape_cast %443 : vector<1x17x32xbf16> to vector<1x17x32xbf16>
    %445 = vector.broadcast %444 : vector<1x17x32xbf16> to vector<8x17x32xbf16>
    %446 = arith.truncf %417 : vector<17x32xf32> to vector<17x32xbf16>
    %447 = vector.shape_cast %446 : vector<17x32xbf16> to vector<1x17x32xbf16>
    %448 = vector.shape_cast %447 : vector<1x17x32xbf16> to vector<1x17x32xbf16>
    %449 = vector.broadcast %448 : vector<1x17x32xbf16> to vector<8x17x32xbf16>
    %450 = arith.truncf %437 : vector<17x32xf32> to vector<17x32xbf16>
    %451 = vector.shape_cast %450 : vector<17x32xbf16> to vector<1x17x32xbf16>
    %452 = vector.shape_cast %451 : vector<1x17x32xbf16> to vector<1x17x32xbf16>
    %453 = vector.broadcast %452 : vector<1x17x32xbf16> to vector<8x17x32xbf16>
    %cst_151 = arith.constant dense<0.000000e+00> : vector<8x17x32xf32>
    %454 = tpu.matmul %445, %439, %cst_151 {dimension_numbers = #tpu.dot_dimension_numbers<[2], [1], [1], [2], [0, 0, 0, 1, 1, 2], [0], [0]>} : vector<8x17x32xbf16>, vector<8x32x32xbf16>, vector<8x17x32xf32> -> vector<8x17x32xf32>
    %455 = arith.truncf %454 : vector<8x17x32xf32> to vector<8x17x32xbf16>
    %cst_152 = arith.constant dense<0.000000e+00> : vector<8x17x17xf32>
    %456 = tpu.matmul %455, %449, %cst_152 {dimension_numbers = #tpu.dot_dimension_numbers<[2], [2], [1], [1], [0, 0, 0, 1, 1, 1], [0], [0]>} : vector<8x17x32xbf16>, vector<8x17x32xbf16>, vector<8x17x17xf32> -> vector<8x17x17xf32>
    %cst_153 = arith.constant dense<0xFF800000> : vector<8x17xf32>
    %457 = vector.multi_reduction <maximumf>, %456, %cst_153 [2] : vector<8x17x17xf32> to vector<8x17xf32>
    %458 = vector.shape_cast %457 : vector<8x17xf32> to vector<8x17x1xf32>
    %459 = vector.broadcast %458 : vector<8x17x1xf32> to vector<8x17x17xf32>
    %460 = arith.subf %456, %459 : vector<8x17x17xf32>
    %461 = math.exp %460 : vector<8x17x17xf32>
    %cst_154 = arith.constant dense<0.000000e+00> : vector<8x17xf32>
    %462 = vector.multi_reduction <add>, %461, %cst_154 [2] : vector<8x17x17xf32> to vector<8x17xf32>
    %463 = vector.shape_cast %462 : vector<8x17xf32> to vector<8x17x1xf32>
    %464 = tpu.reciprocal %463 {approx = true} : vector<8x17x1xf32> -> vector<8x17x1xf32>
    %465 = vector.broadcast %464 : vector<8x17x1xf32> to vector<8x17x17xf32>
    %466 = arith.mulf %461, %465 : vector<8x17x17xf32>
    %cst_155 = arith.constant dense<0.000000e+00> : vector<8x17x32xf32>
    %467 = tpu.matmul %453, %441, %cst_155 {dimension_numbers = #tpu.dot_dimension_numbers<[2], [1], [1], [2], [0, 0, 0, 1, 1, 2], [0], [0]>} : vector<8x17x32xbf16>, vector<8x32x32xbf16>, vector<8x17x32xf32> -> vector<8x17x32xf32>
    %468 = arith.truncf %466 : vector<8x17x17xf32> to vector<8x17x17xbf16>
    %469 = arith.truncf %467 : vector<8x17x32xf32> to vector<8x17x32xbf16>
    %cst_156 = arith.constant dense<0.000000e+00> : vector<8x17x32xf32>
    %470 = tpu.matmul %468, %469, %cst_156 {dimension_numbers = #tpu.dot_dimension_numbers<[2], [1], [1], [2], [0, 0, 0, 1, 1, 2], [0], [0]>} : vector<8x17x17xbf16>, vector<8x17x32xbf16>, vector<8x17x32xf32> -> vector<8x17x32xf32>
    %471 = vector.extract_strided_slice %470 {offsets = [0, 0, 0], sizes = [1, 17, 32], strides = [1, 1, 1]} : vector<8x17x32xf32> to vector<1x17x32xf32>
    %472 = vector.shape_cast %471 : vector<1x17x32xf32> to vector<17x32xf32>
    %473 = vector.extract_strided_slice %470 {offsets = [1, 0, 0], sizes = [1, 17, 32], strides = [1, 1, 1]} : vector<8x17x32xf32> to vector<1x17x32xf32>
    %474 = vector.shape_cast %473 : vector<1x17x32xf32> to vector<17x32xf32>
    %475 = vector.extract_strided_slice %470 {offsets = [2, 0, 0], sizes = [1, 17, 32], strides = [1, 1, 1]} : vector<8x17x32xf32> to vector<1x17x32xf32>
    %476 = vector.shape_cast %475 : vector<1x17x32xf32> to vector<17x32xf32>
    %477 = vector.extract_strided_slice %470 {offsets = [3, 0, 0], sizes = [1, 17, 32], strides = [1, 1, 1]} : vector<8x17x32xf32> to vector<1x17x32xf32>
    %478 = vector.shape_cast %477 : vector<1x17x32xf32> to vector<17x32xf32>
    %479 = vector.extract_strided_slice %470 {offsets = [4, 0, 0], sizes = [1, 17, 32], strides = [1, 1, 1]} : vector<8x17x32xf32> to vector<1x17x32xf32>
    %480 = vector.shape_cast %479 : vector<1x17x32xf32> to vector<17x32xf32>
    %481 = vector.extract_strided_slice %470 {offsets = [5, 0, 0], sizes = [1, 17, 32], strides = [1, 1, 1]} : vector<8x17x32xf32> to vector<1x17x32xf32>
    %482 = vector.shape_cast %481 : vector<1x17x32xf32> to vector<17x32xf32>
    %483 = vector.extract_strided_slice %470 {offsets = [6, 0, 0], sizes = [1, 17, 32], strides = [1, 1, 1]} : vector<8x17x32xf32> to vector<1x17x32xf32>
    %484 = vector.shape_cast %483 : vector<1x17x32xf32> to vector<17x32xf32>
    %485 = vector.extract_strided_slice %470 {offsets = [7, 0, 0], sizes = [1, 17, 32], strides = [1, 1, 1]} : vector<8x17x32xf32> to vector<1x17x32xf32>
    %486 = vector.shape_cast %485 : vector<1x17x32xf32> to vector<17x32xf32>
    %487 = arith.addf %472, %474 : vector<17x32xf32>
    %488 = arith.addf %476, %478 : vector<17x32xf32>
    %489 = arith.addf %480, %482 : vector<17x32xf32>
    %490 = arith.addf %484, %486 : vector<17x32xf32>
    %491 = arith.addf %487, %488 : vector<17x32xf32>
    %492 = arith.addf %489, %490 : vector<17x32xf32>
    %493 = arith.addf %491, %492 : vector<17x32xf32>
    %494 = vector.broadcast %374 : vector<1x32xf32> to vector<17x32xf32>
    %495 = arith.addf %493, %494 : vector<17x32xf32>
    %496 = arith.addf %369, %495 : vector<17x32xf32>
    %cst_157 = arith.constant dense<0.000000e+00> : vector<17xf32>
    %497 = vector.multi_reduction <add>, %496, %cst_157 [1] : vector<17x32xf32> to vector<17xf32>
    %498 = vector.shape_cast %497 : vector<17xf32> to vector<17x1xf32>
    %cst_158 = arith.constant 3.200000e+01 : f32
    %499 = vector.broadcast %cst_158 : f32 to vector<17x1xf32>
    %500 = arith.divf %498, %499 : vector<17x1xf32>
    %501 = vector.broadcast %500 : vector<17x1xf32> to vector<17x32xf32>
    %502 = arith.subf %496, %501 : vector<17x32xf32>
    %503 = arith.mulf %502, %502 : vector<17x32xf32>
    %cst_159 = arith.constant dense<0.000000e+00> : vector<17xf32>
    %504 = vector.multi_reduction <add>, %503, %cst_159 [1] : vector<17x32xf32> to vector<17xf32>
    %505 = vector.shape_cast %504 : vector<17xf32> to vector<17x1xf32>
    %cst_160 = arith.constant 3.200000e+01 : f32
    %506 = vector.broadcast %cst_160 : f32 to vector<17x1xf32>
    %507 = arith.divf %505, %506 : vector<17x1xf32>
    %cst_161 = arith.constant 9.99999974E-6 : f32
    %508 = vector.broadcast %cst_161 : f32 to vector<17x1xf32>
    %509 = arith.addf %507, %508 : vector<17x1xf32>
    %510 = math.rsqrt %509 : vector<17x1xf32>
    %511 = vector.broadcast %510 : vector<17x1xf32> to vector<17x32xf32>
    %512 = arith.mulf %502, %511 : vector<17x32xf32>
    %513 = vector.broadcast %375 : vector<1x32xf32> to vector<17x32xf32>
    %514 = arith.mulf %512, %513 : vector<17x32xf32>
    %515 = vector.broadcast %376 : vector<1x32xf32> to vector<17x32xf32>
    %516 = arith.addf %514, %515 : vector<17x32xf32>
    %c2_162 = arith.constant 2 : index
    %c0_163 = arith.constant 0 : index
    %c0_164 = arith.constant 0 : index
    %517 = vector.load %arg6[%c2_162, %c0_163, %c0_164] : memref<4x32x128xbf16, #tpu.memory_space<vmem>>, vector<1x32x128xbf16>
    %518 = vector.shape_cast %517 : vector<1x32x128xbf16> to vector<32x128xbf16>
    %519 = arith.truncf %516 : vector<17x32xf32> to vector<17x32xbf16>
    %cst_165 = arith.constant dense<0.000000e+00> : vector<17x128xf32>
    %520 = tpu.matmul %519, %518, %cst_165 {dimension_numbers = #tpu.dot_dimension_numbers<[1], [0], [0], [1], [0, 0, 1, 1], [], []>} : vector<17x32xbf16>, vector<32x128xbf16>, vector<17x128xf32> -> vector<17x128xf32>
    %c2_166 = arith.constant 2 : index
    %c0_167 = arith.constant 0 : index
    %c0_168 = arith.constant 0 : index
    %521 = vector.load %arg9[%c2_166, %c0_167, %c0_168] : memref<4x1x128xf32, #tpu.memory_space<vmem>>, vector<1x1x128xf32>
    %522 = vector.shape_cast %521 : vector<1x1x128xf32> to vector<1x128xf32>
    %523 = vector.broadcast %522 : vector<1x128xf32> to vector<17x128xf32>
    %524 = arith.addf %520, %523 : vector<17x128xf32>
    %cst_169 = arith.constant 5.000000e-01 : f32
    %525 = vector.broadcast %cst_169 : f32 to vector<17x128xf32>
    %526 = arith.mulf %525, %524 : vector<17x128xf32>
    %cst_170 = arith.constant 0.707106769 : f32
    %527 = vector.broadcast %cst_170 : f32 to vector<17x128xf32>
    %528 = arith.mulf %524, %527 : vector<17x128xf32>
    %cst_171 = arith.constant 0.000000e+00 : f32
    %529 = vector.broadcast %cst_171 : f32 to vector<17x128xf32>
    %530 = arith.cmpf oge, %528, %529 : vector<17x128xf32>
    %cst_172 = arith.constant 0.000000e+00 : f32
    %531 = vector.broadcast %cst_172 : f32 to vector<17x128xf32>
    %532 = arith.subf %531, %528 : vector<17x128xf32>
    %533 = arith.select %530, %528, %532 : vector<17x128xi1>, vector<17x128xf32>
    %cst_173 = arith.constant 1.000000e+00 : f32
    %cst_174 = arith.constant -1.000000e+00 : f32
    %534 = vector.broadcast %cst_173 : f32 to vector<17x128xf32>
    %535 = vector.broadcast %cst_174 : f32 to vector<17x128xf32>
    %536 = arith.select %530, %534, %535 : vector<17x128xi1>, vector<17x128xf32>
    %cst_175 = arith.constant 0.327591091 : f32
    %537 = vector.broadcast %cst_175 : f32 to vector<17x128xf32>
    %538 = arith.mulf %537, %533 : vector<17x128xf32>
    %cst_176 = arith.constant 1.000000e+00 : f32
    %539 = vector.broadcast %cst_176 : f32 to vector<17x128xf32>
    %540 = arith.addf %539, %538 : vector<17x128xf32>
    %cst_177 = arith.constant 1.000000e+00 : f32
    %541 = vector.broadcast %cst_177 : f32 to vector<17x128xf32>
    %542 = arith.divf %541, %540 : vector<17x128xf32>
    %cst_178 = arith.constant 1.06140542 : f32
    %543 = vector.broadcast %cst_178 : f32 to vector<17x128xf32>
    %544 = arith.mulf %543, %542 : vector<17x128xf32>
    %cst_179 = arith.constant -1.45315206 : f32
    %545 = vector.broadcast %cst_179 : f32 to vector<17x128xf32>
    %546 = arith.addf %544, %545 : vector<17x128xf32>
    %547 = arith.mulf %546, %542 : vector<17x128xf32>
    %cst_180 = arith.constant 1.42141378 : f32
    %548 = vector.broadcast %cst_180 : f32 to vector<17x128xf32>
    %549 = arith.addf %547, %548 : vector<17x128xf32>
    %550 = arith.mulf %549, %542 : vector<17x128xf32>
    %cst_181 = arith.constant -0.284496725 : f32
    %551 = vector.broadcast %cst_181 : f32 to vector<17x128xf32>
    %552 = arith.addf %550, %551 : vector<17x128xf32>
    %553 = arith.mulf %552, %542 : vector<17x128xf32>
    %cst_182 = arith.constant 0.254829586 : f32
    %554 = vector.broadcast %cst_182 : f32 to vector<17x128xf32>
    %555 = arith.addf %553, %554 : vector<17x128xf32>
    %556 = arith.mulf %555, %542 : vector<17x128xf32>
    %cst_183 = arith.constant 0.000000e+00 : f32
    %557 = vector.broadcast %cst_183 : f32 to vector<17x128xf32>
    %558 = arith.subf %557, %533 : vector<17x128xf32>
    %559 = arith.mulf %558, %533 : vector<17x128xf32>
    %560 = math.exp %559 : vector<17x128xf32>
    %561 = arith.mulf %556, %560 : vector<17x128xf32>
    %cst_184 = arith.constant 1.000000e+00 : f32
    %562 = vector.broadcast %cst_184 : f32 to vector<17x128xf32>
    %563 = arith.subf %562, %561 : vector<17x128xf32>
    %564 = arith.mulf %536, %563 : vector<17x128xf32>
    %cst_185 = arith.constant 1.000000e+00 : f32
    %565 = vector.broadcast %cst_185 : f32 to vector<17x128xf32>
    %566 = arith.addf %565, %564 : vector<17x128xf32>
    %567 = arith.mulf %526, %566 : vector<17x128xf32>
    %c2_186 = arith.constant 2 : index
    %c0_187 = arith.constant 0 : index
    %c0_188 = arith.constant 0 : index
    %568 = vector.load %arg7[%c2_186, %c0_187, %c0_188] : memref<4x128x32xbf16, #tpu.memory_space<vmem>>, vector<1x128x32xbf16>
    %569 = vector.shape_cast %568 : vector<1x128x32xbf16> to vector<128x32xbf16>
    %570 = arith.truncf %567 : vector<17x128xf32> to vector<17x128xbf16>
    %cst_189 = arith.constant dense<0.000000e+00> : vector<17x32xf32>
    %571 = tpu.matmul %570, %569, %cst_189 {dimension_numbers = #tpu.dot_dimension_numbers<[1], [0], [0], [1], [0, 0, 1, 1], [], []>} : vector<17x128xbf16>, vector<128x32xbf16>, vector<17x32xf32> -> vector<17x32xf32>
    %572 = arith.addf %496, %571 : vector<17x32xf32>
    %573 = vector.broadcast %377 : vector<1x32xf32> to vector<17x32xf32>
    %574 = arith.addf %572, %573 : vector<17x32xf32>
    %c3 = arith.constant 3 : index
    %c0_190 = arith.constant 0 : index
    %c0_191 = arith.constant 0 : index
    %575 = vector.load %arg8[%c3, %c0_190, %c0_191] : memref<4x6x32xf32, #tpu.memory_space<vmem>>, vector<1x6x32xf32>
    %576 = vector.shape_cast %575 : vector<1x6x32xf32> to vector<6x32xf32>
    %577 = vector.extract_strided_slice %576 {offsets = [0, 0], sizes = [1, 32], strides = [1, 1]} : vector<6x32xf32> to vector<1x32xf32>
    %578 = vector.extract_strided_slice %576 {offsets = [1, 0], sizes = [1, 32], strides = [1, 1]} : vector<6x32xf32> to vector<1x32xf32>
    %579 = vector.extract_strided_slice %576 {offsets = [2, 0], sizes = [1, 32], strides = [1, 1]} : vector<6x32xf32> to vector<1x32xf32>
    %580 = vector.extract_strided_slice %576 {offsets = [3, 0], sizes = [1, 32], strides = [1, 1]} : vector<6x32xf32> to vector<1x32xf32>
    %581 = vector.extract_strided_slice %576 {offsets = [4, 0], sizes = [1, 32], strides = [1, 1]} : vector<6x32xf32> to vector<1x32xf32>
    %582 = vector.extract_strided_slice %576 {offsets = [5, 0], sizes = [1, 32], strides = [1, 1]} : vector<6x32xf32> to vector<1x32xf32>
    %cst_192 = arith.constant dense<0.000000e+00> : vector<17xf32>
    %583 = vector.multi_reduction <add>, %574, %cst_192 [1] : vector<17x32xf32> to vector<17xf32>
    %584 = vector.shape_cast %583 : vector<17xf32> to vector<17x1xf32>
    %cst_193 = arith.constant 3.200000e+01 : f32
    %585 = vector.broadcast %cst_193 : f32 to vector<17x1xf32>
    %586 = arith.divf %584, %585 : vector<17x1xf32>
    %587 = vector.broadcast %586 : vector<17x1xf32> to vector<17x32xf32>
    %588 = arith.subf %574, %587 : vector<17x32xf32>
    %589 = arith.mulf %588, %588 : vector<17x32xf32>
    %cst_194 = arith.constant dense<0.000000e+00> : vector<17xf32>
    %590 = vector.multi_reduction <add>, %589, %cst_194 [1] : vector<17x32xf32> to vector<17xf32>
    %591 = vector.shape_cast %590 : vector<17xf32> to vector<17x1xf32>
    %cst_195 = arith.constant 3.200000e+01 : f32
    %592 = vector.broadcast %cst_195 : f32 to vector<17x1xf32>
    %593 = arith.divf %591, %592 : vector<17x1xf32>
    %cst_196 = arith.constant 9.99999974E-6 : f32
    %594 = vector.broadcast %cst_196 : f32 to vector<17x1xf32>
    %595 = arith.addf %593, %594 : vector<17x1xf32>
    %596 = math.rsqrt %595 : vector<17x1xf32>
    %597 = vector.broadcast %596 : vector<17x1xf32> to vector<17x32xf32>
    %598 = arith.mulf %588, %597 : vector<17x32xf32>
    %599 = vector.broadcast %577 : vector<1x32xf32> to vector<17x32xf32>
    %600 = arith.mulf %598, %599 : vector<17x32xf32>
    %601 = vector.broadcast %578 : vector<1x32xf32> to vector<17x32xf32>
    %602 = arith.addf %600, %601 : vector<17x32xf32>
    %c3_197 = arith.constant 3 : index
    %c0_198 = arith.constant 0 : index
    %c0_199 = arith.constant 0 : index
    %c0_200 = arith.constant 0 : index
    %603 = vector.load %arg4[%c3_197, %c0_198, %c0_199, %c0_200] : memref<4x8x32x32xbf16, #tpu.memory_space<vmem>>, vector<1x8x32x32xbf16>
    %604 = vector.shape_cast %603 : vector<1x8x32x32xbf16> to vector<8x32x32xbf16>
    %c3_201 = arith.constant 3 : index
    %c0_202 = arith.constant 0 : index
    %c0_203 = arith.constant 0 : index
    %c0_204 = arith.constant 0 : index
    %605 = vector.load %arg5[%c3_201, %c0_202, %c0_203, %c0_204] : memref<4x8x32x32xbf16, #tpu.memory_space<vmem>>, vector<1x8x32x32xbf16>
    %606 = vector.shape_cast %605 : vector<1x8x32x32xbf16> to vector<8x32x32xbf16>
    %607 = arith.truncf %602 : vector<17x32xf32> to vector<17x32xbf16>
    %608 = vector.shape_cast %607 : vector<17x32xbf16> to vector<1x17x32xbf16>
    %609 = vector.shape_cast %608 : vector<1x17x32xbf16> to vector<1x17x32xbf16>
    %610 = vector.broadcast %609 : vector<1x17x32xbf16> to vector<8x17x32xbf16>
    %cst_205 = arith.constant dense<0.000000e+00> : vector<8x17x32xf32>
    %611 = tpu.matmul %610, %604, %cst_205 {dimension_numbers = #tpu.dot_dimension_numbers<[2], [1], [1], [2], [0, 0, 0, 1, 1, 2], [0], [0]>} : vector<8x17x32xbf16>, vector<8x32x32xbf16>, vector<8x17x32xf32> -> vector<8x17x32xf32>
    %612 = arith.truncf %611 : vector<8x17x32xf32> to vector<8x17x32xbf16>
    %cst_206 = arith.constant dense<0.000000e+00> : vector<8x17x17xf32>
    %613 = tpu.matmul %612, %610, %cst_206 {dimension_numbers = #tpu.dot_dimension_numbers<[2], [2], [1], [1], [0, 0, 0, 1, 1, 1], [0], [0]>} : vector<8x17x32xbf16>, vector<8x17x32xbf16>, vector<8x17x17xf32> -> vector<8x17x17xf32>
    %cst_207 = arith.constant dense<0xFF800000> : vector<8x17xf32>
    %614 = vector.multi_reduction <maximumf>, %613, %cst_207 [2] : vector<8x17x17xf32> to vector<8x17xf32>
    %615 = vector.shape_cast %614 : vector<8x17xf32> to vector<8x17x1xf32>
    %616 = vector.broadcast %615 : vector<8x17x1xf32> to vector<8x17x17xf32>
    %617 = arith.subf %613, %616 : vector<8x17x17xf32>
    %618 = math.exp %617 : vector<8x17x17xf32>
    %cst_208 = arith.constant dense<0.000000e+00> : vector<8x17xf32>
    %619 = vector.multi_reduction <add>, %618, %cst_208 [2] : vector<8x17x17xf32> to vector<8x17xf32>
    %620 = vector.shape_cast %619 : vector<8x17xf32> to vector<8x17x1xf32>
    %621 = tpu.reciprocal %620 {approx = true} : vector<8x17x1xf32> -> vector<8x17x1xf32>
    %622 = vector.broadcast %621 : vector<8x17x1xf32> to vector<8x17x17xf32>
    %623 = arith.mulf %618, %622 : vector<8x17x17xf32>
    %cst_209 = arith.constant dense<0.000000e+00> : vector<8x17x32xf32>
    %624 = tpu.matmul %610, %606, %cst_209 {dimension_numbers = #tpu.dot_dimension_numbers<[2], [1], [1], [2], [0, 0, 0, 1, 1, 2], [0], [0]>} : vector<8x17x32xbf16>, vector<8x32x32xbf16>, vector<8x17x32xf32> -> vector<8x17x32xf32>
    %625 = arith.truncf %623 : vector<8x17x17xf32> to vector<8x17x17xbf16>
    %626 = arith.truncf %624 : vector<8x17x32xf32> to vector<8x17x32xbf16>
    %cst_210 = arith.constant dense<0.000000e+00> : vector<8x17x32xf32>
    %627 = tpu.matmul %625, %626, %cst_210 {dimension_numbers = #tpu.dot_dimension_numbers<[2], [1], [1], [2], [0, 0, 0, 1, 1, 2], [0], [0]>} : vector<8x17x17xbf16>, vector<8x17x32xbf16>, vector<8x17x32xf32> -> vector<8x17x32xf32>
    %628 = vector.extract_strided_slice %627 {offsets = [0, 0, 0], sizes = [1, 17, 32], strides = [1, 1, 1]} : vector<8x17x32xf32> to vector<1x17x32xf32>
    %629 = vector.shape_cast %628 : vector<1x17x32xf32> to vector<17x32xf32>
    %630 = vector.extract_strided_slice %627 {offsets = [1, 0, 0], sizes = [1, 17, 32], strides = [1, 1, 1]} : vector<8x17x32xf32> to vector<1x17x32xf32>
    %631 = vector.shape_cast %630 : vector<1x17x32xf32> to vector<17x32xf32>
    %632 = vector.extract_strided_slice %627 {offsets = [2, 0, 0], sizes = [1, 17, 32], strides = [1, 1, 1]} : vector<8x17x32xf32> to vector<1x17x32xf32>
    %633 = vector.shape_cast %632 : vector<1x17x32xf32> to vector<17x32xf32>
    %634 = vector.extract_strided_slice %627 {offsets = [3, 0, 0], sizes = [1, 17, 32], strides = [1, 1, 1]} : vector<8x17x32xf32> to vector<1x17x32xf32>
    %635 = vector.shape_cast %634 : vector<1x17x32xf32> to vector<17x32xf32>
    %636 = vector.extract_strided_slice %627 {offsets = [4, 0, 0], sizes = [1, 17, 32], strides = [1, 1, 1]} : vector<8x17x32xf32> to vector<1x17x32xf32>
    %637 = vector.shape_cast %636 : vector<1x17x32xf32> to vector<17x32xf32>
    %638 = vector.extract_strided_slice %627 {offsets = [5, 0, 0], sizes = [1, 17, 32], strides = [1, 1, 1]} : vector<8x17x32xf32> to vector<1x17x32xf32>
    %639 = vector.shape_cast %638 : vector<1x17x32xf32> to vector<17x32xf32>
    %640 = vector.extract_strided_slice %627 {offsets = [6, 0, 0], sizes = [1, 17, 32], strides = [1, 1, 1]} : vector<8x17x32xf32> to vector<1x17x32xf32>
    %641 = vector.shape_cast %640 : vector<1x17x32xf32> to vector<17x32xf32>
    %642 = vector.extract_strided_slice %627 {offsets = [7, 0, 0], sizes = [1, 17, 32], strides = [1, 1, 1]} : vector<8x17x32xf32> to vector<1x17x32xf32>
    %643 = vector.shape_cast %642 : vector<1x17x32xf32> to vector<17x32xf32>
    %644 = arith.addf %629, %631 : vector<17x32xf32>
    %645 = arith.addf %633, %635 : vector<17x32xf32>
    %646 = arith.addf %637, %639 : vector<17x32xf32>
    %647 = arith.addf %641, %643 : vector<17x32xf32>
    %648 = arith.addf %644, %645 : vector<17x32xf32>
    %649 = arith.addf %646, %647 : vector<17x32xf32>
    %650 = arith.addf %648, %649 : vector<17x32xf32>
    %651 = vector.broadcast %579 : vector<1x32xf32> to vector<17x32xf32>
    %652 = arith.addf %650, %651 : vector<17x32xf32>
    %653 = arith.addf %574, %652 : vector<17x32xf32>
    %cst_211 = arith.constant dense<0.000000e+00> : vector<17xf32>
    %654 = vector.multi_reduction <add>, %653, %cst_211 [1] : vector<17x32xf32> to vector<17xf32>
    %655 = vector.shape_cast %654 : vector<17xf32> to vector<17x1xf32>
    %cst_212 = arith.constant 3.200000e+01 : f32
    %656 = vector.broadcast %cst_212 : f32 to vector<17x1xf32>
    %657 = arith.divf %655, %656 : vector<17x1xf32>
    %658 = vector.broadcast %657 : vector<17x1xf32> to vector<17x32xf32>
    %659 = arith.subf %653, %658 : vector<17x32xf32>
    %660 = arith.mulf %659, %659 : vector<17x32xf32>
    %cst_213 = arith.constant dense<0.000000e+00> : vector<17xf32>
    %661 = vector.multi_reduction <add>, %660, %cst_213 [1] : vector<17x32xf32> to vector<17xf32>
    %662 = vector.shape_cast %661 : vector<17xf32> to vector<17x1xf32>
    %cst_214 = arith.constant 3.200000e+01 : f32
    %663 = vector.broadcast %cst_214 : f32 to vector<17x1xf32>
    %664 = arith.divf %662, %663 : vector<17x1xf32>
    %cst_215 = arith.constant 9.99999974E-6 : f32
    %665 = vector.broadcast %cst_215 : f32 to vector<17x1xf32>
    %666 = arith.addf %664, %665 : vector<17x1xf32>
    %667 = math.rsqrt %666 : vector<17x1xf32>
    %668 = vector.broadcast %667 : vector<17x1xf32> to vector<17x32xf32>
    %669 = arith.mulf %659, %668 : vector<17x32xf32>
    %670 = vector.broadcast %580 : vector<1x32xf32> to vector<17x32xf32>
    %671 = arith.mulf %669, %670 : vector<17x32xf32>
    %672 = vector.broadcast %581 : vector<1x32xf32> to vector<17x32xf32>
    %673 = arith.addf %671, %672 : vector<17x32xf32>
    %c3_216 = arith.constant 3 : index
    %c0_217 = arith.constant 0 : index
    %c0_218 = arith.constant 0 : index
    %674 = vector.load %arg6[%c3_216, %c0_217, %c0_218] : memref<4x32x128xbf16, #tpu.memory_space<vmem>>, vector<1x32x128xbf16>
    %675 = vector.shape_cast %674 : vector<1x32x128xbf16> to vector<32x128xbf16>
    %676 = arith.truncf %673 : vector<17x32xf32> to vector<17x32xbf16>
    %cst_219 = arith.constant dense<0.000000e+00> : vector<17x128xf32>
    %677 = tpu.matmul %676, %675, %cst_219 {dimension_numbers = #tpu.dot_dimension_numbers<[1], [0], [0], [1], [0, 0, 1, 1], [], []>} : vector<17x32xbf16>, vector<32x128xbf16>, vector<17x128xf32> -> vector<17x128xf32>
    %c3_220 = arith.constant 3 : index
    %c0_221 = arith.constant 0 : index
    %c0_222 = arith.constant 0 : index
    %678 = vector.load %arg9[%c3_220, %c0_221, %c0_222] : memref<4x1x128xf32, #tpu.memory_space<vmem>>, vector<1x1x128xf32>
    %679 = vector.shape_cast %678 : vector<1x1x128xf32> to vector<1x128xf32>
    %680 = vector.broadcast %679 : vector<1x128xf32> to vector<17x128xf32>
    %681 = arith.addf %677, %680 : vector<17x128xf32>
    %cst_223 = arith.constant 5.000000e-01 : f32
    %682 = vector.broadcast %cst_223 : f32 to vector<17x128xf32>
    %683 = arith.mulf %682, %681 : vector<17x128xf32>
    %cst_224 = arith.constant 0.707106769 : f32
    %684 = vector.broadcast %cst_224 : f32 to vector<17x128xf32>
    %685 = arith.mulf %681, %684 : vector<17x128xf32>
    %cst_225 = arith.constant 0.000000e+00 : f32
    %686 = vector.broadcast %cst_225 : f32 to vector<17x128xf32>
    %687 = arith.cmpf oge, %685, %686 : vector<17x128xf32>
    %cst_226 = arith.constant 0.000000e+00 : f32
    %688 = vector.broadcast %cst_226 : f32 to vector<17x128xf32>
    %689 = arith.subf %688, %685 : vector<17x128xf32>
    %690 = arith.select %687, %685, %689 : vector<17x128xi1>, vector<17x128xf32>
    %cst_227 = arith.constant 1.000000e+00 : f32
    %cst_228 = arith.constant -1.000000e+00 : f32
    %691 = vector.broadcast %cst_227 : f32 to vector<17x128xf32>
    %692 = vector.broadcast %cst_228 : f32 to vector<17x128xf32>
    %693 = arith.select %687, %691, %692 : vector<17x128xi1>, vector<17x128xf32>
    %cst_229 = arith.constant 0.327591091 : f32
    %694 = vector.broadcast %cst_229 : f32 to vector<17x128xf32>
    %695 = arith.mulf %694, %690 : vector<17x128xf32>
    %cst_230 = arith.constant 1.000000e+00 : f32
    %696 = vector.broadcast %cst_230 : f32 to vector<17x128xf32>
    %697 = arith.addf %696, %695 : vector<17x128xf32>
    %cst_231 = arith.constant 1.000000e+00 : f32
    %698 = vector.broadcast %cst_231 : f32 to vector<17x128xf32>
    %699 = arith.divf %698, %697 : vector<17x128xf32>
    %cst_232 = arith.constant 1.06140542 : f32
    %700 = vector.broadcast %cst_232 : f32 to vector<17x128xf32>
    %701 = arith.mulf %700, %699 : vector<17x128xf32>
    %cst_233 = arith.constant -1.45315206 : f32
    %702 = vector.broadcast %cst_233 : f32 to vector<17x128xf32>
    %703 = arith.addf %701, %702 : vector<17x128xf32>
    %704 = arith.mulf %703, %699 : vector<17x128xf32>
    %cst_234 = arith.constant 1.42141378 : f32
    %705 = vector.broadcast %cst_234 : f32 to vector<17x128xf32>
    %706 = arith.addf %704, %705 : vector<17x128xf32>
    %707 = arith.mulf %706, %699 : vector<17x128xf32>
    %cst_235 = arith.constant -0.284496725 : f32
    %708 = vector.broadcast %cst_235 : f32 to vector<17x128xf32>
    %709 = arith.addf %707, %708 : vector<17x128xf32>
    %710 = arith.mulf %709, %699 : vector<17x128xf32>
    %cst_236 = arith.constant 0.254829586 : f32
    %711 = vector.broadcast %cst_236 : f32 to vector<17x128xf32>
    %712 = arith.addf %710, %711 : vector<17x128xf32>
    %713 = arith.mulf %712, %699 : vector<17x128xf32>
    %cst_237 = arith.constant 0.000000e+00 : f32
    %714 = vector.broadcast %cst_237 : f32 to vector<17x128xf32>
    %715 = arith.subf %714, %690 : vector<17x128xf32>
    %716 = arith.mulf %715, %690 : vector<17x128xf32>
    %717 = math.exp %716 : vector<17x128xf32>
    %718 = arith.mulf %713, %717 : vector<17x128xf32>
    %cst_238 = arith.constant 1.000000e+00 : f32
    %719 = vector.broadcast %cst_238 : f32 to vector<17x128xf32>
    %720 = arith.subf %719, %718 : vector<17x128xf32>
    %721 = arith.mulf %693, %720 : vector<17x128xf32>
    %cst_239 = arith.constant 1.000000e+00 : f32
    %722 = vector.broadcast %cst_239 : f32 to vector<17x128xf32>
    %723 = arith.addf %722, %721 : vector<17x128xf32>
    %724 = arith.mulf %683, %723 : vector<17x128xf32>
    %c3_240 = arith.constant 3 : index
    %c0_241 = arith.constant 0 : index
    %c0_242 = arith.constant 0 : index
    %725 = vector.load %arg7[%c3_240, %c0_241, %c0_242] : memref<4x128x32xbf16, #tpu.memory_space<vmem>>, vector<1x128x32xbf16>
    %726 = vector.shape_cast %725 : vector<1x128x32xbf16> to vector<128x32xbf16>
    %727 = arith.truncf %724 : vector<17x128xf32> to vector<17x128xbf16>
    %cst_243 = arith.constant dense<0.000000e+00> : vector<17x32xf32>
    %728 = tpu.matmul %727, %726, %cst_243 {dimension_numbers = #tpu.dot_dimension_numbers<[1], [0], [0], [1], [0, 0, 1, 1], [], []>} : vector<17x128xbf16>, vector<128x32xbf16>, vector<17x32xf32> -> vector<17x32xf32>
    %729 = arith.addf %653, %728 : vector<17x32xf32>
    %730 = vector.broadcast %582 : vector<1x32xf32> to vector<17x32xf32>
    %731 = arith.addf %729, %730 : vector<17x32xf32>
    %c0_244 = arith.constant 0 : index
    %c0_245 = arith.constant 0 : index
    %732 = vector.load %arg10[%c0_244, %c0_245] : memref<2x32xf32, #tpu.memory_space<vmem>>, vector<2x32xf32>
    %733 = vector.extract_strided_slice %732 {offsets = [0, 0], sizes = [1, 32], strides = [1, 1]} : vector<2x32xf32> to vector<1x32xf32>
    %734 = vector.extract_strided_slice %732 {offsets = [1, 0], sizes = [1, 32], strides = [1, 1]} : vector<2x32xf32> to vector<1x32xf32>
    %cst_246 = arith.constant dense<0.000000e+00> : vector<17xf32>
    %735 = vector.multi_reduction <add>, %731, %cst_246 [1] : vector<17x32xf32> to vector<17xf32>
    %736 = vector.shape_cast %735 : vector<17xf32> to vector<17x1xf32>
    %cst_247 = arith.constant 3.200000e+01 : f32
    %737 = vector.broadcast %cst_247 : f32 to vector<17x1xf32>
    %738 = arith.divf %736, %737 : vector<17x1xf32>
    %739 = vector.broadcast %738 : vector<17x1xf32> to vector<17x32xf32>
    %740 = arith.subf %731, %739 : vector<17x32xf32>
    %741 = arith.mulf %740, %740 : vector<17x32xf32>
    %cst_248 = arith.constant dense<0.000000e+00> : vector<17xf32>
    %742 = vector.multi_reduction <add>, %741, %cst_248 [1] : vector<17x32xf32> to vector<17xf32>
    %743 = vector.shape_cast %742 : vector<17xf32> to vector<17x1xf32>
    %cst_249 = arith.constant 3.200000e+01 : f32
    %744 = vector.broadcast %cst_249 : f32 to vector<17x1xf32>
    %745 = arith.divf %743, %744 : vector<17x1xf32>
    %cst_250 = arith.constant 9.99999974E-6 : f32
    %746 = vector.broadcast %cst_250 : f32 to vector<17x1xf32>
    %747 = arith.addf %745, %746 : vector<17x1xf32>
    %748 = math.rsqrt %747 : vector<17x1xf32>
    %749 = vector.broadcast %748 : vector<17x1xf32> to vector<17x32xf32>
    %750 = arith.mulf %740, %749 : vector<17x32xf32>
    %751 = vector.broadcast %733 : vector<1x32xf32> to vector<17x32xf32>
    %752 = arith.mulf %750, %751 : vector<17x32xf32>
    %753 = vector.broadcast %734 : vector<1x32xf32> to vector<17x32xf32>
    %754 = arith.addf %752, %753 : vector<17x32xf32>
    %c0_251 = arith.constant 0 : index
    %c0_252 = arith.constant 0 : index
    %755 = vector.load %arg14[%c0_251, %c0_252] : memref<2x256xf32, #tpu.memory_space<vmem>>, vector<2x256xf32>
    %c0_253 = arith.constant 0 : index
    %c0_254 = arith.constant 0 : index
    %756 = vector.load %arg16[%c0_253, %c0_254] : memref<2x128xf32, #tpu.memory_space<vmem>>, vector<2x128xf32>
    %c0_255 = arith.constant 0 : index
    %c0_256 = arith.constant 0 : index
    %c0_257 = arith.constant 0 : index
    %757 = vector.load %arg11[%c0_255, %c0_256, %c0_257] : memref<9x16x17xbf16, #tpu.memory_space<vmem>>, vector<9x16x17xbf16>
    %c0_258 = arith.constant 0 : index
    %c0_259 = arith.constant 0 : index
    %c0_260 = arith.constant 0 : index
    %758 = vector.load %arg13[%c0_258, %c0_259, %c0_260] : memref<9x32x256xbf16, #tpu.memory_space<vmem>>, vector<9x32x256xbf16>
    %759 = arith.truncf %754 : vector<17x32xf32> to vector<17x32xbf16>
    %760 = vector.shape_cast %759 : vector<17x32xbf16> to vector<1x17x32xbf16>
    %761 = vector.shape_cast %760 : vector<1x17x32xbf16> to vector<1x17x32xbf16>
    %762 = vector.broadcast %761 : vector<1x17x32xbf16> to vector<9x17x32xbf16>
    %cst_261 = arith.constant dense<0.000000e+00> : vector<9x16x32xf32>
    %763 = tpu.matmul %757, %762, %cst_261 {dimension_numbers = #tpu.dot_dimension_numbers<[2], [1], [1], [2], [0, 0, 0, 1, 1, 2], [0], [0]>} : vector<9x16x17xbf16>, vector<9x17x32xbf16>, vector<9x16x32xf32> -> vector<9x16x32xf32>
    %764 = arith.truncf %763 : vector<9x16x32xf32> to vector<9x16x32xbf16>
    %cst_262 = arith.constant dense<0.000000e+00> : vector<9x16x256xf32>
    %765 = tpu.matmul %764, %758, %cst_262 {dimension_numbers = #tpu.dot_dimension_numbers<[2], [1], [1], [2], [0, 0, 0, 1, 1, 2], [0], [0]>} : vector<9x16x32xbf16>, vector<9x32x256xbf16>, vector<9x16x256xf32> -> vector<9x16x256xf32>
    %766 = vector.extract_strided_slice %765 {offsets = [0, 0, 0], sizes = [1, 16, 256], strides = [1, 1, 1]} : vector<9x16x256xf32> to vector<1x16x256xf32>
    %767 = vector.shape_cast %766 : vector<1x16x256xf32> to vector<16x256xf32>
    %768 = vector.extract_strided_slice %765 {offsets = [1, 0, 0], sizes = [1, 16, 256], strides = [1, 1, 1]} : vector<9x16x256xf32> to vector<1x16x256xf32>
    %769 = vector.shape_cast %768 : vector<1x16x256xf32> to vector<16x256xf32>
    %770 = vector.extract_strided_slice %765 {offsets = [2, 0, 0], sizes = [1, 16, 256], strides = [1, 1, 1]} : vector<9x16x256xf32> to vector<1x16x256xf32>
    %771 = vector.shape_cast %770 : vector<1x16x256xf32> to vector<16x256xf32>
    %772 = vector.extract_strided_slice %765 {offsets = [3, 0, 0], sizes = [1, 16, 256], strides = [1, 1, 1]} : vector<9x16x256xf32> to vector<1x16x256xf32>
    %773 = vector.shape_cast %772 : vector<1x16x256xf32> to vector<16x256xf32>
    %774 = vector.extract_strided_slice %765 {offsets = [4, 0, 0], sizes = [1, 16, 256], strides = [1, 1, 1]} : vector<9x16x256xf32> to vector<1x16x256xf32>
    %775 = vector.shape_cast %774 : vector<1x16x256xf32> to vector<16x256xf32>
    %776 = vector.extract_strided_slice %765 {offsets = [5, 0, 0], sizes = [1, 16, 256], strides = [1, 1, 1]} : vector<9x16x256xf32> to vector<1x16x256xf32>
    %777 = vector.shape_cast %776 : vector<1x16x256xf32> to vector<16x256xf32>
    %778 = vector.extract_strided_slice %765 {offsets = [6, 0, 0], sizes = [1, 16, 256], strides = [1, 1, 1]} : vector<9x16x256xf32> to vector<1x16x256xf32>
    %779 = vector.shape_cast %778 : vector<1x16x256xf32> to vector<16x256xf32>
    %780 = vector.extract_strided_slice %765 {offsets = [7, 0, 0], sizes = [1, 16, 256], strides = [1, 1, 1]} : vector<9x16x256xf32> to vector<1x16x256xf32>
    %781 = vector.shape_cast %780 : vector<1x16x256xf32> to vector<16x256xf32>
    %782 = vector.extract_strided_slice %765 {offsets = [8, 0, 0], sizes = [1, 16, 256], strides = [1, 1, 1]} : vector<9x16x256xf32> to vector<1x16x256xf32>
    %783 = vector.shape_cast %782 : vector<1x16x256xf32> to vector<16x256xf32>
    %784 = arith.addf %767, %769 : vector<16x256xf32>
    %785 = arith.addf %771, %773 : vector<16x256xf32>
    %786 = arith.addf %775, %777 : vector<16x256xf32>
    %787 = arith.addf %779, %781 : vector<16x256xf32>
    %788 = arith.addf %784, %785 : vector<16x256xf32>
    %789 = arith.addf %786, %787 : vector<16x256xf32>
    %790 = arith.addf %788, %789 : vector<16x256xf32>
    %791 = arith.addf %790, %783 : vector<16x256xf32>
    %792 = vector.extract_strided_slice %755 {offsets = [0, 0], sizes = [1, 256], strides = [1, 1]} : vector<2x256xf32> to vector<1x256xf32>
    %793 = vector.broadcast %792 : vector<1x256xf32> to vector<16x256xf32>
    %794 = arith.mulf %791, %793 : vector<16x256xf32>
    %795 = vector.extract_strided_slice %755 {offsets = [1, 0], sizes = [1, 256], strides = [1, 1]} : vector<2x256xf32> to vector<1x256xf32>
    %796 = vector.broadcast %795 : vector<1x256xf32> to vector<16x256xf32>
    %797 = arith.addf %794, %796 : vector<16x256xf32>
    %cst_263 = arith.constant 0.000000e+00 : f32
    %798 = vector.broadcast %cst_263 : f32 to vector<16x256xf32>
    %799 = arith.maximumf %797, %798 : vector<16x256xf32>
    %c0_264 = arith.constant 0 : index
    %c0_265 = arith.constant 0 : index
    %c0_266 = arith.constant 0 : index
    %800 = vector.load %arg12[%c0_264, %c0_265, %c0_266] : memref<9x16x16xbf16, #tpu.memory_space<vmem>>, vector<9x16x16xbf16>
    %c0_267 = arith.constant 0 : index
    %c0_268 = arith.constant 0 : index
    %c0_269 = arith.constant 0 : index
    %801 = vector.load %arg15[%c0_267, %c0_268, %c0_269] : memref<9x256x128xbf16, #tpu.memory_space<vmem>>, vector<9x256x128xbf16>
    %802 = arith.truncf %799 : vector<16x256xf32> to vector<16x256xbf16>
    %803 = vector.shape_cast %802 : vector<16x256xbf16> to vector<1x16x256xbf16>
    %804 = vector.shape_cast %803 : vector<1x16x256xbf16> to vector<1x16x256xbf16>
    %805 = vector.broadcast %804 : vector<1x16x256xbf16> to vector<9x16x256xbf16>
    %cst_270 = arith.constant dense<0.000000e+00> : vector<9x16x256xf32>
    %806 = tpu.matmul %800, %805, %cst_270 {dimension_numbers = #tpu.dot_dimension_numbers<[2], [1], [1], [2], [0, 0, 0, 1, 1, 2], [0], [0]>} : vector<9x16x16xbf16>, vector<9x16x256xbf16>, vector<9x16x256xf32> -> vector<9x16x256xf32>
    %807 = arith.truncf %806 : vector<9x16x256xf32> to vector<9x16x256xbf16>
    %cst_271 = arith.constant dense<0.000000e+00> : vector<9x16x128xf32>
    %808 = tpu.matmul %807, %801, %cst_271 {dimension_numbers = #tpu.dot_dimension_numbers<[2], [1], [1], [2], [0, 0, 0, 1, 1, 2], [0], [0]>} : vector<9x16x256xbf16>, vector<9x256x128xbf16>, vector<9x16x128xf32> -> vector<9x16x128xf32>
    %809 = vector.extract_strided_slice %808 {offsets = [0, 0, 0], sizes = [1, 16, 128], strides = [1, 1, 1]} : vector<9x16x128xf32> to vector<1x16x128xf32>
    %810 = vector.shape_cast %809 : vector<1x16x128xf32> to vector<16x128xf32>
    %811 = vector.extract_strided_slice %808 {offsets = [1, 0, 0], sizes = [1, 16, 128], strides = [1, 1, 1]} : vector<9x16x128xf32> to vector<1x16x128xf32>
    %812 = vector.shape_cast %811 : vector<1x16x128xf32> to vector<16x128xf32>
    %813 = vector.extract_strided_slice %808 {offsets = [2, 0, 0], sizes = [1, 16, 128], strides = [1, 1, 1]} : vector<9x16x128xf32> to vector<1x16x128xf32>
    %814 = vector.shape_cast %813 : vector<1x16x128xf32> to vector<16x128xf32>
    %815 = vector.extract_strided_slice %808 {offsets = [3, 0, 0], sizes = [1, 16, 128], strides = [1, 1, 1]} : vector<9x16x128xf32> to vector<1x16x128xf32>
    %816 = vector.shape_cast %815 : vector<1x16x128xf32> to vector<16x128xf32>
    %817 = vector.extract_strided_slice %808 {offsets = [4, 0, 0], sizes = [1, 16, 128], strides = [1, 1, 1]} : vector<9x16x128xf32> to vector<1x16x128xf32>
    %818 = vector.shape_cast %817 : vector<1x16x128xf32> to vector<16x128xf32>
    %819 = vector.extract_strided_slice %808 {offsets = [5, 0, 0], sizes = [1, 16, 128], strides = [1, 1, 1]} : vector<9x16x128xf32> to vector<1x16x128xf32>
    %820 = vector.shape_cast %819 : vector<1x16x128xf32> to vector<16x128xf32>
    %821 = vector.extract_strided_slice %808 {offsets = [6, 0, 0], sizes = [1, 16, 128], strides = [1, 1, 1]} : vector<9x16x128xf32> to vector<1x16x128xf32>
    %822 = vector.shape_cast %821 : vector<1x16x128xf32> to vector<16x128xf32>
    %823 = vector.extract_strided_slice %808 {offsets = [7, 0, 0], sizes = [1, 16, 128], strides = [1, 1, 1]} : vector<9x16x128xf32> to vector<1x16x128xf32>
    %824 = vector.shape_cast %823 : vector<1x16x128xf32> to vector<16x128xf32>
    %825 = vector.extract_strided_slice %808 {offsets = [8, 0, 0], sizes = [1, 16, 128], strides = [1, 1, 1]} : vector<9x16x128xf32> to vector<1x16x128xf32>
    %826 = vector.shape_cast %825 : vector<1x16x128xf32> to vector<16x128xf32>
    %827 = arith.addf %810, %812 : vector<16x128xf32>
    %828 = arith.addf %814, %816 : vector<16x128xf32>
    %829 = arith.addf %818, %820 : vector<16x128xf32>
    %830 = arith.addf %822, %824 : vector<16x128xf32>
    %831 = arith.addf %827, %828 : vector<16x128xf32>
    %832 = arith.addf %829, %830 : vector<16x128xf32>
    %833 = arith.addf %831, %832 : vector<16x128xf32>
    %834 = arith.addf %833, %826 : vector<16x128xf32>
    %835 = vector.extract_strided_slice %756 {offsets = [0, 0], sizes = [1, 128], strides = [1, 1]} : vector<2x128xf32> to vector<1x128xf32>
    %836 = vector.broadcast %835 : vector<1x128xf32> to vector<16x128xf32>
    %837 = arith.mulf %834, %836 : vector<16x128xf32>
    %838 = vector.extract_strided_slice %756 {offsets = [1, 0], sizes = [1, 128], strides = [1, 1]} : vector<2x128xf32> to vector<1x128xf32>
    %839 = vector.broadcast %838 : vector<1x128xf32> to vector<16x128xf32>
    %840 = arith.addf %837, %839 : vector<16x128xf32>
    %cst_272 = arith.constant 0.000000e+00 : f32
    %841 = vector.broadcast %cst_272 : f32 to vector<16x128xf32>
    %842 = arith.maximumf %840, %841 : vector<16x128xf32>
    %c0_273 = arith.constant 0 : index
    %c0_274 = arith.constant 0 : index
    %843 = vector.load %arg17[%c0_273, %c0_274] : memref<128x128xbf16, #tpu.memory_space<vmem>>, vector<128x128xbf16>
    %844 = arith.truncf %842 : vector<16x128xf32> to vector<16x128xbf16>
    %cst_275 = arith.constant dense<0.000000e+00> : vector<16x128xf32>
    %845 = tpu.matmul %844, %843, %cst_275 {dimension_numbers = #tpu.dot_dimension_numbers<[1], [0], [0], [1], [0, 0, 1, 1], [], []>} : vector<16x128xbf16>, vector<128x128xbf16>, vector<16x128xf32> -> vector<16x128xf32>
    %c0_276 = arith.constant 0 : index
    %c0_277 = arith.constant 0 : index
    %846 = vector.load %arg18[%c0_276, %c0_277] : memref<1x128xf32, #tpu.memory_space<vmem>>, vector<1x128xf32>
    %847 = vector.broadcast %846 : vector<1x128xf32> to vector<16x128xf32>
    %848 = arith.addf %845, %847 : vector<16x128xf32>
    %c0_278 = arith.constant 0 : index
    %c0_279 = arith.constant 0 : index
    %c0_280 = arith.constant 0 : index
    %849 = vector.load %arg19[%c0_278, %c0_279, %c0_280] : memref<1x16x128xf32, #tpu.memory_space<vmem>>, vector<1x16x128xf32>
    %850 = vector.shape_cast %849 : vector<1x16x128xf32> to vector<16x128xf32>
    %851 = vector.shape_cast %848 : vector<16x128xf32> to vector<1x16x128xf32>
    tpu.vector_store %arg19[%c0_278, %c0_279, %c0_280], %851 {strides = array<i32>} : memref<1x16x128xf32, #tpu.memory_space<vmem>>, vector<1x16x128xf32>,
    return
  }
  func.func @transform_0(%arg0: i32) -> (i32, i32, i32) {
    %c0_i32 = arith.constant 0 : i32
    %c0_i32_0 = arith.constant 0 : i32
    %c0_i32_1 = arith.constant 0 : i32
    return %arg0, %c0_i32, %c0_i32_0 : i32, i32, i32
  }
  func.func @transform_1(%arg0: i32) -> (i32, i32, i32) {
    %c0_i32 = arith.constant 0 : i32
    %c0_i32_0 = arith.constant 0 : i32
    %c0_i32_1 = arith.constant 0 : i32
    return %arg0, %c0_i32, %c0_i32_0 : i32, i32, i32
  }
  func.func @transform_2(%arg0: i32) -> (i32, i32, i32) {
    %c0_i32 = arith.constant 0 : i32
    %c0_i32_0 = arith.constant 0 : i32
    %c0_i32_1 = arith.constant 0 : i32
    %c0_i32_2 = arith.constant 0 : i32
    return %c0_i32, %c0_i32_0, %c0_i32_1 : i32, i32, i32
  }
  func.func @transform_3(%arg0: i32) -> (i32, i32, i32, i32) {
    %c0_i32 = arith.constant 0 : i32
    %c0_i32_0 = arith.constant 0 : i32
    %c0_i32_1 = arith.constant 0 : i32
    %c0_i32_2 = arith.constant 0 : i32
    %c0_i32_3 = arith.constant 0 : i32
    return %c0_i32, %c0_i32_0, %c0_i32_1, %c0_i32_2 : i32, i32, i32, i32
  }
  func.func @transform_4(%arg0: i32) -> (i32, i32, i32, i32) {
    %c0_i32 = arith.constant 0 : i32
    %c0_i32_0 = arith.constant 0 : i32
    %c0_i32_1 = arith.constant 0 : i32
    %c0_i32_2 = arith.constant 0 : i32
    %c0_i32_3 = arith.constant 0 : i32
    return %c0_i32, %c0_i32_0, %c0_i32_1, %c0_i32_2 : i32, i32, i32, i32
  }
  func.func @transform_5(%arg0: i32) -> (i32, i32, i32) {
    %c0_i32 = arith.constant 0 : i32
    %c0_i32_0 = arith.constant 0 : i32
    %c0_i32_1 = arith.constant 0 : i32
    %c0_i32_2 = arith.constant 0 : i32
    return %c0_i32, %c0_i32_0, %c0_i32_1 : i32, i32, i32
  }
  func.func @transform_6(%arg0: i32) -> (i32, i32, i32) {
    %c0_i32 = arith.constant 0 : i32
    %c0_i32_0 = arith.constant 0 : i32
    %c0_i32_1 = arith.constant 0 : i32
    %c0_i32_2 = arith.constant 0 : i32
    return %c0_i32, %c0_i32_0, %c0_i32_1 : i32, i32, i32
  }
  func.func @transform_7(%arg0: i32) -> (i32, i32, i32) {
    %c0_i32 = arith.constant 0 : i32
    %c0_i32_0 = arith.constant 0 : i32
    %c0_i32_1 = arith.constant 0 : i32
    %c0_i32_2 = arith.constant 0 : i32
    return %c0_i32, %c0_i32_0, %c0_i32_1 : i32, i32, i32
  }
  func.func @transform_8(%arg0: i32) -> (i32, i32, i32) {
    %c0_i32 = arith.constant 0 : i32
    %c0_i32_0 = arith.constant 0 : i32
    %c0_i32_1 = arith.constant 0 : i32
    %c0_i32_2 = arith.constant 0 : i32
    return %c0_i32, %c0_i32_0, %c0_i32_1 : i32, i32, i32
  }
  func.func @transform_9(%arg0: i32) -> (i32, i32) {
    %c0_i32 = arith.constant 0 : i32
    %c0_i32_0 = arith.constant 0 : i32
    %c0_i32_1 = arith.constant 0 : i32
    return %c0_i32, %c0_i32_0 : i32, i32
  }
  func.func @transform_10(%arg0: i32) -> (i32, i32, i32) {
    %c0_i32 = arith.constant 0 : i32
    %c0_i32_0 = arith.constant 0 : i32
    %c0_i32_1 = arith.constant 0 : i32
    %c0_i32_2 = arith.constant 0 : i32
    return %c0_i32, %c0_i32_0, %c0_i32_1 : i32, i32, i32
  }
  func.func @transform_11(%arg0: i32) -> (i32, i32, i32) {
    %c0_i32 = arith.constant 0 : i32
    %c0_i32_0 = arith.constant 0 : i32
    %c0_i32_1 = arith.constant 0 : i32
    %c0_i32_2 = arith.constant 0 : i32
    return %c0_i32, %c0_i32_0, %c0_i32_1 : i32, i32, i32
  }
  func.func @transform_12(%arg0: i32) -> (i32, i32, i32) {
    %c0_i32 = arith.constant 0 : i32
    %c0_i32_0 = arith.constant 0 : i32
    %c0_i32_1 = arith.constant 0 : i32
    %c0_i32_2 = arith.constant 0 : i32
    return %c0_i32, %c0_i32_0, %c0_i32_1 : i32, i32, i32
  }
  func.func @transform_13(%arg0: i32) -> (i32, i32) {
    %c0_i32 = arith.constant 0 : i32
    %c0_i32_0 = arith.constant 0 : i32
    %c0_i32_1 = arith.constant 0 : i32
    return %c0_i32, %c0_i32_0 : i32, i32
  }
  func.func @transform_14(%arg0: i32) -> (i32, i32, i32) {
    %c0_i32 = arith.constant 0 : i32
    %c0_i32_0 = arith.constant 0 : i32
    %c0_i32_1 = arith.constant 0 : i32
    %c0_i32_2 = arith.constant 0 : i32
    return %c0_i32, %c0_i32_0, %c0_i32_1 : i32, i32, i32
  }
  func.func @transform_15(%arg0: i32) -> (i32, i32) {
    %c0_i32 = arith.constant 0 : i32
    %c0_i32_0 = arith.constant 0 : i32
    %c0_i32_1 = arith.constant 0 : i32
    return %c0_i32, %c0_i32_0 : i32, i32
  }
  func.func @transform_16(%arg0: i32) -> (i32, i32) {
    %c0_i32 = arith.constant 0 : i32
    %c0_i32_0 = arith.constant 0 : i32
    %c0_i32_1 = arith.constant 0 : i32
    return %c0_i32, %c0_i32_0 : i32, i32
  }
  func.func @transform_17(%arg0: i32) -> (i32, i32) {
    %c0_i32 = arith.constant 0 : i32
    %c0_i32_0 = arith.constant 0 : i32
    %c0_i32_1 = arith.constant 0 : i32
    return %c0_i32, %c0_i32_0 : i32, i32
  }
  func.func @transform_18(%arg0: i32) -> (i32, i32, i32) {
    %c0_i32 = arith.constant 0 : i32
    %c0_i32_0 = arith.constant 0 : i32
    %c0_i32_1 = arith.constant 0 : i32
    return %arg0, %c0_i32, %c0_i32_0 : i32, i32, i32
  }
}

</mosaic_0001>

<bundles_post_ra>
// kernel: forward.1
= control target key start
LH: loop header
LB: loop body
LE: loop exit
PB: predicated region body
PF: predicated region fallthrough
CT: control target
= control target key end

     0   :  { %s22818_s0 = inlined_call_operand.vmem [shape: f32[2,17,32], index: 0, kind: input, shape index: {}]   ;;  %s22819_s1 = inlined_call_operand.vmem [shape: f32[2,17,32], index: 1, kind: input, shape index: {}]   ;;  %s22820_s2 = inlined_call_operand.vmem [shape: f32[1,17,32], index: 2, kind: input, shape index: {}]   ;;  %s22821_s3 = inlined_call_operand.vmem [shape: bf16[4,8,32,32], index: 3, kind: input, shape index: {}]   ;;  %s22822_s4 = inlined_call_operand.hbm [shape: bf16[4,8,32,32], index: 4, kind: input, shape index: {}]   ;;  %s22823_s5 = inlined_call_operand.hbm [shape: bf16[4,32,128], index: 5, kind: input, shape index: {}]   ;;  %s22824_s6 = inlined_call_operand.vmem [shape: bf16[4,128,32], index: 6, kind: input, shape index: {}]   ;;  %s22825_s7 = inlined_call_operand.vmem [shape: f32[4,6,32], index: 7, kind: input, shape index: {}]   ;;  %s22826_s8 = inlined_call_operand.hbm [shape: f32[4,1,128], index: 8, kind: input, shape index: {}]   ;;  %s22827_s9 = inlined_call_operand.hbm [shape: f32[2,32], index: 9, kind: input, shape index: {}]   ;;  %s22828_s10 = inlined_call_operand.vmem [shape: bf16[9,16,17], index: 10, kind: input, shape index: {}]   ;;  %s22829_s11 = inlined_call_operand.hbm [shape: bf16[9,16,16], index: 11, kind: input, shape index: {}]   ;;  %s22830_s12 = inlined_call_operand.hbm [shape: bf16[9,32,256], index: 12, kind: input, shape index: {}]   ;;  %s22831_s13 = inlined_call_operand.hbm [shape: f32[2,256], index: 13, kind: input, shape index: {}]   ;;  %s22832_s14 = inlined_call_operand.hbm [shape: bf16[9,256,128], index: 14, kind: input, shape index: {}]   ;;  %s22833_s15 = inlined_call_operand.hbm [shape: f32[2,128], index: 15, kind: input, shape index: {}]   ;;  %s22834_s16 = inlined_call_operand.hbm [shape: bf16[128,128], index: 16, kind: input, shape index: {}]   ;;  %s22835_s17 = inlined_call_operand.hbm [shape: f32[1,128], index: 17, kind: input, shape index: {}]   ;;  %s22836_s18 = inlined_call_operand.vmem [shape: f32[2,16,128], index: 18, kind: output, shape index: {}]  }
   0x1   :  { %22853 = sst [smem:[#allocation28_spill]] %s22818_s0 }
   0x2   :  { %22854 = sst [smem:[#allocation29_spill]] %s22819_s1 }
   0x3   :  { %22855 = sst [smem:[#allocation30_spill]] %s22820_s2 }
   0x4   :  { %22856 = sst [smem:[#allocation31_spill]] %s22822_s4 }
   0x5   :  { %22857 = sst [smem:[#allocation32_spill]] %s22823_s5 }
   0x6   :  { %22858 = sst [smem:[#allocation33_spill]] %s22824_s6 }
   0x7   :  { %22859 = sst [smem:[#allocation34_spill]] %s22828_s10 }
   0x8   :  { %22860 = sst [smem:[#allocation35_spill]] %s22836_s18 }
   0x9   :  { %23 = vsyncpa [#allocation3], 0 }
   0xa   :  { %24 = vsyncpa [#allocation5], 0 }
   0xb   :  { %25 = vsyncpa [#allocation8], 0 }
   0xc   :  { %26 = vsyncpa [#allocation11], 0 }
   0xd   :  { %27 = vsyncpa [#allocation14], 0 }
   0xe   :  { %28 = vsyncpa [#allocation17], 0  ;;  %s19593_s27 = smov 0  }
   0xf LB: > { %22861 = sst [smem:[#allocation25_spill]] %s19475_s27  ;;  %s19599_s28 = sadd.s32 4294967295, %s19475_s27   ;;  %s19475_s27 = sphi %s19593_s27, %s34_s27  }
  0x10   : > { %p15132_p0 = scmp.ge.s32.totalorder %s19475_s27, 1  ;;  %p453_p1 = scmp.lt.s32.totalorder %s19475_s27, 3 }
  0x11   : > { %p22845_p2 = scmp.eq.s32.totalorder %s19599_s28, 0  ;;  %s19477_s30 = smov [#allocation4]  }
  0x12   : > { %p19604_p3 = pnand %p15132_p0, %p453_p1  ;;  %s484_s0 = sshll.u32 %s19477_s30, 4  ;;  %s19608_s0 = int_to_ptr.vmem [resolvable:$true] %s484_s0 }
  0x13   : > { %s19478_s19 = smov [#allocation7]   ;;  %s19479_s21 = smov [#allocation10]  }
  0x14   : > { %s22862_s29 = scalar_select %p19604_p3, 1, 0 }
  0x15   : > { %p18152_p4 = pneg %p19604_p3  ;;  %s517_s1 = sshll.u32 %s19478_s19, 4  ;;  %s19612_s1 = int_to_ptr.vmem [resolvable:$true] %s517_s1 }
  0x16   : > { %s543_s22 = sshll.u32 %s19479_s21, 4  ;;  %s22864_s5 = sld [smem:[#allocation32_spill]]  ;;  %s19620_s22 = int_to_ptr.vmem [resolvable:$true] %s543_s22 }
  0x17   : > { %p19616_p5 = pnand %p22845_p2, %p18152_p4 }
  0x19   : > { %p19630_p7 = pneg %p19616_p5 }
  0x1c   : > { %s19137_s24 = scalar_lea.hbm %s22864_s5, 1024 }
  0x1d   : > { %p19138_p6 = scmp.ne.s32.totalorder %s22864_s5, %s19137_s24  ;;  %p19144_p10 = scmp.lt.u32.totalorder %s19137_s24, %s22864_s5 }
  0x1f   : > { %p19140_p8 = pnand %p19630_p7, %p19138_p6 }
  0x21   : > { %p19141_p9 = pneg %p19140_p8 }
  0x23   : > { %p19146_p11 = pnand %p19144_p10, %p19141_p9 }
  0x25   : > { %19149 = shalt.err (!%p19146_p11)
}
  0x26   : > { %s19150_s2 = scalar_lea.vmem %s19608_s0, 1024  ;;  %p19158_p1 = scmp.lt.s32.totalorder %s19608_s0, %s19608_s0 }
  0x27   : > { %p19151_p12 = scmp.ne.s32.totalorder %s19608_s0, %s19150_s2  ;;  %p19159_p4 = scmp.lt.s32.totalorder %s19150_s2, %s19150_s2 }
  0x29   : > { %p19153_p13 = pnand %p19151_p12, %p19630_p7  ;;  %p19160_p6 = por %p19159_p4, %p19158_p1 }
  0x2b   : > { %p19154_p0 = pneg %p19153_p13 }
  0x2d   : > { %p19161_p8 = pnand %p19160_p6, %p19154_p0 }
  0x2f   : > { %19164 = shalt.err (!%p19161_p8)
}
  0x30   : > { %s22841_s23 = smov 64   ;;  %s22843_s24 = smov 4  }
  0x31   : > { %18158 = dma.hbm_to_vmem [thread:$0]  (!%p19616_p5), %s22864_s5, 1024, %s19608_s0, [#allocation5], %s22841_s23, %s22841_s23, %s22843_s24  }
  0x32   : > { %s19165_s2 = scalar_lea.hbm %s22827_s9, 32 }
  0x33   : > { %p19166_p9 = scmp.ne.s32.totalorder %s22827_s9, %s19165_s2  ;;  %p19172_p12 = scmp.lt.u32.totalorder %s19165_s2, %s22827_s9 }
  0x35   : > { %p19168_p10 = pnand %p19166_p9, %p19630_p7 }
  0x37   : > { %p19169_p11 = pneg %p19168_p10 }
  0x39   : > { %p19174_p13 = pnand %p19172_p12, %p19169_p11 }
  0x3b   : > { %19177 = shalt.err (!%p19174_p13)
}
  0x3c   : > { %s19178_s0 = scalar_lea.vmem %s19612_s1, 32  ;;  %p19186_p6 = scmp.lt.s32.totalorder %s19612_s1, %s19612_s1 }
  0x3d   : > { %p19179_p0 = scmp.ne.s32.totalorder %s19612_s1, %s19178_s0  ;;  %p19187_p8 = scmp.lt.s32.totalorder %s19178_s0, %s19178_s0 }
  0x3f   : > { %p19181_p1 = pnand %p19179_p0, %p19630_p7  ;;  %p19188_p9 = por %p19187_p8, %p19186_p6 }
  0x41   : > { %p19182_p4 = pneg %p19181_p1 }
  0x43   : > { %p19189_p10 = pnand %p19188_p9, %p19182_p4 }
  0x45   : > { %19192 = shalt.err (!%p19189_p10)
}
  0x46   : > { %18164 = dma.hbm_to_vmem [thread:$0]  (!%p19616_p5), %s22827_s9, 32, %s19612_s1, [#allocation8]  }
  0x47   : > { %s19193_s25 = scalar_lea.hbm %s22830_s12, 4608 }
  0x48   : > { %p19194_p11 = scmp.ne.s32.totalorder %s22830_s12, %s19193_s25  ;;  %p19200_p0 = scmp.lt.u32.totalorder %s19193_s25, %s22830_s12 }
  0x4a   : > { %p19196_p12 = pnand %p19194_p11, %p19630_p7 }
  0x4c   : > { %p19197_p13 = pneg %p19196_p12 }
  0x4e   : > { %p19202_p1 = pnand %p19200_p0, %p19197_p13 }
  0x50   : > { %19205 = shalt.err (!%p19202_p1)
}
  0x51   : > { %s19206_s1 = scalar_lea.vmem %s19620_s22, 4608  ;;  %p19214_p9 = scmp.lt.s32.totalorder %s19620_s22, %s19620_s22 }
  0x52   : > { %p19207_p4 = scmp.ne.s32.totalorder %s19620_s22, %s19206_s1  ;;  %p19215_p10 = scmp.lt.s32.totalorder %s19206_s1, %s19206_s1 }
  0x54   : > { %p19209_p6 = pnand %p19207_p4, %p19630_p7  ;;  %p19216_p11 = por %p19215_p10, %p19214_p9 }
  0x56   : > { %p19210_p8 = pneg %p19209_p6 }
  0x58   : > { %p19217_p12 = pnand %p19216_p11, %p19210_p8 }
  0x5a   : > { %19220 = shalt.err (!%p19217_p12)
}
  0x5b   : > { %s19482_s0 = smov 128   ;;  %s19483_s6 = smov 8  }
  0x5c   : > { %18170 = dma.hbm_to_vmem [thread:$0]  (!%p19616_p5), %s22830_s12, 4608, %s19620_s22, [#allocation11], %s19482_s0, %s19482_s0, %s19483_s6  }
  0x5d   : > { %s19484_s27 = smov [#allocation13]   ;;  %s19485_s26 = smov [#allocation16]  }
  0x5e   : > { %s567_s25 = sshll.u32 %s19484_s27, 4  ;;  %s591_s19 = sshll.u32 %s19485_s26, 4  ;;  %s568_s25 = int_to_ptr.vmem [resolvable:$true] %s567_s25  ;;  %s19700_s19 = int_to_ptr.vmem [resolvable:$true] %s591_s19 }
  0x5f   : > { %s19221_s1 = scalar_lea.hbm %s22832_s14, 18432 }
  0x60   : > { %p19222_p13 = scmp.ne.s32.totalorder %s22832_s14, %s19221_s1  ;;  %p19228_p4 = scmp.lt.u32.totalorder %s19221_s1, %s22832_s14 }
  0x62   : > { %p19224_p0 = pnand %p19222_p13, %p19630_p7 }
  0x64   : > { %p19225_p1 = pneg %p19224_p0 }
  0x66   : > { %p19230_p6 = pnand %p19228_p4, %p19225_p1 }
  0x68   : > { %19233 = shalt.err (!%p19230_p6)
}
  0x69   : > { %s19234_s0 = scalar_lea.vmem %s568_s25, 18432  ;;  %p19242_p11 = scmp.lt.s32.totalorder %s568_s25, %s568_s25 }
  0x6a   : > { %p19235_p8 = scmp.ne.s32.totalorder %s568_s25, %s19234_s0  ;;  %p19243_p12 = scmp.lt.s32.totalorder %s19234_s0, %s19234_s0 }
  0x6c   : > { %p19237_p9 = pnand %p19235_p8, %p19630_p7  ;;  %p19244_p2 = por %p19243_p12, %p19242_p11 }
  0x6e   : > { %p19238_p10 = pneg %p19237_p9 }
  0x70   : > { %p19245_p3 = pnand %p19244_p2, %p19238_p10 }
  0x72   : > { %19248 = shalt.err (!%p19245_p3)
}
  0x73   : > { %s22866_s23 = smov 4   ;;  %s22867_s24 = smov 64  }
  0x74   : > { %18176 = dma.hbm_to_vmem [thread:$0]  (!%p19616_p5), %s22832_s14, 18432, %s568_s25, [#allocation14], %s22867_s24, %s22867_s24, %s22866_s23  }
  0x75   : > { %s19249_s21 = scalar_lea.hbm %s22834_s16, 1024 }
  0x76   : > { %p19250_p13 = scmp.ne.s32.totalorder %s22834_s16, %s19249_s21  ;;  %p19256_p0 = scmp.lt.u32.totalorder %s19249_s21, %s22834_s16 }
  0x78   : > { %p19252_p2 = pnand %p19250_p13, %p19630_p7 }
  0x7a   : > { %p19253_p3 = pneg %p19252_p2 }
  0x7c   : > { %p19258_p1 = pnand %p19256_p0, %p19253_p3 }
  0x7e   : > { %19261 = shalt.err (!%p19258_p1)
}
  0x7f   : > { %s19262_s25 = scalar_lea.vmem %s19700_s19, 1024  ;;  %p19270_p9 = scmp.lt.s32.totalorder %s19700_s19, %s19700_s19 }
  0x80   : > { %p19263_p4 = scmp.ne.s32.totalorder %s19700_s19, %s19262_s25  ;;  %p19271_p10 = scmp.lt.s32.totalorder %s19262_s25, %s19262_s25 }
  0x82   : > { %p19265_p6 = pnand %p19263_p4, %p19630_p7  ;;  %p19272_p11 = por %p19271_p10, %p19270_p9 }
  0x84   : > { %p19266_p8 = pneg %p19265_p6 }
  0x86   : > { %p19273_p12 = pnand %p19272_p11, %p19266_p8 }
  0x88   : > { %19276 = shalt.err (!%p19273_p12)
}
  0x89   : > { %18182 = dma.hbm_to_vmem [thread:$0]  (!%p19616_p5), %s22834_s16, 1024, %s19700_s19, [#allocation17], %s22867_s24, %s22867_s24, %s22866_s23  }
  0x8a   : > { %s19486_s18 = smov [#allocation2]   ;;  %s19487_s26 = smov [#allocation6]  }
  0x8b   : > { %s471_s27 = sshll.u32 %s19486_s18, 4  ;;  %s503_s21 = sshll.u32 %s19487_s26, 4  ;;  %s472_s27 = int_to_ptr.vmem [resolvable:$true] %s471_s27  ;;  %s19749_s21 = int_to_ptr.vmem [resolvable:$true] %s503_s21 }
  0x8c   : > { %s22868_s4 = sld [smem:[#allocation31_spill]] }
  0x92   : > { %s19277_s10 = scalar_lea.hbm %s22868_s4, 8192 }
  0x93   : > { %p19278_p13 = scmp.ne.s32.totalorder %s22868_s4, %s19277_s10  ;;  %p19284_p0 = scmp.lt.u32.totalorder %s19277_s10, %s22868_s4 }
  0x95   : > { %p19280_p2 = pnand %p19278_p13, %p19630_p7 }
  0x97   : > { %p19281_p3 = pneg %p19280_p2 }
  0x99   : > { %p19286_p1 = pnand %p19284_p0, %p19281_p3 }
  0x9b   : > { %19289 = shalt.err (!%p19286_p1)
}
  0x9c   : > { %s19290_s6 = scalar_lea.vmem %s472_s27, 8192  ;;  %p19298_p9 = scmp.lt.s32.totalorder %s472_s27, %s472_s27 }
  0x9d   : > { %p19291_p4 = scmp.ne.s32.totalorder %s472_s27, %s19290_s6  ;;  %p19299_p10 = scmp.lt.s32.totalorder %s19290_s6, %s19290_s6 }
  0x9f   : > { %p19293_p6 = pnand %p19291_p4, %p19630_p7  ;;  %p19300_p11 = por %p19299_p10, %p19298_p9 }
  0xa1   : > { %p19294_p8 = pneg %p19293_p6 }
  0xa3   : > { %p19301_p12 = pnand %p19300_p11, %p19294_p8 }
  0xa5   : > { %19304 = shalt.err (!%p19301_p12)
}
  0xa6   : > { %18155 = dma.hbm_to_vmem [thread:$0]  (!%p19616_p5), %s22868_s4, 8192, %s472_s27, [#allocation3], %s22867_s24, %s22867_s24, %s22866_s23  }
  0xa7   : > { %s19305_s10 = scalar_lea.hbm %s22826_s8, 64 }
  0xa8   : > { %p19306_p13 = scmp.ne.s32.totalorder %s22826_s8, %s19305_s10  ;;  %p19312_p0 = scmp.lt.u32.totalorder %s19305_s10, %s22826_s8 }
  0xaa   : > { %p19308_p2 = pnand %p19306_p13, %p19630_p7 }
  0xac   : > { %p19309_p3 = pneg %p19308_p2 }
  0xae   : > { %p19314_p1 = pnand %p19312_p0, %p19309_p3 }
  0xb0   : > { %19317 = shalt.err (!%p19314_p1)
}
  0xb1   : > { %s19318_s27 = scalar_lea.vmem %s19749_s21, 64  ;;  %p19326_p9 = scmp.lt.s32.totalorder %s19749_s21, %s19749_s21 }
  0xb2   : > { %p19319_p4 = scmp.ne.s32.totalorder %s19749_s21, %s19318_s27  ;;  %p19327_p10 = scmp.lt.s32.totalorder %s19318_s27, %s19318_s27 }
  0xb4   : > { %p19321_p6 = pnand %p19319_p4, %p19630_p7  ;;  %p19328_p11 = por %p19327_p10, %p19326_p9 }
  0xb6   : > { %p19322_p8 = pneg %p19321_p6 }
  0xb8   : > { %p19329_p12 = pnand %p19328_p11, %p19322_p8 }
  0xba   : > { %19332 = shalt.err (!%p19329_p12)
}
  0xbb   : > { %s19488_s6 = smov 16   ;;  %s19489_s18 = smov 1  }
  0xbc   : > { %18161 = dma.hbm_to_vmem [thread:$0]  (!%p19616_p5), %s22826_s8, 64, %s19749_s21, [#allocation5], %s19488_s6, %s19488_s6, %s19489_s18  }
  0xbd   : > { %s19490_s1 = smov [#allocation9]   ;;  %s19491_s22 = smov [#allocation12]  }
  0xbe   : > { %s530_s10 = sshll.u32 %s19490_s1, 4  ;;  %s557_s25 = sshll.u32 %s19491_s22, 4  ;;  %s531_s10 = int_to_ptr.vmem [resolvable:$true] %s530_s10  ;;  %s19795_s25 = int_to_ptr.vmem [resolvable:$true] %s557_s25 }
  0xbf   : > { %s19333_s27 = scalar_lea.hbm %s22829_s11, 1152 }
  0xc0   : > { %p19334_p13 = scmp.ne.s32.totalorder %s22829_s11, %s19333_s27  ;;  %p19340_p0 = scmp.lt.u32.totalorder %s19333_s27, %s22829_s11 }
  0xc2   : > { %p19336_p2 = pnand %p19334_p13, %p19630_p7 }
  0xc4   : > { %p19337_p3 = pneg %p19336_p2 }
  0xc6   : > { %p19342_p1 = pnand %p19340_p0, %p19337_p3 }
  0xc8   : > { %19345 = shalt.err (!%p19342_p1)
}
  0xc9   : > { %s19346_s6 = scalar_lea.vmem %s531_s10, 1152  ;;  %p19354_p9 = scmp.lt.s32.totalorder %s531_s10, %s531_s10 }
  0xca   : > { %p19347_p4 = scmp.ne.s32.totalorder %s531_s10, %s19346_s6  ;;  %p19355_p10 = scmp.lt.s32.totalorder %s19346_s6, %s19346_s6 }
  0xcc   : > { %p19349_p6 = pnand %p19347_p4, %p19630_p7  ;;  %p19356_p11 = por %p19355_p10, %p19354_p9 }
  0xce   : > { %p19350_p8 = pneg %p19349_p6 }
  0xd0   : > { %p19357_p12 = pnand %p19356_p11, %p19350_p8 }
  0xd2   : > { %19360 = shalt.err (!%p19357_p12)
}
  0xd3   : > { %18167 = dma.hbm_to_vmem [thread:$0]  (!%p19616_p5), %s22829_s11, 1152, %s531_s10, [#allocation8], %s22867_s24, %s22867_s24, %s22866_s23  }
  0xd4   : > { %s19361_s1 = scalar_lea.hbm %s22831_s13, 64 }
  0xd5   : > { %p19362_p13 = scmp.ne.s32.totalorder %s22831_s13, %s19361_s1  ;;  %p19368_p0 = scmp.lt.u32.totalorder %s19361_s1, %s22831_s13 }
  0xd7   : > { %p19364_p2 = pnand %p19362_p13, %p19630_p7 }
  0xd9   : > { %p19365_p3 = pneg %p19364_p2 }
  0xdb   : > { %p19370_p1 = pnand %p19368_p0, %p19365_p3 }
  0xdd   : > { %19373 = shalt.err (!%p19370_p1)
}
  0xde   : > { %s19374_s23 = scalar_lea.vmem %s19795_s25, 64  ;;  %p19382_p9 = scmp.lt.s32.totalorder %s19795_s25, %s19795_s25 }
  0xdf   : > { %p19375_p4 = scmp.ne.s32.totalorder %s19795_s25, %s19374_s23  ;;  %p19383_p10 = scmp.lt.s32.totalorder %s19374_s23, %s19374_s23 }
  0xe1   : > { %p19377_p6 = pnand %p19375_p4, %p19630_p7  ;;  %p19384_p11 = por %p19383_p10, %p19382_p9 }
  0xe3   : > { %p19378_p8 = pneg %p19377_p6 }
  0xe5   : > { %p19385_p12 = pnand %p19384_p11, %p19378_p8 }
  0xe7   : > { %19388 = shalt.err (!%p19385_p12)
}
  0xe8   : > { %18173 = dma.hbm_to_vmem [thread:$0]  (!%p19616_p5), %s22831_s13, 64, %s19795_s25, [#allocation11]  }
  0xe9   : > { %s19492_s26 = smov [#allocation15]   ;;  %s19493_s6 = smov [#allocation18]  }
  0xea   : > { %s581_s21 = sshll.u32 %s19492_s26, 4  ;;  %s605_s4 = sshll.u32 %s19493_s6, 4  ;;  %s582_s21 = int_to_ptr.vmem [resolvable:$true] %s581_s21  ;;  %s19841_s4 = int_to_ptr.vmem [resolvable:$true] %s605_s4 }
  0xeb   : > { %s19389_s2 = scalar_lea.hbm %s22833_s15, 32 }
  0xec   : > { %p19390_p13 = scmp.ne.s32.totalorder %s22833_s15, %s19389_s2  ;;  %p19396_p0 = scmp.lt.u32.totalorder %s19389_s2, %s22833_s15 }
  0xee   : > { %p19392_p2 = pnand %p19390_p13, %p19630_p7 }
  0xf0   : > { %p19393_p3 = pneg %p19392_p2 }
  0xf2   : > { %p19398_p1 = pnand %p19396_p0, %p19393_p3 }
  0xf4   : > { %19401 = shalt.err (!%p19398_p1)
}
  0xf5   : > { %s19402_s19 = scalar_lea.vmem %s582_s21, 32  ;;  %p19410_p9 = scmp.lt.s32.totalorder %s582_s21, %s582_s21 }
  0xf6   : > { %p19403_p4 = scmp.ne.s32.totalorder %s582_s21, %s19402_s19  ;;  %p19411_p10 = scmp.lt.s32.totalorder %s19402_s19, %s19402_s19 }
  0xf8   : > { %p19405_p6 = pnand %p19403_p4, %p19630_p7  ;;  %p19412_p11 = por %p19411_p10, %p19410_p9 }
  0xfa   : > { %p19406_p8 = pneg %p19405_p6 }
  0xfc   : > { %p19413_p12 = pnand %p19412_p11, %p19406_p8 }
  0xfe   : > { %19416 = shalt.err (!%p19413_p12)
}
  0xff   : > { %18179 = dma.hbm_to_vmem [thread:$0]  (!%p19616_p5), %s22833_s15, 32, %s582_s21, [#allocation14]  }
 0x100   : > { %s19417_s26 = scalar_lea.hbm %s22835_s17, 16 }
 0x101   : > { %p19418_p13 = scmp.ne.s32.totalorder %s22835_s17, %s19417_s26  ;;  %p19424_p0 = scmp.lt.u32.totalorder %s19417_s26, %s22835_s17 }
 0x103   : > { %p19420_p2 = pnand %p19418_p13, %p19630_p7 }
 0x105   : > { %p19421_p3 = pneg %p19420_p2 }
 0x107   : > { %p19426_p1 = pnand %p19424_p0, %p19421_p3 }
 0x109   : > { %19429 = shalt.err (!%p19426_p1)
}
 0x10a   : > { %s19430_s21 = scalar_lea.vmem %s19841_s4, 16  ;;  %s19437_s1 = scalar_lea.vmem %s19841_s4, 32 }
 0x10b   : > { %p19431_p4 = scmp.ne.s32.totalorder %s19841_s4, %s19430_s21  ;;  %p19438_p9 = scmp.lt.s32.totalorder %s19841_s4, %s19841_s4 }
 0x10c   : > { %p19439_p10 = scmp.lt.s32.totalorder %s19437_s1, %s19430_s21 }
 0x10d   : > { %p19433_p6 = pnand %p19431_p4, %p19630_p7 }
 0x10e   : > { %p19440_p11 = por %p19439_p10, %p19438_p9 }
 0x10f   : > { %p19434_p8 = pneg %p19433_p6 }
 0x111   : > { %p19441_p12 = pnand %p19440_p11, %p19434_p8 }
 0x113   : > { %19444 = shalt.err (!%p19441_p12)
}
 0x114   : > { %18185 = dma.hbm_to_vmem [thread:$0]  (!%p19616_p5), %s22835_s17, 16, %s19841_s4, [#allocation17]  }
 0x115   : > { %p22869_p13 = scmp.ne.s32.totalorder %s22862_s29, 0 }
 0x117   : > { %634 = sbr.rel (%p22869_p13) target bundleno = 10589 (0x295d), region = 92 }
 0x11e   : > { %p22870_p7 = scmp.eq.s32.totalorder %s19599_s28, 0 }
 0x120   : > { %19450 = dma.done.wait (%p22870_p7), [#allocation3], 8192   ;;  %p22871_p2 = pmov %p22870_p7 }
 0x122   : > { %19452 = vsyncadd (%p22871_p2), [#allocation3], 4294959104  ;;  %p22872_p3 = pmov %p22871_p2 }
 0x123   : > { %p22873_p0 = pmov %p22871_p2 }
 0x124   : > { %19454 = dma.done.wait (%p22872_p3), [#allocation5], 1088  }
 0x125   : > { %19456 = vsyncadd (%p22873_p0), [#allocation5], 4294966208  ;;  %p22874_p1 = pmov %p22873_p0 }
 0x126   : > { %p22875_p5 = pmov %p22873_p0 }
 0x127   : > { %19458 = dma.done.wait (%p22874_p1), [#allocation8], 1184  }
 0x128   : > { %19460 = vsyncadd (%p22875_p5), [#allocation8], 4294966112  ;;  %p22876_p4 = pmov %p22873_p0 }
 0x129   : > { %p22877_p6 = pmov %p22873_p0 }
 0x12a   : > { %19462 = dma.done.wait (%p22876_p4), [#allocation11], 4672  }
 0x12b   : > { %19464 = vsyncadd (%p22877_p6), [#allocation11], 4294962624  ;;  %p22878_p8 = pmov %p22873_p0 }
 0x12c   : > { %p22879_p9 = pmov %p22873_p0 }
 0x12d   : > { %19466 = dma.done.wait (%p22878_p8), [#allocation14], 18464  }
 0x12e   : > { %19468 = vsyncadd (%p22879_p9), [#allocation14], 4294948832  ;;  %p22880_p10 = pmov %p22873_p0 }
 0x12f   : > { %p22881_p11 = pmov %p22873_p0 }
 0x130   : > { %19470 = dma.done.wait (%p22880_p10), [#allocation17], 1040  }
 0x131   : > { %19472 = vsyncadd (%p22881_p11), [#allocation17], 4294966256  ;;  %p733_p12 = scmp.lt.s32.totalorder %s19599_s28, 1  ;;  %s22882_s4 = sld [smem:[#allocation28_spill]]  ;;  %vm765_vm0 = vcmask 261120   ;;  %vm772_vm1 = vcmask 253952   ;;  %v807_v47 = vlaneseq }
 0x132   : > { %s22883_s23 = sld [smem:[#allocation29_spill]]  ;;  %s22884_s6 = sld [smem:[#allocation30_spill]]  ;;  %v18237_v36 = vld [vmem:[%s22821_s3] sm:$0xff]   ;;  %v18238_v37 = vld [vmem:[%s22821_s3 + $0x10] sm:$0xff]   ;;  %v18239_v38 = vld [vmem:[%s22821_s3 + $0x8] sm:$0xff]   ;;  %vm1928_vm2 = vcmask 131072  }
 0x133   : > { %s22896_s28 = smov (!%p733_p12, %s19599_s28), 1  ;;  %16783 = vmatprep.subr.bf16.mxu0 %v18237_v36  ;;  %16791 = vmatprep.subr.bf16.mxu1 %v18238_v37  ;;  %v18240_v39 = vld [vmem:[%s22821_s3 + $0x18] sm:$0xff]   ;;  %v19989_v40 = vld [vmem:[%s22821_s3 + $0x20] sm:$0xff]   ;;  %v19994_v41 = vld [vmem:[%s22821_s3 + $0x30] sm:$0xff]   ;;  %v19998_v54 = vshrl.u32 %v807_v47, 7  ;;  %vm1921_vm3 = vcmask 138240  }
 0x134   : > { %s18107_s29 = smul.u32 24, %s22896_s28  ;;  %16784 = vmatpush3.bf16.msra.mxu0 %v18237_v36  ;;  %16792 = vmatpush3.bf16.msra.mxu1 %v18238_v37  ;;  %v18244_v36 = vld [vmem:[%s22821_s3 + $0x38] sm:$0xff]   ;;  %v18245_v37 = vld [vmem:[%s22821_s3 + $0x40] sm:$0xff]   ;;  %vm2711_vm4 = vcmask 1040384   ;;  %s22887_s20 = sld [smem:[#allocation33_spill]] }
 0x135   : > { %16785 = vmatprep.subr.bf16.mxu0 %v18239_v38  ;;  %16793 = vmatprep.subr.bf16.mxu1 %v18240_v39  ;;  %v20007_v62 = vsub.s32 0, %v19998_v54  ;;  %s22891_s30 = sld [smem:[#allocation34_spill]] }
 0x137   : > { %s19919_s25 = scalar_lea.vmem %s22882_s4, %s18107_s29  ;;  %s15980_s4 = sshll.u32 %s22896_s28, 4 }
 0x138   : > { %s19924_s24 = scalar_lea.vmem %s22883_s23, %s18107_s29  ;;  %v749_v0 = vld [vmem:[%s19919_s25] sm:$0xff]  ;;  %v751_v4 = vld [vmem:[%s19919_s25 + $0x10] sm:$0x1]  ;;  %v750_v8 = vld [vmem:[%s19919_s25 + $0x8] sm:$0xff]  ;;  %16786 = vmatpush3.bf16.msra.mxu0 %v18239_v38  ;;  %16794 = vmatpush3.bf16.msra.mxu1 %v18240_v39  ;;  %s22893_s23 = sld [smem:[#allocation35_spill]] }
 0x139   : > { %v752_v1 = vld [vmem:[%s19924_s24] sm:$0xff]  ;;  %v754_v5 = vld [vmem:[%s19924_s24 + $0x10] sm:$0x1]  ;;  %v753_v9 = vld [vmem:[%s19924_s24 + $0x8] sm:$0xff]  ;;  %v824_v30 = vsel %vm765_vm0, %v750_v8, 0.0  ;;  %v821_v32 = vsel %vm765_vm0, %v749_v0, 0.0  ;;  %16799 = vmatprep.subr.bf16.mxu0 %v19989_v40  ;;  %16807 = vmatprep.subr.bf16.mxu1 %v19994_v41 }
 0x13a   : > { %v758_v2 = vld [vmem:[%s22884_s6] sm:$0xff]  ;;  %v755_v3 = vsub.f32 %v749_v0, %v752_v1  ;;  %v760_v6 = vld [vmem:[%s22884_s6 + $0x10] sm:$0x1]  ;;  %v757_v7 = vsub.f32 %v751_v4, %v754_v5  ;;  %v759_v10 = vld [vmem:[%s22884_s6 + $0x8] sm:$0xff]  ;;  %v756_v12 = vsub.f32 %v750_v8, %v753_v9  ;;  %v827_v35 = vsel %vm772_vm1, %v751_v4, 0.0 }
 0x13b   : > { %v19127_v57 = vld [vmem:[%s19919_s25 + $0x8] sm:$0xff]  ;;  %v19128_v59 = vld [vmem:[%s19919_s25] sm:$0xff]  ;;  %v19129_v4 = vld [vmem:[%s19919_s25 + $0x10] sm:$0x1]  ;;  %v20022_v8 = vsub.s32 1, %v19998_v54 }
 0x13c   : > { %v19941_v11 = vadd.f32 %v758_v2, %v755_v3  ;;  %v19943_v13 = vadd.f32 %v760_v6, %v757_v7  ;;  %v19947_v15 = vadd.f32 %v759_v10, %v756_v12  ;;  %v764_v2 = vld [vmem:[%s22825_s7] sm:$0x3f]  ;;  %v18246_v38 = vld [vmem:[%s22821_s3 + $0x50] sm:$0xff]   ;;  %v18247_v39 = vld [vmem:[%s22821_s3 + $0x48] sm:$0xff]  }
 0x13d   : > { %v20025_v9 = vrot.slane %v764_v2, %v20007_v62 }
 0x13e   : > { %v766_v14 = vsel %vm765_vm0, %v19941_v11, 0.0  ;;  %v773_v16 = vsel %vm772_vm1, %v19943_v13, 0.0  ;;  %v769_v17 = vsel %vm765_vm0, %v19947_v15, 0.0  ;;  %s747_s10 = scalar_lea.vmem %s22893_s23, %s15980_s4 }
 0x13f   : > { %767 = vadd.xlane.f32.xlu0 %v766_v14  ;;  %774 = vadd.xlane.f32.xlu1 %v773_v16  ;;  %v20031_v14 = vld [vmem:[%s19924_s24] sm:$0xff] }
 0x140   : > { %v866_v16 = vsel %vm765_vm0, %v20031_v14, 0.0 }
 0x143   : > { %770 = vadd.xlane.f32.xlu0 %v769_v17 }
 0x1cc   : > { %v768_v18 = vpop.xlane.xlu0 %767  ;;  %v775_v20 = vpop.xlane.xlu1 %774 }
 0x1cd   : > { %v777_v19 = vmul.f32 0.03125, %v768_v18  ;;  %v779_v21 = vmul.f32 0.03125, %v775_v20  ;;  %v20037_v20 = vrot.slane %v764_v2, %v20022_v8  ;;  %v15428_v2 = vld [vmem:[%s22825_s7 + $0x10] sm:$0x3f] }
 0x1cf   : > { %v19954_v22 = vsub.f32 %v19941_v11, %v777_v19  ;;  %v19957_v23 = vsub.f32 %v19943_v13, %v779_v21 }
 0x1d0   : > { %v771_v24 = vpop.xlane.xlu0 %770 }
 0x1d1   : > { %v778_v25 = vmul.f32 0.03125, %v771_v24  ;;  %v783_v26 = vmul.f32 %v19954_v22, %v19954_v22  ;;  %v785_v27 = vmul.f32 %v19957_v23, %v19957_v23 }
 0x1d3   : > { %v19964_v28 = vsub.f32 %v19947_v15, %v778_v25  ;;  %v786_v29 = vsel %vm765_vm0, %v783_v26, 0.0  ;;  %v792_v31 = vsel %vm772_vm1, %v785_v27, 0.0  ;;  %v20043_v25 = vld [vmem:[%s19924_s24 + $0x8] sm:$0xff]  ;;  %v20048_v27 = vld [vmem:[%s19924_s24 + $0x10] sm:$0x1] }
 0x1d4   : > { %787 = vadd.xlane.f32.xlu1 %v786_v29  ;;  %v869_v26 = vsel %vm765_vm0, %v20043_v25, 0.0  ;;  %v872_v29 = vsel %vm772_vm1, %v20048_v27, 0.0 }
 0x1d5   : > { %v784_v33 = vmul.f32 %v19964_v28, %v19964_v28 }
 0x1d7   : > { %v789_v34 = vsel %vm765_vm0, %v784_v33, 0.0 }
 0x1d8   : > { %793 = vadd.xlane.f32.xlu1 %v792_v31  ;;  %790 = vadd.xlane.f32.xlu0 %v789_v34 }
 0x1dc   : > { %825 = vadd.xlane.f32.xlu1 %v824_v30  ;;  %822 = vadd.xlane.f32.xlu0 %v821_v32 }
 0x1e0   : > { %828 = vadd.xlane.f32.xlu0 %v827_v35  ;;  %v18243_v35 = vld [vmem:[%s22821_s3 + $0x28] sm:$0xff]  }
 0x261   : > { %v788_v42 = vpop.xlane.xlu1 %787 }
 0x262   : > { %v795_v43 = vmul.f32 0.03125, %v788_v42  ;;  %v18250_v42 = vld [vmem:[%s22821_s3 + $0x70] sm:$0xff]  }
 0x264   : > { %v798_v44 = vadd.f32 1e-05, %v795_v43  ;;  %v18251_v43 = vld [vmem:[%s22821_s3 + $0x68] sm:$0xff]  }
 0x265   : > { %v794_v45 = vpop.xlane.xlu1 %793  ;;  %v791_v46 = vpop.xlane.xlu0 %790 }
 0x266   : > { %18629 = vrsqrt.f32 %v798_v44  ;;  %v797_v48 = vmul.f32 0.03125, %v794_v45  ;;  %v796_v49 = vmul.f32 0.03125, %v791_v46  ;;  %v18252_v44 = vld [vmem:[%s22821_s3 + $0x78] sm:$0xff]  }
 0x268   : > { %v800_v50 = vadd.f32 1e-05, %v797_v48  ;;  %v799_v51 = vadd.f32 1e-05, %v796_v49 }
 0x269   : > { %v826_v52 = vpop.xlane.xlu1 %825  ;;  %v823_v53 = vpop.xlane.xlu0 %822 }
 0x26a   : > { %18631 = vrsqrt.f32 %v800_v50  ;;  %v831_v55 = vmul.f32 0.03125, %v826_v52  ;;  %v830_v56 = vmul.f32 0.03125, %v823_v53 }
 0x26b   : > { %18633 = vrsqrt.f32 %v799_v51 }
 0x26c   : > { %v20001_v58 = vsub.f32 %v19127_v57, %v831_v55  ;;  %v20004_v60 = vsub.f32 %v19128_v59, %v830_v56 }
 0x26d   : > { %v829_v61 = vpop.xlane.xlu0 %828 }
 0x26e   : > { %v832_v63 = vmul.f32 0.03125, %v829_v61  ;;  %v837_v0 = vmul.f32 %v20001_v58, %v20001_v58  ;;  %v836_v1 = vmul.f32 %v20004_v60, %v20004_v60 }
 0x270   : > { %v18630_v3 = vpop.eup %18629  ;;  %v20017_v5 = vsub.f32 %v19129_v4, %v832_v63  ;;  %v842_v6 = vsel %vm765_vm0, %v837_v0, 0.0  ;;  %v839_v7 = vsel %vm765_vm0, %v836_v1, 0.0 }
 0x271   : > { %843 = vadd.xlane.f32.xlu0 %v842_v6  ;;  %840 = vadd.xlane.f32.xlu1 %v839_v7  ;;  %v804_v10 = vmul.f32 %v18630_v3, %v19954_v22 }
 0x272   : > { %v838_v12 = vmul.f32 %v20017_v5, %v20017_v5 }
 0x273   : > { %v811_v22 = vmul.f32 %v20025_v9, %v804_v10 }
 0x274   : > { %v18632_v17 = vpop.eup %18631  ;;  %v845_v18 = vsel %vm772_vm1, %v838_v12, 0.0  ;;  %v20125_v12 = vrot.slane %v15428_v2, %v20007_v62 }
 0x275   : > { %v18634_v19 = vpop.eup %18633  ;;  %v806_v21 = vmul.f32 %v18632_v17, %v19957_v23  ;;  %846 = vadd.xlane.f32.xlu1 %v845_v18  ;;  %867 = vadd.xlane.f32.xlu0 %v866_v16 }
 0x276   : > { %v805_v24 = vmul.f32 %v18634_v19, %v19964_v28  ;;  %v818_v28 = vadd.f32 %v20037_v20, %v811_v22  ;;  %v20130_v19 = vrot.slane %v15428_v2, %v20022_v8 }
 0x277   : > { %v813_v30 = vmul.f32 %v20025_v9, %v806_v21 }
 0x278   : > { %v812_v23 = vmul.f32 %v20025_v9, %v805_v24 }
 0x279   : > { %v820_v31 = vadd.f32 %v20037_v20, %v813_v30  ;;  %870 = vadd.xlane.f32.xlu1 %v869_v26  ;;  %873 = vadd.xlane.f32.xlu0 %v872_v29 }
 0x27a   : > { %v819_v32 = vadd.f32 %v20037_v20, %v812_v23 }
 0x27b   : > { %v976_v33 = vpack.c.bf16 %v820_v31, %v820_v31 }
 0x27c   : > { %v975_v34 = vpack.c.bf16 %v819_v32, %v818_v28 }
 0x27e   : > { %16787 = vmatprep.mubr.msk.bf16.mxu0 %vm765_vm0, %v975_v34  ;;  %16795 = vmatprep.mubr.msk.bf16.mxu1 %vm765_vm0, %v975_v34 }
 0x27f   : > { %16788 = vmatmul.mubr.msk.bf16.vlgmr.msra.gmra.mrb[0].mxu0 %vm765_vm0, %v976_v33  ;;  %16796 = vmatmul.mubr.msk.bf16.vlgmr.msra.gmra.mrb[0].mxu1 %vm765_vm0, %v976_v33 }
 0x280   : > { %16800 = vmatpush3.bf16.msra.mxu0 %v19989_v40  ;;  %16803 = vmatprep.mubr.msk.bf16.mxu0 %vm765_vm0, %v975_v34  ;;  %v18248_v40 = vld [vmem:[%s22821_s3 + $0x58] sm:$0xff]  }
 0x281   : > { %16808 = vmatpush3.bf16.msra.mxu1 %v19994_v41  ;;  %16811 = vmatprep.mubr.msk.bf16.mxu1 %vm765_vm0, %v975_v34  ;;  %v18249_v41 = vld [vmem:[%s22821_s3 + $0x60] sm:$0xff]  }
 0x282   : > { %16801 = vmatprep.subr.bf16.mxu0 %v18243_v35  ;;  %16809 = vmatprep.subr.bf16.mxu1 %v18244_v36 }
 0x284   : > { %16802 = vmatpush3.bf16.msra.mxu0 %v18243_v35 }
 0x285   : > { %16810 = vmatpush3.bf16.msra.mxu1 %v18244_v36  ;;  %16815 = vmatprep.subr.bf16.mxu0 %v18245_v37 }
 0x286   : > { %16823 = vmatprep.subr.bf16.mxu1 %v18246_v38 }
 0x287   : > { %16804 = vmatmul.mubr.msk.bf16.vlgmr.msra.gmra.mrb[4].mxu0 %vm765_vm0, %v976_v33 }
 0x288   : > { %16812 = vmatmul.mubr.msk.bf16.vlgmr.msra.gmra.mrb[4].mxu1 %vm765_vm0, %v976_v33  ;;  %16816 = vmatpush3.bf16.msra.mxu0 %v18245_v37 }
 0x289   : > { %16819 = vmatprep.mubr.msk.bf16.mxu0 %vm765_vm0, %v975_v34  ;;  %16824 = vmatpush3.bf16.msra.mxu1 %v18246_v38 }
 0x28a   : > { %16827 = vmatprep.mubr.msk.bf16.mxu1 %vm765_vm0, %v975_v34  ;;  %16817 = vmatprep.subr.bf16.mxu0 %v18247_v39 }
 0x28b   : > { %16825 = vmatprep.subr.bf16.mxu1 %v18248_v40 }
 0x28c   : > { %16818 = vmatpush3.bf16.msra.mxu0 %v18247_v39 }
 0x28d   : > { %16826 = vmatpush3.bf16.msra.mxu1 %v18248_v40  ;;  %16831 = vmatprep.subr.bf16.mxu0 %v18249_v41 }
 0x28e   : > { %16839 = vmatprep.subr.bf16.mxu1 %v18250_v42 }
 0x28f   : > { %16820 = vmatmul.mubr.msk.bf16.vlgmr.msra.gmra.mrb[8].mxu0 %vm765_vm0, %v976_v33 }
 0x290   : > { %16828 = vmatmul.mubr.msk.bf16.vlgmr.msra.gmra.mrb[8].mxu1 %vm765_vm0, %v976_v33  ;;  %16832 = vmatpush3.bf16.msra.mxu0 %v18249_v41 }
 0x291   : > { %16835 = vmatprep.mubr.msk.bf16.mxu0 %vm765_vm0, %v975_v34  ;;  %16840 = vmatpush3.bf16.msra.mxu1 %v18250_v42 }
 0x292   : > { %16843 = vmatprep.mubr.msk.bf16.mxu1 %vm765_vm0, %v975_v34  ;;  %16833 = vmatprep.subr.bf16.mxu0 %v18251_v43 }
 0x293   : > { %16841 = vmatprep.subr.bf16.mxu1 %v18252_v44 }
 0x294   : > { %16834 = vmatpush3.bf16.msra.mxu0 %v18251_v43 }
 0x295   : > { %16842 = vmatpush3.bf16.msra.mxu1 %v18252_v44 }
 0x297   : > { %16836 = vmatmul.mubr.msk.bf16.vlgmr.msra.gmra.mrb[12].mxu0 %vm765_vm0, %v976_v33 }
 0x298   : > { %16844 = vmatmul.mubr.msk.bf16.vlgmr.msra.gmra.mrb[12].mxu1 %vm765_vm0, %v976_v33 }
 0x2fe   : > { %v841_v45 = vpop.xlane.xlu1 %840  ;;  %v844_v46 = vpop.xlane.xlu0 %843 }
 0x2ff   : > { %v848_v47 = vmul.f32 0.03125, %v841_v45  ;;  %v849_v48 = vmul.f32 0.03125, %v844_v46 }
 0x301   : > { %v851_v49 = vadd.f32 1e-05, %v848_v47  ;;  %v852_v50 = vadd.f32 1e-05, %v849_v48 }
 0x302   : > { %v847_v51 = vpop.xlane.xlu1 %846  ;;  %v868_v52 = vpop.xlane.xlu0 %867 }
 0x303   : > { %18635 = vrsqrt.f32 %v851_v49  ;;  %v850_v53 = vmul.f32 0.03125, %v847_v51  ;;  %v875_v55 = vmul.f32 0.03125, %v868_v52 }
 0x304   : > { %18637 = vrsqrt.f32 %v852_v50 }
 0x305   : > { %v853_v56 = vadd.f32 1e-05, %v850_v53  ;;  %v20106_v57 = vsub.f32 %v20031_v14, %v875_v55 }
 0x306   : > { %v871_v59 = vpop.xlane.xlu1 %870  ;;  %v874_v61 = vpop.xlane.xlu0 %873 }
 0x307   : > { %18639 = vrsqrt.f32 %v853_v56  ;;  %v876_v63 = vmul.f32 0.03125, %v871_v59  ;;  %v877_v0 = vmul.f32 0.03125, %v874_v61  ;;  %v881_v1 = vmul.f32 %v20106_v57, %v20106_v57 }
 0x309   : > { %v20114_v3 = vsub.f32 %v20043_v25, %v876_v63  ;;  %v20117_v4 = vsub.f32 %v20048_v27, %v877_v0  ;;  %v884_v6 = vsel %vm765_vm0, %v881_v1, 0.0 }
 0x30a   : > { %885 = vadd.xlane.f32.xlu1 %v884_v6 }
 0x30b   : > { %v882_v7 = vmul.f32 %v20114_v3, %v20114_v3  ;;  %v883_v10 = vmul.f32 %v20117_v4, %v20117_v4 }
 0x30d   : > { %v18636_v14 = vpop.eup %18635  ;;  %v887_v16 = vsel %vm765_vm0, %v882_v7, 0.0  ;;  %v890_v17 = vsel %vm772_vm1, %v883_v10, 0.0 }
 0x30e   : > { %v18638_v18 = vpop.eup %18637  ;;  %v857_v21 = vmul.f32 %v18636_v14, %v20004_v60  ;;  %888 = vadd.xlane.f32.xlu0 %v887_v16  ;;  %891 = vadd.xlane.f32.xlu1 %v890_v17 }
 0x30f   : > { %v858_v22 = vmul.f32 %v18638_v18, %v20001_v58 }
 0x310   : > { %v860_v24 = vmul.f32 %v857_v21, %v20025_v9  ;;  %v6259_v25 = vmul.f32 %v20125_v12, %v857_v21 }
 0x311   : > { %v18640_v26 = vpop.eup %18639  ;;  %v861_v27 = vmul.f32 %v858_v22, %v20025_v9  ;;  %v6260_v29 = vmul.f32 %v20125_v12, %v858_v22 }
 0x312   : > { %v863_v30 = vadd.f32 %v860_v24, %v20037_v20  ;;  %v6262_v23 = vadd.f32 %v6259_v25, %v20130_v19  ;;  %v20141_v31 = vmul.f32 %v18640_v26, %v20017_v5 }
 0x313   : > { %v864_v60 = vadd.f32 %v861_v27, %v20037_v20  ;;  %v6263_v58 = vadd.f32 %v6260_v29, %v20130_v19 }
 0x314   : > { %22885 = vst [vmem:[#allocation26_spill] sm:$0xff] %v20141_v31  ;;  %v862_v28 = vmul.f32 %v20141_v31, %v20025_v9 }
 0x315   : > { %v20147_v32 = vpack.c.bf16 %v864_v60, %v863_v30  ;;  %v20149_v33 = vpack.c.bf16 %v6263_v58, %v6262_v23 }
 0x316   : > { %v865_v34 = vadd.f32 %v862_v28, %v20037_v20 }
 0x317   : > { %22886 = vst [vmem:[#allocation27_spill] sm:$0xff] %v20149_v33  ;;  %18043 = vmatprep.subr.msk.bf16.mxu0 %vm765_vm0, %v20147_v32  ;;  %18045 = vmatprep.subr.msk.bf16.mxu1 %vm765_vm0, %v20147_v32  ;;  %v20158_v5 = vsel %vm765_vm0, %v20147_v32, 0 }
 0x318   : > { %v20160_v35 = vpack.c.bf16 %v865_v34, %v865_v34  ;;  %16848 = vmatpush3.bf16.xpose.msra.mxu0 %v20158_v5  ;;  %16856 = vmatpush3.bf16.xpose.msra.mxu1 %v20158_v5 }
 0x31a   : > { %18044 = vmatprep.subr.msk.bf16.mxu0 %vm765_vm0, %v20160_v35  ;;  %18046 = vmatprep.subr.msk.bf16.mxu1 %vm765_vm0, %v20160_v35  ;;  %v20170_v36 = vsel %vm765_vm0, %v20160_v35, 0 }
 0x320   : > { %16850 = vmatpush3.bf16.xpose.msra.mxu0 %v20170_v36  ;;  %16858 = vmatpush3.bf16.xpose.msra.mxu1 %v20170_v36 }
 0x321   : > { %18047 = vmatprep.subr.msk.bf16.mxu0 %vm765_vm0, %v20147_v32  ;;  %18049 = vmatprep.subr.msk.bf16.mxu1 %vm765_vm0, %v20147_v32 }
 0x352   : > { %v16789_v37 = vpop.f32.mrb[0].mxu0  ;;  %v16797_v38 = vpop.f32.mrb[0].mxu1 }
 0x353   : > { %v1033_v39 = vpop.f32.mrb[1].mxu0  ;;  %v1093_v40 = vpop.f32.mrb[1].mxu1  ;;  %v1468_v47 = vpack.c.bf16 %v16789_v37, %v16789_v37  ;;  %v1470_v48 = vpack.c.bf16 %v16797_v38, %v16797_v38  ;;  %v18254_v38 = vld [vmem:[#allocation2 + $0x10] sm:$0xff]  }
 0x354   : > { %v16790_v41 = vpop.f32.mrb[2].mxu0  ;;  %v16798_v42 = vpop.f32.mrb[2].mxu1 }
 0x355   : > { %v1036_v43 = vpop.f32.mrb[3].mxu0  ;;  %v1096_v44 = vpop.f32.mrb[3].mxu1  ;;  %v18258_v42 = vld [vmem:[#allocation2 + $0x30] sm:$0xff]  }
 0x356   : > { %v1467_v45 = vpack.c.bf16 %v1036_v43, %v1033_v39  ;;  %v1469_v46 = vpack.c.bf16 %v1096_v44, %v1093_v40  ;;  %v18255_v40 = vld [vmem:[#allocation2 + $0x8] sm:$0xff]  }
 0x358   : > { %16851 = vmatprep.mubr.msk.bf16.mxu0 %vm765_vm0, %v1467_v45  ;;  %16859 = vmatprep.mubr.msk.bf16.mxu1 %vm765_vm0, %v1469_v46 }
 0x359   : > { %16852 = vmatmul.mubr.msk.bf16.vlgmr.msra.gmra.mrb[16].mxu0 %vm765_vm0, %v1468_v47  ;;  %16860 = vmatmul.mubr.msk.bf16.vlgmr.msra.gmra.mrb[16].mxu1 %vm765_vm0, %v1470_v48 }
 0x35a   : > { %16864 = vmatpush3.bf16.xpose.msra.mxu0 %v20158_v5  ;;  %16872 = vmatpush3.bf16.xpose.msra.mxu1 %v20158_v5  ;;  %v16805_v49 = vpop.f32.mrb[4].mxu0 }
 0x35b   : > { %v16813_v50 = vpop.f32.mrb[4].mxu1  ;;  %18048 = vmatprep.subr.msk.bf16.mxu0 %vm765_vm0, %v20160_v35  ;;  %18050 = vmatprep.subr.msk.bf16.mxu1 %vm765_vm0, %v20160_v35  ;;  %v1153_v51 = vpop.f32.mrb[5].mxu0  ;;  %v1472_v18 = vpack.c.bf16 %v16805_v49, %v16805_v49 }
 0x35c   : > { %v1213_v52 = vpop.f32.mrb[5].mxu1  ;;  %v16806_v53 = vpop.f32.mrb[6].mxu0  ;;  %v1474_v21 = vpack.c.bf16 %v16813_v50, %v16813_v50 }
 0x35d   : > { %v16814_v55 = vpop.f32.mrb[6].mxu1  ;;  %v1156_v56 = vpop.f32.mrb[7].mxu0 }
 0x35e   : > { %v1471_v59 = vpack.c.bf16 %v1156_v56, %v1153_v51  ;;  %v1216_v61 = vpop.f32.mrb[7].mxu1 }
 0x35f   : > { %v1473_v63 = vpack.c.bf16 %v1216_v61, %v1213_v52 }
 0x360   : > { %16867 = vmatprep.mubr.msk.bf16.mxu0 %vm765_vm0, %v1471_v59 }
 0x361   : > { %16875 = vmatprep.mubr.msk.bf16.mxu1 %vm765_vm0, %v1473_v63 }
 0x362   : > { %16866 = vmatpush3.bf16.xpose.msra.mxu0 %v20170_v36  ;;  %16874 = vmatpush3.bf16.xpose.msra.mxu1 %v20170_v36  ;;  %v16821_v0 = vpop.f32.mrb[8].mxu0 }
 0x363   : > { %v16829_v1 = vpop.f32.mrb[8].mxu1  ;;  %18051 = vmatprep.subr.msk.bf16.mxu0 %vm765_vm0, %v20147_v32  ;;  %18053 = vmatprep.subr.msk.bf16.mxu1 %vm765_vm0, %v20147_v32  ;;  %v1273_v2 = vpop.f32.mrb[9].mxu0  ;;  %v1476_v34 = vpack.c.bf16 %v16821_v0, %v16821_v0 }
 0x364   : > { %v1333_v6 = vpop.f32.mrb[9].mxu1  ;;  %v16822_v7 = vpop.f32.mrb[10].mxu0  ;;  %v1478_v37 = vpack.c.bf16 %v16829_v1, %v16829_v1 }
 0x365   : > { %v16830_v10 = vpop.f32.mrb[10].mxu1  ;;  %v1276_v14 = vpop.f32.mrb[11].mxu0 }
 0x366   : > { %v1475_v16 = vpack.c.bf16 %v1276_v14, %v1273_v2  ;;  %v1336_v17 = vpop.f32.mrb[11].mxu1 }
 0x367   : > { %v1477_v22 = vpack.c.bf16 %v1336_v17, %v1333_v6  ;;  %v18259_v17 = vld [vmem:[#allocation2 + $0x28] sm:$0xff]  }
 0x369   : > { %16868 = vmatmul.mubr.msk.bf16.vlgmr.msra.gmra.mrb[20].mxu0 %vm765_vm0, %v1472_v18  ;;  %16876 = vmatmul.mubr.msk.bf16.vlgmr.msra.gmra.mrb[20].mxu1 %vm765_vm0, %v1474_v21  ;;  %v18260_v18 = vld [vmem:[#allocation2 + $0x38] sm:$0xff]   ;;  %v18263_v21 = vld [vmem:[#allocation2 + $0x48] sm:$0xff]  }
 0x36a   : > { %16880 = vmatpush3.bf16.xpose.msra.mxu0 %v20158_v5  ;;  %16883 = vmatprep.mubr.msk.bf16.mxu0 %vm765_vm0, %v1475_v16  ;;  %v16837_v24 = vpop.f32.mrb[12].mxu0 }
 0x36b   : > { %16888 = vmatpush3.bf16.xpose.msra.mxu1 %v20158_v5  ;;  %16891 = vmatprep.mubr.msk.bf16.mxu1 %vm765_vm0, %v1477_v22  ;;  %v16845_v25 = vpop.f32.mrb[12].mxu1  ;;  %v1393_v26 = vpop.f32.mrb[13].mxu0  ;;  %v1480_v39 = vpack.c.bf16 %v16837_v24, %v16837_v24  ;;  %v18264_v22 = vld [vmem:[#allocation2 + $0x58] sm:$0xff]   ;;  %v18265_v24 = vld [vmem:[#allocation2 + $0x60] sm:$0xff]  }
 0x36c   : > { %18052 = vmatprep.subr.msk.bf16.mxu0 %vm765_vm0, %v20160_v35  ;;  %18054 = vmatprep.subr.msk.bf16.mxu1 %vm765_vm0, %v20160_v35  ;;  %v1453_v27 = vpop.f32.mrb[13].mxu1  ;;  %v16838_v29 = vpop.f32.mrb[14].mxu0  ;;  %v1482_v41 = vpack.c.bf16 %v16845_v25, %v16845_v25  ;;  %v18266_v25 = vld [vmem:[#allocation2 + $0x70] sm:$0xff]  }
 0x36d   : > { %v16846_v30 = vpop.f32.mrb[14].mxu1  ;;  %v1396_v23 = vpop.f32.mrb[15].mxu0 }
 0x36e   : > { %v1479_v60 = vpack.c.bf16 %v1396_v23, %v1393_v26  ;;  %v1456_v58 = vpop.f32.mrb[15].mxu1  ;;  %v18267_v26 = vld [vmem:[#allocation2 + $0x68] sm:$0xff]  }
 0x36f   : > { %v1481_v28 = vpack.c.bf16 %v1456_v58, %v1453_v27  ;;  %v18268_v27 = vld [vmem:[#allocation2 + $0x78] sm:$0xff]  }
 0x372   : > { %16882 = vmatpush3.bf16.xpose.msra.mxu0 %v20170_v36 }
 0x373   : > { %16890 = vmatpush3.bf16.xpose.msra.mxu1 %v20170_v36  ;;  %18055 = vmatprep.subr.msk.bf16.mxu0 %vm765_vm0, %v20147_v32 }
 0x374   : > { %18057 = vmatprep.subr.msk.bf16.mxu1 %vm765_vm0, %v20147_v32  ;;  %v18253_v32 = vld [vmem:[#allocation2] sm:$0xff]  }
 0x379   : > { %16884 = vmatmul.mubr.msk.bf16.vlgmr.msra.gmra.mrb[24].mxu0 %vm765_vm0, %v1476_v34 }
 0x37a   : > { %16892 = vmatmul.mubr.msk.bf16.vlgmr.msra.gmra.mrb[24].mxu1 %vm765_vm0, %v1478_v37  ;;  %16896 = vmatpush3.bf16.xpose.msra.mxu0 %v20158_v5 }
 0x37b   : > { %16899 = vmatprep.mubr.msk.bf16.mxu0 %vm765_vm0, %v1479_v60  ;;  %16904 = vmatpush3.bf16.xpose.msra.mxu1 %v20158_v5  ;;  %v18256_v5 = vld [vmem:[#allocation2 + $0x18] sm:$0xff]  }
 0x37c   : > { %16907 = vmatprep.mubr.msk.bf16.mxu1 %vm765_vm0, %v1481_v28  ;;  %18056 = vmatprep.subr.msk.bf16.mxu0 %vm765_vm0, %v20160_v35 }
 0x37d   : > { %18058 = vmatprep.subr.msk.bf16.mxu1 %vm765_vm0, %v20160_v35  ;;  %v18257_v35 = vld [vmem:[#allocation2 + $0x20] sm:$0xff]  }
 0x382   : > { %16898 = vmatpush3.bf16.xpose.msra.mxu0 %v20170_v36 }
 0x383   : > { %16906 = vmatpush3.bf16.xpose.msra.mxu1 %v20170_v36  ;;  %16911 = vmatprep.subr.bf16.mxu0 %v18253_v32 }
 0x384   : > { %16919 = vmatprep.subr.bf16.mxu1 %v18254_v38 }
 0x389   : > { %16900 = vmatmul.mubr.msk.bf16.vlgmr.msra.gmra.mrb[28].mxu0 %vm765_vm0, %v1480_v39 }
 0x38a   : > { %16908 = vmatmul.mubr.msk.bf16.vlgmr.msra.gmra.mrb[28].mxu1 %vm765_vm0, %v1482_v41  ;;  %16912 = vmatpush3.bf16.msra.mxu0 %v18253_v32 }
 0x38b   : > { %16920 = vmatpush3.bf16.msra.mxu1 %v18254_v38  ;;  %16913 = vmatprep.subr.bf16.mxu0 %v18255_v40 }
 0x38c   : > { %16921 = vmatprep.subr.bf16.mxu1 %v18256_v5 }
 0x38e   : > { %16914 = vmatpush3.bf16.msra.mxu0 %v18255_v40 }
 0x38f   : > { %16922 = vmatpush3.bf16.msra.mxu1 %v18256_v5  ;;  %16927 = vmatprep.subr.bf16.mxu0 %v18257_v35 }
 0x390   : > { %16935 = vmatprep.subr.bf16.mxu1 %v18258_v42 }
 0x397   : > { %v886_v36 = vpop.xlane.xlu1 %885 }
 0x398   : > { %v893_v43 = vmul.f32 0.03125, %v886_v36 }
 0x39a   : > { %v896_v44 = vadd.f32 1e-05, %v893_v43 }
 0x39b   : > { %v889_v45 = vpop.xlane.xlu0 %888  ;;  %v892_v46 = vpop.xlane.xlu1 %891 }
 0x39c   : > { %18641 = vrsqrt.f32 %v896_v44  ;;  %v894_v47 = vmul.f32 0.03125, %v889_v45  ;;  %v895_v48 = vmul.f32 0.03125, %v892_v46 }
 0x39e   : > { %v897_v49 = vadd.f32 1e-05, %v894_v47  ;;  %v898_v50 = vadd.f32 1e-05, %v895_v48 }
 0x3a0   : > { %18643 = vrsqrt.f32 %v897_v49 }
 0x3a1   : > { %18645 = vrsqrt.f32 %v898_v50 }
 0x3a6   : > { %v18642_v51 = vpop.eup %18641 }
 0x3a7   : > { %v902_v52 = vmul.f32 %v18642_v51, %v20106_v57 }
 0x3a9   : > { %v905_v53 = vmul.f32 %v902_v52, %v20025_v9  ;;  %v6253_v55 = vmul.f32 %v20125_v12, %v902_v52 }
 0x3aa   : > { %v18644_v56 = vpop.eup %18643 }
 0x3ab   : > { %v18646_v59 = vpop.eup %18645  ;;  %v903_v61 = vmul.f32 %v18644_v56, %v20114_v3  ;;  %v908_v0 = vadd.f32 %v905_v53, %v20037_v20  ;;  %v6256_v1 = vadd.f32 %v6253_v55, %v20130_v19 }
 0x3ac   : > { %v20231_v63 = vmul.f32 %v18646_v59, %v20117_v4 }
 0x3ad   : > { %v906_v2 = vmul.f32 %v903_v61, %v20025_v9  ;;  %v6254_v6 = vmul.f32 %v20125_v12, %v903_v61 }
 0x3ae   : > { %v907_v57 = vmul.f32 %v20231_v63, %v20025_v9  ;;  %v18261_v9 = vld [vmem:[#allocation2 + $0x40] sm:$0xff]  }
 0x3af   : > { %v909_v7 = vadd.f32 %v906_v2, %v20037_v20  ;;  %v6257_v10 = vadd.f32 %v6254_v6, %v20130_v19 }
 0x3b0   : > { %v910_v3 = vadd.f32 %v907_v57, %v20037_v20  ;;  %v18262_v20 = vld [vmem:[#allocation2 + $0x50] sm:$0xff]  }
 0x3b1   : > { %v979_v14 = vpack.c.bf16 %v909_v7, %v908_v0  ;;  %v20242_v4 = vpack.c.bf16 %v6257_v10, %v6256_v1 }
 0x3b2   : > { %v980_v16 = vpack.c.bf16 %v910_v3, %v910_v3 }
 0x3b3   : > { %16915 = vmatprep.mubr.msk.bf16.mxu0 %vm765_vm0, %v979_v14  ;;  %16923 = vmatprep.mubr.msk.bf16.mxu1 %vm765_vm0, %v979_v14 }
 0x3b4   : > { %16916 = vmatmul.mubr.msk.bf16.vlgmr.msra.gmra.mrb[32].mxu0 %vm765_vm0, %v980_v16  ;;  %16924 = vmatmul.mubr.msk.bf16.vlgmr.msra.gmra.mrb[32].mxu1 %vm765_vm0, %v980_v16 }
 0x3b5   : > { %16928 = vmatpush3.bf16.msra.mxu0 %v18257_v35  ;;  %16936 = vmatpush3.bf16.msra.mxu1 %v18258_v42 }
 0x3b6   : > { %16929 = vmatprep.subr.bf16.mxu0 %v18259_v17  ;;  %16937 = vmatprep.subr.bf16.mxu1 %v18260_v18 }
 0x3b7   : > { %16931 = vmatprep.mubr.msk.bf16.mxu0 %vm765_vm0, %v979_v14  ;;  %16939 = vmatprep.mubr.msk.bf16.mxu1 %vm765_vm0, %v979_v14 }
 0x3b9   : > { %16930 = vmatpush3.bf16.msra.mxu0 %v18259_v17  ;;  %16938 = vmatpush3.bf16.msra.mxu1 %v18260_v18 }
 0x3ba   : > { %16943 = vmatprep.subr.bf16.mxu0 %v18261_v9  ;;  %16951 = vmatprep.subr.bf16.mxu1 %v18262_v20 }
 0x3bc   : > { %16932 = vmatmul.mubr.msk.bf16.vlgmr.msra.gmra.mrb[36].mxu0 %vm765_vm0, %v980_v16  ;;  %16940 = vmatmul.mubr.msk.bf16.vlgmr.msra.gmra.mrb[36].mxu1 %vm765_vm0, %v980_v16 }
 0x3bd   : > { %16944 = vmatpush3.bf16.msra.mxu0 %v18261_v9  ;;  %16952 = vmatpush3.bf16.msra.mxu1 %v18262_v20 }
 0x3be   : > { %16945 = vmatprep.subr.bf16.mxu0 %v18263_v21  ;;  %16953 = vmatprep.subr.bf16.mxu1 %v18264_v22 }
 0x3bf   : > { %16947 = vmatprep.mubr.msk.bf16.mxu0 %vm765_vm0, %v979_v14  ;;  %16955 = vmatprep.mubr.msk.bf16.mxu1 %vm765_vm0, %v979_v14 }
 0x3c1   : > { %16946 = vmatpush3.bf16.msra.mxu0 %v18263_v21  ;;  %16954 = vmatpush3.bf16.msra.mxu1 %v18264_v22 }
 0x3c2   : > { %16959 = vmatprep.subr.bf16.mxu0 %v18265_v24  ;;  %16967 = vmatprep.subr.bf16.mxu1 %v18266_v25 }
 0x3c4   : > { %16948 = vmatmul.mubr.msk.bf16.vlgmr.msra.gmra.mrb[40].mxu0 %vm765_vm0, %v980_v16  ;;  %16956 = vmatmul.mubr.msk.bf16.vlgmr.msra.gmra.mrb[40].mxu1 %vm765_vm0, %v980_v16 }
 0x3c5   : > { %16960 = vmatpush3.bf16.msra.mxu0 %v18265_v24  ;;  %16968 = vmatpush3.bf16.msra.mxu1 %v18266_v25 }
 0x3c6   : > { %16961 = vmatprep.subr.bf16.mxu0 %v18267_v26  ;;  %16969 = vmatprep.subr.bf16.mxu1 %v18268_v27 }
 0x3c7   : > { %16963 = vmatprep.mubr.msk.bf16.mxu0 %vm765_vm0, %v979_v14  ;;  %16971 = vmatprep.mubr.msk.bf16.mxu1 %vm765_vm0, %v979_v14 }
 0x3c9   : > { %16962 = vmatpush3.bf16.msra.mxu0 %v18267_v26  ;;  %16970 = vmatpush3.bf16.msra.mxu1 %v18268_v27 }
 0x3cc   : > { %16964 = vmatmul.mubr.msk.bf16.vlgmr.msra.gmra.mrb[44].mxu0 %vm765_vm0, %v980_v16  ;;  %16972 = vmatmul.mubr.msk.bf16.vlgmr.msra.gmra.mrb[44].mxu1 %vm765_vm0, %v980_v16 }
 0x42c   : > { %v20260_v29 = vpop.f32.mrb[16].mxu0  ;;  %v20262_v30 = vpop.f32.mrb[16].mxu1 }
 0x42d   : > { %v20264_v23 = vpop.f32.mrb[17].mxu0  ;;  %v20266_v60 = vpop.f32.mrb[17].mxu1  ;;  %v1929_v58 = vsel %vm1928_vm2, %v20260_v29, -inf  ;;  %v1938_v28 = vsel %vm1928_vm2, %v20262_v30, -inf }
 0x42e   : > { %v16862_v34 = vpop.f32.mrb[18].mxu1  ;;  %1930 = vmax.xlane.f32.xlu0 %v1929_v58  ;;  %v16854_v37 = vpop.f32.mrb[18].mxu0  ;;  %1939 = vmax.xlane.f32.xlu1 %v1938_v28  ;;  %v1922_v40 = vsel %vm1921_vm3, %v20264_v23, -inf  ;;  %v1932_v41 = vsel %vm1921_vm3, %v20266_v60, -inf }
 0x42f   : > { %v20272_v32 = vpop.f32.mrb[19].mxu0  ;;  %v20274_v38 = vpop.f32.mrb[19].mxu1 }
 0x430   : > { %v1925_v39 = vsel %vm1921_vm3, %v20272_v32, -inf  ;;  %v1935_v5 = vsel %vm1921_vm3, %v20274_v38, -inf }
 0x432   : > { %1923 = vmax.xlane.f32.xlu0 %v1922_v40  ;;  %1926 = vmax.xlane.f32.xlu1 %v1925_v39 }
 0x436   : > { %1933 = vmax.xlane.f32.xlu0 %v1932_v41  ;;  %1936 = vmax.xlane.f32.xlu1 %v1935_v5 }
 0x43c   : > { %v20284_v35 = vpop.f32.mrb[20].mxu0  ;;  %v20286_v42 = vpop.f32.mrb[20].mxu1 }
 0x43d   : > { %v20288_v36 = vpop.f32.mrb[21].mxu0  ;;  %v20290_v43 = vpop.f32.mrb[21].mxu1  ;;  %v1947_v44 = vsel %vm1928_vm2, %v20284_v35, -inf  ;;  %v1956_v45 = vsel %vm1928_vm2, %v20286_v42, -inf }
 0x43e   : > { %v16878_v46 = vpop.f32.mrb[22].mxu1  ;;  %1948 = vmax.xlane.f32.xlu0 %v1947_v44  ;;  %v16870_v47 = vpop.f32.mrb[22].mxu0  ;;  %1957 = vmax.xlane.f32.xlu1 %v1956_v45  ;;  %v1941_v51 = vsel %vm1921_vm3, %v20288_v36, -inf  ;;  %v1950_v52 = vsel %vm1921_vm3, %v20290_v43, -inf  ;;  %v22847_v45 = vmov 0  }
 0x43f   : > { %v20296_v48 = vpop.f32.mrb[23].mxu0  ;;  %v20298_v49 = vpop.f32.mrb[23].mxu1  ;;  %v20357_v46 = vsel %vm2711_vm4, 65535, %v22847_v45  ;;  %vm19497_vm4 = vmmov 0  }
 0x440   : > { %v1944_v50 = vsel %vm1921_vm3, %v20296_v48, -inf  ;;  %v1953_v53 = vsel %vm1921_vm3, %v20298_v49, -inf }
 0x442   : > { %1942 = vmax.xlane.f32.xlu0 %v1941_v51  ;;  %1945 = vmax.xlane.f32.xlu1 %v1944_v50 }
 0x446   : > { %1951 = vmax.xlane.f32.xlu0 %v1950_v52  ;;  %1954 = vmax.xlane.f32.xlu1 %v1953_v53 }
 0x44c   : > { %v20308_v55 = vpop.f32.mrb[24].mxu0 }
 0x44d   : > { %v20310_v56 = vpop.f32.mrb[24].mxu1  ;;  %v20312_v59 = vpop.f32.mrb[25].mxu0  ;;  %v1965_v61 = vsel %vm1928_vm2, %v20308_v55, -inf }
 0x44e   : > { %v20316_v0 = vpop.f32.mrb[25].mxu1  ;;  %1966 = vmax.xlane.f32.xlu0 %v1965_v61  ;;  %v16886_v1 = vpop.f32.mrb[26].mxu0  ;;  %v1974_v2 = vsel %vm1928_vm2, %v20310_v56, -inf  ;;  %v1959_v3 = vsel %vm1921_vm3, %v20312_v59, -inf }
 0x44f   : > { %v16894_v6 = vpop.f32.mrb[26].mxu1  ;;  %1975 = vmax.xlane.f32.xlu1 %v1974_v2  ;;  %v20320_v57 = vpop.f32.mrb[27].mxu0  ;;  %v1968_v14 = vsel %vm1921_vm3, %v20316_v0, -inf }
 0x450   : > { %v20322_v7 = vpop.f32.mrb[27].mxu1  ;;  %v1962_v10 = vsel %vm1921_vm3, %v20320_v57, -inf }
 0x451   : > { %v1971_v16 = vsel %vm1921_vm3, %v20322_v7, -inf }
 0x452   : > { %1960 = vmax.xlane.f32.xlu0 %v1959_v3 }
 0x453   : > { %1963 = vmax.xlane.f32.xlu1 %v1962_v10 }
 0x456   : > { %1969 = vmax.xlane.f32.xlu0 %v1968_v14 }
 0x457   : > { %1972 = vmax.xlane.f32.xlu1 %v1971_v16 }
 0x45c   : > { %v20332_v17 = vpop.f32.mrb[28].mxu0 }
 0x45d   : > { %v20334_v18 = vpop.f32.mrb[28].mxu1  ;;  %v20336_v9 = vpop.f32.mrb[29].mxu0  ;;  %v1983_v34 = vsel %vm1928_vm2, %v20332_v17, -inf }
 0x45e   : > { %v20338_v20 = vpop.f32.mrb[29].mxu1  ;;  %v16902_v21 = vpop.f32.mrb[30].mxu0  ;;  %v1977_v22 = vsel %vm1921_vm3, %v20336_v9, -inf  ;;  %v1992_v37 = vsel %vm1928_vm2, %v20334_v18, -inf }
 0x45f   : > { %v16910_v24 = vpop.f32.mrb[30].mxu1  ;;  %1978 = vmax.xlane.f32.xlu0 %v1977_v22  ;;  %v20342_v25 = vpop.f32.mrb[31].mxu0  ;;  %v1986_v58 = vsel %vm1921_vm3, %v20338_v20, -inf }
 0x460   : > { %v20344_v26 = vpop.f32.mrb[31].mxu1  ;;  %v1980_v27 = vsel %vm1921_vm3, %v20342_v25, -inf }
 0x461   : > { %1981 = vmax.xlane.f32.xlu1 %v1980_v27  ;;  %v1989_v28 = vsel %vm1921_vm3, %v20344_v26, -inf }
 0x463   : > { %1987 = vmax.xlane.f32.xlu0 %v1986_v58 }
 0x465   : > { %1990 = vmax.xlane.f32.xlu1 %v1989_v28 }
 0x467   : > { %1984 = vmax.xlane.f32.xlu0 %v1983_v34 }
 0x469   : > { %1993 = vmax.xlane.f32.xlu1 %v1992_v37 }
 0x487   : > { %v16917_v39 = vpop.f32.mrb[32].mxu0  ;;  %v16925_v40 = vpop.f32.mrb[32].mxu1 }
 0x488   : > { %v2690_v41 = vpack.c.bf16 %v16917_v39, %v16917_v39  ;;  %v2239_v5 = vpop.f32.mrb[33].mxu0  ;;  %v2299_v44 = vpop.f32.mrb[33].mxu1  ;;  %v2692_v47 = vpack.c.bf16 %v16925_v40, %v16925_v40 }
 0x489   : > { %v16918_v50 = vpop.f32.mrb[34].mxu0  ;;  %v16926_v51 = vpop.f32.mrb[34].mxu1 }
 0x48a   : > { %v2242_v52 = vpop.f32.mrb[35].mxu0  ;;  %v2302_v53 = vpop.f32.mrb[35].mxu1  ;;  %v2715_v2 = vand.u32 %v20357_v46, %v2690_v41  ;;  %v2772_v6 = vand.u32 %v20357_v46, %v2692_v47 }
 0x48b   : > { %v2689_v61 = vpack.c.bf16 %v2242_v52, %v2239_v5  ;;  %v2691_v1 = vpack.c.bf16 %v2302_v53, %v2299_v44 }
 0x48d   : > { %16975 = vmatprep.subr.bf16.mxu0 %v2689_v61  ;;  %16983 = vmatprep.subr.bf16.mxu1 %v2691_v1 }
 0x48e   : > { %16976 = vmatpush3.bf16.msra.mxu0 %v2689_v61  ;;  %16984 = vmatpush3.bf16.msra.mxu1 %v2691_v1 }
 0x48f   : > { %v20361_v10 = vpop.f32.mrb[36].mxu0  ;;  %v20363_v3 = vpop.f32.mrb[36].mxu1  ;;  %16977 = vmatprep.subr.bf16.mxu0 %v2715_v2  ;;  %16985 = vmatprep.subr.bf16.mxu1 %v2772_v6 }
 0x490   : > { %v2359_v14 = vpop.f32.mrb[37].mxu0  ;;  %v2419_v16 = vpop.f32.mrb[37].mxu1 }
 0x491   : > { %v16934_v21 = vpop.f32.mrb[38].mxu0  ;;  %v16942_v22 = vpop.f32.mrb[38].mxu1 }
 0x492   : > { %v2362_v24 = vpop.f32.mrb[39].mxu0  ;;  %v2422_v27 = vpop.f32.mrb[39].mxu1  ;;  %16978 = vmatpush3.bf16.msra.mxu0 %v2715_v2  ;;  %16986 = vmatpush3.bf16.msra.mxu1 %v2772_v6 }
 0x493   : > { %v20365_v58 = vpack.c.bf16 %v2362_v24, %v2359_v14  ;;  %v20367_v28 = vpack.c.bf16 %v2422_v27, %v2419_v16 }
 0x495   : > { %16991 = vmatprep.subr.bf16.mxu0 %v20365_v58  ;;  %16999 = vmatprep.subr.bf16.mxu1 %v20367_v28 }
 0x497   : > { %v20371_v34 = vpop.f32.mrb[40].mxu0  ;;  %v20373_v37 = vpop.f32.mrb[40].mxu1 }
 0x498   : > { %v2479_v39 = vpop.f32.mrb[41].mxu0  ;;  %v2539_v40 = vpop.f32.mrb[41].mxu1 }
 0x499   : > { %v16950_v41 = vpop.f32.mrb[42].mxu0  ;;  %v16958_v5 = vpop.f32.mrb[42].mxu1 }
 0x49a   : > { %v2482_v44 = vpop.f32.mrb[43].mxu0  ;;  %v2542_v47 = vpop.f32.mrb[43].mxu1 }
 0x49b   : > { %v20375_v50 = vpack.c.bf16 %v2482_v44, %v2479_v39  ;;  %v20377_v51 = vpack.c.bf16 %v2542_v47, %v2539_v40 }
 0x49f   : > { %v20379_v52 = vpop.f32.mrb[44].mxu0  ;;  %v20381_v53 = vpop.f32.mrb[44].mxu1 }
 0x4a0   : > { %v2599_v61 = vpop.f32.mrb[45].mxu0  ;;  %v2659_v1 = vpop.f32.mrb[45].mxu1 }
 0x4a1   : > { %v16966_v2 = vpop.f32.mrb[46].mxu0  ;;  %v16974_v6 = vpop.f32.mrb[46].mxu1 }
 0x4a2   : > { %v2602_v14 = vpop.f32.mrb[47].mxu0  ;;  %v2662_v16 = vpop.f32.mrb[47].mxu1 }
 0x4a3   : > { %v20383_v21 = vpack.c.bf16 %v2602_v14, %v2599_v61  ;;  %v20385_v22 = vpack.c.bf16 %v2662_v16, %v2659_v1 }
 0x4bb   : > { %v1940_v24 = vpop.xlane.xlu1 %1939  ;;  %v1931_v27 = vpop.xlane.xlu0 %1930 }
 0x4bc   : > { %v2000_v39 = vsub.f32 %v20262_v30, %v1940_v24  ;;  %v1997_v40 = vsub.f32 %v20260_v29, %v1931_v27 }
 0x4be   : > { %v2029_v41 = vmul.f32 1.442695, %v2000_v39  ;;  %v2023_v5 = vmul.f32 1.442695, %v1997_v40 }
 0x4bf   : > { %v1927_v44 = vpop.xlane.xlu1 %1926  ;;  %v1924_v47 = vpop.xlane.xlu0 %1923 }
 0x4c0   : > { %18647 = vpow2.f32 %v2029_v41  ;;  %v1996_v2 = vsub.f32 %v20272_v32, %v1927_v44  ;;  %v1995_v6 = vsub.f32 %v20264_v23, %v1924_v47 }
 0x4c1   : > { %18649 = vpow2.f32 %v2023_v5 }
 0x4c2   : > { %v2021_v61 = vmul.f32 1.442695, %v1996_v2  ;;  %v2019_v14 = vmul.f32 1.442695, %v1995_v6 }
 0x4c3   : > { %v1937_v1 = vpop.xlane.xlu1 %1936  ;;  %v1934_v16 = vpop.xlane.xlu0 %1933 }
 0x4c4   : > { %18651 = vpow2.f32 %v2021_v61  ;;  %v1999_v45 = vsub.f32 %v20274_v38, %v1937_v1  ;;  %v1998_v30 = vsub.f32 %v20266_v60, %v1934_v16 }
 0x4c5   : > { %18653 = vpow2.f32 %v2019_v14 }
 0x4c6   : > { %v2027_v29 = vmul.f32 1.442695, %v1999_v45  ;;  %v2025_v24 = vmul.f32 1.442695, %v1998_v30 }
 0x4c8   : > { %18655 = vpow2.f32 %v2027_v29 }
 0x4c9   : > { %18657 = vpow2.f32 %v2025_v24 }
 0x4ca   : > { %v20393_v27 = vpop.eup %18647 }
 0x4cb   : > { %v20395_v32 = vpop.eup %18649  ;;  %v1958_v23 = vpop.xlane.xlu1 %1957  ;;  %v2082_v40 = vsel %vm1928_vm2, %v20393_v27, 0.0 }
 0x4cc   : > { %v1949_v39 = vpop.xlane.xlu0 %1948  ;;  %v2006_v41 = vsub.f32 %v20286_v42, %v1958_v23  ;;  %2083 = vadd.xlane.f32.xlu1 %v2082_v40  ;;  %v2073_v60 = vsel %vm1928_vm2, %v20395_v32, 0.0 }
 0x4cd   : > { %v2003_v38 = vsub.f32 %v20284_v35, %v1949_v39  ;;  %2074 = vadd.xlane.f32.xlu0 %v2073_v60 }
 0x4ce   : > { %v20403_v45 = vpop.eup %18651  ;;  %v2041_v5 = vmul.f32 1.442695, %v2006_v41 }
 0x4cf   : > { %v2035_v44 = vmul.f32 1.442695, %v2003_v38  ;;  %v20405_v47 = vpop.eup %18653  ;;  %v1946_v2 = vpop.xlane.xlu1 %1945  ;;  %v2070_v61 = vsel %vm1921_vm3, %v20403_v45, 0.0 }
 0x4d0   : > { %v1943_v6 = vpop.xlane.xlu0 %1942  ;;  %18659 = vpow2.f32 %v2041_v5  ;;  %v2002_v42 = vsub.f32 %v20296_v48, %v1946_v2  ;;  %2071 = vadd.xlane.f32.xlu1 %v2070_v61  ;;  %v2067_v14 = vsel %vm1921_vm3, %v20405_v47, 0.0 }
 0x4d1   : > { %v2001_v35 = vsub.f32 %v20288_v36, %v1943_v6  ;;  %18661 = vpow2.f32 %v2035_v44  ;;  %2068 = vadd.xlane.f32.xlu0 %v2067_v14 }
 0x4d2   : > { %v20413_v1 = vpop.eup %18655  ;;  %v2033_v16 = vmul.f32 1.442695, %v2002_v42 }
 0x4d3   : > { %v2031_v30 = vmul.f32 1.442695, %v2001_v35  ;;  %v20415_v29 = vpop.eup %18657  ;;  %v1955_v24 = vpop.xlane.xlu1 %1954  ;;  %v2079_v39 = vsel %vm1921_vm3, %v20413_v1, 0.0 }
 0x4d4   : > { %v1952_v23 = vpop.xlane.xlu0 %1951  ;;  %18663 = vpow2.f32 %v2033_v16  ;;  %v2005_v36 = vsub.f32 %v20298_v49, %v1955_v24  ;;  %2080 = vadd.xlane.f32.xlu1 %v2079_v39  ;;  %v2076_v40 = vsel %vm1921_vm3, %v20415_v29, 0.0 }
 0x4d5   : > { %v2004_v48 = vsub.f32 %v20290_v43, %v1952_v23  ;;  %18665 = vpow2.f32 %v2031_v30  ;;  %2077 = vadd.xlane.f32.xlu0 %v2076_v40 }
 0x4d6   : > { %v2039_v41 = vmul.f32 1.442695, %v2005_v36 }
 0x4d7   : > { %v2037_v38 = vmul.f32 1.442695, %v2004_v48 }
 0x4d8   : > { %18667 = vpow2.f32 %v2039_v41 }
 0x4d9   : > { %18669 = vpow2.f32 %v2037_v38 }
 0x4da   : > { %v20423_v60 = vpop.eup %18659 }
 0x4db   : > { %v20425_v5 = vpop.eup %18661  ;;  %v1967_v44 = vpop.xlane.xlu0 %1966  ;;  %v2100_v49 = vsel %vm1928_vm2, %v20423_v60, 0.0 }
 0x4dc   : > { %v1976_v2 = vpop.xlane.xlu1 %1975  ;;  %v2009_v43 = vsub.f32 %v20308_v55, %v1967_v44  ;;  %2101 = vadd.xlane.f32.xlu1 %v2100_v49  ;;  %v2091_v6 = vsel %vm1928_vm2, %v20425_v5, 0.0 }
 0x4dd   : > { %v2012_v61 = vsub.f32 %v20310_v56, %v1976_v2  ;;  %2092 = vadd.xlane.f32.xlu0 %v2091_v6 }
 0x4de   : > { %v20433_v42 = vpop.eup %18663  ;;  %v2047_v35 = vmul.f32 1.442695, %v2009_v43 }
 0x4df   : > { %v20435_v14 = vpop.eup %18665  ;;  %v2053_v16 = vmul.f32 1.442695, %v2012_v61  ;;  %v1961_v30 = vpop.xlane.xlu0 %1960  ;;  %v2088_v24 = vsel %vm1921_vm3, %v20433_v42, 0.0 }
 0x4e0   : > { %18671 = vpow2.f32 %v2047_v35  ;;  %v1964_v23 = vpop.xlane.xlu1 %1963  ;;  %v2007_v55 = vsub.f32 %v20312_v59, %v1961_v30  ;;  %2089 = vadd.xlane.f32.xlu1 %v2088_v24  ;;  %v2085_v39 = vsel %vm1921_vm3, %v20435_v14, 0.0 }
 0x4e1   : > { %18673 = vpow2.f32 %v2053_v16  ;;  %v2008_v56 = vsub.f32 %v20320_v57, %v1964_v23  ;;  %2086 = vadd.xlane.f32.xlu0 %v2085_v39 }
 0x4e2   : > { %v20443_v36 = vpop.eup %18667  ;;  %v2043_v48 = vmul.f32 1.442695, %v2007_v55 }
 0x4e3   : > { %v20445_v40 = vpop.eup %18669  ;;  %v2045_v41 = vmul.f32 1.442695, %v2008_v56  ;;  %v1970_v38 = vpop.xlane.xlu0 %1969  ;;  %v2097_v44 = vsel %vm1921_vm3, %v20443_v36, 0.0 }
 0x4e4   : > { %18675 = vpow2.f32 %v2043_v48  ;;  %v1973_v59 = vpop.xlane.xlu1 %1972  ;;  %v2010_v49 = vsub.f32 %v20316_v0, %v1970_v38  ;;  %2098 = vadd.xlane.f32.xlu1 %v2097_v44  ;;  %v2094_v2 = vsel %vm1921_vm3, %v20445_v40, 0.0 }
 0x4e5   : > { %18677 = vpow2.f32 %v2045_v41  ;;  %v2011_v57 = vsub.f32 %v20322_v7, %v1973_v59  ;;  %2095 = vadd.xlane.f32.xlu0 %v2094_v2 }
 0x4e6   : > { %v2049_v43 = vmul.f32 1.442695, %v2010_v49 }
 0x4e7   : > { %v2051_v6 = vmul.f32 1.442695, %v2011_v57 }
 0x4e8   : > { %18679 = vpow2.f32 %v2049_v43 }
 0x4e9   : > { %18681 = vpow2.f32 %v2051_v6 }
 0x4ea   : > { %v20453_v61 = vpop.eup %18671 }
 0x4eb   : > { %v20455_v35 = vpop.eup %18673  ;;  %v2109_v16 = vsel %vm1928_vm2, %v20453_v61, 0.0 }
 0x4ec   : > { %v2118_v0 = vsel %vm1928_vm2, %v20455_v35, 0.0  ;;  %2110 = vadd.xlane.f32.xlu0 %v2109_v16  ;;  %v1979_v30 = vpop.xlane.xlu0 %1978 }
 0x4ed   : > { %2119 = vadd.xlane.f32.xlu1 %v2118_v0  ;;  %v2013_v7 = vsub.f32 %v20336_v9, %v1979_v30 }
 0x4ee   : > { %v20462_v24 = vpop.eup %18675  ;;  %v1982_v23 = vpop.xlane.xlu1 %1981 }
 0x4ef   : > { %v20464_v55 = vpop.eup %18677  ;;  %v2055_v39 = vmul.f32 1.442695, %v2013_v7  ;;  %v2014_v56 = vsub.f32 %v20342_v25, %v1982_v23  ;;  %v2103_v48 = vsel %vm1921_vm3, %v20462_v24, 0.0 }
 0x4f0   : > { %v2106_v41 = vsel %vm1921_vm3, %v20464_v55, 0.0  ;;  %2104 = vadd.xlane.f32.xlu0 %v2103_v48  ;;  %v1988_v38 = vpop.xlane.xlu0 %1987 }
 0x4f1   : > { %18683 = vpow2.f32 %v2055_v39  ;;  %v2057_v44 = vmul.f32 1.442695, %v2014_v56  ;;  %2107 = vadd.xlane.f32.xlu1 %v2106_v41  ;;  %v2016_v9 = vsub.f32 %v20338_v20, %v1988_v38 }
 0x4f2   : > { %v20472_v59 = vpop.eup %18679  ;;  %v1991_v49 = vpop.xlane.xlu1 %1990 }
 0x4f3   : > { %v20474_v2 = vpop.eup %18681  ;;  %18685 = vpow2.f32 %v2057_v44  ;;  %v2061_v25 = vmul.f32 1.442695, %v2016_v9  ;;  %v2017_v57 = vsub.f32 %v20344_v26, %v1991_v49  ;;  %v2112_v43 = vsel %vm1921_vm3, %v20472_v59, 0.0 }
 0x4f4   : > { %v2115_v6 = vsel %vm1921_vm3, %v20474_v2, 0.0  ;;  %2113 = vadd.xlane.f32.xlu0 %v2112_v43  ;;  %v1985_v16 = vpop.xlane.xlu0 %1984 }
 0x4f5   : > { %18687 = vpow2.f32 %v2061_v25  ;;  %v2063_v0 = vmul.f32 1.442695, %v2017_v57  ;;  %2116 = vadd.xlane.f32.xlu1 %v2115_v6  ;;  %v2015_v20 = vsub.f32 %v20332_v17, %v1985_v16 }
 0x4f6   : > { %v1994_v30 = vpop.xlane.xlu1 %1993 }
 0x4f7   : > { %18689 = vpow2.f32 %v2063_v0  ;;  %v2059_v7 = vmul.f32 1.442695, %v2015_v20  ;;  %v2018_v23 = vsub.f32 %v20334_v18, %v1994_v30 }
 0x4f9   : > { %18691 = vpow2.f32 %v2059_v7  ;;  %v2065_v26 = vmul.f32 1.442695, %v2018_v23 }
 0x4fb   : > { %v20483_v39 = vpop.eup %18683  ;;  %18693 = vpow2.f32 %v2065_v26 }
 0x4fc   : > { %v2121_v56 = vsel %vm1921_vm3, %v20483_v39, 0.0 }
 0x4fd   : > { %v20487_v48 = vpop.eup %18685  ;;  %2122 = vadd.xlane.f32.xlu0 %v2121_v56 }
 0x4fe   : > { %v2124_v41 = vsel %vm1921_vm3, %v20487_v48, 0.0 }
 0x4ff   : > { %v20491_v17 = vpop.eup %18687  ;;  %2125 = vadd.xlane.f32.xlu1 %v2124_v41 }
 0x500   : > { %v2130_v18 = vsel %vm1921_vm3, %v20491_v17, 0.0 }
 0x501   : > { %v20495_v38 = vpop.eup %18689  ;;  %2131 = vadd.xlane.f32.xlu0 %v2130_v18 }
 0x502   : > { %v2133_v44 = vsel %vm1921_vm3, %v20495_v38, 0.0 }
 0x503   : > { %v20499_v9 = vpop.eup %18691  ;;  %2134 = vadd.xlane.f32.xlu1 %v2133_v44 }
 0x504   : > { %v2127_v49 = vsel %vm1928_vm2, %v20499_v9, 0.0 }
 0x505   : > { %v20503_v25 = vpop.eup %18693  ;;  %2128 = vadd.xlane.f32.xlu0 %v2127_v49 }
 0x506   : > { %v2136_v57 = vsel %vm1928_vm2, %v20503_v25, 0.0 }
 0x507   : > { %2137 = vadd.xlane.f32.xlu1 %v2136_v57 }
 0x559   : > { %v2084_v43 = vpop.xlane.xlu1 %2083 }
 0x55a   : > { %v2075_v6 = vpop.xlane.xlu0 %2074 }
 0x55b   : > { %18695 = vrcp.f32 %v2075_v6  ;;  %v2694_v6 = vpack.c.bf16 %v20361_v10, %v20361_v10 }
 0x55d   : > { %v2072_v16 = vpop.xlane.xlu1 %2071  ;;  %v2829_v10 = vand.u32 %v20357_v46, %v2694_v6 }
 0x55e   : > { %18697 = vrcp.f32 %v2072_v16  ;;  %v2069_v0 = vpop.xlane.xlu0 %2068 }
 0x55f   : > { %18699 = vrcp.f32 %v2069_v0 }
 0x560   : > { %18701 = vrcp.f32 %v2084_v43 }
 0x561   : > { %v2081_v20 = vpop.xlane.xlu1 %2080 }
 0x562   : > { %18703 = vrcp.f32 %v2081_v20  ;;  %v2078_v30 = vpop.xlane.xlu0 %2077 }
 0x563   : > { %18705 = vrcp.f32 %v2078_v30 }
 0x565   : > { %v18696_v7 = vpop.eup %18695 }
 0x566   : > { %v2165_v18 = vmul.f32 %v18696_v7, %v20395_v32 }
 0x568   : > { %v18698_v23 = vpop.eup %18697  ;;  %v2674_v30 = vpack.c.bf16 %v2165_v18, %v2165_v18 }
 0x569   : > { %v18700_v26 = vpop.eup %18699  ;;  %v2102_v56 = vpop.xlane.xlu1 %2101  ;;  %v2164_v41 = vmul.f32 %v18698_v23, %v20403_v45 }
 0x56a   : > { %v18702_v44 = vpop.eup %18701  ;;  %v2093_v49 = vpop.xlane.xlu0 %2092  ;;  %v2163_v57 = vmul.f32 %v18700_v26, %v20405_v47  ;;  %v2696_v47 = vpack.c.bf16 %v20363_v3, %v20363_v3 }
 0x56b   : > { %18707 = vrcp.f32 %v2093_v49  ;;  %v2168_v31 = vmul.f32 %v18702_v44, %v20393_v27 }
 0x56c   : > { %v18704_v43 = vpop.eup %18703  ;;  %v2673_v16 = vpack.c.bf16 %v2164_v41, %v2163_v57  ;;  %v2886_v3 = vand.u32 %v20357_v46, %v2696_v47 }
 0x56d   : > { %v18706_v0 = vpop.eup %18705  ;;  %v2090_v20 = vpop.xlane.xlu1 %2089  ;;  %v2167_v33 = vmul.f32 %v18704_v43, %v20413_v1  ;;  %v2676_v7 = vpack.c.bf16 %v2168_v31, %v2168_v31 }
 0x56e   : > { %18709 = vrcp.f32 %v2090_v20  ;;  %v2087_v45 = vpop.xlane.xlu0 %2086  ;;  %16979 = vmatprep.mubr.msk.bf16.mxu0 %vm1921_vm3, %v2673_v16  ;;  %v2166_v32 = vmul.f32 %v18706_v0, %v20415_v29 }
 0x56f   : > { %18711 = vrcp.f32 %v2087_v45  ;;  %16980 = vmatmul.mubr.msk.bf16.vlgmr.msra.gmra.mrb[48].mxu0 %vm1921_vm3, %v2674_v30 }
 0x570   : > { %18713 = vrcp.f32 %v2102_v56  ;;  %16992 = vmatpush3.bf16.msra.mxu0 %v20365_v58  ;;  %v2675_v1 = vpack.c.bf16 %v2167_v33, %v2166_v32 }
 0x571   : > { %16993 = vmatprep.subr.bf16.mxu0 %v2829_v10  ;;  %v2099_v27 = vpop.xlane.xlu1 %2098 }
 0x572   : > { %18715 = vrcp.f32 %v2099_v27  ;;  %v2096_v23 = vpop.xlane.xlu0 %2095  ;;  %16987 = vmatprep.mubr.msk.bf16.mxu1 %vm1921_vm3, %v2675_v1 }
 0x573   : > { %18717 = vrcp.f32 %v2096_v23  ;;  %16988 = vmatmul.mubr.msk.bf16.vlgmr.msra.gmra.mrb[48].mxu1 %vm1921_vm3, %v2676_v7 }
 0x574   : > { %16994 = vmatpush3.bf16.msra.mxu0 %v2829_v10  ;;  %17000 = vmatpush3.bf16.msra.mxu1 %v20367_v28  ;;  %v2698_v28 = vpack.c.bf16 %v20371_v34, %v20371_v34 }
 0x575   : > { %17001 = vmatprep.subr.bf16.mxu1 %v2886_v3  ;;  %17007 = vmatprep.subr.bf16.mxu0 %v20375_v50  ;;  %v18708_v58 = vpop.eup %18707 }
 0x576   : > { %v2171_v56 = vmul.f32 %v18708_v58, %v20425_v5  ;;  %v2943_v34 = vand.u32 %v20357_v46, %v2698_v28 }
 0x578   : > { %v18710_v33 = vpop.eup %18709  ;;  %17002 = vmatpush3.bf16.msra.mxu1 %v2886_v3  ;;  %v2678_v16 = vpack.c.bf16 %v2171_v56, %v2171_v56 }
 0x579   : > { %v18712_v29 = vpop.eup %18711  ;;  %17015 = vmatprep.subr.bf16.mxu1 %v20377_v51  ;;  %v2111_v31 = vpop.xlane.xlu0 %2110  ;;  %v2170_v26 = vmul.f32 %v18710_v33, %v20433_v42 }
 0x57a   : > { %v18714_v41 = vpop.eup %18713  ;;  %v2120_v18 = vpop.xlane.xlu1 %2119  ;;  %v2169_v44 = vmul.f32 %v18712_v29, %v20435_v14  ;;  %18719 = vrcp.f32 %v2111_v31  ;;  %v2700_v14 = vpack.c.bf16 %v20373_v37, %v20373_v37 }
 0x57b   : > { %v2174_v20 = vmul.f32 %v18714_v41, %v20423_v60 }
 0x57c   : > { %v18716_v49 = vpop.eup %18715  ;;  %v2677_v57 = vpack.c.bf16 %v2170_v26, %v2169_v44  ;;  %v3000_v37 = vand.u32 %v20357_v46, %v2700_v14 }
 0x57d   : > { %v18718_v6 = vpop.eup %18717  ;;  %v2105_v43 = vpop.xlane.xlu0 %2104  ;;  %v2173_v0 = vmul.f32 %v18716_v49, %v20443_v36  ;;  %v2680_v30 = vpack.c.bf16 %v2174_v20, %v2174_v20 }
 0x57e   : > { %v2108_v42 = vpop.xlane.xlu1 %2107  ;;  %16995 = vmatprep.mubr.msk.bf16.mxu0 %vm1921_vm3, %v2677_v57  ;;  %18721 = vrcp.f32 %v2105_v43  ;;  %v2172_v5 = vmul.f32 %v18718_v6, %v20445_v40 }
 0x57f   : > { %18723 = vrcp.f32 %v2108_v42  ;;  %16996 = vmatmul.mubr.msk.bf16.vlgmr.msra.gmra.mrb[52].mxu0 %vm1921_vm3, %v2678_v16 }
 0x580   : > { %18725 = vrcp.f32 %v2120_v18  ;;  %17008 = vmatpush3.bf16.msra.mxu0 %v20375_v50  ;;  %v2679_v36 = vpack.c.bf16 %v2173_v0, %v2172_v5 }
 0x581   : > { %17009 = vmatprep.subr.bf16.mxu0 %v2943_v34  ;;  %v2114_v60 = vpop.xlane.xlu0 %2113 }
 0x582   : > { %v2117_v45 = vpop.xlane.xlu1 %2116  ;;  %17003 = vmatprep.mubr.msk.bf16.mxu1 %vm1921_vm3, %v2679_v36  ;;  %18727 = vrcp.f32 %v2114_v60 }
 0x583   : > { %18729 = vrcp.f32 %v2117_v45  ;;  %17004 = vmatmul.mubr.msk.bf16.vlgmr.msra.gmra.mrb[52].mxu1 %vm1921_vm3, %v2680_v30 }
 0x584   : > { %17010 = vmatpush3.bf16.msra.mxu0 %v2943_v34  ;;  %17016 = vmatpush3.bf16.msra.mxu1 %v20377_v51  ;;  %v18720_v50 = vpop.eup %18719  ;;  %v2702_v51 = vpack.c.bf16 %v20379_v52, %v20379_v52 }
 0x585   : > { %17017 = vmatprep.subr.bf16.mxu1 %v3000_v37  ;;  %17023 = vmatprep.subr.bf16.mxu0 %v20383_v21  ;;  %v2177_v10 = vmul.f32 %v18720_v50, %v20453_v61 }
 0x586   : > { %v3057_v52 = vand.u32 %v20357_v46, %v2702_v51 }
 0x587   : > { %v2682_v29 = vpack.c.bf16 %v2177_v10, %v2177_v10 }
 0x588   : > { %v18722_v40 = vpop.eup %18721  ;;  %17018 = vmatpush3.bf16.msra.mxu1 %v3000_v37 }
 0x589   : > { %v18724_v32 = vpop.eup %18723  ;;  %17031 = vmatprep.subr.bf16.mxu1 %v20385_v22  ;;  %v2175_v47 = vmul.f32 %v18722_v40, %v20462_v24 }
 0x58a   : > { %v18726_v1 = vpop.eup %18725  ;;  %v2123_v27 = vpop.xlane.xlu0 %2122  ;;  %v2176_v7 = vmul.f32 %v18724_v32, %v20464_v55  ;;  %v2704_v55 = vpack.c.bf16 %v20381_v53, %v20381_v53 }
 0x58b   : > { %18731 = vrcp.f32 %v2123_v27  ;;  %v2180_v24 = vmul.f32 %v18726_v1, %v20455_v35 }
 0x58c   : > { %v18728_v23 = vpop.eup %18727  ;;  %v2126_v3 = vpop.xlane.xlu1 %2125  ;;  %v2681_v58 = vpack.c.bf16 %v2176_v7, %v2175_v47  ;;  %v3114_v53 = vand.u32 %v20357_v46, %v2704_v55 }
 0x58d   : > { %v18730_v33 = vpop.eup %18729  ;;  %18733 = vrcp.f32 %v2126_v3  ;;  %v2178_v31 = vmul.f32 %v18728_v23, %v20472_v59  ;;  %v2684_v35 = vpack.c.bf16 %v2180_v24, %v2180_v24 }
 0x58e   : > { %17011 = vmatprep.mubr.msk.bf16.mxu0 %vm1921_vm3, %v2681_v58  ;;  %v2132_v61 = vpop.xlane.xlu0 %2131  ;;  %v2179_v26 = vmul.f32 %v18730_v33, %v20474_v2 }
 0x58f   : > { %17012 = vmatmul.mubr.msk.bf16.vlgmr.msra.gmra.mrb[56].mxu0 %vm1921_vm3, %v2682_v29  ;;  %18735 = vrcp.f32 %v2132_v61 }
 0x590   : > { %17024 = vmatpush3.bf16.msra.mxu0 %v20383_v21  ;;  %v2135_v56 = vpop.xlane.xlu1 %2134  ;;  %v2683_v41 = vpack.c.bf16 %v2179_v26, %v2178_v31 }
 0x591   : > { %17025 = vmatprep.subr.bf16.mxu0 %v3057_v52  ;;  %18737 = vrcp.f32 %v2135_v56 }
 0x592   : > { %17019 = vmatprep.mubr.msk.bf16.mxu1 %vm1921_vm3, %v2683_v41  ;;  %v2129_v59 = vpop.xlane.xlu0 %2128 }
 0x593   : > { %17020 = vmatmul.mubr.msk.bf16.vlgmr.msra.gmra.mrb[56].mxu1 %vm1921_vm3, %v2684_v35  ;;  %18739 = vrcp.f32 %v2129_v59 }
 0x594   : > { %17026 = vmatpush3.bf16.msra.mxu0 %v3057_v52  ;;  %17032 = vmatpush3.bf16.msra.mxu1 %v20385_v22  ;;  %v2138_v2 = vpop.xlane.xlu1 %2137 }
 0x595   : > { %v18732_v18 = vpop.eup %18731  ;;  %17033 = vmatprep.subr.bf16.mxu1 %v3114_v53  ;;  %18741 = vrcp.f32 %v2138_v2 }
 0x596   : > { %v2181_v44 = vmul.f32 %v18732_v18, %v20483_v39 }
 0x597   : > { %v18734_v21 = vpop.eup %18733 }
 0x598   : > { %17034 = vmatpush3.bf16.msra.mxu1 %v3114_v53  ;;  %v2182_v28 = vmul.f32 %v18734_v21, %v20487_v48 }
 0x599   : > { %v18736_v49 = vpop.eup %18735 }
 0x59a   : > { %v2685_v57 = vpack.c.bf16 %v2182_v28, %v2181_v44  ;;  %v2184_v43 = vmul.f32 %v18736_v49, %v20491_v17  ;;  %v20576_v28 = vsub.s32 2, %v19998_v54 }
 0x59b   : > { %v18738_v6 = vpop.eup %18737 }
 0x59c   : > { %17027 = vmatprep.mubr.msk.bf16.mxu0 %vm1921_vm3, %v2685_v57  ;;  %v2185_v16 = vmul.f32 %v18738_v6, %v20495_v38 }
 0x59d   : > { %v18740_v22 = vpop.eup %18739 }
 0x59e   : > { %v2687_v0 = vpack.c.bf16 %v2185_v16, %v2184_v43  ;;  %v2183_v20 = vmul.f32 %v18740_v22, %v20499_v9 }
 0x59f   : > { %v18742_v42 = vpop.eup %18741 }
 0x5a0   : > { %17035 = vmatprep.mubr.msk.bf16.mxu1 %vm1921_vm3, %v2687_v0  ;;  %v2686_v5 = vpack.c.bf16 %v2183_v20, %v2183_v20  ;;  %v2186_v39 = vmul.f32 %v18742_v42, %v20503_v25  ;;  %v20581_v20 = vld [vmem:[%s22825_s7] sm:$0x3f] }
 0x5a1   : > { %v3188_v42 = vrot.slane %v20581_v20, %v20576_v28 }
 0x5a2   : > { %17028 = vmatmul.mubr.msk.bf16.vlgmr.msra.gmra.mrb[60].mxu0 %vm1921_vm3, %v2686_v5  ;;  %v2688_v48 = vpack.c.bf16 %v2186_v39, %v2186_v39 }
 0x5a4   : > { %17036 = vmatmul.mubr.msk.bf16.vlgmr.msra.gmra.mrb[60].mxu1 %vm1921_vm3, %v2688_v48 }
 0x642   : > { %v16981_v14 = vpop.f32.mrb[48].mxu0 }
 0x643   : > { %v2751_v34 = vpop.f32.mrb[49].mxu0 }
 0x644   : > { %v16982_v17 = vpop.f32.mrb[50].mxu0 }
 0x645   : > { %v2754_v36 = vpop.f32.mrb[51].mxu0 }
 0x646   : > { %v16989_v38 = vpop.f32.mrb[48].mxu1 }
 0x647   : > { %v3166_v60 = vadd.f32 %v16989_v38, %v16981_v14  ;;  %v2808_v30 = vpop.f32.mrb[49].mxu1 }
 0x648   : > { %v3164_v45 = vadd.f32 %v2808_v30, %v2751_v34  ;;  %v16990_v9 = vpop.f32.mrb[50].mxu1 }
 0x649   : > { %v2811_v37 = vpop.f32.mrb[51].mxu1 }
 0x64a   : > { %v3165_v50 = vadd.f32 %v2811_v37, %v2754_v36 }
 0x652   : > { %v16997_v40 = vpop.f32.mrb[52].mxu0 }
 0x653   : > { %v2865_v32 = vpop.f32.mrb[53].mxu0 }
 0x654   : > { %v16998_v47 = vpop.f32.mrb[54].mxu0 }
 0x655   : > { %v2868_v25 = vpop.f32.mrb[55].mxu0 }
 0x656   : > { %v17005_v10 = vpop.f32.mrb[52].mxu1 }
 0x657   : > { %v3169_v1 = vadd.f32 %v17005_v10, %v16997_v40  ;;  %v2922_v27 = vpop.f32.mrb[53].mxu1 }
 0x658   : > { %v3167_v7 = vadd.f32 %v2922_v27, %v2865_v32  ;;  %v17006_v51 = vpop.f32.mrb[54].mxu1 }
 0x659   : > { %v3178_v23 = vadd.f32 %v3169_v1, %v3166_v60  ;;  %v2925_v3 = vpop.f32.mrb[55].mxu1 }
 0x65a   : > { %v3176_v58 = vadd.f32 %v3167_v7, %v3164_v45  ;;  %v3168_v33 = vadd.f32 %v2925_v3, %v2868_v25 }
 0x65c   : > { %v3177_v29 = vadd.f32 %v3168_v33, %v3165_v50 }
 0x662   : > { %v17013_v31 = vpop.f32.mrb[56].mxu0 }
 0x663   : > { %v2979_v24 = vpop.f32.mrb[57].mxu0 }
 0x664   : > { %v17014_v61 = vpop.f32.mrb[58].mxu0 }
 0x665   : > { %v2982_v26 = vpop.f32.mrb[59].mxu0 }
 0x666   : > { %v17021_v55 = vpop.f32.mrb[56].mxu1 }
 0x667   : > { %v3172_v52 = vadd.f32 %v17021_v55, %v17013_v31  ;;  %v3036_v56 = vpop.f32.mrb[57].mxu1  ;;  %v18270_v31 = vld [vmem:[#allocation4 + $0x8] sm:$0xff]  }
 0x668   : > { %v3170_v41 = vadd.f32 %v3036_v56, %v2979_v24  ;;  %v17022_v35 = vpop.f32.mrb[58].mxu1 }
 0x669   : > { %v3039_v59 = vpop.f32.mrb[59].mxu1 }
 0x66a   : > { %v3171_v53 = vadd.f32 %v3039_v59, %v2982_v26 }
 0x675   : > { %v17029_v2 = vpop.f32.mrb[60].mxu0 }
 0x676   : > { %v3093_v18 = vpop.f32.mrb[61].mxu0 }
 0x677   : > { %v17030_v21 = vpop.f32.mrb[62].mxu0  ;;  %v17037_v44 = vpop.f32.mrb[60].mxu1 }
 0x678   : > { %v3175_v49 = vadd.f32 %v17037_v44, %v17029_v2  ;;  %v3096_v57 = vpop.f32.mrb[63].mxu0  ;;  %v3150_v6 = vpop.f32.mrb[61].mxu1 }
 0x679   : > { %v3173_v43 = vadd.f32 %v3150_v6, %v3093_v18  ;;  %v17038_v16 = vpop.f32.mrb[62].mxu1  ;;  %v20612_v18 = vsub.s32 4, %v19998_v54 }
 0x67a   : > { %v3181_v22 = vadd.f32 %v3175_v49, %v3172_v52  ;;  %v3153_v0 = vpop.f32.mrb[63].mxu1 }
 0x67b   : > { %v3179_v5 = vadd.f32 %v3173_v43, %v3170_v41  ;;  %v3174_v39 = vadd.f32 %v3153_v0, %v3096_v57  ;;  %v3244_v43 = vrot.slane %v20581_v20, %v20612_v18 }
 0x67c   : > { %v3184_v48 = vadd.f32 %v3181_v22, %v3178_v23 }
 0x67d   : > { %v3182_v14 = vadd.f32 %v3179_v5, %v3176_v58  ;;  %v3180_v34 = vadd.f32 %v3174_v39, %v3171_v53  ;;  %v20607_v53 = vsub.s32 3, %v19998_v54 }
 0x67e   : > { %v3191_v17 = vadd.f32 %v3188_v42, %v3184_v48 }
 0x67f   : > { %v3189_v36 = vadd.f32 %v3188_v42, %v3182_v14  ;;  %v3183_v38 = vadd.f32 %v3180_v34, %v3177_v29  ;;  %v18269_v29 = vld [vmem:[#allocation4] sm:$0xff]   ;;  %v3237_v2 = vrot.slane %v20581_v20, %v20607_v53 }
 0x680   : > { %v20594_v37 = vadd.f32 %v3191_v17, %v19943_v13  ;;  %17039 = vmatprep.subr.bf16.mxu0 %v18269_v29  ;;  %v18271_v17 = vld [vmem:[%s22887_s20] sm:$0xff]  }
 0x681   : > { %v3190_v60 = vadd.f32 %v3188_v42, %v3183_v38  ;;  %v20586_v30 = vadd.f32 %v3189_v36, %v19941_v11  ;;  %17040 = vmatpush3.bf16.msra.mxu0 %v18269_v29  ;;  %17047 = vmatprep.subr.bf16.mxu1 %v18271_v17  ;;  %v18272_v36 = vld [vmem:[%s22887_s20 + $0x8] sm:$0xff]   ;;  %v18273_v38 = vld [vmem:[%s22887_s20 + $0x10] sm:$0xff]  }
 0x682   : > { %v3201_v40 = vsel %vm772_vm1, %v20594_v37, 0.0  ;;  %17041 = vmatprep.subr.bf16.mxu0 %v18270_v31  ;;  %17048 = vmatpush3.bf16.msra.mxu1 %v18271_v17 }
 0x683   : > { %v3195_v45 = vsel %vm765_vm0, %v20586_v30, 0.0  ;;  %v20591_v9 = vadd.f32 %v3190_v60, %v19947_v15  ;;  %17049 = vmatprep.subr.bf16.mxu1 %v18272_v36  ;;  %v18274_v60 = vld [vmem:[%s22887_s20 + $0x18] sm:$0xff]  }
 0x684   : > { %3196 = vadd.xlane.f32.xlu0 %v3195_v45  ;;  %v18275_v45 = vld [vmem:[%s22887_s20 + $0x20] sm:$0xff]  }
 0x685   : > { %v3198_v50 = vsel %vm765_vm0, %v20591_v9, 0.0  ;;  %17042 = vmatpush3.bf16.msra.mxu0 %v18270_v31 }
 0x686   : > { %3199 = vadd.xlane.f32.xlu1 %v3198_v50  ;;  %17050 = vmatpush3.bf16.msra.mxu1 %v18272_v36  ;;  %v18276_v50 = vld [vmem:[%s22887_s20 + $0x28] sm:$0xff]  }
 0x687   : > { %17051 = vmatprep.subr.bf16.mxu1 %v18273_v38 }
 0x688   : > { %3202 = vadd.xlane.f32.xlu0 %v3201_v40  ;;  %v18277_v40 = vld [vmem:[%s22887_s20 + $0x30] sm:$0xff]  }
 0x68a   : > { %17052 = vmatpush3.bf16.msra.mxu1 %v18273_v38 }
 0x68b   : > { %17053 = vmatprep.subr.bf16.mxu1 %v18274_v60 }
 0x68e   : > { %17054 = vmatpush3.bf16.msra.mxu1 %v18274_v60 }
 0x68f   : > { %17055 = vmatprep.subr.bf16.mxu1 %v18275_v45 }
 0x692   : > { %17056 = vmatpush3.bf16.msra.mxu1 %v18275_v45 }
 0x693   : > { %17057 = vmatprep.subr.bf16.mxu1 %v18276_v50 }
 0x696   : > { %17058 = vmatpush3.bf16.msra.mxu1 %v18276_v50 }
 0x697   : > { %17059 = vmatprep.subr.bf16.mxu1 %v18277_v40 }
 0x69a   : > { %17060 = vmatpush3.bf16.msra.mxu1 %v18277_v40 }
 0x711   : > { %v3197_v11 = vpop.xlane.xlu0 %3196 }
 0x712   : > { %v3204_v32 = vmul.f32 0.03125, %v3197_v11  ;;  %v18278_v11 = vld [vmem:[%s22887_s20 + $0x38] sm:$0xff]  }
 0x713   : > { %v3200_v47 = vpop.xlane.xlu1 %3199  ;;  %17061 = vmatprep.subr.bf16.mxu1 %v18278_v11 }
 0x714   : > { %v3207_v25 = vsub.f32 %v20586_v30, %v3204_v32  ;;  %v3205_v10 = vmul.f32 0.03125, %v3200_v47  ;;  %17062 = vmatpush3.bf16.msra.mxu1 %v18278_v11  ;;  %v15257_v32 = vld [vmem:[#allocation6] ss:$0 sm:$0xff] }
 0x715   : > { %v3203_v15 = vpop.xlane.xlu0 %3202 }
 0x716   : > { %v3208_v1 = vsub.f32 %v20591_v9, %v3205_v10  ;;  %v3206_v13 = vmul.f32 0.03125, %v3203_v15  ;;  %v3210_v27 = vmul.f32 %v3207_v25, %v3207_v25 }
 0x718   : > { %v3209_v7 = vsub.f32 %v20594_v37, %v3206_v13  ;;  %v3213_v51 = vsel %vm765_vm0, %v3210_v27, 0.0  ;;  %v3211_v23 = vmul.f32 %v3208_v1, %v3208_v1 }
 0x719   : > { %3214 = vadd.xlane.f32.xlu1 %v3213_v51 }
 0x71a   : > { %v3216_v3 = vsel %vm765_vm0, %v3211_v23, 0.0  ;;  %v3212_v58 = vmul.f32 %v3209_v7, %v3209_v7 }
 0x71b   : > { %3217 = vadd.xlane.f32.xlu0 %v3216_v3 }
 0x71c   : > { %v3219_v33 = vsel %vm772_vm1, %v3212_v58, 0.0 }
 0x71d   : > { %3220 = vadd.xlane.f32.xlu1 %v3219_v33 }
 0x7a6   : > { %v3215_v24 = vpop.xlane.xlu1 %3214 }
 0x7a7   : > { %v3222_v61 = vmul.f32 0.03125, %v3215_v24 }
 0x7a8   : > { %v3218_v26 = vpop.xlane.xlu0 %3217 }
 0x7a9   : > { %v3225_v55 = vadd.f32 1e-05, %v3222_v61  ;;  %v3223_v52 = vmul.f32 0.03125, %v3218_v26 }
 0x7aa   : > { %v3221_v56 = vpop.xlane.xlu1 %3220 }
 0x7ab   : > { %18743 = vrsqrt.f32 %v3225_v55  ;;  %v3226_v41 = vadd.f32 1e-05, %v3223_v52  ;;  %v3224_v35 = vmul.f32 0.03125, %v3221_v56 }
 0x7ad   : > { %18745 = vrsqrt.f32 %v3226_v41  ;;  %v3227_v59 = vadd.f32 1e-05, %v3224_v35 }
 0x7af   : > { %18747 = vrsqrt.f32 %v3227_v59 }
 0x7b5   : > { %v18744_v21 = vpop.eup %18743 }
 0x7b6   : > { %v3231_v44 = vmul.f32 %v18744_v21, %v3207_v25 }
 0x7b7   : > { %v18746_v49 = vpop.eup %18745 }
 0x7b8   : > { %v3232_v57 = vmul.f32 %v18746_v49, %v3208_v1  ;;  %v3238_v6 = vmul.f32 %v3237_v2, %v3231_v44 }
 0x7b9   : > { %v18748_v16 = vpop.eup %18747 }
 0x7ba   : > { %v3233_v22 = vmul.f32 %v18748_v16, %v3209_v7  ;;  %v3239_v0 = vmul.f32 %v3237_v2, %v3232_v57  ;;  %v3245_v42 = vadd.f32 %v3244_v43, %v3238_v6 }
 0x7bc   : > { %v3246_v5 = vadd.f32 %v3244_v43, %v3239_v0  ;;  %v3240_v39 = vmul.f32 %v3237_v2, %v3233_v22 }
 0x7be   : > { %v3252_v48 = vpack.c.bf16 %v3246_v5, %v3245_v42  ;;  %v3247_v14 = vadd.f32 %v3244_v43, %v3240_v39 }
 0x7c0   : > { %17043 = vmatprep.mubr.msk.bf16.mxu0 %vm765_vm0, %v3252_v48  ;;  %v3253_v34 = vpack.c.bf16 %v3247_v14, %v3247_v14 }
 0x7c2   : > { %17044 = vmatmul.mubr.msk.bf16.vlgmr.msra.gmra.mrb[64].mxu0 %vm765_vm0, %v3253_v34 }
 0x895   : > { %v17045_v47 = vpop.f32.mrb[64].mxu0 }
 0x896   : > { %v20642_v25 = vadd.f32 %v17045_v47, %v15257_v32  ;;  %v3313_v10 = vpop.f32.mrb[65].mxu0 }
 0x897   : > { %v20644_v15 = vadd.f32 %v15257_v32, %v3313_v10  ;;  %v17046_v1 = vpop.f32.mrb[66].mxu0 }
 0x898   : > { %v20647_v13 = vmul.f32 0.70710677, %v20642_v25  ;;  %v3316_v27 = vpop.f32.mrb[67].mxu0 }
 0x899   : > { %v20650_v7 = vmul.f32 0.70710677, %v20644_v15  ;;  %v20652_v51 = vadd.f32 %v15257_v32, %v3316_v27 }
 0x89a   : > { %vm3335_vm5 = vcmp.ge.f32.partialorder %v20647_v13, 0.0  ;;  %v3338_v23 = vsub.f32 0.0, %v20647_v13 }
 0x89b   : > { %vm3333_vm6 = vcmp.ge.f32.partialorder %v20650_v7, 0.0  ;;  %v3336_v3 = vsub.f32 0.0, %v20650_v7  ;;  %v20662_v33 = vmul.f32 0.70710677, %v20652_v51 }
 0x89c   : > { %v3341_v58 = vsel %vm3335_vm5, %v20647_v13, %v3338_v23  ;;  %v3327_v13 = vmul.f32 0.5, %v20644_v15 }
 0x89d   : > { %v3347_v29 = vmul.f32 0.3275911, %v3341_v58  ;;  %v3339_v31 = vsel %vm3333_vm6, %v20650_v7, %v3336_v3  ;;  %vm3334_vm7 = vcmp.ge.f32.partialorder %v20662_v33, 0.0  ;;  %v3337_v61 = vsub.f32 0.0, %v20662_v33 }
 0x89e   : > { %v3345_v24 = vmul.f32 0.3275911, %v3339_v31  ;;  %v3386_v35 = vsub.f32 0.0, %v3341_v58  ;;  %v3384_v59 = vsub.f32 0.0, %v3339_v31 }
 0x89f   : > { %v3350_v26 = vadd.f32 1.0, %v3347_v29  ;;  %v3340_v52 = vsel %vm3334_vm7, %v20662_v33, %v3337_v61 }
 0x8a0   : > { %v3348_v55 = vadd.f32 1.0, %v3345_v24  ;;  %v3346_v56 = vmul.f32 0.3275911, %v3340_v52  ;;  %v3389_v21 = vmul.f32 %v3386_v35, %v3341_v58  ;;  %v3385_v44 = vsub.f32 0.0, %v3340_v52 }
 0x8a1   : > { %18749 = vrcp.f32 %v3350_v26  ;;  %v3387_v6 = vmul.f32 %v3384_v59, %v3339_v31 }
 0x8a2   : > { %18751 = vrcp.f32 %v3348_v55  ;;  %v3349_v41 = vadd.f32 1.0, %v3346_v56  ;;  %v3394_v0 = vmul.f32 1.442695, %v3389_v21  ;;  %v3388_v42 = vmul.f32 %v3385_v44, %v3340_v52 }
 0x8a3   : > { %v3390_v48 = vmul.f32 1.442695, %v3387_v6  ;;  %v22851_v21 = vmov -1.0  }
 0x8a4   : > { %18753 = vrcp.f32 %v3349_v41  ;;  %v3392_v38 = vmul.f32 1.442695, %v3388_v42  ;;  %v3344_v44 = vsel %vm3335_vm5, 1.0, %v22851_v21 }
 0x8a5   : > { %18755 = vpow2.f32 %v3394_v0 }
 0x8a6   : > { %18757 = vpow2.f32 %v3390_v48  ;;  %v3328_v48 = vmul.f32 0.5, %v20652_v51 }
 0x8a7   : > { %18759 = vpow2.f32 %v3392_v38 }
 0x8ab   : > { %v18750_v2 = vpop.eup %18749 }
 0x8ac   : > { %v18752_v49 = vpop.eup %18751  ;;  %v3359_v57 = vmul.f32 1.0614054, %v18750_v2 }
 0x8ad   : > { %v3357_v43 = vmul.f32 1.0614054, %v18752_v49 }
 0x8ae   : > { %v3362_v16 = vadd.f32 -1.4531521, %v3359_v57  ;;  %v18754_v22 = vpop.eup %18753 }
 0x8af   : > { %v3360_v5 = vadd.f32 -1.4531521, %v3357_v43  ;;  %v3358_v14 = vmul.f32 1.0614054, %v18754_v22  ;;  %v18756_v24 = vpop.eup %18755 }
 0x8b0   : > { %v3365_v39 = vmul.f32 %v18750_v2, %v3362_v16  ;;  %v18758_v26 = vpop.eup %18757 }
 0x8b1   : > { %v3363_v34 = vmul.f32 %v18752_v49, %v3360_v5  ;;  %v3361_v36 = vadd.f32 -1.4531521, %v3358_v14  ;;  %v18760_v59 = vpop.eup %18759 }
 0x8b2   : > { %v3368_v17 = vadd.f32 1.4214138, %v3365_v39  ;;  %v3329_v39 = vmul.f32 0.5, %v20642_v25 }
 0x8b3   : > { %v3366_v60 = vadd.f32 1.4214138, %v3363_v34  ;;  %v3364_v50 = vmul.f32 %v18754_v22, %v3361_v36 }
 0x8b4   : > { %v3371_v45 = vmul.f32 %v18750_v2, %v3368_v17 }
 0x8b5   : > { %v3369_v40 = vmul.f32 %v18752_v49, %v3366_v60  ;;  %v3367_v32 = vadd.f32 1.4214138, %v3364_v50  ;;  %v20685_v60 = vsub.s32 5, %v19998_v54 }
 0x8b6   : > { %v3374_v11 = vadd.f32 -0.28449672, %v3371_v45 }
 0x8b7   : > { %v3372_v47 = vadd.f32 -0.28449672, %v3369_v40  ;;  %v3370_v1 = vmul.f32 %v18754_v22, %v3367_v32  ;;  %v3531_v45 = vrot.slane %v20581_v20, %v20685_v60 }
 0x8b8   : > { %v3377_v10 = vmul.f32 %v18750_v2, %v3374_v11 }
 0x8b9   : > { %v3375_v27 = vmul.f32 %v18752_v49, %v3372_v47  ;;  %v3373_v3 = vadd.f32 -0.28449672, %v3370_v1 }
 0x8ba   : > { %v3380_v23 = vadd.f32 0.2548296, %v3377_v10 }
 0x8bb   : > { %v3378_v58 = vadd.f32 0.2548296, %v3375_v27  ;;  %v3376_v31 = vmul.f32 %v18754_v22, %v3373_v3 }
 0x8bc   : > { %v3383_v29 = vmul.f32 %v18750_v2, %v3380_v23  ;;  %v3342_v2 = vsel %vm3333_vm6, 1.0, %v22851_v21 }
 0x8bd   : > { %v3381_v61 = vmul.f32 %v18752_v49, %v3378_v58  ;;  %v3379_v52 = vadd.f32 0.2548296, %v3376_v31 }
 0x8be   : > { %v3398_v55 = vmul.f32 %v18756_v24, %v3383_v29 }
 0x8bf   : > { %v3396_v56 = vmul.f32 %v18758_v26, %v3381_v61  ;;  %v3382_v35 = vmul.f32 %v18754_v22, %v3379_v52  ;;  %v3343_v22 = vsel %vm3334_vm7, 1.0, %v22851_v21 }
 0x8c0   : > { %v3401_v41 = vsub.f32 1.0, %v3398_v55 }
 0x8c1   : > { %v3399_v57 = vsub.f32 1.0, %v3396_v56  ;;  %v3397_v43 = vmul.f32 %v18760_v59, %v3382_v35  ;;  %v18280_v35 = vld [vmem:[%s22821_s3 + $0xc0] sm:$0xff]   ;;  %v18281_v59 = vld [vmem:[%s22821_s3 + $0x88] sm:$0xff]  }
 0x8c2   : > { %v3404_v6 = vmul.f32 %v3401_v41, %v3344_v44  ;;  %v18279_v41 = vld [vmem:[%s22821_s3 + $0x80] sm:$0xff]   ;;  %17099 = vmatprep.subr.bf16.mxu1 %v18280_v35  ;;  %v18282_v44 = vld [vmem:[%s22821_s3 + $0xc8] sm:$0xff]  }
 0x8c3   : > { %v3402_v49 = vmul.f32 %v3399_v57, %v3342_v2  ;;  %v3400_v16 = vsub.f32 1.0, %v3397_v43  ;;  %17067 = vmatprep.subr.bf16.mxu0 %v18279_v41  ;;  %v18283_v57 = vld [vmem:[%s22821_s3 + $0x90] sm:$0xff]  }
 0x8c4   : > { %v3407_v0 = vadd.f32 1.0, %v3404_v6  ;;  %17068 = vmatpush3.bf16.msra.mxu0 %v18279_v41  ;;  %v18284_v6 = vld [vmem:[%s22821_s3 + $0xe0] sm:$0xff]  }
 0x8c5   : > { %v3403_v42 = vmul.f32 %v3400_v16, %v3343_v22  ;;  %v3405_v5 = vadd.f32 1.0, %v3402_v49  ;;  %17069 = vmatprep.subr.bf16.mxu0 %v18281_v59 }
 0x8c6   : > { %v3410_v34 = vmul.f32 %v3407_v0, %v3329_v39 }
 0x8c7   : > { %v3406_v14 = vadd.f32 1.0, %v3403_v42  ;;  %v3408_v7 = vmul.f32 %v3405_v5, %v3327_v13  ;;  %v15270_v13 = vld [vmem:[%s22825_s7 + $0x8] sm:$0x3f] }
 0x8c8   : > { %v3428_v38 = vpack.c.bf16 %v3410_v34, %v3410_v34  ;;  %17070 = vmatpush3.bf16.msra.mxu0 %v18281_v59 }
 0x8c9   : > { %v3409_v17 = vmul.f32 %v3406_v14, %v3328_v48  ;;  %17075 = vmatprep.subr.bf16.mxu0 %v18283_v57  ;;  %v3579_v48 = vrot.slane %v15270_v13, %v20007_v62 }
 0x8cb   : > { %v3427_v36 = vpack.c.bf16 %v3409_v17, %v3408_v7  ;;  %v3586_v17 = vrot.slane %v15270_v13, %v20022_v8 }
 0x8cd   : > { %17063 = vmatprep.mubr.bf16.mxu1 %v3427_v36 }
 0x8ce   : > { %17064 = vmatmul.mubr.bf16.vlgmr.msra.gmra.mrb[64].mxu1 %v3428_v38 }
 0x8cf   : > { %17100 = vmatpush3.bf16.msra.mxu1 %v18280_v35 }
 0x8d0   : > { %17101 = vmatprep.subr.bf16.mxu1 %v18282_v44 }
 0x8d3   : > { %17102 = vmatpush3.bf16.msra.mxu1 %v18282_v44 }
 0x8d4   : > { %17115 = vmatprep.subr.bf16.mxu1 %v18284_v6 }
 0x9a1   : > { %v17065_v33 = vpop.f32.mrb[64].mxu1 }
 0x9a2   : > { %v3511_v25 = vpop.f32.mrb[65].mxu1  ;;  %v3527_v15 = vadd.f32 %v17065_v33, %v20594_v37 }
 0x9a3   : > { %v3525_v51 = vadd.f32 %v3511_v25, %v20586_v30  ;;  %v17066_v50 = vpop.f32.mrb[66].mxu1 }
 0x9a4   : > { %v3514_v40 = vpop.f32.mrb[67].mxu1  ;;  %v20694_v47 = vadd.f32 %v3531_v45, %v3527_v15 }
 0x9a5   : > { %v20691_v11 = vadd.f32 %v3531_v45, %v3525_v51  ;;  %v3526_v32 = vadd.f32 %v3514_v40, %v20591_v9 }
 0x9a6   : > { %v3543_v30 = vsel %vm772_vm1, %v20694_v47, 0.0 }
 0x9a7   : > { %v20696_v10 = vadd.f32 %v3531_v45, %v3526_v32  ;;  %v3537_v54 = vsel %vm765_vm0, %v20691_v11, 0.0 }
 0x9a8   : > { %3538 = vadd.xlane.f32.xlu0 %v3537_v54 }
 0x9a9   : > { %v3540_v20 = vsel %vm765_vm0, %v20696_v10, 0.0 }
 0x9aa   : > { %3541 = vadd.xlane.f32.xlu1 %v3540_v20  ;;  %v18285_v20 = vld [vmem:[%s22821_s3 + $0x98] sm:$0xff]  }
 0x9ac   : > { %3544 = vadd.xlane.f32.xlu0 %v3543_v30  ;;  %v18286_v30 = vld [vmem:[%s22821_s3 + $0xe8] sm:$0xff]  }
 0xa35   : > { %v3539_v37 = vpop.xlane.xlu0 %3538 }
 0xa36   : > { %v3546_v1 = vmul.f32 0.03125, %v3539_v37  ;;  %v18287_v37 = vld [vmem:[%s22821_s3 + $0xa0] sm:$0xff]  }
 0xa37   : > { %v3542_v27 = vpop.xlane.xlu1 %3541 }
 0xa38   : > { %v3549_v9 = vsub.f32 %v20691_v11, %v3546_v1  ;;  %v3547_v23 = vmul.f32 0.03125, %v3542_v27  ;;  %v18288_v1 = vld [vmem:[%s22821_s3 + $0xa8] sm:$0xff]   ;;  %v18289_v27 = vld [vmem:[%s22821_s3 + $0xb0] sm:$0xff]  }
 0xa39   : > { %v3545_v3 = vpop.xlane.xlu0 %3544 }
 0xa3a   : > { %v3550_v58 = vsub.f32 %v20696_v10, %v3547_v23  ;;  %v3548_v29 = vmul.f32 0.03125, %v3545_v3  ;;  %v3552_v31 = vmul.f32 %v3549_v9, %v3549_v9  ;;  %v18290_v23 = vld [vmem:[%s22821_s3 + $0xb8] sm:$0xff]   ;;  %v18291_v3 = vld [vmem:[%s22821_s3 + $0xd0] sm:$0xff]  }
 0xa3c   : > { %v3551_v24 = vsub.f32 %v20694_v47, %v3548_v29  ;;  %v3555_v61 = vsel %vm765_vm0, %v3552_v31, 0.0  ;;  %v3553_v26 = vmul.f32 %v3550_v58, %v3550_v58  ;;  %v18292_v29 = vld [vmem:[%s22821_s3 + $0xd8] sm:$0xff]   ;;  %v18293_v31 = vld [vmem:[%s22821_s3 + $0xf0] sm:$0xff]  }
 0xa3d   : > { %3556 = vadd.xlane.f32.xlu1 %v3555_v61 }
 0xa3e   : > { %v3558_v55 = vsel %vm765_vm0, %v3553_v26, 0.0  ;;  %v3554_v52 = vmul.f32 %v3551_v24, %v3551_v24 }
 0xa3f   : > { %3559 = vadd.xlane.f32.xlu0 %v3558_v55 }
 0xa40   : > { %v3561_v56 = vsel %vm772_vm1, %v3554_v52, 0.0 }
 0xa41   : > { %3562 = vadd.xlane.f32.xlu1 %v3561_v56 }
 0xaca   : > { %v3557_v2 = vpop.xlane.xlu1 %3556 }
 0xacb   : > { %v3564_v43 = vmul.f32 0.03125, %v3557_v2 }
 0xacc   : > { %v3560_v49 = vpop.xlane.xlu0 %3559 }
 0xacd   : > { %v3567_v16 = vadd.f32 1e-05, %v3564_v43  ;;  %v3565_v0 = vmul.f32 0.03125, %v3560_v49 }
 0xace   : > { %v3563_v22 = vpop.xlane.xlu1 %3562 }
 0xacf   : > { %18761 = vrsqrt.f32 %v3567_v16  ;;  %v3568_v42 = vadd.f32 1e-05, %v3565_v0  ;;  %v3566_v5 = vmul.f32 0.03125, %v3563_v22 }
 0xad1   : > { %18763 = vrsqrt.f32 %v3568_v42  ;;  %v3569_v39 = vadd.f32 1e-05, %v3566_v5 }
 0xad3   : > { %18765 = vrsqrt.f32 %v3569_v39 }
 0xad9   : > { %v18762_v14 = vpop.eup %18761 }
 0xada   : > { %v3573_v34 = vmul.f32 %v18762_v14, %v3549_v9 }
 0xadb   : > { %v18764_v7 = vpop.eup %18763 }
 0xadc   : > { %v3580_v36 = vmul.f32 %v3579_v48, %v3573_v34  ;;  %v3574_v38 = vmul.f32 %v18764_v7, %v3550_v58 }
 0xadd   : > { %v18766_v33 = vpop.eup %18765 }
 0xade   : > { %v3581_v45 = vmul.f32 %v3579_v48, %v3574_v38  ;;  %v3575_v25 = vmul.f32 %v18766_v33, %v3551_v24  ;;  %v3587_v15 = vadd.f32 %v3586_v17, %v3580_v36  ;;  %v18294_v24 = vld [vmem:[%s22821_s3 + $0xf8] sm:$0xff]  }
 0xae0   : > { %v3588_v51 = vadd.f32 %v3586_v17, %v3581_v45  ;;  %v3582_v50 = vmul.f32 %v3579_v48, %v3575_v25 }
 0xae2   : > { %v20733_v40 = vpack.c.bf16 %v3588_v51, %v3587_v15  ;;  %v3589_v32 = vadd.f32 %v3586_v17, %v3582_v50 }
 0xae4   : > { %v20735_v54 = vpack.c.bf16 %v3589_v32, %v3589_v32  ;;  %17071 = vmatprep.mubr.msk.bf16.mxu0 %vm765_vm0, %v20733_v40  ;;  %17103 = vmatprep.mubr.msk.bf16.mxu1 %vm765_vm0, %v20733_v40  ;;  %v20774_v9 = vsel %vm765_vm0, %v20733_v40, 0 }
 0xae6   : > { %17072 = vmatmul.mubr.msk.bf16.vlgmr.msra.gmra.mrb[68].mxu0 %vm765_vm0, %v20735_v54  ;;  %17104 = vmatmul.mubr.msk.bf16.vlgmr.msra.gmra.mrb[68].mxu1 %vm765_vm0, %v20735_v54  ;;  %v20791_v58 = vsel %vm765_vm0, %v20735_v54, 0 }
 0xae7   : > { %17076 = vmatpush3.bf16.msra.mxu0 %v18283_v57  ;;  %17116 = vmatpush3.bf16.msra.mxu1 %v18284_v6 }
 0xae8   : > { %17079 = vmatprep.mubr.msk.bf16.mxu0 %vm765_vm0, %v20733_v40  ;;  %17119 = vmatprep.mubr.msk.bf16.mxu1 %vm765_vm0, %v20733_v40 }
 0xae9   : > { %17077 = vmatprep.subr.bf16.mxu0 %v18285_v20  ;;  %17117 = vmatprep.subr.bf16.mxu1 %v18286_v30 }
 0xaeb   : > { %17078 = vmatpush3.bf16.msra.mxu0 %v18285_v20  ;;  %17118 = vmatpush3.bf16.msra.mxu1 %v18286_v30 }
 0xaec   : > { %18059 = vmatprep.subr.msk.bf16.mxu1 %vm765_vm0, %v20733_v40  ;;  %17083 = vmatprep.subr.bf16.mxu0 %v18287_v37 }
 0xaee   : > { %17080 = vmatmul.mubr.msk.bf16.vlgmr.msra.gmra.mrb[72].mxu0 %vm765_vm0, %v20735_v54  ;;  %17120 = vmatmul.mubr.msk.bf16.vlgmr.msra.gmra.mrb[72].mxu1 %vm765_vm0, %v20735_v54 }
 0xaef   : > { %17084 = vmatpush3.bf16.msra.mxu0 %v18287_v37  ;;  %17087 = vmatprep.mubr.msk.bf16.mxu0 %vm765_vm0, %v20733_v40 }
 0xaf0   : > { %17085 = vmatprep.subr.bf16.mxu0 %v18288_v1 }
 0xaf3   : > { %17086 = vmatpush3.bf16.msra.mxu0 %v18288_v1 }
 0xaf4   : > { %17132 = vmatpush3.bf16.xpose.msra.mxu1 %v20774_v9  ;;  %17091 = vmatprep.subr.bf16.mxu0 %v18289_v27 }
 0xaf5   : > { %18060 = vmatprep.subr.msk.bf16.mxu1 %vm765_vm0, %v20735_v54 }
 0xaf6   : > { %17088 = vmatmul.mubr.msk.bf16.vlgmr.msra.gmra.mrb[76].mxu0 %vm765_vm0, %v20735_v54 }
 0xaf7   : > { %17092 = vmatpush3.bf16.msra.mxu0 %v18289_v27  ;;  %17095 = vmatprep.mubr.msk.bf16.mxu0 %vm765_vm0, %v20733_v40 }
 0xaf8   : > { %17093 = vmatprep.subr.bf16.mxu0 %v18290_v23 }
 0xafb   : > { %17094 = vmatpush3.bf16.msra.mxu0 %v18290_v23 }
 0xafc   : > { %17134 = vmatpush3.bf16.xpose.msra.mxu1 %v20791_v58  ;;  %17107 = vmatprep.subr.bf16.mxu0 %v18291_v3 }
 0xafd   : > { %18063 = vmatprep.subr.msk.bf16.mxu1 %vm765_vm0, %v20733_v40 }
 0xafe   : > { %17096 = vmatmul.mubr.msk.bf16.vlgmr.msra.gmra.mrb[80].mxu0 %vm765_vm0, %v20735_v54 }
 0xaff   : > { %17108 = vmatpush3.bf16.msra.mxu0 %v18291_v3  ;;  %17111 = vmatprep.mubr.msk.bf16.mxu0 %vm765_vm0, %v20733_v40 }
 0xb00   : > { %17109 = vmatprep.subr.bf16.mxu0 %v18292_v29 }
 0xb03   : > { %17110 = vmatpush3.bf16.msra.mxu0 %v18292_v29 }
 0xb04   : > { %17123 = vmatprep.subr.bf16.mxu0 %v18293_v31 }
 0xb06   : > { %17112 = vmatmul.mubr.msk.bf16.vlgmr.msra.gmra.mrb[84].mxu0 %vm765_vm0, %v20735_v54 }
 0xb07   : > { %17124 = vmatpush3.bf16.msra.mxu0 %v18293_v31  ;;  %17127 = vmatprep.mubr.msk.bf16.mxu0 %vm765_vm0, %v20733_v40 }
 0xb08   : > { %17125 = vmatprep.subr.bf16.mxu0 %v18294_v24 }
 0xb0b   : > { %17126 = vmatpush3.bf16.msra.mxu0 %v18294_v24 }
 0xb0c   : > { %18061 = vmatprep.subr.msk.bf16.mxu0 %vm765_vm0, %v20733_v40 }
 0xb0e   : > { %17128 = vmatmul.mubr.msk.bf16.vlgmr.msra.gmra.mrb[88].mxu0 %vm765_vm0, %v20735_v54 }
 0xb14   : > { %17140 = vmatpush3.bf16.xpose.msra.mxu0 %v20774_v9 }
 0xb15   : > { %18062 = vmatprep.subr.msk.bf16.mxu0 %vm765_vm0, %v20735_v54 }
 0xb1c   : > { %17142 = vmatpush3.bf16.xpose.msra.mxu0 %v20791_v58 }
 0xb1d   : > { %18065 = vmatprep.subr.msk.bf16.mxu0 %vm765_vm0, %v20733_v40 }
 0xbb9   : > { %v17073_v61 = vpop.f32.mrb[68].mxu0  ;;  %v20823_v26 = vpop.f32.mrb[68].mxu1 }
 0xbba   : > { %v3710_v55 = vpop.f32.mrb[69].mxu0  ;;  %v3950_v52 = vpop.f32.mrb[69].mxu1  ;;  %v4145_v6 = vpack.c.bf16 %v17073_v61, %v17073_v61  ;;  %v4153_v27 = vpack.c.bf16 %v20823_v26, %v20823_v26  ;;  %v18295_v26 = vld [vmem:[#allocation2 + $0x80] sm:$0xff]  }
 0xbbb   : > { %v17074_v56 = vpop.f32.mrb[70].mxu0  ;;  %v17106_v41 = vpop.f32.mrb[70].mxu1 }
 0xbbc   : > { %v3713_v35 = vpop.f32.mrb[71].mxu0  ;;  %v3953_v59 = vpop.f32.mrb[71].mxu1  ;;  %v18297_v56 = vld [vmem:[#allocation2 + $0x90] sm:$0xff]  }
 0xbbd   : > { %v4144_v44 = vpack.c.bf16 %v3713_v35, %v3710_v55  ;;  %v4152_v57 = vpack.c.bf16 %v3953_v59, %v3950_v52  ;;  %v18296_v52 = vld [vmem:[#allocation2 + $0x88] sm:$0xff]   ;;  %v18299_v35 = vld [vmem:[#allocation2 + $0x98] sm:$0xff]  }
 0xbbe   : > { %v18300_v59 = vld [vmem:[#allocation2 + $0xa8] sm:$0xff]  }
 0xbbf   : > { %17135 = vmatprep.mubr.msk.bf16.mxu1 %vm765_vm0, %v4144_v44  ;;  %v18302_v44 = vld [vmem:[#allocation2 + $0xc0] sm:$0xff]  }
 0xbc0   : > { %17136 = vmatmul.mubr.msk.bf16.vlgmr.msra.gmra.mrb[76].mxu1 %vm765_vm0, %v4145_v6  ;;  %v18304_v6 = vld [vmem:[#allocation2 + $0xc8] sm:$0xff]  }
 0xbc1   : > { %17148 = vmatpush3.bf16.xpose.msra.mxu1 %v20774_v9  ;;  %v17081_v2 = vpop.f32.mrb[72].mxu0  ;;  %v20828_v43 = vpop.f32.mrb[72].mxu1 }
 0xbc2   : > { %18064 = vmatprep.subr.msk.bf16.mxu1 %vm765_vm0, %v20735_v54  ;;  %v3770_v49 = vpop.f32.mrb[73].mxu0  ;;  %v4070_v16 = vpop.f32.mrb[73].mxu1  ;;  %v4147_v48 = vpack.c.bf16 %v17081_v2, %v17081_v2  ;;  %v4157_v55 = vpack.c.bf16 %v20828_v43, %v20828_v43  ;;  %v18305_v2 = vld [vmem:[#allocation2 + $0xd0] sm:$0xff]   ;;  %v18306_v43 = vld [vmem:[#allocation2 + $0xe0] sm:$0xff]  }
 0xbc3   : > { %v17082_v0 = vpop.f32.mrb[74].mxu0  ;;  %v17122_v22 = vpop.f32.mrb[74].mxu1 }
 0xbc4   : > { %v3773_v42 = vpop.f32.mrb[75].mxu0  ;;  %v4073_v5 = vpop.f32.mrb[75].mxu1  ;;  %v18309_v0 = vld [vmem:[#allocation2 + $0xf0] sm:$0xff]   ;;  %v18310_v22 = vld [vmem:[#allocation2 + $0xf8] sm:$0xff]  }
 0xbc5   : > { %v4146_v39 = vpack.c.bf16 %v3773_v42, %v3770_v49  ;;  %v4156_v13 = vpack.c.bf16 %v4073_v5, %v4070_v16  ;;  %v18307_v49 = vld [vmem:[#allocation2 + $0xd8] sm:$0xff]   ;;  %v18308_v16 = vld [vmem:[#allocation2 + $0xe8] sm:$0xff]  }
 0xbc7   : > { %17143 = vmatprep.mubr.msk.bf16.mxu0 %vm765_vm0, %v4146_v39 }
 0xbc8   : > { %17144 = vmatmul.mubr.msk.bf16.vlgmr.msra.gmra.mrb[92].mxu0 %vm765_vm0, %v4147_v48 }
 0xbc9   : > { %17150 = vmatpush3.bf16.xpose.msra.mxu1 %v20791_v58  ;;  %17156 = vmatpush3.bf16.xpose.msra.mxu0 %v20774_v9  ;;  %v17089_v14 = vpop.f32.mrb[76].mxu0 }
 0xbca   : > { %18066 = vmatprep.subr.msk.bf16.mxu0 %vm765_vm0, %v20735_v54  ;;  %18067 = vmatprep.subr.msk.bf16.mxu1 %vm765_vm0, %v20733_v40  ;;  %v3830_v34 = vpop.f32.mrb[77].mxu0  ;;  %v4149_v38 = vpack.c.bf16 %v17089_v14, %v17089_v14 }
 0xbcb   : > { %v17090_v7 = vpop.f32.mrb[78].mxu0 }
 0xbcc   : > { %v3833_v17 = vpop.f32.mrb[79].mxu0 }
 0xbcd   : > { %v4148_v36 = vpack.c.bf16 %v3833_v17, %v3830_v34 }
 0xbcf   : > { %17151 = vmatprep.mubr.msk.bf16.mxu1 %vm765_vm0, %v4148_v36 }
 0xbd0   : > { %17152 = vmatmul.mubr.msk.bf16.vlgmr.msra.gmra.mrb[80].mxu1 %vm765_vm0, %v4149_v38 }
 0xbd1   : > { %17158 = vmatpush3.bf16.xpose.msra.mxu0 %v20791_v58  ;;  %17164 = vmatpush3.bf16.xpose.msra.mxu1 %v20774_v9  ;;  %v17097_v33 = vpop.f32.mrb[80].mxu0 }
 0xbd2   : > { %18068 = vmatprep.subr.msk.bf16.mxu1 %vm765_vm0, %v20735_v54  ;;  %17167 = vmatprep.mubr.msk.bf16.mxu1 %vm765_vm0, %v4152_v57  ;;  %v3890_v45 = vpop.f32.mrb[81].mxu0  ;;  %v4151_v50 = vpack.c.bf16 %v17097_v33, %v17097_v33  ;;  %v18303_v57 = vld [vmem:[#allocation2 + $0xb8] sm:$0xff]  }
 0xbd3   : > { %18069 = vmatprep.subr.msk.bf16.mxu0 %vm765_vm0, %v20733_v40  ;;  %v17098_v25 = vpop.f32.mrb[82].mxu0 }
 0xbd4   : > { %v3893_v15 = vpop.f32.mrb[83].mxu0 }
 0xbd5   : > { %v4150_v51 = vpack.c.bf16 %v3893_v15, %v3890_v45 }
 0xbd7   : > { %17159 = vmatprep.mubr.msk.bf16.mxu0 %vm765_vm0, %v4150_v51 }
 0xbd8   : > { %17160 = vmatmul.mubr.msk.bf16.vlgmr.msra.gmra.mrb[96].mxu0 %vm765_vm0, %v4151_v50 }
 0xbd9   : > { %17166 = vmatpush3.bf16.xpose.msra.mxu1 %v20791_v58  ;;  %17172 = vmatpush3.bf16.xpose.msra.mxu0 %v20774_v9  ;;  %v17113_v32 = vpop.f32.mrb[84].mxu0 }
 0xbda   : > { %18070 = vmatprep.subr.msk.bf16.mxu0 %vm765_vm0, %v20735_v54  ;;  %18071 = vmatprep.subr.msk.bf16.mxu1 %vm765_vm0, %v20733_v40  ;;  %v4010_v20 = vpop.f32.mrb[85].mxu0  ;;  %v4155_v61 = vpack.c.bf16 %v17113_v32, %v17113_v32 }
 0xbdb   : > { %v17114_v30 = vpop.f32.mrb[86].mxu0 }
 0xbdc   : > { %v4013_v37 = vpop.f32.mrb[87].mxu0 }
 0xbdd   : > { %v4154_v1 = vpack.c.bf16 %v4013_v37, %v4010_v20 }
 0xbdf   : > { %17175 = vmatprep.mubr.msk.bf16.mxu0 %vm765_vm0, %v4154_v1 }
 0xbe0   : > { %17168 = vmatmul.mubr.msk.bf16.vlgmr.msra.gmra.mrb[84].mxu1 %vm765_vm0, %v4153_v27 }
 0xbe1   : > { %17174 = vmatpush3.bf16.xpose.msra.mxu0 %v20791_v58  ;;  %17180 = vmatpush3.bf16.xpose.msra.mxu1 %v20774_v9  ;;  %v17129_v23 = vpop.f32.mrb[88].mxu0 }
 0xbe2   : > { %17183 = vmatprep.mubr.msk.bf16.mxu1 %vm765_vm0, %v4156_v13  ;;  %18072 = vmatprep.subr.msk.bf16.mxu1 %vm765_vm0, %v20735_v54  ;;  %v4130_v3 = vpop.f32.mrb[89].mxu0  ;;  %v4159_v41 = vpack.c.bf16 %v17129_v23, %v17129_v23 }
 0xbe3   : > { %18073 = vmatprep.subr.msk.bf16.mxu0 %vm765_vm0, %v20733_v40  ;;  %v17130_v29 = vpop.f32.mrb[90].mxu0 }
 0xbe4   : > { %v4133_v31 = vpop.f32.mrb[91].mxu0 }
 0xbe5   : > { %v4158_v24 = vpack.c.bf16 %v4133_v31, %v4130_v3 }
 0xbe8   : > { %17176 = vmatmul.mubr.msk.bf16.vlgmr.msra.gmra.mrb[100].mxu0 %vm765_vm0, %v4155_v61 }
 0xbe9   : > { %17182 = vmatpush3.bf16.xpose.msra.mxu1 %v20791_v58  ;;  %17188 = vmatpush3.bf16.xpose.msra.mxu0 %v20774_v9  ;;  %v18298_v9 = vld [vmem:[#allocation2 + $0xa0] sm:$0xff]  }
 0xbea   : > { %17191 = vmatprep.mubr.msk.bf16.mxu0 %vm765_vm0, %v4158_v24  ;;  %18074 = vmatprep.subr.msk.bf16.mxu0 %vm765_vm0, %v20735_v54 }
 0xbeb   : > { %17195 = vmatprep.subr.bf16.mxu1 %v18295_v26 }
 0xbf0   : > { %17184 = vmatmul.mubr.msk.bf16.vlgmr.msra.gmra.mrb[88].mxu1 %vm765_vm0, %v4157_v55 }
 0xbf1   : > { %17190 = vmatpush3.bf16.xpose.msra.mxu0 %v20791_v58  ;;  %17196 = vmatpush3.bf16.msra.mxu1 %v18295_v26  ;;  %v18301_v58 = vld [vmem:[#allocation2 + $0xb0] sm:$0xff]  }
 0xbf2   : > { %17199 = vmatprep.mubr.msk.bf16.mxu1 %vm765_vm0, %v20733_v40  ;;  %17197 = vmatprep.subr.bf16.mxu1 %v18296_v52 }
 0xbf3   : > { %17203 = vmatprep.subr.bf16.mxu0 %v18297_v56 }
 0xbf5   : > { %17198 = vmatpush3.bf16.msra.mxu1 %v18296_v52 }
 0xbf6   : > { %17211 = vmatprep.subr.bf16.mxu1 %v18298_v9 }
 0xbf8   : > { %17192 = vmatmul.mubr.msk.bf16.vlgmr.msra.gmra.mrb[104].mxu0 %vm765_vm0, %v4159_v41  ;;  %17200 = vmatmul.mubr.msk.bf16.vlgmr.msra.gmra.mrb[92].mxu1 %vm765_vm0, %v20735_v54 }
 0xbf9   : > { %17204 = vmatpush3.bf16.msra.mxu0 %v18297_v56  ;;  %17207 = vmatprep.mubr.msk.bf16.mxu0 %vm765_vm0, %v20733_v40 }
 0xbfa   : > { %17212 = vmatpush3.bf16.msra.mxu1 %v18298_v9  ;;  %17215 = vmatprep.mubr.msk.bf16.mxu1 %vm765_vm0, %v20733_v40 }
 0xbfb   : > { %17205 = vmatprep.subr.bf16.mxu0 %v18299_v35  ;;  %17213 = vmatprep.subr.bf16.mxu1 %v18300_v59 }
 0xbfd   : > { %17206 = vmatpush3.bf16.msra.mxu0 %v18299_v35 }
 0xbfe   : > { %17214 = vmatpush3.bf16.msra.mxu1 %v18300_v59  ;;  %17219 = vmatprep.subr.bf16.mxu0 %v18301_v58 }
 0xbff   : > { %17227 = vmatprep.subr.bf16.mxu1 %v18302_v44 }
 0xc00   : > { %17208 = vmatmul.mubr.msk.bf16.vlgmr.msra.gmra.mrb[108].mxu0 %vm765_vm0, %v20735_v54 }
 0xc01   : > { %17216 = vmatmul.mubr.msk.bf16.vlgmr.msra.gmra.mrb[96].mxu1 %vm765_vm0, %v20735_v54  ;;  %17220 = vmatpush3.bf16.msra.mxu0 %v18301_v58 }
 0xc02   : > { %17223 = vmatprep.mubr.msk.bf16.mxu0 %vm765_vm0, %v20733_v40  ;;  %17228 = vmatpush3.bf16.msra.mxu1 %v18302_v44 }
 0xc03   : > { %17231 = vmatprep.mubr.msk.bf16.mxu1 %vm765_vm0, %v20733_v40  ;;  %17221 = vmatprep.subr.bf16.mxu0 %v18303_v57 }
 0xc04   : > { %17229 = vmatprep.subr.bf16.mxu1 %v18304_v6 }
 0xc05   : > { %17222 = vmatpush3.bf16.msra.mxu0 %v18303_v57 }
 0xc06   : > { %17230 = vmatpush3.bf16.msra.mxu1 %v18304_v6  ;;  %17235 = vmatprep.subr.bf16.mxu0 %v18305_v2 }
 0xc07   : > { %17243 = vmatprep.subr.bf16.mxu1 %v18306_v43 }
 0xc08   : > { %17224 = vmatmul.mubr.msk.bf16.vlgmr.msra.gmra.mrb[112].mxu0 %vm765_vm0, %v20735_v54 }
 0xc09   : > { %17232 = vmatmul.mubr.msk.bf16.vlgmr.msra.gmra.mrb[100].mxu1 %vm765_vm0, %v20735_v54  ;;  %17236 = vmatpush3.bf16.msra.mxu0 %v18305_v2 }
 0xc0a   : > { %17239 = vmatprep.mubr.msk.bf16.mxu0 %vm765_vm0, %v20733_v40  ;;  %17244 = vmatpush3.bf16.msra.mxu1 %v18306_v43 }
 0xc0b   : > { %17247 = vmatprep.mubr.msk.bf16.mxu1 %vm765_vm0, %v20733_v40  ;;  %17237 = vmatprep.subr.bf16.mxu0 %v18307_v49 }
 0xc0c   : > { %17245 = vmatprep.subr.bf16.mxu1 %v18308_v16 }
 0xc0d   : > { %17238 = vmatpush3.bf16.msra.mxu0 %v18307_v49 }
 0xc0e   : > { %17246 = vmatpush3.bf16.msra.mxu1 %v18308_v16  ;;  %17251 = vmatprep.subr.bf16.mxu0 %v18309_v0 }
 0xc10   : > { %17240 = vmatmul.mubr.msk.bf16.vlgmr.msra.gmra.mrb[116].mxu0 %vm765_vm0, %v20735_v54 }
 0xc11   : > { %17248 = vmatmul.mubr.msk.bf16.vlgmr.msra.gmra.mrb[104].mxu1 %vm765_vm0, %v20735_v54  ;;  %17252 = vmatpush3.bf16.msra.mxu0 %v18309_v0 }
 0xc12   : > { %17255 = vmatprep.mubr.msk.bf16.mxu0 %vm765_vm0, %v20733_v40  ;;  %17253 = vmatprep.subr.bf16.mxu0 %v18310_v22 }
 0xc15   : > { %17254 = vmatpush3.bf16.msra.mxu0 %v18310_v22 }
 0xc18   : > { %17256 = vmatmul.mubr.msk.bf16.vlgmr.msra.gmra.mrb[120].mxu0 %vm765_vm0, %v20735_v54 }
 0xc93   : > { %v20911_v42 = vpop.f32.mrb[76].mxu1 }
 0xc94   : > { %v20913_v5 = vpop.f32.mrb[77].mxu1  ;;  %v4598_v39 = vsel %vm1928_vm2, %v20911_v42, -inf }
 0xc95   : > { %4599 = vmax.xlane.f32.xlu0 %v4598_v39  ;;  %v17138_v13 = vpop.f32.mrb[78].mxu1  ;;  %v4592_v40 = vsel %vm1921_vm3, %v20913_v5, -inf }
 0xc96   : > { %v20917_v48 = vpop.f32.mrb[79].mxu1 }
 0xc97   : > { %v4595_v14 = vsel %vm1921_vm3, %v20917_v48, -inf }
 0xc98   : > { %4596 = vmax.xlane.f32.xlu1 %v4595_v14 }
 0xc99   : > { %4593 = vmax.xlane.f32.xlu0 %v4592_v40 }
 0xc9b   : > { %v20923_v54 = vpop.f32.mrb[92].mxu0 }
 0xc9c   : > { %v20925_v34 = vpop.f32.mrb[93].mxu0  ;;  %v4607_v7 = vsel %vm1928_vm2, %v20923_v54, -inf }
 0xc9d   : > { %v17146_v17 = vpop.f32.mrb[94].mxu0  ;;  %4608 = vmax.xlane.f32.xlu1 %v4607_v7  ;;  %v4601_v36 = vsel %vm1921_vm3, %v20925_v34, -inf }
 0xc9e   : > { %v20931_v38 = vpop.f32.mrb[95].mxu0  ;;  %4602 = vmax.xlane.f32.xlu0 %v4601_v36 }
 0xc9f   : > { %v4604_v33 = vsel %vm1921_vm3, %v20931_v38, -inf }
 0xca1   : > { %4605 = vmax.xlane.f32.xlu1 %v4604_v33 }
 0xca3   : > { %v20935_v45 = vpop.f32.mrb[80].mxu1 }
 0xca4   : > { %v20937_v25 = vpop.f32.mrb[81].mxu1  ;;  %v4616_v15 = vsel %vm1928_vm2, %v20935_v45, -inf }
 0xca5   : > { %4617 = vmax.xlane.f32.xlu0 %v4616_v15  ;;  %v17154_v51 = vpop.f32.mrb[82].mxu1  ;;  %v4610_v20 = vsel %vm1921_vm3, %v20937_v25, -inf }
 0xca6   : > { %v20941_v50 = vpop.f32.mrb[83].mxu1 }
 0xca7   : > { %v4613_v32 = vsel %vm1921_vm3, %v20941_v50, -inf }
 0xca8   : > { %4614 = vmax.xlane.f32.xlu1 %v4613_v32 }
 0xca9   : > { %4611 = vmax.xlane.f32.xlu0 %v4610_v20 }
 0xcab   : > { %v20947_v30 = vpop.f32.mrb[96].mxu0 }
 0xcac   : > { %v20949_v37 = vpop.f32.mrb[97].mxu0  ;;  %v4625_v1 = vsel %vm1928_vm2, %v20947_v30, -inf }
 0xcad   : > { %v17162_v27 = vpop.f32.mrb[98].mxu0  ;;  %4626 = vmax.xlane.f32.xlu1 %v4625_v1  ;;  %v4619_v23 = vsel %vm1921_vm3, %v20949_v37, -inf }
 0xcae   : > { %v20955_v3 = vpop.f32.mrb[99].mxu0  ;;  %4620 = vmax.xlane.f32.xlu0 %v4619_v23 }
 0xcaf   : > { %v4622_v29 = vsel %vm1921_vm3, %v20955_v3, -inf }
 0xcb1   : > { %4623 = vmax.xlane.f32.xlu1 %v4622_v29 }
 0xcb3   : > { %v20959_v31 = vpop.f32.mrb[84].mxu1 }
 0xcb4   : > { %v20961_v24 = vpop.f32.mrb[85].mxu1  ;;  %v4634_v61 = vsel %vm1928_vm2, %v20959_v31, -inf }
 0xcb5   : > { %4635 = vmax.xlane.f32.xlu0 %v4634_v61  ;;  %v17170_v26 = vpop.f32.mrb[86].mxu1  ;;  %v4628_v56 = vsel %vm1921_vm3, %v20961_v24, -inf }
 0xcb6   : > { %v20965_v55 = vpop.f32.mrb[87].mxu1 }
 0xcb7   : > { %v4631_v52 = vsel %vm1921_vm3, %v20965_v55, -inf }
 0xcb8   : > { %4632 = vmax.xlane.f32.xlu1 %v4631_v52 }
 0xcb9   : > { %4629 = vmax.xlane.f32.xlu0 %v4628_v56 }
 0xcbb   : > { %v20971_v9 = vpop.f32.mrb[100].mxu0 }
 0xcbc   : > { %v20973_v41 = vpop.f32.mrb[101].mxu0  ;;  %v4643_v35 = vsel %vm1928_vm2, %v20971_v9, -inf }
 0xcbd   : > { %v17178_v59 = vpop.f32.mrb[102].mxu0  ;;  %4644 = vmax.xlane.f32.xlu1 %v4643_v35  ;;  %v4637_v58 = vsel %vm1921_vm3, %v20973_v41, -inf }
 0xcbe   : > { %v20979_v44 = vpop.f32.mrb[103].mxu0  ;;  %4638 = vmax.xlane.f32.xlu0 %v4637_v58 }
 0xcbf   : > { %v4640_v57 = vsel %vm1921_vm3, %v20979_v44, -inf }
 0xcc1   : > { %4641 = vmax.xlane.f32.xlu1 %v4640_v57 }
 0xcc3   : > { %v20983_v6 = vpop.f32.mrb[88].mxu1 }
 0xcc4   : > { %v20985_v2 = vpop.f32.mrb[89].mxu1  ;;  %v4652_v1 = vsel %vm1928_vm2, %v20983_v6, -inf }
 0xcc5   : > { %v17186_v43 = vpop.f32.mrb[90].mxu1  ;;  %v4646_v49 = vsel %vm1921_vm3, %v20985_v2, -inf }
 0xcc6   : > { %4647 = vmax.xlane.f32.xlu0 %v4646_v49  ;;  %v20989_v16 = vpop.f32.mrb[91].mxu1 }
 0xcc7   : > { %v4649_v0 = vsel %vm1921_vm3, %v20989_v16, -inf }
 0xcc8   : > { %4650 = vmax.xlane.f32.xlu1 %v4649_v0 }
 0xccb   : > { %v20993_v22 = vpop.f32.mrb[104].mxu0  ;;  %v17201_v39 = vpop.f32.mrb[92].mxu1 }
 0xccc   : > { %v20995_v13 = vpop.f32.mrb[105].mxu0  ;;  %v4902_v14 = vpop.f32.mrb[93].mxu1  ;;  %v5353_v40 = vpack.c.bf16 %v17201_v39, %v17201_v39  ;;  %v4661_v23 = vsel %vm1928_vm2, %v20993_v22, -inf }
 0xccd   : > { %v17194_v7 = vpop.f32.mrb[106].mxu0  ;;  %v17202_v17 = vpop.f32.mrb[94].mxu1  ;;  %v4655_v36 = vsel %vm1921_vm3, %v20995_v13, -inf }
 0xcce   : > { %v20999_v33 = vpop.f32.mrb[107].mxu0  ;;  %4656 = vmax.xlane.f32.xlu0 %v4655_v36  ;;  %v4905_v15 = vpop.f32.mrb[95].mxu1  ;;  %v5375_v20 = vand.u32 %v5353_v40, %v20357_v46 }
 0xccf   : > { %v5352_v51 = vpack.c.bf16 %v4905_v15, %v4902_v14  ;;  %v4658_v32 = vsel %vm1921_vm3, %v20999_v33, -inf }
 0xcd0   : > { %4659 = vmax.xlane.f32.xlu1 %v4658_v32 }
 0xcd1   : > { %17259 = vmatprep.subr.bf16.mxu1 %v5352_v51 }
 0xcd2   : > { %4653 = vmax.xlane.f32.xlu0 %v4652_v1  ;;  %17260 = vmatpush3.bf16.msra.mxu1 %v5352_v51 }
 0xcd3   : > { %v17209_v27 = vpop.f32.mrb[108].mxu0  ;;  %17261 = vmatprep.subr.bf16.mxu1 %v5375_v20 }
 0xcd4   : > { %v21008_v29 = vpop.f32.mrb[96].mxu1  ;;  %v4962_v61 = vpop.f32.mrb[109].mxu0  ;;  %4662 = vmax.xlane.f32.xlu1 %v4661_v23  ;;  %v5355_v26 = vpack.c.bf16 %v17209_v27, %v17209_v27 }
 0xcd5   : > { %v5022_v52 = vpop.f32.mrb[97].mxu1  ;;  %v17210_v56 = vpop.f32.mrb[110].mxu0 }
 0xcd6   : > { %v17218_v35 = vpop.f32.mrb[98].mxu1  ;;  %v4965_v59 = vpop.f32.mrb[111].mxu0  ;;  %17262 = vmatpush3.bf16.msra.mxu1 %v5375_v20  ;;  %v5432_v49 = vand.u32 %v5355_v26, %v20357_v46 }
 0xcd7   : > { %v5354_v58 = vpack.c.bf16 %v4965_v59, %v4962_v61  ;;  %v5025_v57 = vpop.f32.mrb[99].mxu1 }
 0xcd8   : > { %v21010_v43 = vpack.c.bf16 %v5025_v57, %v5022_v52 }
 0xcd9   : > { %17267 = vmatprep.subr.bf16.mxu0 %v5354_v58 }
 0xcda   : > { %17275 = vmatprep.subr.bf16.mxu1 %v21010_v43  ;;  %17268 = vmatpush3.bf16.msra.mxu0 %v5354_v58 }
 0xcdb   : > { %v21014_v0 = vpop.f32.mrb[112].mxu0  ;;  %17269 = vmatprep.subr.bf16.mxu0 %v5432_v49 }
 0xcdc   : > { %v21016_v39 = vpop.f32.mrb[100].mxu1  ;;  %v5082_v14 = vpop.f32.mrb[113].mxu0 }
 0xcdd   : > { %v5142_v40 = vpop.f32.mrb[101].mxu1  ;;  %v17226_v7 = vpop.f32.mrb[114].mxu0 }
 0xcde   : > { %v17234_v17 = vpop.f32.mrb[102].mxu1  ;;  %v5085_v36 = vpop.f32.mrb[115].mxu0  ;;  %17270 = vmatpush3.bf16.msra.mxu0 %v5432_v49 }
 0xcdf   : > { %v21018_v15 = vpack.c.bf16 %v5085_v36, %v5082_v14  ;;  %v5145_v51 = vpop.f32.mrb[103].mxu1 }
 0xce0   : > { %v21020_v32 = vpack.c.bf16 %v5145_v51, %v5142_v40 }
 0xce1   : > { %17283 = vmatprep.subr.bf16.mxu0 %v21018_v15 }
 0xce3   : > { %v21023_v20 = vpop.f32.mrb[116].mxu0 }
 0xce4   : > { %v21025_v1 = vpop.f32.mrb[104].mxu1  ;;  %v5202_v27 = vpop.f32.mrb[117].mxu0 }
 0xce5   : > { %v5262_v23 = vpop.f32.mrb[105].mxu1  ;;  %v17242_v61 = vpop.f32.mrb[118].mxu0 }
 0xce6   : > { %v17250_v26 = vpop.f32.mrb[106].mxu1  ;;  %v5205_v52 = vpop.f32.mrb[119].mxu0 }
 0xce7   : > { %v21027_v56 = vpack.c.bf16 %v5205_v52, %v5202_v27  ;;  %v5265_v35 = vpop.f32.mrb[107].mxu1 }
 0xce8   : > { %v21029_v59 = vpack.c.bf16 %v5265_v35, %v5262_v23 }
 0xceb   : > { %v21031_v58 = vpop.f32.mrb[120].mxu0 }
 0xcec   : > { %v5322_v57 = vpop.f32.mrb[121].mxu0 }
 0xced   : > { %v17258_v49 = vpop.f32.mrb[122].mxu0 }
 0xcee   : > { %v5325_v14 = vpop.f32.mrb[123].mxu0 }
 0xcef   : > { %v21033_v40 = vpack.c.bf16 %v5325_v14, %v5322_v57 }
 0xd22   : > { %v4600_v7 = vpop.xlane.xlu0 %4599 }
 0xd23   : > { %v4666_v17 = vsub.f32 %v20911_v42, %v4600_v7 }
 0xd25   : > { %v4692_v36 = vmul.f32 1.442695, %v4666_v17  ;;  %v4597_v51 = vpop.xlane.xlu1 %4596 }
 0xd26   : > { %v4665_v61 = vsub.f32 %v20917_v48, %v4597_v51  ;;  %v4594_v26 = vpop.xlane.xlu0 %4593 }
 0xd27   : > { %18767 = vpow2.f32 %v4692_v36  ;;  %v4664_v27 = vsub.f32 %v20913_v5, %v4594_v26 }
 0xd28   : > { %v4690_v23 = vmul.f32 1.442695, %v4665_v61 }
 0xd29   : > { %v4688_v52 = vmul.f32 1.442695, %v4664_v27 }
 0xd2a   : > { %18769 = vpow2.f32 %v4690_v23  ;;  %v4609_v35 = vpop.xlane.xlu1 %4608 }
 0xd2b   : > { %18771 = vpow2.f32 %v4688_v52  ;;  %v4669_v49 = vsub.f32 %v20923_v54, %v4609_v35  ;;  %v4603_v57 = vpop.xlane.xlu0 %4602 }
 0xd2c   : > { %v4667_v14 = vsub.f32 %v20925_v34, %v4603_v57 }
 0xd2d   : > { %v4698_v21 = vmul.f32 1.442695, %v4669_v49 }
 0xd2e   : > { %v4694_v42 = vmul.f32 1.442695, %v4667_v14  ;;  %v4606_v7 = vpop.xlane.xlu1 %4605 }
 0xd2f   : > { %18773 = vpow2.f32 %v4698_v21  ;;  %v4668_v48 = vsub.f32 %v20931_v38, %v4606_v7 }
 0xd30   : > { %18775 = vpow2.f32 %v4694_v42 }
 0xd31   : > { %v21041_v17 = vpop.eup %18767  ;;  %v4696_v5 = vmul.f32 1.442695, %v4668_v48 }
 0xd32   : > { %v4618_v36 = vpop.xlane.xlu0 %4617  ;;  %v4742_v51 = vsel %vm1928_vm2, %v21041_v17, 0.0 }
 0xd33   : > { %18777 = vpow2.f32 %v4696_v5  ;;  %v4672_v54 = vsub.f32 %v20935_v45, %v4618_v36  ;;  %4743 = vadd.xlane.f32.xlu0 %v4742_v51 }
 0xd34   : > { %v21046_v61 = vpop.eup %18769 }
 0xd35   : > { %v21048_v34 = vpop.eup %18771  ;;  %v4704_v26 = vmul.f32 1.442695, %v4672_v54  ;;  %v4615_v21 = vpop.xlane.xlu1 %4614  ;;  %v4739_v38 = vsel %vm1921_vm3, %v21046_v61, 0.0 }
 0xd36   : > { %v4671_v27 = vsub.f32 %v20941_v50, %v4615_v21  ;;  %v4612_v23 = vpop.xlane.xlu0 %4611  ;;  %4740 = vadd.xlane.f32.xlu1 %v4739_v38  ;;  %v4736_v52 = vsel %vm1921_vm3, %v21048_v34, 0.0 }
 0xd37   : > { %18779 = vpow2.f32 %v4704_v26  ;;  %v4670_v45 = vsub.f32 %v20937_v25, %v4612_v23  ;;  %4737 = vadd.xlane.f32.xlu0 %v4736_v52 }
 0xd38   : > { %v4702_v35 = vmul.f32 1.442695, %v4671_v27 }
 0xd39   : > { %v21056_v49 = vpop.eup %18773  ;;  %v4700_v57 = vmul.f32 1.442695, %v4670_v45 }
 0xd3a   : > { %v21058_v14 = vpop.eup %18775  ;;  %18781 = vpow2.f32 %v4702_v35  ;;  %v4627_v42 = vpop.xlane.xlu1 %4626  ;;  %v4751_v50 = vsel %vm1928_vm2, %v21056_v49, 0.0 }
 0xd3b   : > { %18783 = vpow2.f32 %v4700_v57  ;;  %v4675_v7 = vsub.f32 %v20947_v30, %v4627_v42  ;;  %v4621_v48 = vpop.xlane.xlu0 %4620  ;;  %4752 = vadd.xlane.f32.xlu1 %v4751_v50  ;;  %v4745_v25 = vsel %vm1921_vm3, %v21058_v14, 0.0 }
 0xd3c   : > { %v4673_v5 = vsub.f32 %v20949_v37, %v4621_v48  ;;  %4746 = vadd.xlane.f32.xlu0 %v4745_v25 }
 0xd3d   : > { %v21066_v36 = vpop.eup %18777  ;;  %v4710_v51 = vmul.f32 1.442695, %v4675_v7 }
 0xd3e   : > { %v4706_v54 = vmul.f32 1.442695, %v4673_v5  ;;  %v4624_v26 = vpop.xlane.xlu1 %4623  ;;  %v4748_v21 = vsel %vm1921_vm3, %v21066_v36, 0.0 }
 0xd3f   : > { %18785 = vpow2.f32 %v4710_v51  ;;  %v4674_v38 = vsub.f32 %v20955_v3, %v4624_v26  ;;  %4749 = vadd.xlane.f32.xlu1 %v4748_v21 }
 0xd40   : > { %18787 = vpow2.f32 %v4706_v54 }
 0xd41   : > { %v21071_v30 = vpop.eup %18779  ;;  %v4708_v27 = vmul.f32 1.442695, %v4674_v38 }
 0xd42   : > { %v4636_v23 = vpop.xlane.xlu0 %4635  ;;  %v4760_v37 = vsel %vm1928_vm2, %v21071_v30, 0.0 }
 0xd43   : > { %18789 = vpow2.f32 %v4708_v27  ;;  %v4678_v52 = vsub.f32 %v20959_v31, %v4636_v23  ;;  %4761 = vadd.xlane.f32.xlu0 %v4760_v37 }
 0xd44   : > { %v21076_v45 = vpop.eup %18781 }
 0xd45   : > { %v21078_v35 = vpop.eup %18783  ;;  %v4716_v57 = vmul.f32 1.442695, %v4678_v52  ;;  %v4633_v42 = vpop.xlane.xlu1 %4632  ;;  %v4757_v3 = vsel %vm1921_vm3, %v21076_v45, 0.0 }
 0xd46   : > { %v4677_v50 = vsub.f32 %v20965_v55, %v4633_v42  ;;  %v4630_v7 = vpop.xlane.xlu0 %4629  ;;  %4758 = vadd.xlane.f32.xlu1 %v4757_v3  ;;  %v4754_v48 = vsel %vm1921_vm3, %v21078_v35, 0.0 }
 0xd47   : > { %18791 = vpow2.f32 %v4716_v57  ;;  %v4676_v31 = vsub.f32 %v20961_v24, %v4630_v7  ;;  %4755 = vadd.xlane.f32.xlu0 %v4754_v48 }
 0xd48   : > { %v4714_v25 = vmul.f32 1.442695, %v4677_v50 }
 0xd49   : > { %v21086_v5 = vpop.eup %18785  ;;  %v4712_v51 = vmul.f32 1.442695, %v4676_v31 }
 0xd4a   : > { %v21088_v54 = vpop.eup %18787  ;;  %18793 = vpow2.f32 %v4714_v25  ;;  %v4645_v26 = vpop.xlane.xlu1 %4644  ;;  %v4769_v55 = vsel %vm1928_vm2, %v21086_v5, 0.0 }
 0xd4b   : > { %18795 = vpow2.f32 %v4712_v51  ;;  %v4681_v21 = vsub.f32 %v20971_v9, %v4645_v26  ;;  %v4639_v38 = vpop.xlane.xlu0 %4638  ;;  %4770 = vadd.xlane.f32.xlu1 %v4769_v55  ;;  %v4763_v24 = vsel %vm1921_vm3, %v21088_v54, 0.0 }
 0xd4c   : > { %v4679_v27 = vsub.f32 %v20973_v41, %v4639_v38  ;;  %4764 = vadd.xlane.f32.xlu0 %v4763_v24 }
 0xd4d   : > { %v21096_v23 = vpop.eup %18789  ;;  %v4722_v37 = vmul.f32 1.442695, %v4681_v21 }
 0xd4e   : > { %v4718_v52 = vmul.f32 1.442695, %v4679_v27  ;;  %v4642_v57 = vpop.xlane.xlu1 %4641  ;;  %v4766_v42 = vsel %vm1921_vm3, %v21096_v23, 0.0 }
 0xd4f   : > { %18797 = vpow2.f32 %v4722_v37  ;;  %v4680_v3 = vsub.f32 %v20979_v44, %v4642_v57  ;;  %4767 = vadd.xlane.f32.xlu1 %v4766_v42 }
 0xd50   : > { %18799 = vpow2.f32 %v4718_v52 }
 0xd51   : > { %v21101_v9 = vpop.eup %18791  ;;  %v4720_v50 = vmul.f32 1.442695, %v4680_v3 }
 0xd52   : > { %v4778_v41 = vsel %vm1928_vm2, %v21101_v9, 0.0 }
 0xd53   : > { %18801 = vpow2.f32 %v4720_v50  ;;  %4779 = vadd.xlane.f32.xlu0 %v4778_v41  ;;  %v4648_v7 = vpop.xlane.xlu0 %4647 }
 0xd54   : > { %v21105_v48 = vpop.eup %18793  ;;  %v4682_v31 = vsub.f32 %v20985_v2, %v4648_v7 }
 0xd55   : > { %v21108_v25 = vpop.eup %18795  ;;  %v4651_v51 = vpop.xlane.xlu1 %4650  ;;  %v4775_v44 = vsel %vm1921_vm3, %v21105_v48, 0.0 }
 0xd56   : > { %v4724_v26 = vmul.f32 1.442695, %v4682_v31  ;;  %v4683_v55 = vsub.f32 %v20989_v16, %v4651_v51  ;;  %4776 = vadd.xlane.f32.xlu1 %v4775_v44  ;;  %v4772_v21 = vsel %vm1921_vm3, %v21108_v25, 0.0 }
 0xd57   : > { %4773 = vadd.xlane.f32.xlu0 %v4772_v21 }
 0xd58   : > { %18803 = vpow2.f32 %v4724_v26  ;;  %v4726_v38 = vmul.f32 1.442695, %v4683_v55 }
 0xd59   : > { %v21115_v24 = vpop.eup %18797 }
 0xd5a   : > { %v21117_v27 = vpop.eup %18799  ;;  %18805 = vpow2.f32 %v4726_v38  ;;  %v4787_v2 = vsel %vm1928_vm2, %v21115_v24, 0.0 }
 0xd5b   : > { %v4657_v37 = vpop.xlane.xlu0 %4656  ;;  %4788 = vadd.xlane.f32.xlu1 %v4787_v2  ;;  %v4781_v16 = vsel %vm1921_vm3, %v21117_v27, 0.0 }
 0xd5c   : > { %v4685_v52 = vsub.f32 %v20995_v13, %v4657_v37  ;;  %4782 = vadd.xlane.f32.xlu0 %v4781_v16 }
 0xd5d   : > { %v21124_v57 = vpop.eup %18801  ;;  %v4660_v42 = vpop.xlane.xlu1 %4659 }
 0xd5e   : > { %v4730_v3 = vmul.f32 1.442695, %v4685_v52  ;;  %v4686_v50 = vsub.f32 %v20999_v33, %v4660_v42  ;;  %v4784_v41 = vsel %vm1921_vm3, %v21124_v57, 0.0 }
 0xd5f   : > { %v4654_v7 = vpop.xlane.xlu0 %4653  ;;  %4785 = vadd.xlane.f32.xlu1 %v4784_v41 }
 0xd60   : > { %18807 = vpow2.f32 %v4730_v3  ;;  %v4732_v31 = vmul.f32 1.442695, %v4686_v50  ;;  %v4684_v51 = vsub.f32 %v20983_v6, %v4654_v7 }
 0xd61   : > { %v4663_v44 = vpop.xlane.xlu1 %4662 }
 0xd62   : > { %v21130_v26 = vpop.eup %18803  ;;  %18809 = vpow2.f32 %v4732_v31  ;;  %v4728_v13 = vmul.f32 1.442695, %v4684_v51  ;;  %v4687_v55 = vsub.f32 %v20993_v22, %v4663_v44 }
 0xd63   : > { %v4790_v21 = vsel %vm1921_vm3, %v21130_v26, 0.0 }
 0xd64   : > { %v21135_v33 = vpop.eup %18805  ;;  %18811 = vpow2.f32 %v4728_v13  ;;  %v4734_v38 = vmul.f32 1.442695, %v4687_v55  ;;  %4791 = vadd.xlane.f32.xlu0 %v4790_v21 }
 0xd65   : > { %v4793_v2 = vsel %vm1921_vm3, %v21135_v33, 0.0 }
 0xd66   : > { %18813 = vpow2.f32 %v4734_v38  ;;  %4794 = vadd.xlane.f32.xlu1 %v4793_v2 }
 0xd6a   : > { %v21139_v6 = vpop.eup %18807 }
 0xd6b   : > { %v4799_v37 = vsel %vm1921_vm3, %v21139_v6, 0.0 }
 0xd6c   : > { %v21143_v16 = vpop.eup %18809  ;;  %4800 = vadd.xlane.f32.xlu0 %v4799_v37 }
 0xd6d   : > { %v4802_v22 = vsel %vm1921_vm3, %v21143_v16, 0.0 }
 0xd6e   : > { %v21147_v52 = vpop.eup %18811  ;;  %4803 = vadd.xlane.f32.xlu1 %v4802_v22 }
 0xd6f   : > { %v4796_v42 = vsel %vm1928_vm2, %v21147_v52, 0.0 }
 0xd70   : > { %v21151_v3 = vpop.eup %18813  ;;  %4797 = vadd.xlane.f32.xlu0 %v4796_v42 }
 0xd71   : > { %v4805_v50 = vsel %vm1928_vm2, %v21151_v3, 0.0 }
 0xd72   : > { %4806 = vadd.xlane.f32.xlu1 %v4805_v50  ;;  %v5357_v50 = vpack.c.bf16 %v21008_v29, %v21008_v29 }
 0xdc0   : > { %v4744_v41 = vpop.xlane.xlu0 %4743 }
 0xdc1   : > { %18815 = vrcp.f32 %v4744_v41 }
 0xdc3   : > { %v4741_v7 = vpop.xlane.xlu1 %4740 }
 0xdc4   : > { %18817 = vrcp.f32 %v4741_v7  ;;  %v4738_v31 = vpop.xlane.xlu0 %4737 }
 0xdc5   : > { %18819 = vrcp.f32 %v4738_v31 }
 0xdc8   : > { %v4753_v51 = vpop.xlane.xlu1 %4752 }
 0xdc9   : > { %v4747_v44 = vpop.xlane.xlu0 %4746  ;;  %18821 = vrcp.f32 %v4753_v51 }
 0xdca   : > { %18823 = vrcp.f32 %v4747_v44 }
 0xdcb   : > { %v18816_v13 = vpop.eup %18815 }
 0xdcc   : > { %v4750_v55 = vpop.xlane.xlu1 %4749  ;;  %v4834_v37 = vmul.f32 %v18816_v13, %v21041_v17 }
 0xdcd   : > { %18825 = vrcp.f32 %v4750_v55 }
 0xdce   : > { %v18818_v21 = vpop.eup %18817  ;;  %v5337_v31 = vpack.c.bf16 %v4834_v37, %v4834_v37 }
 0xdcf   : > { %v18820_v38 = vpop.eup %18819  ;;  %v4833_v2 = vmul.f32 %v18818_v21, %v21046_v61  ;;  %v5489_v61 = vand.u32 %v5357_v50, %v20357_v46 }
 0xdd0   : > { %v4762_v22 = vpop.xlane.xlu0 %4761  ;;  %v4832_v42 = vmul.f32 %v18820_v38, %v21048_v34  ;;  %v5359_v38 = vpack.c.bf16 %v21014_v0, %v21014_v0 }
 0xdd1   : > { %18827 = vrcp.f32 %v4762_v22 }
 0xdd2   : > { %v5336_v41 = vpack.c.bf16 %v4833_v2, %v4832_v42  ;;  %v5546_v42 = vand.u32 %v5359_v38, %v20357_v46 }
 0xdd3   : > { %v4759_v7 = vpop.xlane.xlu1 %4758  ;;  %v18822_v51 = vpop.eup %18821 }
 0xdd4   : > { %18829 = vrcp.f32 %v4759_v7  ;;  %v4756_v44 = vpop.xlane.xlu0 %4755  ;;  %17263 = vmatprep.mubr.msk.bf16.mxu1 %vm1921_vm3, %v5336_v41  ;;  %v18824_v55 = vpop.eup %18823  ;;  %v4837_v29 = vmul.f32 %v18822_v51, %v21056_v49 }
 0xdd5   : > { %18831 = vrcp.f32 %v4756_v44  ;;  %17264 = vmatmul.mubr.msk.bf16.vlgmr.msra.gmra.mrb[108].mxu1 %vm1921_vm3, %v5337_v31  ;;  %v4835_v13 = vmul.f32 %v18824_v55, %v21058_v14  ;;  %v5361_v31 = vpack.c.bf16 %v21016_v39, %v21016_v39 }
 0xdd6   : > { %17276 = vmatpush3.bf16.msra.mxu1 %v21010_v43  ;;  %v5339_v43 = vpack.c.bf16 %v4837_v29, %v4837_v29 }
 0xdd7   : > { %v18826_v17 = vpop.eup %18825  ;;  %17277 = vmatprep.subr.bf16.mxu1 %v5489_v61 }
 0xdd8   : > { %v4771_v34 = vpop.xlane.xlu1 %4770  ;;  %v4836_v21 = vmul.f32 %v18826_v17, %v21066_v36 }
 0xdd9   : > { %v4765_v2 = vpop.xlane.xlu0 %4764  ;;  %18833 = vrcp.f32 %v4771_v34 }
 0xdda   : > { %17278 = vmatpush3.bf16.msra.mxu1 %v5489_v61  ;;  %v5338_v37 = vpack.c.bf16 %v4836_v21, %v4835_v13  ;;  %18835 = vrcp.f32 %v4765_v2  ;;  %v5363_v13 = vpack.c.bf16 %v21023_v20, %v21023_v20 }
 0xddb   : > { %17291 = vmatprep.subr.bf16.mxu1 %v21020_v32  ;;  %v18828_v22 = vpop.eup %18827 }
 0xddc   : > { %17271 = vmatprep.mubr.msk.bf16.mxu0 %vm1921_vm3, %v5338_v37  ;;  %v4768_v49 = vpop.xlane.xlu1 %4767  ;;  %v4840_v50 = vmul.f32 %v18828_v22, %v21071_v30  ;;  %v5603_v30 = vand.u32 %v5361_v31, %v20357_v46 }
 0xddd   : > { %18837 = vrcp.f32 %v4768_v49  ;;  %17272 = vmatmul.mubr.msk.bf16.vlgmr.msra.gmra.mrb[124].mxu0 %vm1921_vm3, %v5339_v43  ;;  %v5365_v49 = vpack.c.bf16 %v21025_v1, %v21025_v1 }
 0xdde   : > { %v18830_v14 = vpop.eup %18829  ;;  %17284 = vmatpush3.bf16.msra.mxu0 %v21018_v15  ;;  %v5341_v55 = vpack.c.bf16 %v4840_v50, %v4840_v50 }
 0xddf   : > { %v18832_v0 = vpop.eup %18831  ;;  %17285 = vmatprep.subr.bf16.mxu0 %v5546_v42  ;;  %v4839_v36 = vmul.f32 %v18830_v14, %v21076_v45 }
 0xde0   : > { %v4780_v41 = vpop.xlane.xlu0 %4779  ;;  %v4838_v7 = vmul.f32 %v18832_v0, %v21078_v35 }
 0xde1   : > { %18839 = vrcp.f32 %v4780_v41 }
 0xde2   : > { %17286 = vmatpush3.bf16.msra.mxu0 %v5546_v42  ;;  %v5340_v51 = vpack.c.bf16 %v4839_v36, %v4838_v7  ;;  %v5367_v7 = vpack.c.bf16 %v21031_v58, %v21031_v58 }
 0xde3   : > { %17299 = vmatprep.subr.bf16.mxu0 %v21027_v56  ;;  %v4777_v44 = vpop.xlane.xlu1 %4776  ;;  %v18834_v15 = vpop.eup %18833 }
 0xde4   : > { %18841 = vrcp.f32 %v4777_v44  ;;  %v4774_v61 = vpop.xlane.xlu0 %4773  ;;  %17279 = vmatprep.mubr.msk.bf16.mxu1 %vm1921_vm3, %v5340_v51  ;;  %v18836_v45 = vpop.eup %18835  ;;  %v4843_v35 = vmul.f32 %v18834_v15, %v21086_v5  ;;  %v5660_v5 = vand.u32 %v5363_v13, %v20357_v46 }
 0xde5   : > { %18843 = vrcp.f32 %v4774_v61  ;;  %17280 = vmatmul.mubr.msk.bf16.vlgmr.msra.gmra.mrb[112].mxu1 %vm1921_vm3, %v5341_v55  ;;  %v4841_v29 = vmul.f32 %v18836_v45, %v21088_v54 }
 0xde6   : > { %17292 = vmatpush3.bf16.msra.mxu1 %v21020_v32  ;;  %v5343_v32 = vpack.c.bf16 %v4843_v35, %v4843_v35 }
 0xde7   : > { %v18838_v39 = vpop.eup %18837  ;;  %17293 = vmatprep.subr.bf16.mxu1 %v5603_v30 }
 0xde8   : > { %v4789_v17 = vpop.xlane.xlu1 %4788  ;;  %v4842_v34 = vmul.f32 %v18838_v39, %v21096_v23 }
 0xde9   : > { %v4783_v21 = vpop.xlane.xlu0 %4782  ;;  %18845 = vrcp.f32 %v4789_v17 }
 0xdea   : > { %17294 = vmatpush3.bf16.msra.mxu1 %v5603_v30  ;;  %v5342_v38 = vpack.c.bf16 %v4842_v34, %v4841_v29  ;;  %18847 = vrcp.f32 %v4783_v21 }
 0xdeb   : > { %17307 = vmatprep.subr.bf16.mxu1 %v21029_v59  ;;  %v18840_v2 = vpop.eup %18839 }
 0xdec   : > { %v4786_v37 = vpop.xlane.xlu1 %4785  ;;  %17287 = vmatprep.mubr.msk.bf16.mxu0 %vm1921_vm3, %v5342_v38  ;;  %v4846_v43 = vmul.f32 %v18840_v2, %v21101_v9  ;;  %v5717_v9 = vand.u32 %v5365_v49, %v20357_v46 }
 0xded   : > { %18849 = vrcp.f32 %v4786_v37  ;;  %17288 = vmatmul.mubr.msk.bf16.vlgmr.msra.gmra.mrb[128].mxu0 %vm1921_vm3, %v5343_v32 }
 0xdee   : > { %v18842_v54 = vpop.eup %18841  ;;  %17300 = vmatpush3.bf16.msra.mxu0 %v21027_v56  ;;  %v5345_v36 = vpack.c.bf16 %v4846_v43, %v4846_v43 }
 0xdef   : > { %v18844_v20 = vpop.eup %18843  ;;  %17301 = vmatprep.subr.bf16.mxu0 %v5660_v5  ;;  %v4845_v23 = vmul.f32 %v18842_v54, %v21105_v48 }
 0xdf0   : > { %v4844_v22 = vmul.f32 %v18844_v20, %v21108_v25 }
 0xdf1   : > { %v4792_v42 = vpop.xlane.xlu0 %4791 }
 0xdf2   : > { %18851 = vrcp.f32 %v4792_v42  ;;  %17302 = vmatpush3.bf16.msra.mxu0 %v5660_v5  ;;  %v5344_v14 = vpack.c.bf16 %v4845_v23, %v4844_v22 }
 0xdf3   : > { %17315 = vmatprep.subr.bf16.mxu0 %v21033_v40  ;;  %v4795_v0 = vpop.xlane.xlu1 %4794  ;;  %v18846_v56 = vpop.eup %18845 }
 0xdf4   : > { %18853 = vrcp.f32 %v4795_v0  ;;  %17295 = vmatprep.mubr.msk.bf16.mxu1 %vm1921_vm3, %v5344_v14  ;;  %v18848_v48 = vpop.eup %18847  ;;  %v4849_v25 = vmul.f32 %v18846_v56, %v21115_v24 }
 0xdf5   : > { %17296 = vmatmul.mubr.msk.bf16.vlgmr.msra.gmra.mrb[116].mxu1 %vm1921_vm3, %v5345_v36  ;;  %v4847_v50 = vmul.f32 %v18848_v48, %v21117_v27 }
 0xdf6   : > { %17308 = vmatpush3.bf16.msra.mxu1 %v21029_v59  ;;  %v5347_v55 = vpack.c.bf16 %v4849_v25, %v4849_v25  ;;  %v5774_v59 = vand.u32 %v5367_v7, %v20357_v46 }
 0xdf7   : > { %v18850_v1 = vpop.eup %18849  ;;  %17309 = vmatprep.subr.bf16.mxu1 %v5717_v9 }
 0xdf8   : > { %v4848_v41 = vmul.f32 %v18850_v1, %v21124_v57 }
 0xdf9   : > { %v4801_v31 = vpop.xlane.xlu0 %4800 }
 0xdfa   : > { %18855 = vrcp.f32 %v4801_v31  ;;  %17310 = vmatpush3.bf16.msra.mxu1 %v5717_v9  ;;  %v5346_v51 = vpack.c.bf16 %v4848_v41, %v4847_v50 }
 0xdfb   : > { %v4804_v44 = vpop.xlane.xlu1 %4803 }
 0xdfc   : > { %v18852_v15 = vpop.eup %18851  ;;  %18857 = vrcp.f32 %v4804_v44  ;;  %17303 = vmatprep.mubr.msk.bf16.mxu0 %vm1921_vm3, %v5346_v51 }
 0xdfd   : > { %v4798_v24 = vpop.xlane.xlu0 %4797  ;;  %17304 = vmatmul.mubr.msk.bf16.vlgmr.msra.gmra.mrb[132].mxu0 %vm1921_vm3, %v5347_v55  ;;  %v4850_v57 = vmul.f32 %v18852_v15, %v21130_v26 }
 0xdfe   : > { %v18854_v27 = vpop.eup %18853  ;;  %18859 = vrcp.f32 %v4798_v24  ;;  %17316 = vmatpush3.bf16.msra.mxu0 %v21033_v40 }
 0xdff   : > { %17317 = vmatprep.subr.bf16.mxu0 %v5774_v59  ;;  %v4807_v58 = vpop.xlane.xlu1 %4806  ;;  %v4851_v61 = vmul.f32 %v18854_v27, %v21135_v33 }
 0xe00   : > { %18861 = vrcp.f32 %v4807_v58 }
 0xe01   : > { %v5348_v45 = vpack.c.bf16 %v4851_v61, %v4850_v57 }
 0xe02   : > { %17318 = vmatpush3.bf16.msra.mxu0 %v5774_v59 }
 0xe03   : > { %17311 = vmatprep.mubr.msk.bf16.mxu1 %vm1921_vm3, %v5348_v45 }
 0xe04   : > { %v18856_v30 = vpop.eup %18855 }
 0xe05   : > { %v4853_v35 = vmul.f32 %v18856_v30, %v21139_v6 }
 0xe06   : > { %v18858_v39 = vpop.eup %18857 }
 0xe07   : > { %v4854_v17 = vmul.f32 %v18858_v39, %v21143_v16 }
 0xe08   : > { %v18860_v29 = vpop.eup %18859 }
 0xe09   : > { %v5350_v34 = vpack.c.bf16 %v4854_v17, %v4853_v35  ;;  %v4852_v40 = vmul.f32 %v18860_v29, %v21147_v52 }
 0xe0a   : > { %v18862_v13 = vpop.eup %18861 }
 0xe0b   : > { %17319 = vmatprep.mubr.msk.bf16.mxu0 %vm1921_vm3, %v5350_v34  ;;  %v5349_v26 = vpack.c.bf16 %v4852_v40, %v4852_v40  ;;  %v4855_v33 = vmul.f32 %v18862_v13, %v21151_v3 }
 0xe0d   : > { %17312 = vmatmul.mubr.msk.bf16.vlgmr.msra.gmra.mrb[120].mxu1 %vm1921_vm3, %v5349_v26  ;;  %v5351_v21 = vpack.c.bf16 %v4855_v33, %v4855_v33  ;;  %v21226_v26 = vld [vmem:[%s22825_s7 + $0x8] sm:$0x3f] }
 0xe0e   : > { %v5848_v33 = vrot.slane %v21226_v26, %v20576_v28 }
 0xe0f   : > { %17320 = vmatmul.mubr.msk.bf16.vlgmr.msra.gmra.mrb[136].mxu0 %vm1921_vm3, %v5351_v21 }
 0xea8   : > { %v17265_v38 = vpop.f32.mrb[108].mxu1 }
 0xea9   : > { %v5411_v32 = vpop.f32.mrb[109].mxu1 }
 0xeaa   : > { %v17266_v6 = vpop.f32.mrb[110].mxu1 }
 0xeab   : > { %v5414_v2 = vpop.f32.mrb[111].mxu1 }
 0xeb0   : > { %v17273_v16 = vpop.f32.mrb[124].mxu0 }
 0xeb1   : > { %v5826_v37 = vadd.f32 %v17273_v16, %v17265_v38  ;;  %v5468_v5 = vpop.f32.mrb[125].mxu0 }
 0xeb2   : > { %v5824_v54 = vadd.f32 %v5468_v5, %v5411_v32  ;;  %v17274_v52 = vpop.f32.mrb[126].mxu0 }
 0xeb3   : > { %v5471_v20 = vpop.f32.mrb[127].mxu0 }
 0xeb4   : > { %v5825_v23 = vadd.f32 %v5471_v20, %v5414_v2 }
 0xeb8   : > { %v17281_v43 = vpop.f32.mrb[112].mxu1 }
 0xeb9   : > { %v5525_v22 = vpop.f32.mrb[113].mxu1 }
 0xeba   : > { %v17282_v49 = vpop.f32.mrb[114].mxu1 }
 0xebb   : > { %v5528_v3 = vpop.f32.mrb[115].mxu1 }
 0xec0   : > { %v17289_v42 = vpop.f32.mrb[128].mxu0 }
 0xec1   : > { %v5829_v14 = vadd.f32 %v17289_v42, %v17281_v43  ;;  %v5582_v0 = vpop.f32.mrb[129].mxu0 }
 0xec2   : > { %v5827_v36 = vadd.f32 %v5582_v0, %v5525_v22  ;;  %v17290_v56 = vpop.f32.mrb[130].mxu0 }
 0xec3   : > { %v5838_v48 = vadd.f32 %v5829_v14, %v5826_v37  ;;  %v5585_v9 = vpop.f32.mrb[131].mxu0 }
 0xec4   : > { %v5836_v1 = vadd.f32 %v5827_v36, %v5824_v54  ;;  %v5828_v25 = vadd.f32 %v5585_v9, %v5528_v3 }
 0xec6   : > { %v5837_v50 = vadd.f32 %v5828_v25, %v5825_v23 }
 0xec8   : > { %v17297_v41 = vpop.f32.mrb[116].mxu1 }
 0xec9   : > { %v5639_v7 = vpop.f32.mrb[117].mxu1 }
 0xeca   : > { %v17298_v31 = vpop.f32.mrb[118].mxu1 }
 0xecb   : > { %v5642_v51 = vpop.f32.mrb[119].mxu1  ;;  %v18312_v31 = vld [vmem:[#allocation4 + $0x18] sm:$0xff]  }
 0xed0   : > { %v17305_v44 = vpop.f32.mrb[132].mxu0 }
 0xed1   : > { %v5832_v55 = vadd.f32 %v17305_v44, %v17297_v41  ;;  %v5696_v15 = vpop.f32.mrb[133].mxu0 }
 0xed2   : > { %v5830_v59 = vadd.f32 %v5696_v15, %v5639_v7  ;;  %v17306_v24 = vpop.f32.mrb[134].mxu0  ;;  %v18311_v7 = vld [vmem:[#allocation4 + $0x10] sm:$0xff]  }
 0xed3   : > { %v5699_v27 = vpop.f32.mrb[135].mxu0  ;;  %17323 = vmatprep.subr.bf16.mxu1 %v18311_v7 }
 0xed4   : > { %v5831_v58 = vadd.f32 %v5699_v27, %v5642_v51  ;;  %17324 = vmatpush3.bf16.msra.mxu1 %v18311_v7 }
 0xed5   : > { %17325 = vmatprep.subr.bf16.mxu1 %v18312_v31 }
 0xed8   : > { %17326 = vmatpush3.bf16.msra.mxu1 %v18312_v31 }
 0xee0   : > { %v17313_v57 = vpop.f32.mrb[120].mxu1 }
 0xee1   : > { %v5753_v61 = vpop.f32.mrb[121].mxu1 }
 0xee2   : > { %v17314_v45 = vpop.f32.mrb[122].mxu1  ;;  %v17321_v30 = vpop.f32.mrb[136].mxu0 }
 0xee3   : > { %v5835_v39 = vadd.f32 %v17321_v30, %v17313_v57  ;;  %v5756_v35 = vpop.f32.mrb[123].mxu1  ;;  %v5810_v17 = vpop.f32.mrb[137].mxu0 }
 0xee4   : > { %v5833_v29 = vadd.f32 %v5810_v17, %v5753_v61  ;;  %v17322_v34 = vpop.f32.mrb[138].mxu0  ;;  %v5897_v61 = vrot.slane %v21226_v26, %v20607_v53 }
 0xee5   : > { %v5841_v40 = vadd.f32 %v5835_v39, %v5832_v55  ;;  %v5813_v13 = vpop.f32.mrb[139].mxu0 }
 0xee6   : > { %v5839_v21 = vadd.f32 %v5833_v29, %v5830_v59  ;;  %v5834_v38 = vadd.f32 %v5813_v13, %v5756_v35  ;;  %v5904_v29 = vrot.slane %v21226_v26, %v20612_v18 }
 0xee7   : > { %v5844_v32 = vadd.f32 %v5841_v40, %v5838_v48 }
 0xee8   : > { %v5842_v6 = vadd.f32 %v5839_v21, %v5836_v1  ;;  %v5840_v2 = vadd.f32 %v5834_v38, %v5831_v58 }
 0xee9   : > { %v5851_v16 = vadd.f32 %v5848_v33, %v5844_v32 }
 0xeea   : > { %v5849_v37 = vadd.f32 %v5848_v33, %v5842_v6  ;;  %v5843_v5 = vadd.f32 %v5840_v2, %v5837_v50 }
 0xeeb   : > { %v21239_v43 = vadd.f32 %v5851_v16, %v20694_v47  ;;  %v18313_v16 = vld [vmem:[%s22887_s20 + $0x40] sm:$0xff]  }
 0xeec   : > { %v5850_v54 = vadd.f32 %v5848_v33, %v5843_v5  ;;  %v21231_v52 = vadd.f32 %v5849_v37, %v20691_v11  ;;  %17331 = vmatprep.subr.bf16.mxu0 %v18313_v16  ;;  %v18314_v37 = vld [vmem:[%s22887_s20 + $0x48] sm:$0xff]   ;;  %v18315_v5 = vld [vmem:[%s22887_s20 + $0x50] sm:$0xff]  }
 0xeed   : > { %v5861_v49 = vsel %vm772_vm1, %v21239_v43, 0.0  ;;  %17332 = vmatpush3.bf16.msra.mxu0 %v18313_v16 }
 0xeee   : > { %v5855_v20 = vsel %vm765_vm0, %v21231_v52, 0.0  ;;  %v21236_v23 = vadd.f32 %v5850_v54, %v20696_v10  ;;  %17333 = vmatprep.subr.bf16.mxu0 %v18314_v37  ;;  %v18316_v54 = vld [vmem:[%s22887_s20 + $0x58] sm:$0xff]  }
 0xeef   : > { %5856 = vadd.xlane.f32.xlu0 %v5855_v20  ;;  %v18317_v20 = vld [vmem:[%s22887_s20 + $0x60] sm:$0xff]  }
 0xef0   : > { %v5858_v22 = vsel %vm765_vm0, %v21236_v23, 0.0 }
 0xef1   : > { %5859 = vadd.xlane.f32.xlu1 %v5858_v22  ;;  %17334 = vmatpush3.bf16.msra.mxu0 %v18314_v37  ;;  %v18318_v22 = vld [vmem:[%s22887_s20 + $0x68] sm:$0xff]  }
 0xef2   : > { %17335 = vmatprep.subr.bf16.mxu0 %v18315_v5 }
 0xef3   : > { %5862 = vadd.xlane.f32.xlu0 %v5861_v49  ;;  %v18319_v49 = vld [vmem:[%s22887_s20 + $0x70] sm:$0xff]  }
 0xef5   : > { %17336 = vmatpush3.bf16.msra.mxu0 %v18315_v5 }
 0xef6   : > { %17337 = vmatprep.subr.bf16.mxu0 %v18316_v54 }
 0xef9   : > { %17338 = vmatpush3.bf16.msra.mxu0 %v18316_v54 }
 0xefa   : > { %17339 = vmatprep.subr.bf16.mxu0 %v18317_v20 }
 0xefd   : > { %17340 = vmatpush3.bf16.msra.mxu0 %v18317_v20 }
 0xefe   : > { %17341 = vmatprep.subr.bf16.mxu0 %v18318_v22 }
 0xf01   : > { %17342 = vmatpush3.bf16.msra.mxu0 %v18318_v22 }
 0xf02   : > { %17343 = vmatprep.subr.bf16.mxu0 %v18319_v49 }
 0xf05   : > { %17344 = vmatpush3.bf16.msra.mxu0 %v18319_v49 }
 0xf7c   : > { %v5857_v11 = vpop.xlane.xlu0 %5856 }
 0xf7d   : > { %v5864_v3 = vmul.f32 0.03125, %v5857_v11  ;;  %v18320_v11 = vld [vmem:[%s22887_s20 + $0x78] sm:$0xff]  }
 0xf7e   : > { %v5860_v42 = vpop.xlane.xlu1 %5859  ;;  %17345 = vmatprep.subr.bf16.mxu0 %v18320_v11 }
 0xf7f   : > { %v5867_v14 = vsub.f32 %v21231_v52, %v5864_v3  ;;  %v5865_v0 = vmul.f32 0.03125, %v5860_v42  ;;  %17346 = vmatpush3.bf16.msra.mxu0 %v18320_v11  ;;  %v15399_v3 = vld [vmem:[#allocation6 + $0x1] ss:$0 sm:$0xff] }
 0xf80   : > { %v5863_v10 = vpop.xlane.xlu0 %5862 }
 0xf81   : > { %v5868_v36 = vsub.f32 %v21236_v23, %v5865_v0  ;;  %v5866_v47 = vmul.f32 0.03125, %v5863_v10  ;;  %v5870_v56 = vmul.f32 %v5867_v14, %v5867_v14 }
 0xf83   : > { %v5869_v48 = vsub.f32 %v21239_v43, %v5866_v47  ;;  %v5873_v9 = vsel %vm765_vm0, %v5870_v56, 0.0  ;;  %v5871_v1 = vmul.f32 %v5868_v36, %v5868_v36 }
 0xf84   : > { %5874 = vadd.xlane.f32.xlu1 %v5873_v9 }
 0xf85   : > { %v5876_v25 = vsel %vm765_vm0, %v5871_v1, 0.0  ;;  %v5872_v50 = vmul.f32 %v5869_v48, %v5869_v48 }
 0xf86   : > { %5877 = vadd.xlane.f32.xlu0 %v5876_v25 }
 0xf87   : > { %v5879_v41 = vsel %vm772_vm1, %v5872_v50, 0.0 }
 0xf88   : > { %5880 = vadd.xlane.f32.xlu1 %v5879_v41 }
0x1011   : > { %v5875_v51 = vpop.xlane.xlu1 %5874 }
0x1012   : > { %v5882_v44 = vmul.f32 0.03125, %v5875_v51 }
0x1013   : > { %v5878_v55 = vpop.xlane.xlu0 %5877 }
0x1014   : > { %v5885_v15 = vadd.f32 1e-05, %v5882_v44  ;;  %v5883_v59 = vmul.f32 0.03125, %v5878_v55 }
0x1015   : > { %v5881_v24 = vpop.xlane.xlu1 %5880 }
0x1016   : > { %18863 = vrsqrt.f32 %v5885_v15  ;;  %v5886_v27 = vadd.f32 1e-05, %v5883_v59  ;;  %v5884_v58 = vmul.f32 0.03125, %v5881_v24 }
0x1018   : > { %18865 = vrsqrt.f32 %v5886_v27  ;;  %v5887_v57 = vadd.f32 1e-05, %v5884_v58 }
0x101a   : > { %18867 = vrsqrt.f32 %v5887_v57 }
0x1020   : > { %v18864_v45 = vpop.eup %18863 }
0x1021   : > { %v5891_v30 = vmul.f32 %v18864_v45, %v5867_v14 }
0x1022   : > { %v18866_v39 = vpop.eup %18865 }
0x1023   : > { %v5892_v35 = vmul.f32 %v18866_v39, %v5868_v36  ;;  %v5898_v17 = vmul.f32 %v5897_v61, %v5891_v30 }
0x1024   : > { %v18868_v34 = vpop.eup %18867 }
0x1025   : > { %v5893_v40 = vmul.f32 %v18868_v34, %v5869_v48  ;;  %v5899_v13 = vmul.f32 %v5897_v61, %v5892_v35  ;;  %v5905_v33 = vadd.f32 %v5904_v29, %v5898_v17 }
0x1027   : > { %v5906_v21 = vadd.f32 %v5904_v29, %v5899_v13  ;;  %v5900_v38 = vmul.f32 %v5897_v61, %v5893_v40 }
0x1029   : > { %v5913_v32 = vpack.c.bf16 %v5906_v21, %v5905_v33  ;;  %v5907_v6 = vadd.f32 %v5904_v29, %v5900_v38 }
0x102b   : > { %17327 = vmatprep.mubr.msk.bf16.mxu1 %vm765_vm0, %v5913_v32  ;;  %v5914_v2 = vpack.c.bf16 %v5907_v6, %v5907_v6 }
0x102d   : > { %17328 = vmatmul.mubr.msk.bf16.vlgmr.msra.gmra.mrb[124].mxu1 %vm765_vm0, %v5914_v2 }
0x1100   : > { %v17329_v42 = vpop.f32.mrb[124].mxu1 }
0x1101   : > { %v21281_v14 = vadd.f32 %v17329_v42, %v15399_v3  ;;  %v5975_v0 = vpop.f32.mrb[125].mxu1 }
0x1102   : > { %v21283_v10 = vadd.f32 %v15399_v3, %v5975_v0  ;;  %v17330_v36 = vpop.f32.mrb[126].mxu1 }
0x1103   : > { %v21286_v47 = vmul.f32 0.70710677, %v21281_v14  ;;  %v5978_v56 = vpop.f32.mrb[127].mxu1 }
0x1104   : > { %v21289_v48 = vmul.f32 0.70710677, %v21283_v10  ;;  %v21291_v9 = vadd.f32 %v15399_v3, %v5978_v56 }
0x1105   : > { %vm5997_vm8 = vcmp.ge.f32.partialorder %v21286_v47, 0.0  ;;  %v6000_v1 = vsub.f32 0.0, %v21286_v47 }
0x1106   : > { %vm5995_vm9 = vcmp.ge.f32.partialorder %v21289_v48, 0.0  ;;  %v5998_v25 = vsub.f32 0.0, %v21289_v48  ;;  %v21301_v41 = vmul.f32 0.70710677, %v21291_v9 }
0x1107   : > { %v6003_v50 = vsel %vm5997_vm8, %v21286_v47, %v6000_v1  ;;  %v5989_v47 = vmul.f32 0.5, %v21283_v10 }
0x1108   : > { %v6009_v7 = vmul.f32 0.3275911, %v6003_v50  ;;  %v6001_v31 = vsel %vm5995_vm9, %v21289_v48, %v5998_v25  ;;  %vm5996_vm10 = vcmp.ge.f32.partialorder %v21301_v41, 0.0  ;;  %v5999_v44 = vsub.f32 0.0, %v21301_v41 }
0x1109   : > { %v6007_v51 = vmul.f32 0.3275911, %v6001_v31  ;;  %v6048_v58 = vsub.f32 0.0, %v6003_v50  ;;  %v6046_v57 = vsub.f32 0.0, %v6001_v31 }
0x110a   : > { %v6012_v55 = vadd.f32 1.0, %v6009_v7  ;;  %v6002_v59 = vsel %vm5996_vm10, %v21301_v41, %v5999_v44  ;;  %v6194_v41 = vrot.slane %v21226_v26, %v20685_v60 }
0x110b   : > { %v6010_v15 = vadd.f32 1.0, %v6007_v51  ;;  %v6008_v24 = vmul.f32 0.3275911, %v6002_v59  ;;  %v6051_v45 = vmul.f32 %v6048_v58, %v6003_v50  ;;  %v6047_v30 = vsub.f32 0.0, %v6002_v59 }
0x110c   : > { %18869 = vrcp.f32 %v6012_v55  ;;  %v6049_v17 = vmul.f32 %v6046_v57, %v6001_v31 }
0x110d   : > { %18871 = vrcp.f32 %v6010_v15  ;;  %v6011_v27 = vadd.f32 1.0, %v6008_v24  ;;  %v6056_v13 = vmul.f32 1.442695, %v6051_v45  ;;  %v6050_v21 = vmul.f32 %v6047_v30, %v6002_v59 }
0x110e   : > { %v6052_v32 = vmul.f32 1.442695, %v6049_v17  ;;  %v22888_v45 = vmov -1.0  }
0x110f   : > { %18873 = vrcp.f32 %v6011_v27  ;;  %v6054_v54 = vmul.f32 1.442695, %v6050_v21  ;;  %v6006_v30 = vsel %vm5997_vm8, 1.0, %v22888_v45 }
0x1110   : > { %18875 = vpow2.f32 %v6056_v13 }
0x1111   : > { %18877 = vpow2.f32 %v6052_v32  ;;  %v5990_v32 = vmul.f32 0.5, %v21291_v9 }
0x1112   : > { %18879 = vpow2.f32 %v6054_v54 }
0x1116   : > { %v18870_v61 = vpop.eup %18869 }
0x1117   : > { %v18872_v39 = vpop.eup %18871  ;;  %v6021_v35 = vmul.f32 1.0614054, %v18870_v61 }
0x1118   : > { %v6019_v29 = vmul.f32 1.0614054, %v18872_v39 }
0x1119   : > { %v6024_v34 = vadd.f32 -1.4531521, %v6021_v35  ;;  %v18874_v40 = vpop.eup %18873 }
0x111a   : > { %v6022_v33 = vadd.f32 -1.4531521, %v6019_v29  ;;  %v6020_v6 = vmul.f32 1.0614054, %v18874_v40  ;;  %v18876_v51 = vpop.eup %18875 }
0x111b   : > { %v6027_v38 = vmul.f32 %v18870_v61, %v6024_v34  ;;  %v18878_v55 = vpop.eup %18877 }
0x111c   : > { %v6025_v2 = vmul.f32 %v18872_v39, %v6022_v33  ;;  %v6023_v37 = vadd.f32 -1.4531521, %v6020_v6  ;;  %v18880_v57 = vpop.eup %18879  ;;  %v6005_v33 = vsel %vm5996_vm10, 1.0, %v22888_v45 }
0x111d   : > { %v6030_v16 = vadd.f32 1.4214138, %v6027_v38  ;;  %v5991_v38 = vmul.f32 0.5, %v21281_v14 }
0x111e   : > { %v6028_v5 = vadd.f32 1.4214138, %v6025_v2  ;;  %v6026_v22 = vmul.f32 %v18874_v40, %v6023_v37 }
0x111f   : > { %v6033_v20 = vmul.f32 %v18870_v61, %v6030_v16 }
0x1120   : > { %v6031_v49 = vmul.f32 %v18872_v39, %v6028_v5  ;;  %v6029_v3 = vadd.f32 1.4214138, %v6026_v22 }
0x1121   : > { %v6036_v11 = vadd.f32 -0.28449672, %v6033_v20 }
0x1122   : > { %v6034_v42 = vadd.f32 -0.28449672, %v6031_v49  ;;  %v6032_v36 = vmul.f32 %v18874_v40, %v6029_v3 }
0x1123   : > { %v6039_v0 = vmul.f32 %v18870_v61, %v6036_v11 }
0x1124   : > { %v6037_v56 = vmul.f32 %v18872_v39, %v6034_v42  ;;  %v6035_v25 = vadd.f32 -0.28449672, %v6032_v36 }
0x1125   : > { %v6042_v1 = vadd.f32 0.2548296, %v6039_v0 }
0x1126   : > { %v6040_v50 = vadd.f32 0.2548296, %v6037_v56  ;;  %v6038_v31 = vmul.f32 %v18874_v40, %v6035_v25 }
0x1127   : > { %v6045_v7 = vmul.f32 %v18870_v61, %v6042_v1  ;;  %v6004_v61 = vsel %vm5995_vm9, 1.0, %v22888_v45 }
0x1128   : > { %v6043_v44 = vmul.f32 %v18872_v39, %v6040_v50  ;;  %v6041_v59 = vadd.f32 0.2548296, %v6038_v31 }
0x1129   : > { %v6060_v15 = vmul.f32 %v18876_v51, %v6045_v7 }
0x112a   : > { %v6058_v24 = vmul.f32 %v18878_v55, %v6043_v44  ;;  %v6044_v58 = vmul.f32 %v18874_v40, %v6041_v59 }
0x112b   : > { %v6063_v27 = vsub.f32 1.0, %v6060_v15 }
0x112c   : > { %v6061_v35 = vsub.f32 1.0, %v6058_v24  ;;  %v6059_v29 = vmul.f32 %v18880_v57, %v6044_v58  ;;  %v18322_v58 = vld [vmem:[%s22821_s3 + $0x140] sm:$0xff]   ;;  %v18323_v57 = vld [vmem:[%s22821_s3 + $0x108] sm:$0xff]  }
0x112d   : > { %v6066_v17 = vmul.f32 %v6063_v27, %v6006_v30  ;;  %v18321_v27 = vld [vmem:[%s22821_s3 + $0x100] sm:$0xff]   ;;  %17383 = vmatprep.subr.bf16.mxu0 %v18322_v58  ;;  %v18324_v30 = vld [vmem:[%s22821_s3 + $0x148] sm:$0xff]  }
0x112e   : > { %v6064_v34 = vmul.f32 %v6061_v35, %v6004_v61  ;;  %v6062_v39 = vsub.f32 1.0, %v6059_v29  ;;  %17351 = vmatprep.subr.bf16.mxu1 %v18321_v27  ;;  %v18325_v35 = vld [vmem:[%s22821_s3 + $0x110] sm:$0xff]  }
0x112f   : > { %v6069_v13 = vadd.f32 1.0, %v6066_v17  ;;  %17352 = vmatpush3.bf16.msra.mxu1 %v18321_v27  ;;  %v18326_v17 = vld [vmem:[%s22821_s3 + $0x160] sm:$0xff]  }
0x1130   : > { %v6067_v40 = vadd.f32 1.0, %v6064_v34  ;;  %v6065_v21 = vmul.f32 %v6062_v39, %v6005_v33  ;;  %17353 = vmatprep.subr.bf16.mxu1 %v18323_v57 }
0x1131   : > { %v6072_v2 = vmul.f32 %v6069_v13, %v5991_v38 }
0x1132   : > { %v6068_v6 = vadd.f32 1.0, %v6065_v21  ;;  %v6070_v48 = vmul.f32 %v6067_v40, %v5989_v47 }
0x1133   : > { %v6091_v5 = vpack.c.bf16 %v6072_v2, %v6072_v2  ;;  %17354 = vmatpush3.bf16.msra.mxu1 %v18323_v57 }
0x1134   : > { %v6071_v16 = vmul.f32 %v6068_v6, %v5990_v32  ;;  %17359 = vmatprep.subr.bf16.mxu1 %v18325_v35 }
0x1136   : > { %v6090_v37 = vpack.c.bf16 %v6071_v16, %v6070_v48 }
0x1138   : > { %17347 = vmatprep.mubr.bf16.mxu0 %v6090_v37 }
0x1139   : > { %17348 = vmatmul.mubr.bf16.vlgmr.msra.gmra.mrb[140].mxu0 %v6091_v5 }
0x113a   : > { %17384 = vmatpush3.bf16.msra.mxu0 %v18322_v58 }
0x113b   : > { %17385 = vmatprep.subr.bf16.mxu0 %v18324_v30 }
0x113e   : > { %17386 = vmatpush3.bf16.msra.mxu0 %v18324_v30 }
0x113f   : > { %17399 = vmatprep.subr.bf16.mxu0 %v18326_v17 }
0x120c   : > { %v17349_v54 = vpop.f32.mrb[140].mxu0 }
0x120d   : > { %v6174_v20 = vpop.f32.mrb[141].mxu0  ;;  %v6190_v22 = vadd.f32 %v17349_v54, %v21239_v43 }
0x120e   : > { %v6188_v14 = vadd.f32 %v6174_v20, %v21231_v52  ;;  %v17350_v10 = vpop.f32.mrb[142].mxu0 }
0x120f   : > { %v6177_v49 = vpop.f32.mrb[143].mxu0  ;;  %v21330_v3 = vadd.f32 %v6194_v41, %v6190_v22 }
0x1210   : > { %v21327_v9 = vadd.f32 %v6194_v41, %v6188_v14  ;;  %v6189_v11 = vadd.f32 %v6177_v49, %v21236_v23  ;;  %v18327_v49 = vld [vmem:[%s22821_s3 + $0x118] sm:$0xff]  }
0x1211   : > { %v6206_v52 = vsel %vm772_vm1, %v21330_v3, 0.0 }
0x1212   : > { %v21332_v42 = vadd.f32 %v6194_v41, %v6189_v11  ;;  %v6200_v0 = vsel %vm765_vm0, %v21327_v9, 0.0  ;;  %v18328_v11 = vld [vmem:[%s22821_s3 + $0x168] sm:$0xff]  }
0x1213   : > { %6201 = vadd.xlane.f32.xlu0 %v6200_v0  ;;  %v18329_v0 = vld [vmem:[%s22821_s3 + $0x120] sm:$0xff]  }
0x1214   : > { %v6203_v26 = vsel %vm765_vm0, %v21332_v42, 0.0 }
0x1215   : > { %6204 = vadd.xlane.f32.xlu1 %v6203_v26  ;;  %v6255_v26 = vmul.f32 %v20125_v12, %v20231_v63  ;;  %v18331_v63 = vld [vmem:[%s22821_s3 + $0x130] sm:$0xff]  }
0x1217   : > { %6207 = vadd.xlane.f32.xlu0 %v6206_v52  ;;  %v18330_v52 = vld [vmem:[%s22821_s3 + $0x128] sm:$0xff]  }
0x12a0   : > { %v6202_v43 = vpop.xlane.xlu0 %6201 }
0x12a1   : > { %v6209_v36 = vmul.f32 0.03125, %v6202_v43  ;;  %v6258_v43 = vadd.f32 %v6255_v26, %v20130_v19 }
0x12a2   : > { %v6205_v56 = vpop.xlane.xlu1 %6204 }
0x12a3   : > { %v6212_v23 = vsub.f32 %v21327_v9, %v6209_v36  ;;  %v6210_v1 = vmul.f32 0.03125, %v6205_v56  ;;  %v21399_v36 = vpack.c.bf16 %v6258_v43, %v6258_v43  ;;  %v21403_v56 = vsel %vm765_vm0, %v20242_v4, 0 }
0x12a4   : > { %v6208_v25 = vpop.xlane.xlu0 %6207 }
0x12a5   : > { %v6213_v50 = vsub.f32 %v21332_v42, %v6210_v1  ;;  %v6211_v7 = vmul.f32 0.03125, %v6208_v25  ;;  %v6215_v31 = vmul.f32 %v6212_v23, %v6212_v23  ;;  %v18333_v1 = vld [vmem:[%s22821_s3 + $0x150] sm:$0xff]   ;;  %v21418_v25 = vsel %vm765_vm0, %v21399_v36, 0 }
0x12a7   : > { %v6214_v51 = vsub.f32 %v21330_v3, %v6211_v7  ;;  %v6218_v44 = vsel %vm765_vm0, %v6215_v31, 0.0  ;;  %v6216_v55 = vmul.f32 %v6213_v50, %v6213_v50  ;;  %v18335_v7 = vld [vmem:[%s22821_s3 + $0x170] sm:$0xff]   ;;  %v18336_v31 = vld [vmem:[%s22821_s3 + $0x178] sm:$0xff]  }
0x12a8   : > { %6219 = vadd.xlane.f32.xlu1 %v6218_v44 }
0x12a9   : > { %v6221_v15 = vsel %vm765_vm0, %v6216_v55, 0.0  ;;  %v6217_v59 = vmul.f32 %v6214_v51, %v6214_v51 }
0x12aa   : > { %6222 = vadd.xlane.f32.xlu0 %v6221_v15 }
0x12ab   : > { %v6224_v24 = vsel %vm772_vm1, %v6217_v59, 0.0 }
0x12ac   : > { %6225 = vadd.xlane.f32.xlu1 %v6224_v24 }
0x1335   : > { %v6220_v61 = vpop.xlane.xlu1 %6219 }
0x1336   : > { %v6227_v29 = vmul.f32 0.03125, %v6220_v61 }
0x1337   : > { %v6223_v34 = vpop.xlane.xlu0 %6222 }
0x1338   : > { %v6230_v39 = vadd.f32 1e-05, %v6227_v29  ;;  %v6228_v13 = vmul.f32 0.03125, %v6223_v34 }
0x1339   : > { %v6226_v33 = vpop.xlane.xlu1 %6225 }
0x133a   : > { %18881 = vrsqrt.f32 %v6230_v39  ;;  %v6231_v40 = vadd.f32 1e-05, %v6228_v13  ;;  %v6229_v21 = vmul.f32 0.03125, %v6226_v33 }
0x133c   : > { %18883 = vrsqrt.f32 %v6231_v40  ;;  %v6232_v38 = vadd.f32 1e-05, %v6229_v21 }
0x133e   : > { %18885 = vrsqrt.f32 %v6232_v38 }
0x1344   : > { %v18882_v47 = vpop.eup %18881 }
0x1345   : > { %v6236_v32 = vmul.f32 %v18882_v47, %v6212_v23  ;;  %v18332_v23 = vld [vmem:[%s22821_s3 + $0x138] sm:$0xff]  }
0x1346   : > { %v18884_v6 = vpop.eup %18883 }
0x1347   : > { %v6243_v2 = vmul.f32 %v20125_v12, %v6236_v32  ;;  %v6237_v48 = vmul.f32 %v18884_v6, %v6213_v50  ;;  %v18334_v50 = vld [vmem:[%s22821_s3 + $0x158] sm:$0xff]  }
0x1348   : > { %v18886_v16 = vpop.eup %18885 }
0x1349   : > { %v6244_v37 = vmul.f32 %v20125_v12, %v6237_v48  ;;  %v6238_v5 = vmul.f32 %v18886_v16, %v6214_v51  ;;  %v6250_v54 = vadd.f32 %v20130_v19, %v6243_v2 }
0x134b   : > { %v6251_v41 = vadd.f32 %v20130_v19, %v6244_v37  ;;  %v6245_v20 = vmul.f32 %v20125_v12, %v6238_v5 }
0x134d   : > { %v6331_v22 = vpack.c.bf16 %v6251_v41, %v6250_v54  ;;  %v6252_v14 = vadd.f32 %v20130_v19, %v6245_v20 }
0x134f   : > { %v6332_v10 = vpack.c.bf16 %v6252_v14, %v6252_v14  ;;  %17355 = vmatprep.mubr.msk.bf16.mxu1 %vm765_vm0, %v6331_v22  ;;  %17387 = vmatprep.mubr.msk.bf16.mxu0 %vm765_vm0, %v6331_v22 }
0x1351   : > { %17356 = vmatmul.mubr.msk.bf16.vlgmr.msra.gmra.mrb[128].mxu1 %vm765_vm0, %v6332_v10  ;;  %17388 = vmatmul.mubr.msk.bf16.vlgmr.msra.gmra.mrb[144].mxu0 %vm765_vm0, %v6332_v10 }
0x1352   : > { %17360 = vmatpush3.bf16.msra.mxu1 %v18325_v35  ;;  %17400 = vmatpush3.bf16.msra.mxu0 %v18326_v17 }
0x1353   : > { %17363 = vmatprep.mubr.msk.bf16.mxu1 %vm765_vm0, %v6331_v22  ;;  %17403 = vmatprep.mubr.msk.bf16.mxu0 %vm765_vm0, %v6331_v22 }
0x1354   : > { %17361 = vmatprep.subr.bf16.mxu1 %v18327_v49  ;;  %17401 = vmatprep.subr.bf16.mxu0 %v18328_v11 }
0x1356   : > { %17362 = vmatpush3.bf16.msra.mxu1 %v18327_v49  ;;  %17402 = vmatpush3.bf16.msra.mxu0 %v18328_v11 }
0x1357   : > { %18075 = vmatprep.subr.msk.bf16.mxu0 %vm765_vm0, %v20242_v4  ;;  %17367 = vmatprep.subr.bf16.mxu1 %v18329_v0 }
0x1359   : > { %17364 = vmatmul.mubr.msk.bf16.vlgmr.msra.gmra.mrb[132].mxu1 %vm765_vm0, %v6332_v10  ;;  %17404 = vmatmul.mubr.msk.bf16.vlgmr.msra.gmra.mrb[148].mxu0 %vm765_vm0, %v6332_v10 }
0x135a   : > { %17368 = vmatpush3.bf16.msra.mxu1 %v18329_v0  ;;  %17371 = vmatprep.mubr.msk.bf16.mxu1 %vm765_vm0, %v6331_v22 }
0x135b   : > { %17369 = vmatprep.subr.bf16.mxu1 %v18330_v52 }
0x135e   : > { %17370 = vmatpush3.bf16.msra.mxu1 %v18330_v52 }
0x135f   : > { %17416 = vmatpush3.bf16.xpose.msra.mxu0 %v21403_v56  ;;  %17375 = vmatprep.subr.bf16.mxu1 %v18331_v63 }
0x1360   : > { %18076 = vmatprep.subr.msk.bf16.mxu0 %vm765_vm0, %v21399_v36 }
0x1361   : > { %17372 = vmatmul.mubr.msk.bf16.vlgmr.msra.gmra.mrb[136].mxu1 %vm765_vm0, %v6332_v10 }
0x1362   : > { %17376 = vmatpush3.bf16.msra.mxu1 %v18331_v63  ;;  %17379 = vmatprep.mubr.msk.bf16.mxu1 %vm765_vm0, %v6331_v22 }
0x1363   : > { %17377 = vmatprep.subr.bf16.mxu1 %v18332_v23 }
0x1366   : > { %17378 = vmatpush3.bf16.msra.mxu1 %v18332_v23 }
0x1367   : > { %17418 = vmatpush3.bf16.xpose.msra.mxu0 %v21418_v25  ;;  %17391 = vmatprep.subr.bf16.mxu1 %v18333_v1 }
0x1368   : > { %18079 = vmatprep.subr.msk.bf16.mxu0 %vm765_vm0, %v20242_v4 }
0x1369   : > { %17380 = vmatmul.mubr.msk.bf16.vlgmr.msra.gmra.mrb[140].mxu1 %vm765_vm0, %v6332_v10 }
0x136a   : > { %17392 = vmatpush3.bf16.msra.mxu1 %v18333_v1  ;;  %17395 = vmatprep.mubr.msk.bf16.mxu1 %vm765_vm0, %v6331_v22 }
0x136b   : > { %17393 = vmatprep.subr.bf16.mxu1 %v18334_v50 }
0x136e   : > { %17394 = vmatpush3.bf16.msra.mxu1 %v18334_v50 }
0x136f   : > { %17407 = vmatprep.subr.bf16.mxu1 %v18335_v7 }
0x1371   : > { %17396 = vmatmul.mubr.msk.bf16.vlgmr.msra.gmra.mrb[144].mxu1 %vm765_vm0, %v6332_v10 }
0x1372   : > { %17408 = vmatpush3.bf16.msra.mxu1 %v18335_v7  ;;  %17411 = vmatprep.mubr.msk.bf16.mxu1 %vm765_vm0, %v6331_v22 }
0x1373   : > { %17409 = vmatprep.subr.bf16.mxu1 %v18336_v31 }
0x1376   : > { %17410 = vmatpush3.bf16.msra.mxu1 %v18336_v31  ;;  %v18337_v31 = vld [vmem:[#allocation2 + $0x100] sm:$0xff]  }
0x1377   : > { %18077 = vmatprep.subr.msk.bf16.mxu1 %vm765_vm0, %v20242_v4 }
0x1379   : > { %17412 = vmatmul.mubr.msk.bf16.vlgmr.msra.gmra.mrb[148].mxu1 %vm765_vm0, %v6332_v10 }
0x137f   : > { %17424 = vmatpush3.bf16.xpose.msra.mxu1 %v21403_v56 }
0x1380   : > { %18078 = vmatprep.subr.msk.bf16.mxu1 %vm765_vm0, %v21399_v36 }
0x1387   : > { %17426 = vmatpush3.bf16.xpose.msra.mxu1 %v21418_v25 }
0x1388   : > { %18081 = vmatprep.subr.msk.bf16.mxu1 %vm765_vm0, %v20242_v4 }
0x1424   : > { %v17357_v51 = vpop.f32.mrb[128].mxu1  ;;  %v21445_v44 = vpop.f32.mrb[144].mxu0 }
0x1425   : > { %v6389_v55 = vpop.f32.mrb[129].mxu1  ;;  %v6629_v15 = vpop.f32.mrb[145].mxu0  ;;  %v6824_v35 = vpack.c.bf16 %v17357_v51, %v17357_v51  ;;  %v6832_v52 = vpack.c.bf16 %v21445_v44, %v21445_v44  ;;  %v22889_v51 = vld [vmem:[#allocation26_spill] sm:$0xff] }
0x1426   : > { %v17358_v59 = vpop.f32.mrb[130].mxu1  ;;  %v17390_v24 = vpop.f32.mrb[146].mxu0 }
0x1427   : > { %v6392_v27 = vpop.f32.mrb[131].mxu1  ;;  %v6632_v58 = vpop.f32.mrb[147].mxu0  ;;  %v22890_v59 = vld [vmem:[#allocation27_spill] sm:$0xff] }
0x1428   : > { %v6823_v57 = vpack.c.bf16 %v6392_v27, %v6389_v55  ;;  %v6831_v30 = vpack.c.bf16 %v6632_v58, %v6629_v15  ;;  %v18338_v55 = vld [vmem:[#allocation2 + $0x108] sm:$0xff]   ;;  %v18339_v15 = vld [vmem:[#allocation2 + $0x110] sm:$0xff]   ;;  %v18341_v27 = vld [vmem:[#allocation2 + $0x118] sm:$0xff]  }
0x1429   : > { %v18342_v58 = vld [vmem:[#allocation2 + $0x128] sm:$0xff]  }
0x142a   : > { %17419 = vmatprep.mubr.msk.bf16.mxu0 %vm765_vm0, %v6823_v57  ;;  %v18345_v57 = vld [vmem:[#allocation2 + $0x138] sm:$0xff]  }
0x142b   : > { %17420 = vmatmul.mubr.msk.bf16.vlgmr.msra.gmra.mrb[152].mxu0 %vm765_vm0, %v6824_v35  ;;  %v18347_v35 = vld [vmem:[#allocation2 + $0x150] sm:$0xff]  }
0x142c   : > { %17432 = vmatpush3.bf16.xpose.msra.mxu0 %v21403_v56  ;;  %v17365_v17 = vpop.f32.mrb[132].mxu1  ;;  %v21450_v61 = vpop.f32.mrb[148].mxu0 }
0x142d   : > { %18080 = vmatprep.subr.msk.bf16.mxu0 %vm765_vm0, %v21399_v36  ;;  %v6449_v29 = vpop.f32.mrb[133].mxu1  ;;  %v6749_v34 = vpop.f32.mrb[149].mxu0  ;;  %v6826_v47 = vpack.c.bf16 %v17365_v17, %v17365_v17  ;;  %v6836_v44 = vpack.c.bf16 %v21450_v61, %v21450_v61  ;;  %v18348_v17 = vld [vmem:[#allocation2 + $0x160] sm:$0xff]   ;;  %v18349_v61 = vld [vmem:[#allocation2 + $0x158] sm:$0xff]  }
0x142e   : > { %v17366_v39 = vpop.f32.mrb[134].mxu1  ;;  %v17406_v13 = vpop.f32.mrb[150].mxu0 }
0x142f   : > { %v6452_v33 = vpop.f32.mrb[135].mxu1  ;;  %v6752_v40 = vpop.f32.mrb[151].mxu0  ;;  %v18352_v39 = vld [vmem:[#allocation2 + $0x178] sm:$0xff]  }
0x1430   : > { %v6825_v21 = vpack.c.bf16 %v6452_v33, %v6449_v29  ;;  %v6835_v38 = vpack.c.bf16 %v6752_v40, %v6749_v34  ;;  %v18350_v29 = vld [vmem:[#allocation2 + $0x168] sm:$0xff]   ;;  %v18351_v34 = vld [vmem:[#allocation2 + $0x170] sm:$0xff]  }
0x1432   : > { %17427 = vmatprep.mubr.msk.bf16.mxu1 %vm765_vm0, %v6825_v21 }
0x1433   : > { %17428 = vmatmul.mubr.msk.bf16.vlgmr.msra.gmra.mrb[152].mxu1 %vm765_vm0, %v6826_v47 }
0x1434   : > { %17434 = vmatpush3.bf16.xpose.msra.mxu0 %v21418_v25  ;;  %17440 = vmatpush3.bf16.xpose.msra.mxu1 %v21403_v56  ;;  %v17373_v32 = vpop.f32.mrb[136].mxu1 }
0x1435   : > { %18082 = vmatprep.subr.msk.bf16.mxu1 %vm765_vm0, %v21399_v36  ;;  %18083 = vmatprep.subr.msk.bf16.mxu0 %vm765_vm0, %v20242_v4  ;;  %v6509_v6 = vpop.f32.mrb[137].mxu1  ;;  %v6828_v37 = vpack.c.bf16 %v17373_v32, %v17373_v32 }
0x1436   : > { %v17374_v2 = vpop.f32.mrb[138].mxu1 }
0x1437   : > { %v6512_v48 = vpop.f32.mrb[139].mxu1 }
0x1438   : > { %v6827_v16 = vpack.c.bf16 %v6512_v48, %v6509_v6 }
0x143a   : > { %17435 = vmatprep.mubr.msk.bf16.mxu0 %vm765_vm0, %v6827_v16 }
0x143b   : > { %17436 = vmatmul.mubr.msk.bf16.vlgmr.msra.gmra.mrb[156].mxu0 %vm765_vm0, %v6828_v37 }
0x143c   : > { %17442 = vmatpush3.bf16.xpose.msra.mxu1 %v21418_v25  ;;  %17448 = vmatpush3.bf16.xpose.msra.mxu0 %v21403_v56  ;;  %v17381_v5 = vpop.f32.mrb[140].mxu1 }
0x143d   : > { %18084 = vmatprep.subr.msk.bf16.mxu0 %vm765_vm0, %v21399_v36  ;;  %17451 = vmatprep.mubr.msk.bf16.mxu0 %vm765_vm0, %v6831_v30  ;;  %v6569_v54 = vpop.f32.mrb[141].mxu1  ;;  %v6830_v14 = vpack.c.bf16 %v17381_v5, %v17381_v5  ;;  %v18346_v30 = vld [vmem:[#allocation2 + $0x148] sm:$0xff]  }
0x143e   : > { %18085 = vmatprep.subr.msk.bf16.mxu1 %vm765_vm0, %v20242_v4  ;;  %v17382_v41 = vpop.f32.mrb[142].mxu1 }
0x143f   : > { %v6572_v20 = vpop.f32.mrb[143].mxu1 }
0x1440   : > { %v6829_v22 = vpack.c.bf16 %v6572_v20, %v6569_v54 }
0x1442   : > { %17443 = vmatprep.mubr.msk.bf16.mxu1 %vm765_vm0, %v6829_v22 }
0x1443   : > { %17444 = vmatmul.mubr.msk.bf16.vlgmr.msra.gmra.mrb[156].mxu1 %vm765_vm0, %v6830_v14 }
0x1444   : > { %17450 = vmatpush3.bf16.xpose.msra.mxu0 %v21418_v25  ;;  %17456 = vmatpush3.bf16.xpose.msra.mxu1 %v21403_v56  ;;  %v17397_v10 = vpop.f32.mrb[144].mxu1 }
0x1445   : > { %18086 = vmatprep.subr.msk.bf16.mxu1 %vm765_vm0, %v21399_v36  ;;  %18087 = vmatprep.subr.msk.bf16.mxu0 %vm765_vm0, %v20242_v4  ;;  %v6689_v49 = vpop.f32.mrb[145].mxu1  ;;  %v6834_v7 = vpack.c.bf16 %v17397_v10, %v17397_v10 }
0x1446   : > { %v17398_v11 = vpop.f32.mrb[146].mxu1 }
0x1447   : > { %v6692_v0 = vpop.f32.mrb[147].mxu1 }
0x1448   : > { %v6833_v26 = vpack.c.bf16 %v6692_v0, %v6689_v49 }
0x144a   : > { %17459 = vmatprep.mubr.msk.bf16.mxu1 %vm765_vm0, %v6833_v26 }
0x144b   : > { %17452 = vmatmul.mubr.msk.bf16.vlgmr.msra.gmra.mrb[160].mxu0 %vm765_vm0, %v6832_v52 }
0x144c   : > { %17458 = vmatpush3.bf16.xpose.msra.mxu1 %v21418_v25  ;;  %17464 = vmatpush3.bf16.xpose.msra.mxu0 %v21403_v56  ;;  %v17413_v43 = vpop.f32.mrb[148].mxu1 }
0x144d   : > { %17467 = vmatprep.mubr.msk.bf16.mxu0 %vm765_vm0, %v6835_v38  ;;  %18088 = vmatprep.subr.msk.bf16.mxu0 %vm765_vm0, %v21399_v36  ;;  %v6809_v63 = vpop.f32.mrb[149].mxu1  ;;  %v6838_v24 = vpack.c.bf16 %v17413_v43, %v17413_v43 }
0x144e   : > { %18089 = vmatprep.subr.msk.bf16.mxu1 %vm765_vm0, %v20242_v4  ;;  %v17414_v23 = vpop.f32.mrb[150].mxu1  ;;  %v6261_v4 = vmul.f32 %v20125_v12, %v22889_v51 }
0x144f   : > { %v6812_v1 = vpop.f32.mrb[151].mxu1 }
0x1450   : > { %v6837_v50 = vpack.c.bf16 %v6812_v1, %v6809_v63 }
0x1453   : > { %17460 = vmatmul.mubr.msk.bf16.vlgmr.msra.gmra.mrb[160].mxu1 %vm765_vm0, %v6834_v7 }
0x1454   : > { %17466 = vmatpush3.bf16.xpose.msra.mxu0 %v21418_v25  ;;  %17472 = vmatpush3.bf16.xpose.msra.mxu1 %v21403_v56  ;;  %v6264_v56 = vadd.f32 %v6261_v4, %v20130_v19  ;;  %v18343_v19 = vld [vmem:[#allocation2 + $0x130] sm:$0xff]  }
0x1455   : > { %17475 = vmatprep.mubr.msk.bf16.mxu1 %vm765_vm0, %v6837_v50  ;;  %18090 = vmatprep.subr.msk.bf16.mxu1 %vm765_vm0, %v21399_v36  ;;  %v18340_v36 = vld [vmem:[#allocation2 + $0x120] sm:$0xff]  }
0x1456   : > { %17479 = vmatprep.subr.bf16.mxu0 %v18337_v31  ;;  %v6336_v12 = vpack.c.bf16 %v6264_v56, %v6264_v56 }
0x145b   : > { %17468 = vmatmul.mubr.msk.bf16.vlgmr.msra.gmra.mrb[164].mxu0 %vm765_vm0, %v6836_v44 }
0x145c   : > { %17474 = vmatpush3.bf16.xpose.msra.mxu1 %v21418_v25  ;;  %17480 = vmatpush3.bf16.msra.mxu0 %v18337_v31  ;;  %v18344_v25 = vld [vmem:[#allocation2 + $0x140] sm:$0xff]  }
0x145d   : > { %17483 = vmatprep.mubr.msk.bf16.mxu0 %vm765_vm0, %v22890_v59  ;;  %17481 = vmatprep.subr.bf16.mxu0 %v18338_v55 }
0x145e   : > { %17487 = vmatprep.subr.bf16.mxu1 %v18339_v15 }
0x1460   : > { %17482 = vmatpush3.bf16.msra.mxu0 %v18338_v55 }
0x1461   : > { %17495 = vmatprep.subr.bf16.mxu0 %v18340_v36 }
0x1463   : > { %17476 = vmatmul.mubr.msk.bf16.vlgmr.msra.gmra.mrb[164].mxu1 %vm765_vm0, %v6838_v24  ;;  %17484 = vmatmul.mubr.msk.bf16.vlgmr.msra.gmra.mrb[168].mxu0 %vm765_vm0, %v6336_v12 }
0x1464   : > { %17488 = vmatpush3.bf16.msra.mxu1 %v18339_v15  ;;  %17491 = vmatprep.mubr.msk.bf16.mxu1 %vm765_vm0, %v22890_v59 }
0x1465   : > { %17496 = vmatpush3.bf16.msra.mxu0 %v18340_v36  ;;  %17499 = vmatprep.mubr.msk.bf16.mxu0 %vm765_vm0, %v22890_v59 }
0x1466   : > { %17489 = vmatprep.subr.bf16.mxu1 %v18341_v27  ;;  %17497 = vmatprep.subr.bf16.mxu0 %v18342_v58 }
0x1468   : > { %17490 = vmatpush3.bf16.msra.mxu1 %v18341_v27 }
0x1469   : > { %17498 = vmatpush3.bf16.msra.mxu0 %v18342_v58  ;;  %17503 = vmatprep.subr.bf16.mxu1 %v18343_v19 }
0x146a   : > { %17511 = vmatprep.subr.bf16.mxu0 %v18344_v25 }
0x146b   : > { %17492 = vmatmul.mubr.msk.bf16.vlgmr.msra.gmra.mrb[168].mxu1 %vm765_vm0, %v6336_v12 }
0x146c   : > { %17500 = vmatmul.mubr.msk.bf16.vlgmr.msra.gmra.mrb[172].mxu0 %vm765_vm0, %v6336_v12  ;;  %17504 = vmatpush3.bf16.msra.mxu1 %v18343_v19 }
0x146d   : > { %17507 = vmatprep.mubr.msk.bf16.mxu1 %vm765_vm0, %v22890_v59  ;;  %17512 = vmatpush3.bf16.msra.mxu0 %v18344_v25 }
0x146e   : > { %17515 = vmatprep.mubr.msk.bf16.mxu0 %vm765_vm0, %v22890_v59  ;;  %17505 = vmatprep.subr.bf16.mxu1 %v18345_v57 }
0x146f   : > { %17513 = vmatprep.subr.bf16.mxu0 %v18346_v30 }
0x1470   : > { %17506 = vmatpush3.bf16.msra.mxu1 %v18345_v57 }
0x1471   : > { %17514 = vmatpush3.bf16.msra.mxu0 %v18346_v30  ;;  %17519 = vmatprep.subr.bf16.mxu1 %v18347_v35 }
0x1472   : > { %17527 = vmatprep.subr.bf16.mxu0 %v18348_v17 }
0x1473   : > { %17508 = vmatmul.mubr.msk.bf16.vlgmr.msra.gmra.mrb[172].mxu1 %vm765_vm0, %v6336_v12 }
0x1474   : > { %17516 = vmatmul.mubr.msk.bf16.vlgmr.msra.gmra.mrb[176].mxu0 %vm765_vm0, %v6336_v12  ;;  %17520 = vmatpush3.bf16.msra.mxu1 %v18347_v35 }
0x1475   : > { %17523 = vmatprep.mubr.msk.bf16.mxu1 %vm765_vm0, %v22890_v59  ;;  %17528 = vmatpush3.bf16.msra.mxu0 %v18348_v17 }
0x1476   : > { %17531 = vmatprep.mubr.msk.bf16.mxu0 %vm765_vm0, %v22890_v59  ;;  %17521 = vmatprep.subr.bf16.mxu1 %v18349_v61 }
0x1477   : > { %17529 = vmatprep.subr.bf16.mxu0 %v18350_v29 }
0x1478   : > { %17522 = vmatpush3.bf16.msra.mxu1 %v18349_v61 }
0x1479   : > { %17530 = vmatpush3.bf16.msra.mxu0 %v18350_v29  ;;  %17535 = vmatprep.subr.bf16.mxu1 %v18351_v34 }
0x147b   : > { %17524 = vmatmul.mubr.msk.bf16.vlgmr.msra.gmra.mrb[176].mxu1 %vm765_vm0, %v6336_v12 }
0x147c   : > { %17532 = vmatmul.mubr.msk.bf16.vlgmr.msra.gmra.mrb[180].mxu0 %vm765_vm0, %v6336_v12  ;;  %17536 = vmatpush3.bf16.msra.mxu1 %v18351_v34 }
0x147d   : > { %17539 = vmatprep.mubr.msk.bf16.mxu1 %vm765_vm0, %v22890_v59  ;;  %17537 = vmatprep.subr.bf16.mxu1 %v18352_v39 }
0x1480   : > { %17538 = vmatpush3.bf16.msra.mxu1 %v18352_v39 }
0x1483   : > { %17540 = vmatmul.mubr.msk.bf16.vlgmr.msra.gmra.mrb[180].mxu1 %vm765_vm0, %v6336_v12 }
0x14fe   : > { %v21528_v13 = vpop.f32.mrb[152].mxu0 }
0x14ff   : > { %v21530_v33 = vpop.f32.mrb[153].mxu0  ;;  %v7283_v40 = vsel %vm1928_vm2, %v21528_v13, -inf }
0x1500   : > { %7284 = vmax.xlane.f32.xlu0 %v7283_v40  ;;  %v17422_v21 = vpop.f32.mrb[154].mxu0  ;;  %v7277_v32 = vsel %vm1921_vm3, %v21530_v33, -inf }
0x1501   : > { %v21534_v38 = vpop.f32.mrb[155].mxu0 }
0x1502   : > { %v7280_v47 = vsel %vm1921_vm3, %v21534_v38, -inf }
0x1503   : > { %7281 = vmax.xlane.f32.xlu1 %v7280_v47 }
0x1504   : > { %7278 = vmax.xlane.f32.xlu0 %v7277_v32 }
0x1506   : > { %v21540_v6 = vpop.f32.mrb[152].mxu1 }
0x1507   : > { %v21542_v2 = vpop.f32.mrb[153].mxu1  ;;  %v7292_v48 = vsel %vm1928_vm2, %v21540_v6, -inf }
0x1508   : > { %7293 = vmax.xlane.f32.xlu1 %v7292_v48  ;;  %v17430_v16 = vpop.f32.mrb[154].mxu1  ;;  %v7286_v37 = vsel %vm1921_vm3, %v21542_v2, -inf }
0x1509   : > { %7287 = vmax.xlane.f32.xlu0 %v7286_v37  ;;  %v21548_v5 = vpop.f32.mrb[155].mxu1 }
0x150a   : > { %v7289_v54 = vsel %vm1921_vm3, %v21548_v5, -inf }
0x150c   : > { %7290 = vmax.xlane.f32.xlu1 %v7289_v54 }
0x150e   : > { %v21552_v41 = vpop.f32.mrb[156].mxu0 }
0x150f   : > { %v21554_v20 = vpop.f32.mrb[157].mxu0  ;;  %v7301_v22 = vsel %vm1928_vm2, %v21552_v41, -inf }
0x1510   : > { %v17438_v14 = vpop.f32.mrb[158].mxu0  ;;  %7302 = vmax.xlane.f32.xlu0 %v7301_v22  ;;  %v7295_v11 = vsel %vm1921_vm3, %v21554_v20, -inf }
0x1511   : > { %v21558_v10 = vpop.f32.mrb[159].mxu0 }
0x1512   : > { %v7298_v49 = vsel %vm1921_vm3, %v21558_v10, -inf }
0x1513   : > { %7299 = vmax.xlane.f32.xlu1 %v7298_v49 }
0x1514   : > { %7296 = vmax.xlane.f32.xlu0 %v7295_v11 }
0x1516   : > { %v21564_v0 = vpop.f32.mrb[156].mxu1 }
0x1517   : > { %v21566_v26 = vpop.f32.mrb[157].mxu1  ;;  %v7310_v52 = vsel %vm1928_vm2, %v21564_v0, -inf }
0x1518   : > { %7311 = vmax.xlane.f32.xlu1 %v7310_v52  ;;  %v17446_v43 = vpop.f32.mrb[158].mxu1  ;;  %v7304_v63 = vsel %vm1921_vm3, %v21566_v26, -inf }
0x1519   : > { %7305 = vmax.xlane.f32.xlu0 %v7304_v63  ;;  %v21572_v23 = vpop.f32.mrb[159].mxu1 }
0x151a   : > { %v7307_v1 = vsel %vm1921_vm3, %v21572_v23, -inf }
0x151c   : > { %7308 = vmax.xlane.f32.xlu1 %v7307_v1 }
0x151e   : > { %v21576_v50 = vpop.f32.mrb[160].mxu0 }
0x151f   : > { %v21578_v7 = vpop.f32.mrb[161].mxu0  ;;  %v7319_v31 = vsel %vm1928_vm2, %v21576_v50, -inf }
0x1520   : > { %v17454_v51 = vpop.f32.mrb[162].mxu0  ;;  %7320 = vmax.xlane.f32.xlu0 %v7319_v31  ;;  %v7313_v55 = vsel %vm1921_vm3, %v21578_v7, -inf }
0x1521   : > { %v21582_v4 = vpop.f32.mrb[163].mxu0 }
0x1522   : > { %v7316_v44 = vsel %vm1921_vm3, %v21582_v4, -inf }
0x1523   : > { %7317 = vmax.xlane.f32.xlu1 %v7316_v44 }
0x1524   : > { %7314 = vmax.xlane.f32.xlu0 %v7313_v55 }
0x1526   : > { %v21588_v15 = vpop.f32.mrb[160].mxu1 }
0x1527   : > { %v21590_v56 = vpop.f32.mrb[161].mxu1  ;;  %v7328_v59 = vsel %vm1928_vm2, %v21588_v15, -inf }
0x1528   : > { %7329 = vmax.xlane.f32.xlu1 %v7328_v59  ;;  %v17462_v36 = vpop.f32.mrb[162].mxu1  ;;  %v7322_v12 = vsel %vm1921_vm3, %v21590_v56, -inf }
0x1529   : > { %7323 = vmax.xlane.f32.xlu0 %v7322_v12  ;;  %v21596_v24 = vpop.f32.mrb[163].mxu1 }
0x152a   : > { %v7325_v27 = vsel %vm1921_vm3, %v21596_v24, -inf }
0x152c   : > { %7326 = vmax.xlane.f32.xlu1 %v7325_v27 }
0x152e   : > { %v21600_v58 = vpop.f32.mrb[164].mxu0 }
0x152f   : > { %v21602_v19 = vpop.f32.mrb[165].mxu0  ;;  %v7337_v22 = vsel %vm1928_vm2, %v21600_v58, -inf }
0x1530   : > { %v17470_v25 = vpop.f32.mrb[166].mxu0  ;;  %v7331_v57 = vsel %vm1921_vm3, %v21602_v19, -inf }
0x1531   : > { %v21606_v30 = vpop.f32.mrb[167].mxu0  ;;  %7332 = vmax.xlane.f32.xlu0 %v7331_v57 }
0x1532   : > { %v7334_v35 = vsel %vm1921_vm3, %v21606_v30, -inf }
0x1533   : > { %7335 = vmax.xlane.f32.xlu1 %v7334_v35 }
0x1536   : > { %v21610_v17 = vpop.f32.mrb[164].mxu1  ;;  %v17485_v61 = vpop.f32.mrb[168].mxu0 }
0x1537   : > { %v21612_v29 = vpop.f32.mrb[165].mxu1  ;;  %v7593_v34 = vpop.f32.mrb[169].mxu0  ;;  %v8044_v39 = vpack.c.bf16 %v17485_v61, %v17485_v61  ;;  %v7346_v49 = vsel %vm1928_vm2, %v21610_v17, -inf }
0x1538   : > { %v17478_v40 = vpop.f32.mrb[166].mxu1  ;;  %v17486_v21 = vpop.f32.mrb[170].mxu0  ;;  %v7340_v47 = vsel %vm1921_vm3, %v21612_v29, -inf }
0x1539   : > { %v7596_v32 = vpop.f32.mrb[171].mxu0  ;;  %7341 = vmax.xlane.f32.xlu0 %v7340_v47  ;;  %v21616_v48 = vpop.f32.mrb[167].mxu1  ;;  %v8066_v54 = vand.u32 %v8044_v39, %v20357_v46 }
0x153a   : > { %v8043_v16 = vpack.c.bf16 %v7596_v32, %v7593_v34  ;;  %v7343_v37 = vsel %vm1921_vm3, %v21616_v48, -inf }
0x153b   : > { %7344 = vmax.xlane.f32.xlu1 %v7343_v37 }
0x153c   : > { %17543 = vmatprep.subr.bf16.mxu0 %v8043_v16 }
0x153d   : > { %17544 = vmatpush3.bf16.msra.mxu0 %v8043_v16  ;;  %7338 = vmax.xlane.f32.xlu0 %v7337_v22 }
0x153e   : > { %v17493_v14 = vpop.f32.mrb[168].mxu1  ;;  %17545 = vmatprep.subr.bf16.mxu0 %v8066_v54 }
0x153f   : > { %v21625_v11 = vpop.f32.mrb[172].mxu0  ;;  %v7653_v52 = vpop.f32.mrb[169].mxu1  ;;  %7347 = vmax.xlane.f32.xlu1 %v7346_v49  ;;  %v8046_v43 = vpack.c.bf16 %v17493_v14, %v17493_v14 }
0x1540   : > { %v7713_v63 = vpop.f32.mrb[173].mxu0  ;;  %v17494_v1 = vpop.f32.mrb[170].mxu1 }
0x1541   : > { %v17502_v31 = vpop.f32.mrb[174].mxu0  ;;  %v7656_v51 = vpop.f32.mrb[171].mxu1  ;;  %17546 = vmatpush3.bf16.msra.mxu0 %v8066_v54  ;;  %v8123_v36 = vand.u32 %v8046_v43, %v20357_v46 }
0x1542   : > { %v8045_v44 = vpack.c.bf16 %v7656_v51, %v7653_v52  ;;  %v7716_v55 = vpop.f32.mrb[175].mxu0 }
0x1543   : > { %v21627_v59 = vpack.c.bf16 %v7716_v55, %v7713_v63 }
0x1544   : > { %17551 = vmatprep.subr.bf16.mxu1 %v8045_v44 }
0x1545   : > { %17559 = vmatprep.subr.bf16.mxu0 %v21627_v59  ;;  %17552 = vmatpush3.bf16.msra.mxu1 %v8045_v44 }
0x1546   : > { %v21631_v12 = vpop.f32.mrb[172].mxu1  ;;  %17553 = vmatprep.subr.bf16.mxu1 %v8123_v36 }
0x1547   : > { %v21633_v27 = vpop.f32.mrb[176].mxu0  ;;  %v7773_v25 = vpop.f32.mrb[173].mxu1 }
0x1548   : > { %v7833_v57 = vpop.f32.mrb[177].mxu0  ;;  %v17510_v35 = vpop.f32.mrb[174].mxu1 }
0x1549   : > { %v17518_v61 = vpop.f32.mrb[178].mxu0  ;;  %v7776_v34 = vpop.f32.mrb[175].mxu1  ;;  %17554 = vmatpush3.bf16.msra.mxu1 %v8123_v36 }
0x154a   : > { %v21635_v39 = vpack.c.bf16 %v7776_v34, %v7773_v25  ;;  %v7836_v40 = vpop.f32.mrb[179].mxu0 }
0x154b   : > { %v21637_v21 = vpack.c.bf16 %v7836_v40, %v7833_v57 }
0x154c   : > { %17567 = vmatprep.subr.bf16.mxu1 %v21635_v39 }
0x154e   : > { %v21640_v47 = vpop.f32.mrb[176].mxu1 }
0x154f   : > { %v21642_v32 = vpop.f32.mrb[180].mxu0  ;;  %v7893_v16 = vpop.f32.mrb[177].mxu1 }
0x1550   : > { %v7953_v37 = vpop.f32.mrb[181].mxu0  ;;  %v17526_v54 = vpop.f32.mrb[178].mxu1 }
0x1551   : > { %v17534_v22 = vpop.f32.mrb[182].mxu0  ;;  %v7896_v14 = vpop.f32.mrb[179].mxu1 }
0x1552   : > { %v21644_v49 = vpack.c.bf16 %v7896_v14, %v7893_v16  ;;  %v7956_v52 = vpop.f32.mrb[183].mxu0 }
0x1553   : > { %v21646_v43 = vpack.c.bf16 %v7956_v52, %v7953_v37 }
0x1556   : > { %v21648_v63 = vpop.f32.mrb[180].mxu1 }
0x1557   : > { %v8013_v1 = vpop.f32.mrb[181].mxu1 }
0x1558   : > { %v17542_v31 = vpop.f32.mrb[182].mxu1 }
0x1559   : > { %v8016_v51 = vpop.f32.mrb[183].mxu1 }
0x155a   : > { %v21650_v44 = vpack.c.bf16 %v8016_v51, %v8013_v1 }
0x158d   : > { %v7285_v55 = vpop.xlane.xlu0 %7284 }
0x158e   : > { %v7351_v36 = vsub.f32 %v21528_v13, %v7285_v55 }
0x1590   : > { %v7377_v25 = vmul.f32 1.442695, %v7351_v36  ;;  %v7282_v57 = vpop.xlane.xlu1 %7281 }
0x1591   : > { %v7350_v35 = vsub.f32 %v21534_v38, %v7282_v57  ;;  %v7279_v61 = vpop.xlane.xlu0 %7278 }
0x1592   : > { %18887 = vpow2.f32 %v7377_v25  ;;  %v7349_v34 = vsub.f32 %v21530_v33, %v7279_v61 }
0x1593   : > { %v7375_v40 = vmul.f32 1.442695, %v7350_v35 }
0x1594   : > { %v7373_v16 = vmul.f32 1.442695, %v7349_v34 }
0x1595   : > { %18889 = vpow2.f32 %v7375_v40  ;;  %v7294_v37 = vpop.xlane.xlu1 %7293 }
0x1596   : > { %18891 = vpow2.f32 %v7373_v16  ;;  %v7354_v54 = vsub.f32 %v21540_v6, %v7294_v37  ;;  %v7288_v22 = vpop.xlane.xlu0 %7287 }
0x1597   : > { %v7352_v14 = vsub.f32 %v21542_v2, %v7288_v22 }
0x1598   : > { %v7383_v52 = vmul.f32 1.442695, %v7354_v54 }
0x1599   : > { %v7379_v13 = vmul.f32 1.442695, %v7352_v14  ;;  %v7291_v1 = vpop.xlane.xlu1 %7290 }
0x159a   : > { %18893 = vpow2.f32 %v7383_v52  ;;  %v7353_v38 = vsub.f32 %v21548_v5, %v7291_v1 }
0x159b   : > { %18895 = vpow2.f32 %v7379_v13 }
0x159c   : > { %v21658_v31 = vpop.eup %18887  ;;  %v7381_v33 = vmul.f32 1.442695, %v7353_v38 }
0x159d   : > { %v7303_v51 = vpop.xlane.xlu0 %7302  ;;  %v7427_v55 = vsel %vm1928_vm2, %v21658_v31, 0.0 }
0x159e   : > { %18897 = vpow2.f32 %v7381_v33  ;;  %v7357_v6 = vsub.f32 %v21552_v41, %v7303_v51  ;;  %7428 = vadd.xlane.f32.xlu0 %v7427_v55 }
0x159f   : > { %v21663_v36 = vpop.eup %18889 }
0x15a0   : > { %v21665_v2 = vpop.eup %18891  ;;  %v7389_v25 = vmul.f32 1.442695, %v7357_v6  ;;  %v7300_v57 = vpop.xlane.xlu1 %7299  ;;  %v7424_v5 = vsel %vm1921_vm3, %v21663_v36, 0.0 }
0x15a1   : > { %v7356_v35 = vsub.f32 %v21558_v10, %v7300_v57  ;;  %v7297_v61 = vpop.xlane.xlu0 %7296  ;;  %7425 = vadd.xlane.f32.xlu1 %v7424_v5  ;;  %v7421_v34 = vsel %vm1921_vm3, %v21665_v2, 0.0 }
0x15a2   : > { %18899 = vpow2.f32 %v7389_v25  ;;  %v7355_v41 = vsub.f32 %v21554_v20, %v7297_v61  ;;  %7422 = vadd.xlane.f32.xlu0 %v7421_v34 }
0x15a3   : > { %v7387_v40 = vmul.f32 1.442695, %v7356_v35 }
0x15a4   : > { %v21673_v16 = vpop.eup %18893  ;;  %v7385_v37 = vmul.f32 1.442695, %v7355_v41 }
0x15a5   : > { %v21675_v54 = vpop.eup %18895  ;;  %18901 = vpow2.f32 %v7387_v40  ;;  %v7312_v22 = vpop.xlane.xlu1 %7311  ;;  %v7436_v10 = vsel %vm1928_vm2, %v21673_v16, 0.0 }
0x15a6   : > { %18903 = vpow2.f32 %v7385_v37  ;;  %v7360_v14 = vsub.f32 %v21564_v0, %v7312_v22  ;;  %v7306_v52 = vpop.xlane.xlu0 %7305  ;;  %7437 = vadd.xlane.f32.xlu1 %v7436_v10  ;;  %v7430_v20 = vsel %vm1921_vm3, %v21675_v54, 0.0 }
0x15a7   : > { %v7358_v13 = vsub.f32 %v21566_v26, %v7306_v52  ;;  %7431 = vadd.xlane.f32.xlu0 %v7430_v20 }
0x15a8   : > { %v21683_v1 = vpop.eup %18897  ;;  %v7395_v38 = vmul.f32 1.442695, %v7360_v14 }
0x15a9   : > { %v7391_v33 = vmul.f32 1.442695, %v7358_v13  ;;  %v7309_v51 = vpop.xlane.xlu1 %7308  ;;  %v7433_v55 = vsel %vm1921_vm3, %v21683_v1, 0.0 }
0x15aa   : > { %18905 = vpow2.f32 %v7395_v38  ;;  %v7359_v6 = vsub.f32 %v21572_v23, %v7309_v51  ;;  %7434 = vadd.xlane.f32.xlu1 %v7433_v55 }
0x15ab   : > { %18907 = vpow2.f32 %v7391_v33 }
0x15ac   : > { %v21688_v0 = vpop.eup %18899  ;;  %v7393_v25 = vmul.f32 1.442695, %v7359_v6 }
0x15ad   : > { %v7321_v57 = vpop.xlane.xlu0 %7320  ;;  %v7445_v26 = vsel %vm1928_vm2, %v21688_v0, 0.0 }
0x15ae   : > { %18909 = vpow2.f32 %v7393_v25  ;;  %v7363_v5 = vsub.f32 %v21576_v50, %v7321_v57  ;;  %7446 = vadd.xlane.f32.xlu0 %v7445_v26 }
0x15af   : > { %v21693_v35 = vpop.eup %18901 }
0x15b0   : > { %v21695_v61 = vpop.eup %18903  ;;  %v7401_v34 = vmul.f32 1.442695, %v7363_v5  ;;  %v7318_v41 = vpop.xlane.xlu1 %7317  ;;  %v7442_v23 = vsel %vm1921_vm3, %v21693_v35, 0.0 }
0x15b1   : > { %v7362_v40 = vsub.f32 %v21582_v4, %v7318_v41  ;;  %v7315_v37 = vpop.xlane.xlu0 %7314  ;;  %7443 = vadd.xlane.f32.xlu1 %v7442_v23  ;;  %v7439_v22 = vsel %vm1921_vm3, %v21695_v61, 0.0 }
0x15b2   : > { %18911 = vpow2.f32 %v7401_v34  ;;  %v7361_v50 = vsub.f32 %v21578_v7, %v7315_v37  ;;  %7440 = vadd.xlane.f32.xlu0 %v7439_v22 }
0x15b3   : > { %v7399_v10 = vmul.f32 1.442695, %v7362_v40 }
0x15b4   : > { %v21703_v14 = vpop.eup %18905  ;;  %v7397_v52 = vmul.f32 1.442695, %v7361_v50 }
0x15b5   : > { %v21705_v20 = vpop.eup %18907  ;;  %18913 = vpow2.f32 %v7399_v10  ;;  %v7330_v13 = vpop.xlane.xlu1 %7329  ;;  %v7454_v4 = vsel %vm1928_vm2, %v21703_v14, 0.0 }
0x15b6   : > { %18915 = vpow2.f32 %v7397_v52  ;;  %v7366_v38 = vsub.f32 %v21588_v15, %v7330_v13  ;;  %v7324_v33 = vpop.xlane.xlu0 %7323  ;;  %7455 = vadd.xlane.f32.xlu1 %v7454_v4  ;;  %v7448_v7 = vsel %vm1921_vm3, %v21705_v20, 0.0 }
0x15b7   : > { %v7364_v51 = vsub.f32 %v21590_v56, %v7324_v33  ;;  %7449 = vadd.xlane.f32.xlu0 %v7448_v7 }
0x15b8   : > { %v21713_v55 = vpop.eup %18909  ;;  %v7407_v6 = vmul.f32 1.442695, %v7366_v38 }
0x15b9   : > { %v7403_v25 = vmul.f32 1.442695, %v7364_v51  ;;  %v7327_v57 = vpop.xlane.xlu1 %7326  ;;  %v7451_v26 = vsel %vm1921_vm3, %v21713_v55, 0.0 }
0x15ba   : > { %18917 = vpow2.f32 %v7407_v6  ;;  %v7365_v5 = vsub.f32 %v21596_v24, %v7327_v57  ;;  %7452 = vadd.xlane.f32.xlu1 %v7451_v26 }
0x15bb   : > { %18919 = vpow2.f32 %v7403_v25 }
0x15bc   : > { %v21718_v15 = vpop.eup %18911  ;;  %v7405_v34 = vmul.f32 1.442695, %v7365_v5 }
0x15bd   : > { %v7463_v56 = vsel %vm1928_vm2, %v21718_v15, 0.0 }
0x15be   : > { %18921 = vpow2.f32 %v7405_v34  ;;  %v7333_v41 = vpop.xlane.xlu0 %7332  ;;  %7464 = vadd.xlane.f32.xlu0 %v7463_v56 }
0x15bf   : > { %v21722_v23 = vpop.eup %18913  ;;  %v7367_v40 = vsub.f32 %v21602_v19, %v7333_v41 }
0x15c0   : > { %v21725_v37 = vpop.eup %18915  ;;  %v7336_v22 = vpop.xlane.xlu1 %7335  ;;  %v7460_v24 = vsel %vm1921_vm3, %v21722_v23, 0.0 }
0x15c1   : > { %v7409_v50 = vmul.f32 1.442695, %v7367_v40  ;;  %v7368_v10 = vsub.f32 %v21606_v30, %v7336_v22  ;;  %7461 = vadd.xlane.f32.xlu1 %v7460_v24  ;;  %v7457_v52 = vsel %vm1921_vm3, %v21725_v37, 0.0 }
0x15c2   : > { %7458 = vadd.xlane.f32.xlu0 %v7457_v52 }
0x15c3   : > { %18923 = vpow2.f32 %v7409_v50  ;;  %v7411_v13 = vmul.f32 1.442695, %v7368_v10 }
0x15c4   : > { %v21732_v4 = vpop.eup %18917 }
0x15c5   : > { %v21734_v38 = vpop.eup %18919  ;;  %18925 = vpow2.f32 %v7411_v13  ;;  %v7472_v19 = vsel %vm1928_vm2, %v21732_v4, 0.0 }
0x15c6   : > { %v7342_v33 = vpop.xlane.xlu0 %7341  ;;  %7473 = vadd.xlane.f32.xlu1 %v7472_v19  ;;  %v7466_v30 = vsel %vm1921_vm3, %v21734_v38, 0.0 }
0x15c7   : > { %v7370_v7 = vsub.f32 %v21612_v29, %v7342_v33  ;;  %7467 = vadd.xlane.f32.xlu0 %v7466_v30 }
0x15c8   : > { %v21741_v51 = vpop.eup %18921  ;;  %v7345_v6 = vpop.xlane.xlu1 %7344 }
0x15c9   : > { %v7415_v25 = vmul.f32 1.442695, %v7370_v7  ;;  %v7371_v57 = vsub.f32 %v21616_v48, %v7345_v6  ;;  %v7469_v26 = vsel %vm1921_vm3, %v21741_v51, 0.0 }
0x15ca   : > { %v7339_v5 = vpop.xlane.xlu0 %7338  ;;  %7470 = vadd.xlane.f32.xlu1 %v7469_v26 }
0x15cb   : > { %18927 = vpow2.f32 %v7415_v25  ;;  %v7417_v34 = vmul.f32 1.442695, %v7371_v57  ;;  %v7369_v56 = vsub.f32 %v21600_v58, %v7339_v5 }
0x15cc   : > { %v7348_v41 = vpop.xlane.xlu1 %7347 }
0x15cd   : > { %v21747_v40 = vpop.eup %18923  ;;  %18929 = vpow2.f32 %v7417_v34  ;;  %v7413_v29 = vmul.f32 1.442695, %v7369_v56  ;;  %v7372_v22 = vsub.f32 %v21610_v17, %v7348_v41 }
0x15ce   : > { %v7475_v24 = vsel %vm1921_vm3, %v21747_v40, 0.0 }
0x15cf   : > { %v21752_v48 = vpop.eup %18925  ;;  %18931 = vpow2.f32 %v7413_v29  ;;  %v7419_v50 = vmul.f32 1.442695, %v7372_v22  ;;  %7476 = vadd.xlane.f32.xlu0 %v7475_v24 }
0x15d0   : > { %v7478_v10 = vsel %vm1921_vm3, %v21752_v48, 0.0 }
0x15d1   : > { %18933 = vpow2.f32 %v7419_v50  ;;  %7479 = vadd.xlane.f32.xlu1 %v7478_v10 }
0x15d5   : > { %v21756_v58 = vpop.eup %18927 }
0x15d6   : > { %v7484_v52 = vsel %vm1921_vm3, %v21756_v58, 0.0 }
0x15d7   : > { %v21760_v13 = vpop.eup %18929  ;;  %7485 = vadd.xlane.f32.xlu0 %v7484_v52  ;;  %v8048_v52 = vpack.c.bf16 %v21625_v11, %v21625_v11 }
0x15d8   : > { %v7487_v17 = vsel %vm1921_vm3, %v21760_v13, 0.0 }
0x15d9   : > { %v21764_v19 = vpop.eup %18931  ;;  %7488 = vadd.xlane.f32.xlu1 %v7487_v17 }
0x15da   : > { %v7481_v33 = vsel %vm1928_vm2, %v21764_v19, 0.0 }
0x15db   : > { %v21768_v30 = vpop.eup %18933  ;;  %7482 = vadd.xlane.f32.xlu0 %v7481_v33 }
0x15dc   : > { %v7490_v7 = vsel %vm1928_vm2, %v21768_v30, 0.0 }
0x15dd   : > { %7491 = vadd.xlane.f32.xlu1 %v7490_v7 }
0x162b   : > { %v7429_v6 = vpop.xlane.xlu0 %7428 }
0x162c   : > { %18935 = vrcp.f32 %v7429_v6 }
0x162e   : > { %v7426_v25 = vpop.xlane.xlu1 %7425 }
0x162f   : > { %18937 = vrcp.f32 %v7426_v25  ;;  %v7423_v57 = vpop.xlane.xlu0 %7422 }
0x1630   : > { %18939 = vrcp.f32 %v7423_v57 }
0x1633   : > { %v7438_v26 = vpop.xlane.xlu1 %7437 }
0x1634   : > { %v7432_v5 = vpop.xlane.xlu0 %7431  ;;  %18941 = vrcp.f32 %v7438_v26 }
0x1635   : > { %18943 = vrcp.f32 %v7432_v5 }
0x1636   : > { %v18936_v34 = vpop.eup %18935 }
0x1637   : > { %v7435_v56 = vpop.xlane.xlu1 %7434  ;;  %v7519_v22 = vmul.f32 %v18936_v34, %v21658_v31  ;;  %v8180_v31 = vand.u32 %v8048_v52, %v20357_v46  ;;  %v8050_v34 = vpack.c.bf16 %v21631_v12, %v21631_v12  ;;  %v8052_v52 = vpack.c.bf16 %v21633_v27, %v21633_v27 }
0x1638   : > { %18945 = vrcp.f32 %v7435_v56 }
0x1639   : > { %v18938_v41 = vpop.eup %18937  ;;  %v8028_v7 = vpack.c.bf16 %v7519_v22, %v7519_v22  ;;  %v8237_v22 = vand.u32 %v8050_v34, %v20357_v46 }
0x163a   : > { %v18940_v29 = vpop.eup %18939  ;;  %v7518_v24 = vmul.f32 %v18938_v41, %v21663_v36 }
0x163b   : > { %v7447_v50 = vpop.xlane.xlu0 %7446  ;;  %v7517_v10 = vmul.f32 %v18940_v29, %v21665_v2 }
0x163c   : > { %18947 = vrcp.f32 %v7447_v50 }
0x163d   : > { %v8027_v17 = vpack.c.bf16 %v7518_v24, %v7517_v10 }
0x163e   : > { %v7444_v33 = vpop.xlane.xlu1 %7443  ;;  %v18942_v6 = vpop.eup %18941 }
0x163f   : > { %18949 = vrcp.f32 %v7444_v33  ;;  %v7441_v25 = vpop.xlane.xlu0 %7440  ;;  %17547 = vmatprep.mubr.msk.bf16.mxu0 %vm1921_vm3, %v8027_v17  ;;  %v18944_v57 = vpop.eup %18943  ;;  %v7522_v11 = vmul.f32 %v18942_v6, %v21673_v16 }
0x1640   : > { %18951 = vrcp.f32 %v7441_v25  ;;  %17548 = vmatmul.mubr.msk.bf16.vlgmr.msra.gmra.mrb[184].mxu0 %vm1921_vm3, %v8028_v7  ;;  %v7520_v26 = vmul.f32 %v18944_v57, %v21675_v54 }
0x1641   : > { %17560 = vmatpush3.bf16.msra.mxu0 %v21627_v59  ;;  %v8030_v59 = vpack.c.bf16 %v7522_v11, %v7522_v11 }
0x1642   : > { %v18946_v36 = vpop.eup %18945  ;;  %17561 = vmatprep.subr.bf16.mxu0 %v8180_v31 }
0x1643   : > { %v7456_v2 = vpop.xlane.xlu1 %7455  ;;  %v7521_v5 = vmul.f32 %v18946_v36, %v21683_v1  ;;  %v8054_v36 = vpack.c.bf16 %v21640_v47, %v21640_v47 }
0x1644   : > { %v7450_v56 = vpop.xlane.xlu0 %7449  ;;  %18953 = vrcp.f32 %v7456_v2 }
0x1645   : > { %17562 = vmatpush3.bf16.msra.mxu0 %v8180_v31  ;;  %v8029_v41 = vpack.c.bf16 %v7521_v5, %v7520_v26  ;;  %18955 = vrcp.f32 %v7450_v56 }
0x1646   : > { %17575 = vmatprep.subr.bf16.mxu0 %v21637_v21  ;;  %v18948_v29 = vpop.eup %18947 }
0x1647   : > { %17555 = vmatprep.mubr.msk.bf16.mxu1 %vm1921_vm3, %v8029_v41  ;;  %v7453_v16 = vpop.xlane.xlu1 %7452  ;;  %v7525_v1 = vmul.f32 %v18948_v29, %v21688_v0  ;;  %v8056_v41 = vpack.c.bf16 %v21642_v32, %v21642_v32 }
0x1648   : > { %18957 = vrcp.f32 %v7453_v16  ;;  %17556 = vmatmul.mubr.msk.bf16.vlgmr.msra.gmra.mrb[184].mxu1 %vm1921_vm3, %v8030_v59 }
0x1649   : > { %v18950_v54 = vpop.eup %18949  ;;  %17568 = vmatpush3.bf16.msra.mxu1 %v21635_v39  ;;  %v8032_v7 = vpack.c.bf16 %v7525_v1, %v7525_v1  ;;  %v8058_v1 = vpack.c.bf16 %v21648_v63, %v21648_v63 }
0x164a   : > { %v18952_v12 = vpop.eup %18951  ;;  %17569 = vmatprep.subr.bf16.mxu1 %v8237_v22  ;;  %v7524_v24 = vmul.f32 %v18950_v54, %v21693_v35  ;;  %v8294_v35 = vand.u32 %v8052_v52, %v20357_v46 }
0x164b   : > { %v7465_v50 = vpop.xlane.xlu0 %7464  ;;  %v7523_v10 = vmul.f32 %v18952_v12, %v21695_v61 }
0x164c   : > { %18959 = vrcp.f32 %v7465_v50 }
0x164d   : > { %17570 = vmatpush3.bf16.msra.mxu1 %v8237_v22  ;;  %v8031_v17 = vpack.c.bf16 %v7524_v24, %v7523_v10 }
0x164e   : > { %17583 = vmatprep.subr.bf16.mxu1 %v21644_v49  ;;  %v7462_v33 = vpop.xlane.xlu1 %7461  ;;  %v18954_v39 = vpop.eup %18953 }
0x164f   : > { %18961 = vrcp.f32 %v7462_v33  ;;  %v7459_v6 = vpop.xlane.xlu0 %7458  ;;  %17563 = vmatprep.mubr.msk.bf16.mxu0 %vm1921_vm3, %v8031_v17  ;;  %v18956_v0 = vpop.eup %18955  ;;  %v7528_v61 = vmul.f32 %v18954_v39, %v21703_v14  ;;  %v8351_v14 = vand.u32 %v8054_v36, %v20357_v46 }
0x1650   : > { %18963 = vrcp.f32 %v7459_v6  ;;  %17564 = vmatmul.mubr.msk.bf16.vlgmr.msra.gmra.mrb[188].mxu0 %vm1921_vm3, %v8032_v7  ;;  %v7526_v57 = vmul.f32 %v18956_v0, %v21705_v20 }
0x1651   : > { %17576 = vmatpush3.bf16.msra.mxu0 %v21637_v21  ;;  %v8034_v21 = vpack.c.bf16 %v7528_v61, %v7528_v61 }
0x1652   : > { %v18958_v27 = vpop.eup %18957  ;;  %17577 = vmatprep.subr.bf16.mxu0 %v8294_v35 }
0x1653   : > { %v7474_v25 = vpop.xlane.xlu1 %7473  ;;  %v7527_v31 = vmul.f32 %v18958_v27, %v21713_v55 }
0x1654   : > { %v7468_v11 = vpop.xlane.xlu0 %7467  ;;  %18965 = vrcp.f32 %v7474_v25 }
0x1655   : > { %17578 = vmatpush3.bf16.msra.mxu0 %v8294_v35  ;;  %v8033_v2 = vpack.c.bf16 %v7527_v31, %v7526_v57  ;;  %18967 = vrcp.f32 %v7468_v11 }
0x1656   : > { %17591 = vmatprep.subr.bf16.mxu0 %v21646_v43  ;;  %v18960_v26 = vpop.eup %18959 }
0x1657   : > { %v7471_v5 = vpop.xlane.xlu1 %7470  ;;  %17571 = vmatprep.mubr.msk.bf16.mxu1 %vm1921_vm3, %v8033_v2  ;;  %v7531_v55 = vmul.f32 %v18960_v26, %v21718_v15 }
0x1658   : > { %18969 = vrcp.f32 %v7471_v5  ;;  %17572 = vmatmul.mubr.msk.bf16.vlgmr.msra.gmra.mrb[188].mxu1 %vm1921_vm3, %v8034_v21 }
0x1659   : > { %v18962_v20 = vpop.eup %18961  ;;  %17584 = vmatpush3.bf16.msra.mxu1 %v21644_v49  ;;  %v8036_v22 = vpack.c.bf16 %v7531_v55, %v7531_v55 }
0x165a   : > { %v18964_v47 = vpop.eup %18963  ;;  %17585 = vmatprep.subr.bf16.mxu1 %v8351_v14  ;;  %v7530_v34 = vmul.f32 %v18962_v20, %v21722_v23  ;;  %v8408_v23 = vand.u32 %v8056_v41, %v20357_v46 }
0x165b   : > { %v7529_v56 = vmul.f32 %v18964_v47, %v21725_v37 }
0x165c   : > { %v7477_v59 = vpop.xlane.xlu0 %7476 }
0x165d   : > { %18971 = vrcp.f32 %v7477_v59  ;;  %17586 = vmatpush3.bf16.msra.mxu1 %v8351_v14  ;;  %v8035_v29 = vpack.c.bf16 %v7530_v34, %v7529_v56 }
0x165e   : > { %17599 = vmatprep.subr.bf16.mxu1 %v21650_v44  ;;  %v7480_v16 = vpop.xlane.xlu1 %7479  ;;  %v18966_v49 = vpop.eup %18965 }
0x165f   : > { %18973 = vrcp.f32 %v7480_v16  ;;  %17579 = vmatprep.mubr.msk.bf16.mxu0 %vm1921_vm3, %v8035_v29  ;;  %v18968_v15 = vpop.eup %18967  ;;  %v7534_v37 = vmul.f32 %v18966_v49, %v21732_v4 }
0x1660   : > { %17580 = vmatmul.mubr.msk.bf16.vlgmr.msra.gmra.mrb[192].mxu0 %vm1921_vm3, %v8036_v22  ;;  %v7532_v54 = vmul.f32 %v18968_v15, %v21734_v38 }
0x1661   : > { %17592 = vmatpush3.bf16.msra.mxu0 %v21646_v43  ;;  %v8038_v52 = vpack.c.bf16 %v7534_v37, %v7534_v37  ;;  %v8465_v43 = vand.u32 %v8058_v1, %v20357_v46 }
0x1662   : > { %v18970_v32 = vpop.eup %18969  ;;  %17593 = vmatprep.subr.bf16.mxu0 %v8408_v23 }
0x1663   : > { %v7533_v12 = vmul.f32 %v18970_v32, %v21741_v51 }
0x1664   : > { %v7486_v24 = vpop.xlane.xlu0 %7485 }
0x1665   : > { %18975 = vrcp.f32 %v7486_v24  ;;  %17594 = vmatpush3.bf16.msra.mxu0 %v8408_v23  ;;  %v8037_v50 = vpack.c.bf16 %v7533_v12, %v7532_v54 }
0x1666   : > { %v7489_v10 = vpop.xlane.xlu1 %7488 }
0x1667   : > { %v18972_v17 = vpop.eup %18971  ;;  %18977 = vrcp.f32 %v7489_v10  ;;  %17587 = vmatprep.mubr.msk.bf16.mxu1 %vm1921_vm3, %v8037_v50 }
0x1668   : > { %v7483_v4 = vpop.xlane.xlu0 %7482  ;;  %17588 = vmatmul.mubr.msk.bf16.vlgmr.msra.gmra.mrb[192].mxu1 %vm1921_vm3, %v8038_v52  ;;  %v7535_v51 = vmul.f32 %v18972_v17, %v21747_v40 }
0x1669   : > { %v18974_v38 = vpop.eup %18973  ;;  %18979 = vrcp.f32 %v7483_v4  ;;  %17600 = vmatpush3.bf16.msra.mxu1 %v21650_v44 }
0x166a   : > { %17601 = vmatprep.subr.bf16.mxu1 %v8465_v43  ;;  %v7492_v63 = vpop.xlane.xlu1 %7491  ;;  %v7536_v33 = vmul.f32 %v18974_v38, %v21752_v48 }
0x166b   : > { %18981 = vrcp.f32 %v7492_v63 }
0x166c   : > { %v8039_v7 = vpack.c.bf16 %v7536_v33, %v7535_v51 }
0x166d   : > { %17602 = vmatpush3.bf16.msra.mxu1 %v8465_v43 }
0x166e   : > { %17595 = vmatprep.mubr.msk.bf16.mxu0 %vm1921_vm3, %v8039_v7 }
0x166f   : > { %v18976_v39 = vpop.eup %18975 }
0x1670   : > { %v7538_v0 = vmul.f32 %v18976_v39, %v21756_v58 }
0x1671   : > { %v18978_v6 = vpop.eup %18977 }
0x1672   : > { %v7539_v35 = vmul.f32 %v18978_v6, %v21760_v13 }
0x1673   : > { %v18980_v27 = vpop.eup %18979 }
0x1674   : > { %v7537_v44 = vmul.f32 %v18980_v27, %v21764_v19  ;;  %v8041_v61 = vpack.c.bf16 %v7539_v35, %v7538_v0 }
0x1675   : > { %v18982_v25 = vpop.eup %18981 }
0x1676   : > { %v7540_v40 = vmul.f32 %v18982_v25, %v21768_v30  ;;  %17603 = vmatprep.mubr.msk.bf16.mxu1 %vm1921_vm3, %v8041_v61  ;;  %v8040_v48 = vpack.c.bf16 %v7537_v44, %v7537_v44  ;;  %v21843_v44 = vld [vmem:[%s22825_s7 + $0x10] sm:$0x3f] }
0x1677   : > { %v8539_v61 = vrot.slane %v21843_v44, %v20576_v28 }
0x1678   : > { %17596 = vmatmul.mubr.msk.bf16.vlgmr.msra.gmra.mrb[196].mxu0 %vm1921_vm3, %v8040_v48  ;;  %v8042_v57 = vpack.c.bf16 %v7540_v40, %v7540_v40 }
0x167a   : > { %17604 = vmatmul.mubr.msk.bf16.vlgmr.msra.gmra.mrb[196].mxu1 %vm1921_vm3, %v8042_v57 }
0x1713   : > { %v17549_v31 = vpop.f32.mrb[184].mxu0 }
0x1714   : > { %v8102_v36 = vpop.f32.mrb[185].mxu0 }
0x1715   : > { %v17550_v58 = vpop.f32.mrb[186].mxu0 }
0x1716   : > { %v8105_v11 = vpop.f32.mrb[187].mxu0 }
0x171b   : > { %v17557_v13 = vpop.f32.mrb[184].mxu1 }
0x171c   : > { %v8517_v2 = vadd.f32 %v17557_v13, %v17549_v31  ;;  %v8159_v21 = vpop.f32.mrb[185].mxu1 }
0x171d   : > { %v8515_v19 = vadd.f32 %v8159_v21, %v8102_v36  ;;  %v17558_v26 = vpop.f32.mrb[186].mxu1 }
0x171e   : > { %v8162_v5 = vpop.f32.mrb[187].mxu1 }
0x171f   : > { %v8516_v14 = vadd.f32 %v8162_v5, %v8105_v11 }
0x1723   : > { %v17565_v30 = vpop.f32.mrb[188].mxu0 }
0x1724   : > { %v8216_v20 = vpop.f32.mrb[189].mxu0 }
0x1725   : > { %v17566_v47 = vpop.f32.mrb[190].mxu0 }
0x1726   : > { %v8219_v55 = vpop.f32.mrb[191].mxu0 }
0x172b   : > { %v17573_v34 = vpop.f32.mrb[188].mxu1 }
0x172c   : > { %v8520_v56 = vadd.f32 %v17573_v34, %v17565_v30  ;;  %v8273_v41 = vpop.f32.mrb[189].mxu1 }
0x172d   : > { %v8518_v59 = vadd.f32 %v8273_v41, %v8216_v20  ;;  %v17574_v29 = vpop.f32.mrb[190].mxu1 }
0x172e   : > { %v8529_v16 = vadd.f32 %v8520_v56, %v8517_v2  ;;  %v8276_v22 = vpop.f32.mrb[191].mxu1 }
0x172f   : > { %v8527_v49 = vadd.f32 %v8518_v59, %v8515_v19  ;;  %v8519_v15 = vadd.f32 %v8276_v22, %v8219_v55 }
0x1731   : > { %v8528_v23 = vadd.f32 %v8519_v15, %v8516_v14  ;;  %v18353_v15 = vld [vmem:[#allocation4 + $0x20] sm:$0xff]  }
0x1732   : > { %17607 = vmatprep.subr.bf16.mxu0 %v18353_v15 }
0x1733   : > { %v17581_v32 = vpop.f32.mrb[192].mxu0  ;;  %17608 = vmatpush3.bf16.msra.mxu0 %v18353_v15 }
0x1734   : > { %v8330_v37 = vpop.f32.mrb[193].mxu0 }
0x1735   : > { %v17582_v54 = vpop.f32.mrb[194].mxu0 }
0x1736   : > { %v8333_v12 = vpop.f32.mrb[195].mxu0 }
0x173b   : > { %v17589_v1 = vpop.f32.mrb[192].mxu1 }
0x173c   : > { %v8523_v24 = vadd.f32 %v17589_v1, %v17581_v32  ;;  %v8387_v50 = vpop.f32.mrb[193].mxu1 }
0x173d   : > { %v8521_v10 = vadd.f32 %v8387_v50, %v8330_v37  ;;  %v17590_v52 = vpop.f32.mrb[194].mxu1 }
0x173e   : > { %v8390_v17 = vpop.f32.mrb[195].mxu1 }
0x173f   : > { %v8522_v43 = vadd.f32 %v8390_v17, %v8333_v12  ;;  %v8588_v17 = vrot.slane %v21843_v44, %v20607_v53 }
0x174b   : > { %v17597_v4 = vpop.f32.mrb[196].mxu0 }
0x174c   : > { %v8444_v38 = vpop.f32.mrb[197].mxu0 }
0x174d   : > { %v17598_v63 = vpop.f32.mrb[198].mxu0  ;;  %v17605_v51 = vpop.f32.mrb[196].mxu1 }
0x174e   : > { %v8526_v33 = vadd.f32 %v17605_v51, %v17597_v4  ;;  %v8447_v7 = vpop.f32.mrb[199].mxu0  ;;  %v8501_v39 = vpop.f32.mrb[197].mxu1 }
0x174f   : > { %v8524_v6 = vadd.f32 %v8501_v39, %v8444_v38  ;;  %v17606_v0 = vpop.f32.mrb[198].mxu1 }
0x1750   : > { %v8532_v35 = vadd.f32 %v8526_v33, %v8523_v24  ;;  %v8504_v27 = vpop.f32.mrb[199].mxu1  ;;  %v8595_v33 = vrot.slane %v21843_v44, %v20612_v18 }
0x1751   : > { %v8530_v25 = vadd.f32 %v8524_v6, %v8521_v10  ;;  %v8525_v40 = vadd.f32 %v8504_v27, %v8447_v7 }
0x1752   : > { %v8535_v48 = vadd.f32 %v8532_v35, %v8529_v16 }
0x1753   : > { %v8533_v57 = vadd.f32 %v8530_v25, %v8527_v49  ;;  %v8531_v31 = vadd.f32 %v8525_v40, %v8522_v43 }
0x1754   : > { %v8542_v36 = vadd.f32 %v8539_v61, %v8535_v48  ;;  %v18355_v48 = vld [vmem:[%s22887_s20 + $0x80] sm:$0xff]  }
0x1755   : > { %v8540_v58 = vadd.f32 %v8539_v61, %v8533_v57  ;;  %v8534_v11 = vadd.f32 %v8531_v31, %v8528_v23  ;;  %v18354_v23 = vld [vmem:[#allocation4 + $0x28] sm:$0xff]   ;;  %17615 = vmatprep.subr.bf16.mxu1 %v18355_v48  ;;  %v18357_v31 = vld [vmem:[%s22887_s20 + $0x90] sm:$0xff]  }
0x1756   : > { %v21856_v26 = vadd.f32 %v8542_v36, %v21330_v3  ;;  %17609 = vmatprep.subr.bf16.mxu0 %v18354_v23  ;;  %17616 = vmatpush3.bf16.msra.mxu1 %v18355_v48  ;;  %v18356_v57 = vld [vmem:[%s22887_s20 + $0x88] sm:$0xff]   ;;  %v18358_v36 = vld [vmem:[%s22887_s20 + $0x98] sm:$0xff]  }
0x1757   : > { %v8541_v13 = vadd.f32 %v8539_v61, %v8534_v11  ;;  %v21848_v2 = vadd.f32 %v8540_v58, %v21327_v9  ;;  %17610 = vmatpush3.bf16.msra.mxu0 %v18354_v23  ;;  %17617 = vmatprep.subr.bf16.mxu1 %v18356_v57  ;;  %v18359_v58 = vld [vmem:[%s22887_s20 + $0xa0] sm:$0xff]   ;;  %v18360_v11 = vld [vmem:[%s22887_s20 + $0xa8] sm:$0xff]  }
0x1758   : > { %v8552_v14 = vsel %vm772_vm1, %v21856_v26, 0.0 }
0x1759   : > { %v8546_v21 = vsel %vm765_vm0, %v21848_v2, 0.0  ;;  %v21853_v19 = vadd.f32 %v8541_v13, %v21332_v42  ;;  %v18361_v13 = vld [vmem:[%s22887_s20 + $0xb0] sm:$0xff]  }
0x175a   : > { %8547 = vadd.xlane.f32.xlu0 %v8546_v21  ;;  %17618 = vmatpush3.bf16.msra.mxu1 %v18356_v57  ;;  %v18362_v21 = vld [vmem:[%s22887_s20 + $0xb8] sm:$0xff]  }
0x175b   : > { %v8549_v5 = vsel %vm765_vm0, %v21853_v19, 0.0  ;;  %17619 = vmatprep.subr.bf16.mxu1 %v18357_v31 }
0x175c   : > { %8550 = vadd.xlane.f32.xlu1 %v8549_v5  ;;  %v15557_v5 = vld [vmem:[#allocation6 + $0x2] ss:$0 sm:$0xff] }
0x175e   : > { %8553 = vadd.xlane.f32.xlu0 %v8552_v14  ;;  %17620 = vmatpush3.bf16.msra.mxu1 %v18357_v31 }
0x175f   : > { %17621 = vmatprep.subr.bf16.mxu1 %v18358_v36 }
0x1762   : > { %17622 = vmatpush3.bf16.msra.mxu1 %v18358_v36 }
0x1763   : > { %17623 = vmatprep.subr.bf16.mxu1 %v18359_v58 }
0x1766   : > { %17624 = vmatpush3.bf16.msra.mxu1 %v18359_v58 }
0x1767   : > { %17625 = vmatprep.subr.bf16.mxu1 %v18360_v11 }
0x176a   : > { %17626 = vmatpush3.bf16.msra.mxu1 %v18360_v11 }
0x176b   : > { %17627 = vmatprep.subr.bf16.mxu1 %v18361_v13 }
0x176e   : > { %17628 = vmatpush3.bf16.msra.mxu1 %v18361_v13 }
0x176f   : > { %17629 = vmatprep.subr.bf16.mxu1 %v18362_v21 }
0x1772   : > { %17630 = vmatpush3.bf16.msra.mxu1 %v18362_v21 }
0x17e7   : > { %v8548_v9 = vpop.xlane.xlu0 %8547 }
0x17e8   : > { %v8555_v30 = vmul.f32 0.03125, %v8548_v9 }
0x17e9   : > { %v8551_v20 = vpop.xlane.xlu1 %8550 }
0x17ea   : > { %v8558_v47 = vsub.f32 %v21848_v2, %v8555_v30  ;;  %v8556_v55 = vmul.f32 0.03125, %v8551_v20 }
0x17eb   : > { %v8554_v42 = vpop.xlane.xlu0 %8553 }
0x17ec   : > { %v8559_v34 = vsub.f32 %v21853_v19, %v8556_v55  ;;  %v8557_v3 = vmul.f32 0.03125, %v8554_v42  ;;  %v8561_v56 = vmul.f32 %v8558_v47, %v8558_v47 }
0x17ee   : > { %v8560_v41 = vsub.f32 %v21856_v26, %v8557_v3  ;;  %v8564_v59 = vsel %vm765_vm0, %v8561_v56, 0.0  ;;  %v8562_v29 = vmul.f32 %v8559_v34, %v8559_v34 }
0x17ef   : > { %8565 = vadd.xlane.f32.xlu1 %v8564_v59 }
0x17f0   : > { %v8567_v16 = vsel %vm765_vm0, %v8562_v29, 0.0  ;;  %v8563_v22 = vmul.f32 %v8560_v41, %v8560_v41 }
0x17f1   : > { %8568 = vadd.xlane.f32.xlu0 %v8567_v16 }
0x17f2   : > { %v8570_v49 = vsel %vm772_vm1, %v8563_v22, 0.0 }
0x17f3   : > { %8571 = vadd.xlane.f32.xlu1 %v8570_v49 }
0x187c   : > { %v8566_v32 = vpop.xlane.xlu1 %8565 }
0x187d   : > { %v8573_v37 = vmul.f32 0.03125, %v8566_v32 }
0x187e   : > { %v8569_v54 = vpop.xlane.xlu0 %8568 }
0x187f   : > { %v8576_v12 = vadd.f32 1e-05, %v8573_v37  ;;  %v8574_v1 = vmul.f32 0.03125, %v8569_v54 }
0x1880   : > { %v8572_v24 = vpop.xlane.xlu1 %8571 }
0x1881   : > { %18983 = vrsqrt.f32 %v8576_v12  ;;  %v8577_v50 = vadd.f32 1e-05, %v8574_v1  ;;  %v8575_v10 = vmul.f32 0.03125, %v8572_v24 }
0x1883   : > { %18985 = vrsqrt.f32 %v8577_v50  ;;  %v8578_v52 = vadd.f32 1e-05, %v8575_v10 }
0x1885   : > { %18987 = vrsqrt.f32 %v8578_v52 }
0x188b   : > { %v18984_v43 = vpop.eup %18983 }
0x188c   : > { %v8582_v4 = vmul.f32 %v18984_v43, %v8558_v47 }
0x188d   : > { %v18986_v38 = vpop.eup %18985 }
0x188e   : > { %v8583_v63 = vmul.f32 %v18986_v38, %v8559_v34  ;;  %v8589_v51 = vmul.f32 %v8588_v17, %v8582_v4 }
0x188f   : > { %v18988_v7 = vpop.eup %18987 }
0x1890   : > { %v8584_v39 = vmul.f32 %v18988_v7, %v8560_v41  ;;  %v8590_v6 = vmul.f32 %v8588_v17, %v8583_v63  ;;  %v8596_v0 = vadd.f32 %v8595_v33, %v8589_v51 }
0x1892   : > { %v8597_v35 = vadd.f32 %v8595_v33, %v8590_v6  ;;  %v8591_v27 = vmul.f32 %v8588_v17, %v8584_v39 }
0x1894   : > { %v8604_v61 = vpack.c.bf16 %v8597_v35, %v8596_v0  ;;  %v8598_v25 = vadd.f32 %v8595_v33, %v8591_v27 }
0x1896   : > { %17611 = vmatprep.mubr.msk.bf16.mxu0 %vm765_vm0, %v8604_v61  ;;  %v8605_v40 = vpack.c.bf16 %v8598_v25, %v8598_v25 }
0x1898   : > { %17612 = vmatmul.mubr.msk.bf16.vlgmr.msra.gmra.mrb[200].mxu0 %vm765_vm0, %v8605_v40 }
0x196b   : > { %v17613_v14 = vpop.f32.mrb[200].mxu0 }
0x196c   : > { %v21898_v9 = vadd.f32 %v17613_v14, %v15557_v5  ;;  %v8666_v30 = vpop.f32.mrb[201].mxu0 }
0x196d   : > { %v21900_v20 = vadd.f32 %v15557_v5, %v8666_v30  ;;  %v17614_v47 = vpop.f32.mrb[202].mxu0 }
0x196e   : > { %v21903_v55 = vmul.f32 0.70710677, %v21898_v9  ;;  %v8669_v42 = vpop.f32.mrb[203].mxu0 }
0x196f   : > { %v21906_v34 = vmul.f32 0.70710677, %v21900_v20  ;;  %v21908_v3 = vadd.f32 %v15557_v5, %v8669_v42 }
0x1970   : > { %vm8688_vm11 = vcmp.ge.f32.partialorder %v21903_v55, 0.0  ;;  %v8691_v56 = vsub.f32 0.0, %v21903_v55 }
0x1971   : > { %vm8686_vm12 = vcmp.ge.f32.partialorder %v21906_v34, 0.0  ;;  %v8689_v41 = vsub.f32 0.0, %v21906_v34  ;;  %v21918_v29 = vmul.f32 0.70710677, %v21908_v3 }
0x1972   : > { %v8694_v59 = vsel %vm8688_vm11, %v21903_v55, %v8691_v56  ;;  %v8680_v55 = vmul.f32 0.5, %v21900_v20 }
0x1973   : > { %v8700_v16 = vmul.f32 0.3275911, %v8694_v59  ;;  %v8692_v22 = vsel %vm8686_vm12, %v21906_v34, %v8689_v41  ;;  %vm8687_vm13 = vcmp.ge.f32.partialorder %v21918_v29, 0.0  ;;  %v8690_v15 = vsub.f32 0.0, %v21918_v29 }
0x1974   : > { %v8698_v49 = vmul.f32 0.3275911, %v8692_v22  ;;  %v8739_v1 = vsub.f32 0.0, %v8694_v59  ;;  %v8737_v24 = vsub.f32 0.0, %v8692_v22 }
0x1975   : > { %v8703_v23 = vadd.f32 1.0, %v8700_v16  ;;  %v8693_v37 = vsel %vm8687_vm13, %v21918_v29, %v8690_v15  ;;  %v8885_v29 = vrot.slane %v21843_v44, %v20685_v60 }
0x1976   : > { %v8701_v32 = vadd.f32 1.0, %v8698_v49  ;;  %v8699_v54 = vmul.f32 0.3275911, %v8693_v37  ;;  %v8742_v10 = vmul.f32 %v8739_v1, %v8694_v59  ;;  %v8738_v52 = vsub.f32 0.0, %v8693_v37 }
0x1977   : > { %18989 = vrcp.f32 %v8703_v23  ;;  %v8740_v4 = vmul.f32 %v8737_v24, %v8692_v22 }
0x1978   : > { %18991 = vrcp.f32 %v8701_v32  ;;  %v8702_v12 = vadd.f32 1.0, %v8699_v54  ;;  %v8747_v33 = vmul.f32 1.442695, %v8742_v10  ;;  %v8741_v39 = vmul.f32 %v8738_v52, %v8693_v37 }
0x1979   : > { %v8743_v0 = vmul.f32 1.442695, %v8740_v4  ;;  %v8696_v4 = vsel %vm8687_vm13, 1.0, %v22888_v45 }
0x197a   : > { %18993 = vrcp.f32 %v8702_v12  ;;  %v8745_v48 = vmul.f32 1.442695, %v8741_v39  ;;  %v8697_v12 = vsel %vm8688_vm11, 1.0, %v22888_v45 }
0x197b   : > { %18995 = vpow2.f32 %v8747_v33  ;;  %v8681_v33 = vmul.f32 0.5, %v21908_v3 }
0x197c   : > { %18997 = vpow2.f32 %v8743_v0 }
0x197d   : > { %18999 = vpow2.f32 %v8745_v48 }
0x1981   : > { %v18990_v50 = vpop.eup %18989 }
0x1982   : > { %v18992_v17 = vpop.eup %18991  ;;  %v8712_v43 = vmul.f32 1.0614054, %v18990_v50 }
0x1983   : > { %v8710_v38 = vmul.f32 1.0614054, %v18992_v17 }
0x1984   : > { %v8715_v63 = vadd.f32 -1.4531521, %v8712_v43  ;;  %v18994_v51 = vpop.eup %18993 }
0x1985   : > { %v8713_v7 = vadd.f32 -1.4531521, %v8710_v38  ;;  %v8711_v35 = vmul.f32 1.0614054, %v18994_v51  ;;  %v18996_v59 = vpop.eup %18995 }
0x1986   : > { %v8718_v6 = vmul.f32 %v18990_v50, %v8715_v63  ;;  %v18998_v22 = vpop.eup %18997 }
0x1987   : > { %v8716_v27 = vmul.f32 %v18992_v17, %v8713_v7  ;;  %v8714_v25 = vadd.f32 -1.4531521, %v8711_v35  ;;  %v19000_v54 = vpop.eup %18999 }
0x1988   : > { %v8721_v61 = vadd.f32 1.4214138, %v8718_v6 }
0x1989   : > { %v8719_v40 = vadd.f32 1.4214138, %v8716_v27  ;;  %v8717_v31 = vmul.f32 %v18994_v51, %v8714_v25 }
0x198a   : > { %v8724_v57 = vmul.f32 %v18990_v50, %v8721_v61 }
0x198b   : > { %v8722_v36 = vmul.f32 %v18992_v17, %v8719_v40  ;;  %v8720_v11 = vadd.f32 1.4214138, %v8717_v31 }
0x198c   : > { %v8727_v58 = vadd.f32 -0.28449672, %v8724_v57 }
0x198d   : > { %v8725_v13 = vadd.f32 -0.28449672, %v8722_v36  ;;  %v8723_v5 = vmul.f32 %v18994_v51, %v8720_v11 }
0x198e   : > { %v8730_v21 = vmul.f32 %v18990_v50, %v8727_v58 }
0x198f   : > { %v8728_v14 = vmul.f32 %v18992_v17, %v8725_v13  ;;  %v8726_v47 = vadd.f32 -0.28449672, %v8723_v5 }
0x1990   : > { %v8733_v30 = vadd.f32 0.2548296, %v8730_v21 }
0x1991   : > { %v8731_v42 = vadd.f32 0.2548296, %v8728_v14  ;;  %v8729_v41 = vmul.f32 %v18994_v51, %v8726_v47 }
0x1992   : > { %v8736_v56 = vmul.f32 %v18990_v50, %v8733_v30  ;;  %v8695_v50 = vsel %vm8686_vm12, 1.0, %v22888_v45 }
0x1993   : > { %v8734_v16 = vmul.f32 %v18992_v17, %v8731_v42  ;;  %v8732_v15 = vadd.f32 0.2548296, %v8729_v41 }
0x1994   : > { %v8751_v49 = vmul.f32 %v18996_v59, %v8736_v56 }
0x1995   : > { %v8749_v23 = vmul.f32 %v18998_v22, %v8734_v16  ;;  %v8735_v37 = vmul.f32 %v18994_v51, %v8732_v15  ;;  %v8682_v51 = vmul.f32 0.5, %v21898_v9  ;;  %v18363_v22 = vld [vmem:[%s22821_s3 + $0x180] sm:$0xff]   ;;  %v18365_v15 = vld [vmem:[%s22821_s3 + $0x188] sm:$0xff]  }
0x1996   : > { %v8754_v32 = vsub.f32 1.0, %v8751_v49  ;;  %v18364_v49 = vld [vmem:[%s22821_s3 + $0x1c0] sm:$0xff]   ;;  %17635 = vmatprep.subr.bf16.mxu0 %v18363_v22 }
0x1997   : > { %v8752_v1 = vsub.f32 1.0, %v8749_v23  ;;  %v8750_v10 = vmul.f32 %v19000_v54, %v8735_v37  ;;  %17667 = vmatprep.subr.bf16.mxu1 %v18364_v49  ;;  %17636 = vmatpush3.bf16.msra.mxu0 %v18363_v22  ;;  %v18366_v23 = vld [vmem:[%s22821_s3 + $0x1c8] sm:$0xff]   ;;  %v18368_v37 = vld [vmem:[%s22821_s3 + $0x1e0] sm:$0xff]  }
0x1998   : > { %v8757_v24 = vmul.f32 %v8754_v32, %v8697_v12  ;;  %17637 = vmatprep.subr.bf16.mxu0 %v18365_v15  ;;  %v18367_v32 = vld [vmem:[%s22821_s3 + $0x190] sm:$0xff]  }
0x1999   : > { %v8755_v52 = vmul.f32 %v8752_v1, %v8695_v50  ;;  %v8753_v17 = vsub.f32 1.0, %v8750_v10 }
0x199a   : > { %v8760_v43 = vadd.f32 1.0, %v8757_v24 }
0x199b   : > { %v8758_v38 = vadd.f32 1.0, %v8755_v52  ;;  %v8756_v63 = vmul.f32 %v8753_v17, %v8696_v4  ;;  %17638 = vmatpush3.bf16.msra.mxu0 %v18365_v15  ;;  %v15586_v4 = vld [vmem:[%s22825_s7 + $0x18] sm:$0x3f] }
0x199c   : > { %v8763_v39 = vmul.f32 %v8760_v43, %v8682_v51  ;;  %17643 = vmatprep.subr.bf16.mxu0 %v18367_v32 }
0x199d   : > { %v8759_v7 = vadd.f32 1.0, %v8756_v63  ;;  %v8761_v34 = vmul.f32 %v8758_v38, %v8680_v55  ;;  %v8933_v38 = vrot.slane %v15586_v4, %v20007_v62 }
0x199e   : > { %v8782_v35 = vpack.c.bf16 %v8763_v39, %v8763_v39 }
0x199f   : > { %v8762_v6 = vmul.f32 %v8759_v7, %v8681_v33  ;;  %v8940_v33 = vrot.slane %v15586_v4, %v20022_v8 }
0x19a1   : > { %v8781_v0 = vpack.c.bf16 %v8762_v6, %v8761_v34 }
0x19a3   : > { %17631 = vmatprep.mubr.bf16.mxu1 %v8781_v0 }
0x19a4   : > { %17632 = vmatmul.mubr.bf16.vlgmr.msra.gmra.mrb[200].mxu1 %v8782_v35 }
0x19a5   : > { %17668 = vmatpush3.bf16.msra.mxu1 %v18364_v49 }
0x19a6   : > { %17669 = vmatprep.subr.bf16.mxu1 %v18366_v23 }
0x19a9   : > { %17670 = vmatpush3.bf16.msra.mxu1 %v18366_v23 }
0x19aa   : > { %17683 = vmatprep.subr.bf16.mxu1 %v18368_v37 }
0x1a77   : > { %v17633_v27 = vpop.f32.mrb[200].mxu1 }
0x1a78   : > { %v8865_v61 = vpop.f32.mrb[201].mxu1  ;;  %v8881_v25 = vadd.f32 %v17633_v27, %v21856_v26 }
0x1a79   : > { %v8879_v9 = vadd.f32 %v8865_v61, %v21848_v2  ;;  %v17634_v20 = vpop.f32.mrb[202].mxu1 }
0x1a7a   : > { %v8868_v40 = vpop.f32.mrb[203].mxu1  ;;  %v21947_v57 = vadd.f32 %v8885_v29, %v8881_v25  ;;  %v18369_v20 = vld [vmem:[%s22821_s3 + $0x198] sm:$0xff]  }
0x1a7b   : > { %v21944_v3 = vadd.f32 %v8885_v29, %v8879_v9  ;;  %v8880_v48 = vadd.f32 %v8868_v40, %v21853_v19  ;;  %v18370_v40 = vld [vmem:[%s22821_s3 + $0x1e8] sm:$0xff]  }
0x1a7c   : > { %v8897_v2 = vsel %vm772_vm1, %v21947_v57, 0.0 }
0x1a7d   : > { %v21949_v31 = vadd.f32 %v8885_v29, %v8880_v48  ;;  %v8891_v36 = vsel %vm765_vm0, %v21944_v3, 0.0  ;;  %v18371_v48 = vld [vmem:[%s22821_s3 + $0x1a0] sm:$0xff]  }
0x1a7e   : > { %8892 = vadd.xlane.f32.xlu0 %v8891_v36  ;;  %v18372_v36 = vld [vmem:[%s22821_s3 + $0x1a8] sm:$0xff]  }
0x1a7f   : > { %v8894_v44 = vsel %vm765_vm0, %v21949_v31, 0.0 }
0x1a80   : > { %8895 = vadd.xlane.f32.xlu1 %v8894_v44  ;;  %v18373_v44 = vld [vmem:[%s22821_s3 + $0x1b0] sm:$0xff]  }
0x1a82   : > { %8898 = vadd.xlane.f32.xlu0 %v8897_v2 }
0x1b0b   : > { %v8893_v26 = vpop.xlane.xlu0 %8892 }
0x1b0c   : > { %v8900_v58 = vmul.f32 0.03125, %v8893_v26  ;;  %v18374_v26 = vld [vmem:[%s22821_s3 + $0x1b8] sm:$0xff]  }
0x1b0d   : > { %v8896_v11 = vpop.xlane.xlu1 %8895 }
0x1b0e   : > { %v8903_v19 = vsub.f32 %v21944_v3, %v8900_v58  ;;  %v8901_v13 = vmul.f32 0.03125, %v8896_v11  ;;  %v18375_v58 = vld [vmem:[%s22821_s3 + $0x1d0] sm:$0xff]  }
0x1b0f   : > { %v8899_v21 = vpop.xlane.xlu0 %8898 }
0x1b10   : > { %v8904_v5 = vsub.f32 %v21949_v31, %v8901_v13  ;;  %v8902_v14 = vmul.f32 0.03125, %v8899_v21  ;;  %v8906_v30 = vmul.f32 %v8903_v19, %v8903_v19  ;;  %v18377_v13 = vld [vmem:[%s22821_s3 + $0x1f0] sm:$0xff]   ;;  %v18378_v21 = vld [vmem:[%s22821_s3 + $0x1f8] sm:$0xff]  }
0x1b12   : > { %v8905_v47 = vsub.f32 %v21947_v57, %v8902_v14  ;;  %v8909_v42 = vsel %vm765_vm0, %v8906_v30, 0.0  ;;  %v8907_v56 = vmul.f32 %v8904_v5, %v8904_v5 }
0x1b13   : > { %8910 = vadd.xlane.f32.xlu1 %v8909_v42 }
0x1b14   : > { %v8912_v41 = vsel %vm765_vm0, %v8907_v56, 0.0  ;;  %v8908_v59 = vmul.f32 %v8905_v47, %v8905_v47 }
0x1b15   : > { %8913 = vadd.xlane.f32.xlu0 %v8912_v41 }
0x1b16   : > { %v8915_v16 = vsel %vm772_vm1, %v8908_v59, 0.0 }
0x1b17   : > { %8916 = vadd.xlane.f32.xlu1 %v8915_v16 }
0x1ba0   : > { %v8911_v54 = vpop.xlane.xlu1 %8910 }
0x1ba1   : > { %v8918_v12 = vmul.f32 0.03125, %v8911_v54 }
0x1ba2   : > { %v8914_v1 = vpop.xlane.xlu0 %8913 }
0x1ba3   : > { %v8921_v24 = vadd.f32 1e-05, %v8918_v12  ;;  %v8919_v50 = vmul.f32 0.03125, %v8914_v1 }
0x1ba4   : > { %v8917_v10 = vpop.xlane.xlu1 %8916 }
0x1ba5   : > { %19001 = vrsqrt.f32 %v8921_v24  ;;  %v8922_v52 = vadd.f32 1e-05, %v8919_v50  ;;  %v8920_v17 = vmul.f32 0.03125, %v8917_v10 }
0x1ba7   : > { %19003 = vrsqrt.f32 %v8922_v52  ;;  %v8923_v43 = vadd.f32 1e-05, %v8920_v17 }
0x1ba9   : > { %19005 = vrsqrt.f32 %v8923_v43 }
0x1baf   : > { %v19002_v63 = vpop.eup %19001 }
0x1bb0   : > { %v8927_v51 = vmul.f32 %v19002_v63, %v8903_v19  ;;  %v18376_v19 = vld [vmem:[%s22821_s3 + $0x1d8] sm:$0xff]  }
0x1bb1   : > { %v19004_v55 = vpop.eup %19003 }
0x1bb2   : > { %v8934_v7 = vmul.f32 %v8933_v38, %v8927_v51  ;;  %v8928_v39 = vmul.f32 %v19004_v55, %v8904_v5 }
0x1bb3   : > { %v19006_v34 = vpop.eup %19005 }
0x1bb4   : > { %v8935_v6 = vmul.f32 %v8933_v38, %v8928_v39  ;;  %v8929_v0 = vmul.f32 %v19006_v34, %v8905_v47  ;;  %v8941_v35 = vadd.f32 %v8940_v33, %v8934_v7 }
0x1bb6   : > { %v8942_v27 = vadd.f32 %v8940_v33, %v8935_v6  ;;  %v8936_v29 = vmul.f32 %v8933_v38, %v8929_v0 }
0x1bb8   : > { %v21986_v61 = vpack.c.bf16 %v8942_v27, %v8941_v35  ;;  %v8943_v25 = vadd.f32 %v8940_v33, %v8936_v29 }
0x1bba   : > { %v21988_v9 = vpack.c.bf16 %v8943_v25, %v8943_v25  ;;  %17639 = vmatprep.mubr.msk.bf16.mxu0 %vm765_vm0, %v21986_v61  ;;  %17671 = vmatprep.mubr.msk.bf16.mxu1 %vm765_vm0, %v21986_v61  ;;  %v22027_v2 = vsel %vm765_vm0, %v21986_v61, 0 }
0x1bbc   : > { %17640 = vmatmul.mubr.msk.bf16.vlgmr.msra.gmra.mrb[204].mxu0 %vm765_vm0, %v21988_v9  ;;  %17672 = vmatmul.mubr.msk.bf16.vlgmr.msra.gmra.mrb[204].mxu1 %vm765_vm0, %v21988_v9  ;;  %v22044_v11 = vsel %vm765_vm0, %v21988_v9, 0 }
0x1bbd   : > { %17644 = vmatpush3.bf16.msra.mxu0 %v18367_v32  ;;  %17684 = vmatpush3.bf16.msra.mxu1 %v18368_v37 }
0x1bbe   : > { %17647 = vmatprep.mubr.msk.bf16.mxu0 %vm765_vm0, %v21986_v61  ;;  %17687 = vmatprep.mubr.msk.bf16.mxu1 %vm765_vm0, %v21986_v61 }
0x1bbf   : > { %17645 = vmatprep.subr.bf16.mxu0 %v18369_v20  ;;  %17685 = vmatprep.subr.bf16.mxu1 %v18370_v40 }
0x1bc1   : > { %17646 = vmatpush3.bf16.msra.mxu0 %v18369_v20  ;;  %17686 = vmatpush3.bf16.msra.mxu1 %v18370_v40 }
0x1bc2   : > { %18091 = vmatprep.subr.msk.bf16.mxu1 %vm765_vm0, %v21986_v61  ;;  %17651 = vmatprep.subr.bf16.mxu0 %v18371_v48 }
0x1bc4   : > { %17648 = vmatmul.mubr.msk.bf16.vlgmr.msra.gmra.mrb[208].mxu0 %vm765_vm0, %v21988_v9  ;;  %17688 = vmatmul.mubr.msk.bf16.vlgmr.msra.gmra.mrb[208].mxu1 %vm765_vm0, %v21988_v9 }
0x1bc5   : > { %17652 = vmatpush3.bf16.msra.mxu0 %v18371_v48  ;;  %17655 = vmatprep.mubr.msk.bf16.mxu0 %vm765_vm0, %v21986_v61 }
0x1bc6   : > { %17653 = vmatprep.subr.bf16.mxu0 %v18372_v36 }
0x1bc9   : > { %17654 = vmatpush3.bf16.msra.mxu0 %v18372_v36 }
0x1bca   : > { %17700 = vmatpush3.bf16.xpose.msra.mxu1 %v22027_v2  ;;  %17659 = vmatprep.subr.bf16.mxu0 %v18373_v44 }
0x1bcb   : > { %18092 = vmatprep.subr.msk.bf16.mxu1 %vm765_vm0, %v21988_v9 }
0x1bcc   : > { %17656 = vmatmul.mubr.msk.bf16.vlgmr.msra.gmra.mrb[212].mxu0 %vm765_vm0, %v21988_v9 }
0x1bcd   : > { %17660 = vmatpush3.bf16.msra.mxu0 %v18373_v44  ;;  %17663 = vmatprep.mubr.msk.bf16.mxu0 %vm765_vm0, %v21986_v61 }
0x1bce   : > { %17661 = vmatprep.subr.bf16.mxu0 %v18374_v26 }
0x1bd1   : > { %17662 = vmatpush3.bf16.msra.mxu0 %v18374_v26 }
0x1bd2   : > { %17702 = vmatpush3.bf16.xpose.msra.mxu1 %v22044_v11  ;;  %17675 = vmatprep.subr.bf16.mxu0 %v18375_v58 }
0x1bd3   : > { %18095 = vmatprep.subr.msk.bf16.mxu1 %vm765_vm0, %v21986_v61 }
0x1bd4   : > { %17664 = vmatmul.mubr.msk.bf16.vlgmr.msra.gmra.mrb[216].mxu0 %vm765_vm0, %v21988_v9 }
0x1bd5   : > { %17676 = vmatpush3.bf16.msra.mxu0 %v18375_v58  ;;  %17679 = vmatprep.mubr.msk.bf16.mxu0 %vm765_vm0, %v21986_v61 }
0x1bd6   : > { %17677 = vmatprep.subr.bf16.mxu0 %v18376_v19 }
0x1bd9   : > { %17678 = vmatpush3.bf16.msra.mxu0 %v18376_v19  ;;  %v18379_v19 = vld [vmem:[#allocation2 + $0x180] sm:$0xff]  }
0x1bda   : > { %17691 = vmatprep.subr.bf16.mxu0 %v18377_v13 }
0x1bdc   : > { %17680 = vmatmul.mubr.msk.bf16.vlgmr.msra.gmra.mrb[220].mxu0 %vm765_vm0, %v21988_v9 }
0x1bdd   : > { %17692 = vmatpush3.bf16.msra.mxu0 %v18377_v13  ;;  %17695 = vmatprep.mubr.msk.bf16.mxu0 %vm765_vm0, %v21986_v61 }
0x1bde   : > { %17693 = vmatprep.subr.bf16.mxu0 %v18378_v21 }
0x1be1   : > { %17694 = vmatpush3.bf16.msra.mxu0 %v18378_v21  ;;  %v18380_v21 = vld [vmem:[#allocation2 + $0x188] sm:$0xff]  }
0x1be2   : > { %18093 = vmatprep.subr.msk.bf16.mxu0 %vm765_vm0, %v21986_v61 }
0x1be4   : > { %17696 = vmatmul.mubr.msk.bf16.vlgmr.msra.gmra.mrb[224].mxu0 %vm765_vm0, %v21988_v9 }
0x1bea   : > { %17708 = vmatpush3.bf16.xpose.msra.mxu0 %v22027_v2 }
0x1beb   : > { %18094 = vmatprep.subr.msk.bf16.mxu0 %vm765_vm0, %v21988_v9 }
0x1bf2   : > { %17710 = vmatpush3.bf16.xpose.msra.mxu0 %v22044_v11 }
0x1bf3   : > { %18097 = vmatprep.subr.msk.bf16.mxu0 %vm765_vm0, %v21986_v61 }
0x1c8f   : > { %v17641_v5 = vpop.f32.mrb[204].mxu0  ;;  %v22076_v14 = vpop.f32.mrb[204].mxu1 }
0x1c90   : > { %v9064_v30 = vpop.f32.mrb[205].mxu0  ;;  %v9304_v47 = vpop.f32.mrb[205].mxu1  ;;  %v9499_v49 = vpack.c.bf16 %v17641_v5, %v17641_v5  ;;  %v9507_v20 = vpack.c.bf16 %v22076_v14, %v22076_v14  ;;  %v18381_v5 = vld [vmem:[#allocation2 + $0x190] sm:$0xff]  }
0x1c91   : > { %v17642_v42 = vpop.f32.mrb[206].mxu0  ;;  %v17674_v56 = vpop.f32.mrb[206].mxu1 }
0x1c92   : > { %v9067_v41 = vpop.f32.mrb[207].mxu0  ;;  %v9307_v59 = vpop.f32.mrb[207].mxu1  ;;  %v18386_v42 = vld [vmem:[#allocation2 + $0x1c0] sm:$0xff]   ;;  %v18387_v56 = vld [vmem:[#allocation2 + $0x1b8] sm:$0xff]  }
0x1c93   : > { %v9498_v16 = vpack.c.bf16 %v9067_v41, %v9064_v30  ;;  %v9506_v22 = vpack.c.bf16 %v9307_v59, %v9304_v47  ;;  %v18383_v30 = vld [vmem:[#allocation2 + $0x198] sm:$0xff]   ;;  %v18384_v47 = vld [vmem:[#allocation2 + $0x1a8] sm:$0xff]   ;;  %v18389_v59 = vld [vmem:[#allocation2 + $0x1d0] sm:$0xff]  }
0x1c94   : > { %v18388_v41 = vld [vmem:[#allocation2 + $0x1c8] sm:$0xff]  }
0x1c95   : > { %17703 = vmatprep.mubr.msk.bf16.mxu1 %vm765_vm0, %v9498_v16  ;;  %v18390_v16 = vld [vmem:[#allocation2 + $0x1e0] sm:$0xff]  }
0x1c96   : > { %17704 = vmatmul.mubr.msk.bf16.vlgmr.msra.gmra.mrb[212].mxu1 %vm765_vm0, %v9499_v49  ;;  %v18392_v49 = vld [vmem:[#allocation2 + $0x1e8] sm:$0xff]  }
0x1c97   : > { %17716 = vmatpush3.bf16.xpose.msra.mxu1 %v22027_v2  ;;  %v17649_v15 = vpop.f32.mrb[208].mxu0  ;;  %v22081_v23 = vpop.f32.mrb[208].mxu1 }
0x1c98   : > { %18096 = vmatprep.subr.msk.bf16.mxu1 %vm765_vm0, %v21988_v9  ;;  %v9124_v32 = vpop.f32.mrb[209].mxu0  ;;  %v9424_v37 = vpop.f32.mrb[209].mxu1  ;;  %v9501_v52 = vpack.c.bf16 %v17649_v15, %v17649_v15  ;;  %v9511_v13 = vpack.c.bf16 %v22081_v23, %v22081_v23  ;;  %v18393_v15 = vld [vmem:[#allocation2 + $0x1f0] sm:$0xff]   ;;  %v18394_v23 = vld [vmem:[#allocation2 + $0x1f8] sm:$0xff]  }
0x1c99   : > { %v17650_v54 = vpop.f32.mrb[210].mxu0  ;;  %v17690_v12 = vpop.f32.mrb[210].mxu1 }
0x1c9a   : > { %v9127_v1 = vpop.f32.mrb[211].mxu0  ;;  %v9427_v24 = vpop.f32.mrb[211].mxu1 }
0x1c9b   : > { %v9500_v50 = vpack.c.bf16 %v9127_v1, %v9124_v32  ;;  %v9510_v10 = vpack.c.bf16 %v9427_v24, %v9424_v37 }
0x1c9d   : > { %17711 = vmatprep.mubr.msk.bf16.mxu0 %vm765_vm0, %v9500_v50 }
0x1c9e   : > { %17712 = vmatmul.mubr.msk.bf16.vlgmr.msra.gmra.mrb[228].mxu0 %vm765_vm0, %v9501_v52 }
0x1c9f   : > { %17718 = vmatpush3.bf16.xpose.msra.mxu1 %v22044_v11  ;;  %17724 = vmatpush3.bf16.xpose.msra.mxu0 %v22027_v2  ;;  %v17657_v17 = vpop.f32.mrb[212].mxu0 }
0x1ca0   : > { %18098 = vmatprep.subr.msk.bf16.mxu0 %vm765_vm0, %v21988_v9  ;;  %18099 = vmatprep.subr.msk.bf16.mxu1 %vm765_vm0, %v21986_v61  ;;  %v9184_v43 = vpop.f32.mrb[213].mxu0  ;;  %v9503_v51 = vpack.c.bf16 %v17657_v17, %v17657_v17 }
0x1ca1   : > { %v17658_v4 = vpop.f32.mrb[214].mxu0 }
0x1ca2   : > { %v9187_v38 = vpop.f32.mrb[215].mxu0 }
0x1ca3   : > { %v9502_v63 = vpack.c.bf16 %v9187_v38, %v9184_v43 }
0x1ca5   : > { %17719 = vmatprep.mubr.msk.bf16.mxu1 %vm765_vm0, %v9502_v63 }
0x1ca6   : > { %17720 = vmatmul.mubr.msk.bf16.vlgmr.msra.gmra.mrb[216].mxu1 %vm765_vm0, %v9503_v51 }
0x1ca7   : > { %17726 = vmatpush3.bf16.xpose.msra.mxu0 %v22044_v11  ;;  %17732 = vmatpush3.bf16.xpose.msra.mxu1 %v22027_v2  ;;  %v17665_v55 = vpop.f32.mrb[216].mxu0 }
0x1ca8   : > { %18100 = vmatprep.subr.msk.bf16.mxu1 %vm765_vm0, %v21988_v9  ;;  %17735 = vmatprep.mubr.msk.bf16.mxu1 %vm765_vm0, %v9506_v22  ;;  %v9244_v33 = vpop.f32.mrb[217].mxu0  ;;  %v9505_v6 = vpack.c.bf16 %v17665_v55, %v17665_v55  ;;  %v18391_v22 = vld [vmem:[#allocation2 + $0x1d8] sm:$0xff]  }
0x1ca9   : > { %18101 = vmatprep.subr.msk.bf16.mxu0 %vm765_vm0, %v21986_v61  ;;  %v17666_v7 = vpop.f32.mrb[218].mxu0 }
0x1caa   : > { %v9247_v39 = vpop.f32.mrb[219].mxu0 }
0x1cab   : > { %v9504_v34 = vpack.c.bf16 %v9247_v39, %v9244_v33 }
0x1cad   : > { %17727 = vmatprep.mubr.msk.bf16.mxu0 %vm765_vm0, %v9504_v34 }
0x1cae   : > { %17728 = vmatmul.mubr.msk.bf16.vlgmr.msra.gmra.mrb[232].mxu0 %vm765_vm0, %v9505_v6 }
0x1caf   : > { %17734 = vmatpush3.bf16.xpose.msra.mxu1 %v22044_v11  ;;  %17740 = vmatpush3.bf16.xpose.msra.mxu0 %v22027_v2  ;;  %v17681_v0 = vpop.f32.mrb[220].mxu0 }
0x1cb0   : > { %18102 = vmatprep.subr.msk.bf16.mxu0 %vm765_vm0, %v21988_v9  ;;  %18103 = vmatprep.subr.msk.bf16.mxu1 %vm765_vm0, %v21986_v61  ;;  %v9364_v35 = vpop.f32.mrb[221].mxu0  ;;  %v9509_v58 = vpack.c.bf16 %v17681_v0, %v17681_v0 }
0x1cb1   : > { %v17682_v27 = vpop.f32.mrb[222].mxu0 }
0x1cb2   : > { %v9367_v29 = vpop.f32.mrb[223].mxu0 }
0x1cb3   : > { %v9508_v25 = vpack.c.bf16 %v9367_v29, %v9364_v35 }
0x1cb5   : > { %17743 = vmatprep.mubr.msk.bf16.mxu0 %vm765_vm0, %v9508_v25 }
0x1cb6   : > { %17736 = vmatmul.mubr.msk.bf16.vlgmr.msra.gmra.mrb[220].mxu1 %vm765_vm0, %v9507_v20 }
0x1cb7   : > { %17742 = vmatpush3.bf16.xpose.msra.mxu0 %v22044_v11  ;;  %17748 = vmatpush3.bf16.xpose.msra.mxu1 %v22027_v2  ;;  %v17697_v40 = vpop.f32.mrb[224].mxu0 }
0x1cb8   : > { %17751 = vmatprep.mubr.msk.bf16.mxu1 %vm765_vm0, %v9510_v10  ;;  %18104 = vmatprep.subr.msk.bf16.mxu1 %vm765_vm0, %v21988_v9  ;;  %v9484_v48 = vpop.f32.mrb[225].mxu0  ;;  %v9513_v14 = vpack.c.bf16 %v17697_v40, %v17697_v40 }
0x1cb9   : > { %18105 = vmatprep.subr.msk.bf16.mxu0 %vm765_vm0, %v21986_v61  ;;  %v17698_v36 = vpop.f32.mrb[226].mxu0 }
0x1cba   : > { %v9487_v44 = vpop.f32.mrb[227].mxu0 }
0x1cbb   : > { %v9512_v26 = vpack.c.bf16 %v9487_v44, %v9484_v48 }
0x1cbe   : > { %17744 = vmatmul.mubr.msk.bf16.vlgmr.msra.gmra.mrb[236].mxu0 %vm765_vm0, %v9509_v58 }
0x1cbf   : > { %17750 = vmatpush3.bf16.xpose.msra.mxu1 %v22044_v11  ;;  %17756 = vmatpush3.bf16.xpose.msra.mxu0 %v22027_v2  ;;  %v18382_v2 = vld [vmem:[#allocation2 + $0x1a0] sm:$0xff]  }
0x1cc0   : > { %17759 = vmatprep.mubr.msk.bf16.mxu0 %vm765_vm0, %v9512_v26  ;;  %18106 = vmatprep.subr.msk.bf16.mxu0 %vm765_vm0, %v21988_v9 }
0x1cc1   : > { %17763 = vmatprep.subr.bf16.mxu1 %v18379_v19 }
0x1cc6   : > { %17752 = vmatmul.mubr.msk.bf16.vlgmr.msra.gmra.mrb[224].mxu1 %vm765_vm0, %v9511_v13 }
0x1cc7   : > { %17758 = vmatpush3.bf16.xpose.msra.mxu0 %v22044_v11  ;;  %17764 = vmatpush3.bf16.msra.mxu1 %v18379_v19  ;;  %v18385_v11 = vld [vmem:[#allocation2 + $0x1b0] sm:$0xff]  }
0x1cc8   : > { %17767 = vmatprep.mubr.msk.bf16.mxu1 %vm765_vm0, %v21986_v61  ;;  %17765 = vmatprep.subr.bf16.mxu1 %v18380_v21 }
0x1cc9   : > { %17771 = vmatprep.subr.bf16.mxu0 %v18381_v5 }
0x1ccb   : > { %17766 = vmatpush3.bf16.msra.mxu1 %v18380_v21 }
0x1ccc   : > { %17779 = vmatprep.subr.bf16.mxu1 %v18382_v2 }
0x1cce   : > { %17760 = vmatmul.mubr.msk.bf16.vlgmr.msra.gmra.mrb[240].mxu0 %vm765_vm0, %v9513_v14  ;;  %17768 = vmatmul.mubr.msk.bf16.vlgmr.msra.gmra.mrb[228].mxu1 %vm765_vm0, %v21988_v9 }
0x1ccf   : > { %17772 = vmatpush3.bf16.msra.mxu0 %v18381_v5  ;;  %17775 = vmatprep.mubr.msk.bf16.mxu0 %vm765_vm0, %v21986_v61 }
0x1cd0   : > { %17780 = vmatpush3.bf16.msra.mxu1 %v18382_v2  ;;  %17783 = vmatprep.mubr.msk.bf16.mxu1 %vm765_vm0, %v21986_v61 }
0x1cd1   : > { %17773 = vmatprep.subr.bf16.mxu0 %v18383_v30  ;;  %17781 = vmatprep.subr.bf16.mxu1 %v18384_v47 }
0x1cd3   : > { %17774 = vmatpush3.bf16.msra.mxu0 %v18383_v30 }
0x1cd4   : > { %17782 = vmatpush3.bf16.msra.mxu1 %v18384_v47  ;;  %17787 = vmatprep.subr.bf16.mxu0 %v18385_v11 }
0x1cd5   : > { %17795 = vmatprep.subr.bf16.mxu1 %v18386_v42 }
0x1cd6   : > { %17776 = vmatmul.mubr.msk.bf16.vlgmr.msra.gmra.mrb[244].mxu0 %vm765_vm0, %v21988_v9 }
0x1cd7   : > { %17784 = vmatmul.mubr.msk.bf16.vlgmr.msra.gmra.mrb[232].mxu1 %vm765_vm0, %v21988_v9  ;;  %17788 = vmatpush3.bf16.msra.mxu0 %v18385_v11 }
0x1cd8   : > { %17791 = vmatprep.mubr.msk.bf16.mxu0 %vm765_vm0, %v21986_v61  ;;  %17796 = vmatpush3.bf16.msra.mxu1 %v18386_v42 }
0x1cd9   : > { %17799 = vmatprep.mubr.msk.bf16.mxu1 %vm765_vm0, %v21986_v61  ;;  %17789 = vmatprep.subr.bf16.mxu0 %v18387_v56 }
0x1cda   : > { %17797 = vmatprep.subr.bf16.mxu1 %v18388_v41 }
0x1cdb   : > { %17790 = vmatpush3.bf16.msra.mxu0 %v18387_v56 }
0x1cdc   : > { %17798 = vmatpush3.bf16.msra.mxu1 %v18388_v41  ;;  %17803 = vmatprep.subr.bf16.mxu0 %v18389_v59 }
0x1cdd   : > { %17811 = vmatprep.subr.bf16.mxu1 %v18390_v16 }
0x1cde   : > { %17792 = vmatmul.mubr.msk.bf16.vlgmr.msra.gmra.mrb[248].mxu0 %vm765_vm0, %v21988_v9 }
0x1cdf   : > { %17800 = vmatmul.mubr.msk.bf16.vlgmr.msra.gmra.mrb[236].mxu1 %vm765_vm0, %v21988_v9  ;;  %17804 = vmatpush3.bf16.msra.mxu0 %v18389_v59 }
0x1ce0   : > { %17807 = vmatprep.mubr.msk.bf16.mxu0 %vm765_vm0, %v21986_v61  ;;  %17812 = vmatpush3.bf16.msra.mxu1 %v18390_v16 }
0x1ce1   : > { %17815 = vmatprep.mubr.msk.bf16.mxu1 %vm765_vm0, %v21986_v61  ;;  %17805 = vmatprep.subr.bf16.mxu0 %v18391_v22 }
0x1ce2   : > { %17813 = vmatprep.subr.bf16.mxu1 %v18392_v49 }
0x1ce3   : > { %17806 = vmatpush3.bf16.msra.mxu0 %v18391_v22 }
0x1ce4   : > { %17814 = vmatpush3.bf16.msra.mxu1 %v18392_v49  ;;  %17819 = vmatprep.subr.bf16.mxu0 %v18393_v15 }
0x1ce6   : > { %17808 = vmatmul.mubr.msk.bf16.vlgmr.msra.gmra.mrb[252].mxu0 %vm765_vm0, %v21988_v9 }
0x1ce7   : > { %17816 = vmatmul.mubr.msk.bf16.vlgmr.msra.gmra.mrb[240].mxu1 %vm765_vm0, %v21988_v9  ;;  %17820 = vmatpush3.bf16.msra.mxu0 %v18393_v15 }
0x1ce8   : > { %17823 = vmatprep.mubr.msk.bf16.mxu0 %vm765_vm0, %v21986_v61  ;;  %17821 = vmatprep.subr.bf16.mxu0 %v18394_v23 }
0x1ceb   : > { %17822 = vmatpush3.bf16.msra.mxu0 %v18394_v23 }
0x1cee   : > { %17824 = vmatmul.mubr.msk.bf16.vlgmr.msra.gmra.mrb[0].mxu0 %vm765_vm0, %v21988_v9 }
0x1d69   : > { %v22164_v32 = vpop.f32.mrb[212].mxu1 }
0x1d6a   : > { %v22166_v37 = vpop.f32.mrb[213].mxu1  ;;  %v9952_v54 = vsel %vm1928_vm2, %v22164_v32, -inf }
0x1d6b   : > { %9953 = vmax.xlane.f32.xlu0 %v9952_v54  ;;  %v17706_v12 = vpop.f32.mrb[214].mxu1  ;;  %v9946_v61 = vsel %vm1921_vm3, %v22166_v37, -inf }
0x1d6c   : > { %v22170_v1 = vpop.f32.mrb[215].mxu1 }
0x1d6d   : > { %v9949_v24 = vsel %vm1921_vm3, %v22170_v1, -inf }
0x1d6e   : > { %9950 = vmax.xlane.f32.xlu1 %v9949_v24 }
0x1d6f   : > { %9947 = vmax.xlane.f32.xlu0 %v9946_v61 }
0x1d71   : > { %v22176_v9 = vpop.f32.mrb[228].mxu0 }
0x1d72   : > { %v22178_v50 = vpop.f32.mrb[229].mxu0  ;;  %v9961_v10 = vsel %vm1928_vm2, %v22176_v9, -inf }
0x1d73   : > { %v17714_v52 = vpop.f32.mrb[230].mxu0  ;;  %9962 = vmax.xlane.f32.xlu1 %v9961_v10  ;;  %v9955_v17 = vsel %vm1921_vm3, %v22178_v50, -inf }
0x1d74   : > { %v22184_v43 = vpop.f32.mrb[231].mxu0  ;;  %9956 = vmax.xlane.f32.xlu0 %v9955_v17 }
0x1d75   : > { %v9958_v4 = vsel %vm1921_vm3, %v22184_v43, -inf }
0x1d77   : > { %9959 = vmax.xlane.f32.xlu1 %v9958_v4 }
0x1d79   : > { %v22188_v38 = vpop.f32.mrb[216].mxu1 }
0x1d7a   : > { %v22190_v63 = vpop.f32.mrb[217].mxu1  ;;  %v9970_v51 = vsel %vm1928_vm2, %v22188_v38, -inf }
0x1d7b   : > { %9971 = vmax.xlane.f32.xlu0 %v9970_v51  ;;  %v17722_v55 = vpop.f32.mrb[218].mxu1  ;;  %v9964_v39 = vsel %vm1921_vm3, %v22190_v63, -inf }
0x1d7c   : > { %v22194_v33 = vpop.f32.mrb[219].mxu1 }
0x1d7d   : > { %v9967_v7 = vsel %vm1921_vm3, %v22194_v33, -inf }
0x1d7e   : > { %9968 = vmax.xlane.f32.xlu1 %v9967_v7 }
0x1d7f   : > { %9965 = vmax.xlane.f32.xlu0 %v9964_v39 }
0x1d81   : > { %v22200_v34 = vpop.f32.mrb[232].mxu0 }
0x1d82   : > { %v22202_v6 = vpop.f32.mrb[233].mxu0  ;;  %v9979_v0 = vsel %vm1928_vm2, %v22200_v34, -inf }
0x1d83   : > { %v17730_v35 = vpop.f32.mrb[234].mxu0  ;;  %9980 = vmax.xlane.f32.xlu1 %v9979_v0  ;;  %v9973_v27 = vsel %vm1921_vm3, %v22202_v6, -inf }
0x1d84   : > { %v22208_v29 = vpop.f32.mrb[235].mxu0  ;;  %9974 = vmax.xlane.f32.xlu0 %v9973_v27 }
0x1d85   : > { %v9976_v25 = vsel %vm1921_vm3, %v22208_v29, -inf }
0x1d87   : > { %9977 = vmax.xlane.f32.xlu1 %v9976_v25 }
0x1d89   : > { %v22212_v20 = vpop.f32.mrb[220].mxu1 }
0x1d8a   : > { %v22214_v40 = vpop.f32.mrb[221].mxu1  ;;  %v9988_v48 = vsel %vm1928_vm2, %v22212_v20, -inf }
0x1d8b   : > { %9989 = vmax.xlane.f32.xlu0 %v9988_v48  ;;  %v17738_v36 = vpop.f32.mrb[222].mxu1  ;;  %v9982_v58 = vsel %vm1921_vm3, %v22214_v40, -inf }
0x1d8c   : > { %v22218_v44 = vpop.f32.mrb[223].mxu1 }
0x1d8d   : > { %v9985_v26 = vsel %vm1921_vm3, %v22218_v44, -inf }
0x1d8e   : > { %9986 = vmax.xlane.f32.xlu1 %v9985_v26 }
0x1d8f   : > { %9983 = vmax.xlane.f32.xlu0 %v9982_v58 }
0x1d91   : > { %v22224_v19 = vpop.f32.mrb[236].mxu0 }
0x1d92   : > { %v22226_v13 = vpop.f32.mrb[237].mxu0  ;;  %v9997_v21 = vsel %vm1928_vm2, %v22224_v19, -inf }
0x1d93   : > { %v17746_v5 = vpop.f32.mrb[238].mxu0  ;;  %9998 = vmax.xlane.f32.xlu1 %v9997_v21  ;;  %v9991_v2 = vsel %vm1921_vm3, %v22226_v13, -inf }
0x1d94   : > { %v22232_v14 = vpop.f32.mrb[239].mxu0  ;;  %9992 = vmax.xlane.f32.xlu0 %v9991_v2 }
0x1d95   : > { %v9994_v30 = vsel %vm1921_vm3, %v22232_v14, -inf }
0x1d97   : > { %9995 = vmax.xlane.f32.xlu1 %v9994_v30 }
0x1d99   : > { %v22236_v47 = vpop.f32.mrb[224].mxu1 }
0x1d9a   : > { %v22238_v11 = vpop.f32.mrb[225].mxu1  ;;  %v10006_v51 = vsel %vm1928_vm2, %v22236_v47, -inf }
0x1d9b   : > { %v17754_v42 = vpop.f32.mrb[226].mxu1  ;;  %v10000_v56 = vsel %vm1921_vm3, %v22238_v11, -inf }
0x1d9c   : > { %10001 = vmax.xlane.f32.xlu0 %v10000_v56  ;;  %v22242_v41 = vpop.f32.mrb[227].mxu1 }
0x1d9d   : > { %v10003_v59 = vsel %vm1921_vm3, %v22242_v41, -inf }
0x1d9e   : > { %10004 = vmax.xlane.f32.xlu1 %v10003_v59 }
0x1da1   : > { %v22246_v16 = vpop.f32.mrb[240].mxu0  ;;  %v17769_v22 = vpop.f32.mrb[228].mxu1 }
0x1da2   : > { %v22248_v49 = vpop.f32.mrb[241].mxu0  ;;  %v10256_v15 = vpop.f32.mrb[229].mxu1  ;;  %v10707_v23 = vpack.c.bf16 %v17769_v22, %v17769_v22  ;;  %v10015_v7 = vsel %vm1928_vm2, %v22246_v16, -inf }
0x1da3   : > { %v17762_v54 = vpop.f32.mrb[242].mxu0  ;;  %v17770_v12 = vpop.f32.mrb[230].mxu1  ;;  %v10009_v24 = vsel %vm1921_vm3, %v22248_v49, -inf }
0x1da4   : > { %v22252_v61 = vpop.f32.mrb[243].mxu0  ;;  %10010 = vmax.xlane.f32.xlu0 %v10009_v24  ;;  %v10259_v10 = vpop.f32.mrb[231].mxu1  ;;  %v10729_v4 = vand.u32 %v10707_v23, %v20357_v46 }
0x1da5   : > { %v10706_v52 = vpack.c.bf16 %v10259_v10, %v10256_v15  ;;  %v10012_v17 = vsel %vm1921_vm3, %v22252_v61, -inf }
0x1da6   : > { %10013 = vmax.xlane.f32.xlu1 %v10012_v17 }
0x1da7   : > { %17827 = vmatprep.subr.bf16.mxu1 %v10706_v52 }
0x1da8   : > { %10007 = vmax.xlane.f32.xlu0 %v10006_v51  ;;  %17828 = vmatpush3.bf16.msra.mxu1 %v10706_v52 }
0x1da9   : > { %v17777_v55 = vpop.f32.mrb[244].mxu0  ;;  %17829 = vmatprep.subr.bf16.mxu1 %v10729_v4 }
0x1daa   : > { %v22261_v39 = vpop.f32.mrb[232].mxu1  ;;  %v10316_v0 = vpop.f32.mrb[245].mxu0  ;;  %10016 = vmax.xlane.f32.xlu1 %v10015_v7  ;;  %v10709_v35 = vpack.c.bf16 %v17777_v55, %v17777_v55 }
0x1dab   : > { %v10376_v27 = vpop.f32.mrb[233].mxu1  ;;  %v17778_v25 = vpop.f32.mrb[246].mxu0 }
0x1dac   : > { %v17786_v48 = vpop.f32.mrb[234].mxu1  ;;  %v10319_v36 = vpop.f32.mrb[247].mxu0  ;;  %17830 = vmatpush3.bf16.msra.mxu1 %v10729_v4  ;;  %v10786_v5 = vand.u32 %v10709_v35, %v20357_v46 }
0x1dad   : > { %v10708_v26 = vpack.c.bf16 %v10319_v36, %v10316_v0  ;;  %v10379_v58 = vpop.f32.mrb[235].mxu1 }
0x1dae   : > { %v22263_v21 = vpack.c.bf16 %v10379_v58, %v10376_v27 }
0x1daf   : > { %17835 = vmatprep.subr.bf16.mxu0 %v10708_v26 }
0x1db0   : > { %17843 = vmatprep.subr.bf16.mxu1 %v22263_v21  ;;  %17836 = vmatpush3.bf16.msra.mxu0 %v10708_v26 }
0x1db1   : > { %v22267_v2 = vpop.f32.mrb[248].mxu0  ;;  %17837 = vmatprep.subr.bf16.mxu0 %v10786_v5 }
0x1db2   : > { %v22269_v30 = vpop.f32.mrb[236].mxu1  ;;  %v10436_v42 = vpop.f32.mrb[249].mxu0 }
0x1db3   : > { %v10496_v56 = vpop.f32.mrb[237].mxu1  ;;  %v17794_v59 = vpop.f32.mrb[250].mxu0 }
0x1db4   : > { %v17802_v22 = vpop.f32.mrb[238].mxu1  ;;  %v10439_v15 = vpop.f32.mrb[251].mxu0  ;;  %17838 = vmatpush3.bf16.msra.mxu0 %v10786_v5 }
0x1db5   : > { %v22271_v23 = vpack.c.bf16 %v10439_v15, %v10436_v42  ;;  %v10499_v54 = vpop.f32.mrb[239].mxu1 }
0x1db6   : > { %v22273_v12 = vpack.c.bf16 %v10499_v54, %v10496_v56 }
0x1db7   : > { %17851 = vmatprep.subr.bf16.mxu0 %v22271_v23 }
0x1db9   : > { %v22276_v24 = vpop.f32.mrb[252].mxu0 }
0x1dba   : > { %v22278_v10 = vpop.f32.mrb[240].mxu1  ;;  %v10556_v52 = vpop.f32.mrb[253].mxu0 }
0x1dbb   : > { %v10616_v17 = vpop.f32.mrb[241].mxu1  ;;  %v17810_v4 = vpop.f32.mrb[254].mxu0 }
0x1dbc   : > { %v17818_v51 = vpop.f32.mrb[242].mxu1  ;;  %v10559_v55 = vpop.f32.mrb[255].mxu0 }
0x1dbd   : > { %v22280_v7 = vpack.c.bf16 %v10559_v55, %v10556_v52  ;;  %v10619_v0 = vpop.f32.mrb[243].mxu1 }
0x1dbe   : > { %v22282_v35 = vpack.c.bf16 %v10619_v0, %v10616_v17 }
0x1dc1   : > { %v22284_v27 = vpop.f32.mrb[0].mxu0 }
0x1dc2   : > { %v10676_v25 = vpop.f32.mrb[1].mxu0 }
0x1dc3   : > { %v17826_v48 = vpop.f32.mrb[2].mxu0 }
0x1dc4   : > { %v10679_v36 = vpop.f32.mrb[3].mxu0 }
0x1dc5   : > { %v22286_v26 = vpack.c.bf16 %v10679_v36, %v10676_v25 }
0x1df8   : > { %v9954_v58 = vpop.xlane.xlu0 %9953 }
0x1df9   : > { %v10020_v5 = vsub.f32 %v22164_v32, %v9954_v58 }
0x1dfb   : > { %v10046_v42 = vmul.f32 1.442695, %v10020_v5  ;;  %v9951_v56 = vpop.xlane.xlu1 %9950 }
0x1dfc   : > { %v10019_v59 = vsub.f32 %v22170_v1, %v9951_v56  ;;  %v9948_v22 = vpop.xlane.xlu0 %9947 }
0x1dfd   : > { %19007 = vpow2.f32 %v10046_v42  ;;  %v10018_v15 = vsub.f32 %v22166_v37, %v9948_v22 }
0x1dfe   : > { %v10044_v54 = vmul.f32 1.442695, %v10019_v59 }
0x1dff   : > { %v10042_v52 = vmul.f32 1.442695, %v10018_v15 }
0x1e00   : > { %19009 = vpow2.f32 %v10044_v54  ;;  %v9963_v17 = vpop.xlane.xlu1 %9962 }
0x1e01   : > { %19011 = vpow2.f32 %v10042_v52  ;;  %v10023_v4 = vsub.f32 %v22176_v9, %v9963_v17  ;;  %v9957_v51 = vpop.xlane.xlu0 %9956 }
0x1e02   : > { %v10021_v55 = vsub.f32 %v22178_v50, %v9957_v51 }
0x1e03   : > { %v10052_v0 = vmul.f32 1.442695, %v10023_v4 }
0x1e04   : > { %v10048_v32 = vmul.f32 1.442695, %v10021_v55  ;;  %v9960_v25 = vpop.xlane.xlu1 %9959 }
0x1e05   : > { %19013 = vpow2.f32 %v10052_v0  ;;  %v10022_v1 = vsub.f32 %v22184_v43, %v9960_v25 }
0x1e06   : > { %19015 = vpow2.f32 %v10048_v32 }
0x1e07   : > { %v22294_v48 = vpop.eup %19007  ;;  %v10050_v37 = vmul.f32 1.442695, %v10022_v1 }
0x1e08   : > { %v9972_v36 = vpop.xlane.xlu0 %9971  ;;  %v10096_v58 = vsel %vm1928_vm2, %v22294_v48, 0.0 }
0x1e09   : > { %19017 = vpow2.f32 %v10050_v37  ;;  %v10026_v9 = vsub.f32 %v22188_v38, %v9972_v36  ;;  %10097 = vadd.xlane.f32.xlu0 %v10096_v58 }
0x1e0a   : > { %v22299_v5 = vpop.eup %19009 }
0x1e0b   : > { %v22301_v50 = vpop.eup %19011  ;;  %v10058_v42 = vmul.f32 1.442695, %v10026_v9  ;;  %v9969_v56 = vpop.xlane.xlu1 %9968  ;;  %v10093_v43 = vsel %vm1921_vm3, %v22299_v5, 0.0 }
0x1e0c   : > { %v10025_v59 = vsub.f32 %v22194_v33, %v9969_v56  ;;  %v9966_v22 = vpop.xlane.xlu0 %9965  ;;  %10094 = vadd.xlane.f32.xlu1 %v10093_v43  ;;  %v10090_v15 = vsel %vm1921_vm3, %v22301_v50, 0.0 }
0x1e0d   : > { %19019 = vpow2.f32 %v10058_v42  ;;  %v10024_v38 = vsub.f32 %v22190_v63, %v9966_v22  ;;  %10091 = vadd.xlane.f32.xlu0 %v10090_v15 }
0x1e0e   : > { %v10056_v54 = vmul.f32 1.442695, %v10025_v59 }
0x1e0f   : > { %v22309_v52 = vpop.eup %19013  ;;  %v10054_v17 = vmul.f32 1.442695, %v10024_v38 }
0x1e10   : > { %v22311_v4 = vpop.eup %19015  ;;  %19021 = vpow2.f32 %v10056_v54  ;;  %v9981_v51 = vpop.xlane.xlu1 %9980  ;;  %v10105_v33 = vsel %vm1928_vm2, %v22309_v52, 0.0 }
0x1e11   : > { %19023 = vpow2.f32 %v10054_v17  ;;  %v10029_v55 = vsub.f32 %v22200_v34, %v9981_v51  ;;  %v9975_v0 = vpop.xlane.xlu0 %9974  ;;  %10106 = vadd.xlane.f32.xlu1 %v10105_v33  ;;  %v10099_v63 = vsel %vm1921_vm3, %v22311_v4, 0.0 }
0x1e12   : > { %v10027_v32 = vsub.f32 %v22202_v6, %v9975_v0  ;;  %10100 = vadd.xlane.f32.xlu0 %v10099_v63 }
0x1e13   : > { %v22319_v25 = vpop.eup %19017  ;;  %v10064_v1 = vmul.f32 1.442695, %v10029_v55 }
0x1e14   : > { %v10060_v37 = vmul.f32 1.442695, %v10027_v32  ;;  %v9978_v36 = vpop.xlane.xlu1 %9977  ;;  %v10102_v58 = vsel %vm1921_vm3, %v22319_v25, 0.0 }
0x1e15   : > { %19025 = vpow2.f32 %v10064_v1  ;;  %v10028_v9 = vsub.f32 %v22208_v29, %v9978_v36  ;;  %10103 = vadd.xlane.f32.xlu1 %v10102_v58 }
0x1e16   : > { %19027 = vpow2.f32 %v10060_v37 }
0x1e17   : > { %v22324_v34 = vpop.eup %19019  ;;  %v10062_v42 = vmul.f32 1.442695, %v10028_v9 }
0x1e18   : > { %v9990_v56 = vpop.xlane.xlu0 %9989  ;;  %v10114_v6 = vsel %vm1928_vm2, %v22324_v34, 0.0 }
0x1e19   : > { %19029 = vpow2.f32 %v10062_v42  ;;  %v10032_v43 = vsub.f32 %v22212_v20, %v9990_v56  ;;  %10115 = vadd.xlane.f32.xlu0 %v10114_v6 }
0x1e1a   : > { %v22329_v59 = vpop.eup %19021 }
0x1e1b   : > { %v22331_v22 = vpop.eup %19023  ;;  %v10070_v15 = vmul.f32 1.442695, %v10032_v43  ;;  %v9987_v38 = vpop.xlane.xlu1 %9986  ;;  %v10111_v29 = vsel %vm1921_vm3, %v22329_v59, 0.0 }
0x1e1c   : > { %v10031_v54 = vsub.f32 %v22218_v44, %v9987_v38  ;;  %v9984_v17 = vpop.xlane.xlu0 %9983  ;;  %10112 = vadd.xlane.f32.xlu1 %v10111_v29  ;;  %v10108_v51 = vsel %vm1921_vm3, %v22331_v22, 0.0 }
0x1e1d   : > { %19031 = vpow2.f32 %v10070_v15  ;;  %v10030_v20 = vsub.f32 %v22214_v40, %v9984_v17  ;;  %10109 = vadd.xlane.f32.xlu0 %v10108_v51 }
0x1e1e   : > { %v10068_v33 = vmul.f32 1.442695, %v10031_v54 }
0x1e1f   : > { %v22339_v55 = vpop.eup %19025  ;;  %v10066_v0 = vmul.f32 1.442695, %v10030_v20 }
0x1e20   : > { %v22341_v63 = vpop.eup %19027  ;;  %19033 = vpow2.f32 %v10068_v33  ;;  %v9999_v32 = vpop.xlane.xlu1 %9998  ;;  %v10123_v44 = vsel %vm1928_vm2, %v22339_v55, 0.0 }
0x1e21   : > { %19035 = vpow2.f32 %v10066_v0  ;;  %v10035_v1 = vsub.f32 %v22224_v19, %v9999_v32  ;;  %v9993_v37 = vpop.xlane.xlu0 %9992  ;;  %10124 = vadd.xlane.f32.xlu1 %v10123_v44  ;;  %v10117_v40 = vsel %vm1921_vm3, %v22341_v63, 0.0 }
0x1e22   : > { %v10033_v36 = vsub.f32 %v22226_v13, %v9993_v37  ;;  %10118 = vadd.xlane.f32.xlu0 %v10117_v40 }
0x1e23   : > { %v22349_v58 = vpop.eup %19029  ;;  %v10076_v9 = vmul.f32 1.442695, %v10035_v1 }
0x1e24   : > { %v10072_v42 = vmul.f32 1.442695, %v10033_v36  ;;  %v9996_v56 = vpop.xlane.xlu1 %9995  ;;  %v10120_v6 = vsel %vm1921_vm3, %v22349_v58, 0.0 }
0x1e25   : > { %19037 = vpow2.f32 %v10076_v9  ;;  %v10034_v43 = vsub.f32 %v22232_v14, %v9996_v56  ;;  %10121 = vadd.xlane.f32.xlu1 %v10120_v6 }
0x1e26   : > { %19039 = vpow2.f32 %v10072_v42 }
0x1e27   : > { %v22354_v19 = vpop.eup %19031  ;;  %v10074_v15 = vmul.f32 1.442695, %v10034_v43 }
0x1e28   : > { %v10132_v13 = vsel %vm1928_vm2, %v22354_v19, 0.0 }
0x1e29   : > { %19041 = vpow2.f32 %v10074_v15  ;;  %10133 = vadd.xlane.f32.xlu0 %v10132_v13  ;;  %v10002_v38 = vpop.xlane.xlu0 %10001 }
0x1e2a   : > { %v22358_v29 = vpop.eup %19033  ;;  %v10036_v54 = vsub.f32 %v22238_v11, %v10002_v38 }
0x1e2b   : > { %v22361_v17 = vpop.eup %19035  ;;  %v10005_v51 = vpop.xlane.xlu1 %10004  ;;  %v10129_v14 = vsel %vm1921_vm3, %v22358_v29, 0.0 }
0x1e2c   : > { %v10078_v20 = vmul.f32 1.442695, %v10036_v54  ;;  %v10037_v33 = vsub.f32 %v22242_v41, %v10005_v51  ;;  %10130 = vadd.xlane.f32.xlu1 %v10129_v14  ;;  %v10126_v0 = vsel %vm1921_vm3, %v22361_v17, 0.0 }
0x1e2d   : > { %10127 = vadd.xlane.f32.xlu0 %v10126_v0 }
0x1e2e   : > { %19043 = vpow2.f32 %v10078_v20  ;;  %v10080_v32 = vmul.f32 1.442695, %v10037_v33 }
0x1e2f   : > { %v22368_v44 = vpop.eup %19037 }
0x1e30   : > { %v22370_v1 = vpop.eup %19039  ;;  %19045 = vpow2.f32 %v10080_v32  ;;  %v10141_v11 = vsel %vm1928_vm2, %v22368_v44, 0.0 }
0x1e31   : > { %v10011_v37 = vpop.xlane.xlu0 %10010  ;;  %10142 = vadd.xlane.f32.xlu1 %v10141_v11  ;;  %v10135_v41 = vsel %vm1921_vm3, %v22370_v1, 0.0 }
0x1e32   : > { %v10039_v40 = vsub.f32 %v22248_v49, %v10011_v37  ;;  %10136 = vadd.xlane.f32.xlu0 %v10135_v41 }
0x1e33   : > { %v22377_v36 = vpop.eup %19041  ;;  %v10014_v9 = vpop.xlane.xlu1 %10013 }
0x1e34   : > { %v10084_v42 = vmul.f32 1.442695, %v10039_v40  ;;  %v10040_v56 = vsub.f32 %v22252_v61, %v10014_v9  ;;  %v10138_v6 = vsel %vm1921_vm3, %v22377_v36, 0.0 }
0x1e35   : > { %v10008_v43 = vpop.xlane.xlu0 %10007  ;;  %10139 = vadd.xlane.f32.xlu1 %v10138_v6 }
0x1e36   : > { %19047 = vpow2.f32 %v10084_v42  ;;  %v10086_v15 = vmul.f32 1.442695, %v10040_v56  ;;  %v10038_v13 = vsub.f32 %v22236_v47, %v10008_v43 }
0x1e37   : > { %v10017_v38 = vpop.xlane.xlu1 %10016 }
0x1e38   : > { %v22383_v54 = vpop.eup %19043  ;;  %19049 = vpow2.f32 %v10086_v15  ;;  %v10082_v49 = vmul.f32 1.442695, %v10038_v13  ;;  %v10041_v51 = vsub.f32 %v22246_v16, %v10017_v38 }
0x1e39   : > { %v10144_v14 = vsel %vm1921_vm3, %v22383_v54, 0.0 }
0x1e3a   : > { %v22388_v61 = vpop.eup %19045  ;;  %19051 = vpow2.f32 %v10082_v49  ;;  %v10088_v20 = vmul.f32 1.442695, %v10041_v51  ;;  %10145 = vadd.xlane.f32.xlu0 %v10144_v14 }
0x1e3b   : > { %v10147_v33 = vsel %vm1921_vm3, %v22388_v61, 0.0 }
0x1e3c   : > { %19053 = vpow2.f32 %v10088_v20  ;;  %10148 = vadd.xlane.f32.xlu1 %v10147_v33 }
0x1e40   : > { %v22392_v47 = vpop.eup %19047 }
0x1e41   : > { %v10153_v0 = vsel %vm1921_vm3, %v22392_v47, 0.0 }
0x1e42   : > { %v22396_v32 = vpop.eup %19049  ;;  %10154 = vadd.xlane.f32.xlu0 %v10153_v0  ;;  %v10711_v0 = vpack.c.bf16 %v22261_v39, %v22261_v39 }
0x1e43   : > { %v10156_v16 = vsel %vm1921_vm3, %v22396_v32, 0.0 }
0x1e44   : > { %v22400_v11 = vpop.eup %19051  ;;  %10157 = vadd.xlane.f32.xlu1 %v10156_v16 }
0x1e45   : > { %v10150_v37 = vsel %vm1928_vm2, %v22400_v11, 0.0 }
0x1e46   : > { %v22404_v41 = vpop.eup %19053  ;;  %10151 = vadd.xlane.f32.xlu0 %v10150_v37 }
0x1e47   : > { %v10159_v40 = vsel %vm1928_vm2, %v22404_v41, 0.0 }
0x1e48   : > { %10160 = vadd.xlane.f32.xlu1 %v10159_v40 }
0x1e96   : > { %v10098_v9 = vpop.xlane.xlu0 %10097 }
0x1e97   : > { %19055 = vrcp.f32 %v10098_v9 }
0x1e99   : > { %v10095_v42 = vpop.xlane.xlu1 %10094 }
0x1e9a   : > { %19057 = vrcp.f32 %v10095_v42  ;;  %v10092_v56 = vpop.xlane.xlu0 %10091 }
0x1e9b   : > { %19059 = vrcp.f32 %v10092_v56 }
0x1e9e   : > { %v10107_v6 = vpop.xlane.xlu1 %10106 }
0x1e9f   : > { %v10101_v43 = vpop.xlane.xlu0 %10100  ;;  %19061 = vrcp.f32 %v10107_v6 }
0x1ea0   : > { %19063 = vrcp.f32 %v10101_v43 }
0x1ea1   : > { %v19056_v15 = vpop.eup %19055 }
0x1ea2   : > { %v10104_v13 = vpop.xlane.xlu1 %10103  ;;  %v10188_v51 = vmul.f32 %v19056_v15, %v22294_v48  ;;  %v10843_v48 = vand.u32 %v10711_v0, %v20357_v46  ;;  %v10713_v15 = vpack.c.bf16 %v22267_v2, %v22267_v2  ;;  %v10715_v0 = vpack.c.bf16 %v22269_v30, %v22269_v30 }
0x1ea3   : > { %19065 = vrcp.f32 %v10104_v13 }
0x1ea4   : > { %v19058_v38 = vpop.eup %19057  ;;  %v10691_v40 = vpack.c.bf16 %v10188_v51, %v10188_v51  ;;  %v10900_v51 = vand.u32 %v10713_v15, %v20357_v46 }
0x1ea5   : > { %v19060_v49 = vpop.eup %19059  ;;  %v10187_v14 = vmul.f32 %v19058_v38, %v22299_v5 }
0x1ea6   : > { %v10116_v20 = vpop.xlane.xlu0 %10115  ;;  %v10186_v33 = vmul.f32 %v19060_v49, %v22301_v50 }
0x1ea7   : > { %19067 = vrcp.f32 %v10116_v20 }
0x1ea8   : > { %v10690_v16 = vpack.c.bf16 %v10187_v14, %v10186_v33 }
0x1ea9   : > { %v10113_v37 = vpop.xlane.xlu1 %10112  ;;  %v19062_v9 = vpop.eup %19061 }
0x1eaa   : > { %19069 = vrcp.f32 %v10113_v37  ;;  %v10110_v42 = vpop.xlane.xlu0 %10109  ;;  %17831 = vmatprep.mubr.msk.bf16.mxu1 %vm1921_vm3, %v10690_v16  ;;  %v19064_v56 = vpop.eup %19063  ;;  %v10191_v39 = vmul.f32 %v19062_v9, %v22309_v52 }
0x1eab   : > { %19071 = vrcp.f32 %v10110_v42  ;;  %17832 = vmatmul.mubr.msk.bf16.vlgmr.msra.gmra.mrb[244].mxu1 %vm1921_vm3, %v10691_v40  ;;  %v10189_v6 = vmul.f32 %v19064_v56, %v22311_v4 }
0x1eac   : > { %17844 = vmatpush3.bf16.msra.mxu1 %v22263_v21  ;;  %v10693_v49 = vpack.c.bf16 %v10191_v39, %v10191_v39 }
0x1ead   : > { %v19066_v5 = vpop.eup %19065  ;;  %17845 = vmatprep.subr.bf16.mxu1 %v10843_v48 }
0x1eae   : > { %v10125_v50 = vpop.xlane.xlu1 %10124  ;;  %v10190_v43 = vmul.f32 %v19066_v5, %v22319_v25  ;;  %v10717_v5 = vpack.c.bf16 %v22276_v24, %v22276_v24 }
0x1eaf   : > { %v10119_v13 = vpop.xlane.xlu0 %10118  ;;  %19073 = vrcp.f32 %v10125_v50 }
0x1eb0   : > { %17846 = vmatpush3.bf16.msra.mxu1 %v10843_v48  ;;  %v10692_v38 = vpack.c.bf16 %v10190_v43, %v10189_v6  ;;  %19075 = vrcp.f32 %v10119_v13 }
0x1eb1   : > { %17859 = vmatprep.subr.bf16.mxu1 %v22273_v12  ;;  %v19068_v21 = vpop.eup %19067 }
0x1eb2   : > { %17839 = vmatprep.mubr.msk.bf16.mxu0 %vm1921_vm3, %v10692_v38  ;;  %v10122_v52 = vpop.xlane.xlu1 %10121  ;;  %v10194_v25 = vmul.f32 %v19068_v21, %v22324_v34  ;;  %v10719_v38 = vpack.c.bf16 %v22278_v10, %v22278_v10 }
0x1eb3   : > { %19077 = vrcp.f32 %v10122_v52  ;;  %17840 = vmatmul.mubr.msk.bf16.vlgmr.msra.gmra.mrb[4].mxu0 %vm1921_vm3, %v10693_v49 }
0x1eb4   : > { %v19070_v4 = vpop.eup %19069  ;;  %17852 = vmatpush3.bf16.msra.mxu0 %v22271_v23  ;;  %v10695_v40 = vpack.c.bf16 %v10194_v25, %v10194_v25  ;;  %v10721_v25 = vpack.c.bf16 %v22284_v27, %v22284_v27 }
0x1eb5   : > { %v19072_v2 = vpop.eup %19071  ;;  %17853 = vmatprep.subr.bf16.mxu0 %v10900_v51  ;;  %v10193_v14 = vmul.f32 %v19070_v4, %v22329_v59  ;;  %v10957_v59 = vand.u32 %v10715_v0, %v20357_v46 }
0x1eb6   : > { %v10134_v20 = vpop.xlane.xlu0 %10133  ;;  %v10192_v33 = vmul.f32 %v19072_v2, %v22331_v22 }
0x1eb7   : > { %19079 = vrcp.f32 %v10134_v20 }
0x1eb8   : > { %17854 = vmatpush3.bf16.msra.mxu0 %v10900_v51  ;;  %v10694_v16 = vpack.c.bf16 %v10193_v14, %v10192_v33 }
0x1eb9   : > { %17867 = vmatprep.subr.bf16.mxu0 %v22280_v7  ;;  %v10131_v37 = vpop.xlane.xlu1 %10130  ;;  %v19074_v23 = vpop.eup %19073 }
0x1eba   : > { %19081 = vrcp.f32 %v10131_v37  ;;  %v10128_v9 = vpop.xlane.xlu0 %10127  ;;  %17847 = vmatprep.mubr.msk.bf16.mxu1 %vm1921_vm3, %v10694_v16  ;;  %v19076_v34 = vpop.eup %19075  ;;  %v10197_v22 = vmul.f32 %v19074_v23, %v22339_v55  ;;  %v11014_v55 = vand.u32 %v10717_v5, %v20357_v46 }
0x1ebb   : > { %19083 = vrcp.f32 %v10128_v9  ;;  %17848 = vmatmul.mubr.msk.bf16.vlgmr.msra.gmra.mrb[248].mxu1 %vm1921_vm3, %v10695_v40  ;;  %v10195_v56 = vmul.f32 %v19076_v34, %v22341_v63 }
0x1ebc   : > { %17860 = vmatpush3.bf16.msra.mxu1 %v22273_v12  ;;  %v10697_v6 = vpack.c.bf16 %v10197_v22, %v10197_v22 }
0x1ebd   : > { %v19078_v30 = vpop.eup %19077  ;;  %17861 = vmatprep.subr.bf16.mxu1 %v10957_v59 }
0x1ebe   : > { %v10143_v42 = vpop.xlane.xlu1 %10142  ;;  %v10196_v48 = vmul.f32 %v19078_v30, %v22349_v58 }
0x1ebf   : > { %v10137_v39 = vpop.xlane.xlu0 %10136  ;;  %19085 = vrcp.f32 %v10143_v42 }
0x1ec0   : > { %17862 = vmatpush3.bf16.msra.mxu1 %v10957_v59  ;;  %v10696_v50 = vpack.c.bf16 %v10196_v48, %v10195_v56  ;;  %19087 = vrcp.f32 %v10137_v39 }
0x1ec1   : > { %17875 = vmatprep.subr.bf16.mxu1 %v22282_v35  ;;  %v19080_v12 = vpop.eup %19079 }
0x1ec2   : > { %v10140_v43 = vpop.xlane.xlu1 %10139  ;;  %17855 = vmatprep.mubr.msk.bf16.mxu0 %vm1921_vm3, %v10696_v50  ;;  %v10200_v58 = vmul.f32 %v19080_v12, %v22354_v19 }
0x1ec3   : > { %19089 = vrcp.f32 %v10140_v43  ;;  %17856 = vmatmul.mubr.msk.bf16.vlgmr.msra.gmra.mrb[8].mxu0 %vm1921_vm3, %v10697_v6 }
0x1ec4   : > { %v19082_v63 = vpop.eup %19081  ;;  %17868 = vmatpush3.bf16.msra.mxu0 %v22280_v7  ;;  %v10699_v51 = vpack.c.bf16 %v10200_v58, %v10200_v58 }
0x1ec5   : > { %v19084_v24 = vpop.eup %19083  ;;  %17869 = vmatprep.subr.bf16.mxu0 %v11014_v55  ;;  %v10199_v15 = vmul.f32 %v19082_v63, %v22358_v29  ;;  %v11071_v29 = vand.u32 %v10719_v38, %v20357_v46 }
0x1ec6   : > { %v10198_v13 = vmul.f32 %v19084_v24, %v22361_v17 }
0x1ec7   : > { %v10146_v49 = vpop.xlane.xlu0 %10145 }
0x1ec8   : > { %19091 = vrcp.f32 %v10146_v49  ;;  %17870 = vmatpush3.bf16.msra.mxu0 %v11014_v55  ;;  %v10698_v21 = vpack.c.bf16 %v10199_v15, %v10198_v13 }
0x1ec9   : > { %17883 = vmatprep.subr.bf16.mxu0 %v22286_v26  ;;  %v10149_v52 = vpop.xlane.xlu1 %10148  ;;  %v19086_v7 = vpop.eup %19085 }
0x1eca   : > { %19093 = vrcp.f32 %v10149_v52  ;;  %17863 = vmatprep.mubr.msk.bf16.mxu1 %vm1921_vm3, %v10698_v21  ;;  %v19088_v19 = vpop.eup %19087  ;;  %v10203_v17 = vmul.f32 %v19086_v7, %v22368_v44 }
0x1ecb   : > { %17864 = vmatmul.mubr.msk.bf16.vlgmr.msra.gmra.mrb[252].mxu1 %vm1921_vm3, %v10699_v51  ;;  %v10201_v4 = vmul.f32 %v19088_v19, %v22370_v1 }
0x1ecc   : > { %17876 = vmatpush3.bf16.msra.mxu1 %v22282_v35  ;;  %v10701_v33 = vpack.c.bf16 %v10203_v17, %v10203_v17  ;;  %v11128_v35 = vand.u32 %v10721_v25, %v20357_v46 }
0x1ecd   : > { %v19090_v10 = vpop.eup %19089  ;;  %17877 = vmatprep.subr.bf16.mxu1 %v11071_v29 }
0x1ece   : > { %v10202_v2 = vmul.f32 %v19090_v10, %v22377_v36 }
0x1ecf   : > { %v10155_v14 = vpop.xlane.xlu0 %10154 }
0x1ed0   : > { %19095 = vrcp.f32 %v10155_v14  ;;  %17878 = vmatpush3.bf16.msra.mxu1 %v11071_v29  ;;  %v10700_v20 = vpack.c.bf16 %v10202_v2, %v10201_v4 }
0x1ed1   : > { %v10158_v0 = vpop.xlane.xlu1 %10157 }
0x1ed2   : > { %v19092_v16 = vpop.eup %19091  ;;  %19097 = vrcp.f32 %v10158_v0  ;;  %17871 = vmatprep.mubr.msk.bf16.mxu0 %vm1921_vm3, %v10700_v20 }
0x1ed3   : > { %v10152_v44 = vpop.xlane.xlu0 %10151  ;;  %17872 = vmatmul.mubr.msk.bf16.vlgmr.msra.gmra.mrb[12].mxu0 %vm1921_vm3, %v10701_v33  ;;  %v10204_v36 = vmul.f32 %v19092_v16, %v22383_v54 }
0x1ed4   : > { %v19094_v1 = vpop.eup %19093  ;;  %19099 = vrcp.f32 %v10152_v44  ;;  %17884 = vmatpush3.bf16.msra.mxu0 %v22286_v26 }
0x1ed5   : > { %17885 = vmatprep.subr.bf16.mxu0 %v11128_v35  ;;  %v10161_v27 = vpop.xlane.xlu1 %10160  ;;  %v10205_v37 = vmul.f32 %v19094_v1, %v22388_v61 }
0x1ed6   : > { %19101 = vrcp.f32 %v10161_v27 }
0x1ed7   : > { %v10702_v40 = vpack.c.bf16 %v10205_v37, %v10204_v36 }
0x1ed8   : > { %17886 = vmatpush3.bf16.msra.mxu0 %v11128_v35 }
0x1ed9   : > { %17879 = vmatprep.mubr.msk.bf16.mxu1 %vm1921_vm3, %v10702_v40 }
0x1eda   : > { %v19096_v23 = vpop.eup %19095 }
0x1edb   : > { %v10207_v34 = vmul.f32 %v19096_v23, %v22392_v47 }
0x1edc   : > { %v19098_v9 = vpop.eup %19097 }
0x1edd   : > { %v10208_v59 = vmul.f32 %v19098_v9, %v22396_v32 }
0x1ede   : > { %v19100_v30 = vpop.eup %19099 }
0x1edf   : > { %v10206_v26 = vmul.f32 %v19100_v30, %v22400_v11  ;;  %v10704_v22 = vpack.c.bf16 %v10208_v59, %v10207_v34 }
0x1ee0   : > { %v19102_v42 = vpop.eup %19101 }
0x1ee1   : > { %v10703_v56 = vpack.c.bf16 %v10206_v26, %v10206_v26  ;;  %v10209_v54 = vmul.f32 %v19102_v42, %v22404_v41  ;;  %17887 = vmatprep.mubr.msk.bf16.mxu0 %vm1921_vm3, %v10704_v22  ;;  %v22479_v26 = vld [vmem:[%s22825_s7 + $0x18] sm:$0x3f] }
0x1ee2   : > { %v11202_v22 = vrot.slane %v22479_v26, %v20576_v28 }
0x1ee3   : > { %v10705_v61 = vpack.c.bf16 %v10209_v54, %v10209_v54  ;;  %17880 = vmatmul.mubr.msk.bf16.vlgmr.msra.gmra.mrb[0].mxu1 %vm1921_vm3, %v10703_v56 }
0x1ee5   : > { %17888 = vmatmul.mubr.msk.bf16.vlgmr.msra.gmra.mrb[16].mxu0 %vm1921_vm3, %v10705_v61 }
0x1f7e   : > { %v17833_v48 = vpop.f32.mrb[244].mxu1 }
0x1f7f   : > { %v10765_v5 = vpop.f32.mrb[245].mxu1 }
0x1f80   : > { %v17834_v47 = vpop.f32.mrb[246].mxu1 }
0x1f81   : > { %v10768_v39 = vpop.f32.mrb[247].mxu1 }
0x1f86   : > { %v17841_v32 = vpop.f32.mrb[4].mxu0 }
0x1f87   : > { %v11180_v50 = vadd.f32 %v17841_v32, %v17833_v48  ;;  %v10822_v6 = vpop.f32.mrb[5].mxu0 }
0x1f88   : > { %v11178_v11 = vadd.f32 %v10822_v6, %v10765_v5  ;;  %v17842_v12 = vpop.f32.mrb[6].mxu0 }
0x1f89   : > { %v10825_v43 = vpop.f32.mrb[7].mxu0 }
0x1f8a   : > { %v11179_v55 = vadd.f32 %v10825_v43, %v10768_v39 }
0x1f8e   : > { %v17849_v63 = vpop.f32.mrb[248].mxu1 }
0x1f8f   : > { %v10879_v41 = vpop.f32.mrb[249].mxu1 }
0x1f90   : > { %v17850_v24 = vpop.f32.mrb[250].mxu1 }
0x1f91   : > { %v10882_v58 = vpop.f32.mrb[251].mxu1 }
0x1f96   : > { %v17857_v15 = vpop.f32.mrb[8].mxu0 }
0x1f97   : > { %v11183_v13 = vadd.f32 %v17857_v15, %v17849_v63  ;;  %v10936_v38 = vpop.f32.mrb[9].mxu0 }
0x1f98   : > { %v11181_v49 = vadd.f32 %v10936_v38, %v10879_v41  ;;  %v17858_v21 = vpop.f32.mrb[10].mxu0 }
0x1f99   : > { %v11192_v52 = vadd.f32 %v11183_v13, %v11180_v50  ;;  %v10939_v51 = vpop.f32.mrb[11].mxu0 }
0x1f9a   : > { %v11190_v7 = vadd.f32 %v11181_v49, %v11178_v11  ;;  %v11182_v19 = vadd.f32 %v10939_v51, %v10882_v58 }
0x1f9c   : > { %v11191_v29 = vadd.f32 %v11182_v19, %v11179_v55  ;;  %v18395_v19 = vld [vmem:[#allocation4 + $0x30] sm:$0xff]  }
0x1f9d   : > { %17891 = vmatprep.subr.bf16.mxu1 %v18395_v19 }
0x1f9e   : > { %v17865_v10 = vpop.f32.mrb[252].mxu1  ;;  %17892 = vmatpush3.bf16.msra.mxu1 %v18395_v19 }
0x1f9f   : > { %v10993_v17 = vpop.f32.mrb[253].mxu1 }
0x1fa0   : > { %v17866_v4 = vpop.f32.mrb[254].mxu1 }
0x1fa1   : > { %v10996_v2 = vpop.f32.mrb[255].mxu1 }
0x1fa6   : > { %v17873_v25 = vpop.f32.mrb[12].mxu0 }
0x1fa7   : > { %v11186_v14 = vadd.f32 %v17873_v25, %v17865_v10  ;;  %v11050_v20 = vpop.f32.mrb[13].mxu0 }
0x1fa8   : > { %v11184_v33 = vadd.f32 %v11050_v20, %v10993_v17  ;;  %v17874_v0 = vpop.f32.mrb[14].mxu0 }
0x1fa9   : > { %v11053_v16 = vpop.f32.mrb[15].mxu0 }
0x1faa   : > { %v11185_v35 = vadd.f32 %v11053_v16, %v10996_v2  ;;  %v11251_v16 = vrot.slane %v22479_v26, %v20607_v53 }
0x1fb6   : > { %v17881_v44 = vpop.f32.mrb[0].mxu1 }
0x1fb7   : > { %v11107_v1 = vpop.f32.mrb[1].mxu1 }
0x1fb8   : > { %v17882_v27 = vpop.f32.mrb[2].mxu1  ;;  %v17889_v36 = vpop.f32.mrb[16].mxu0 }
0x1fb9   : > { %v11189_v37 = vadd.f32 %v17889_v36, %v17881_v44  ;;  %v11110_v40 = vpop.f32.mrb[3].mxu1  ;;  %v11164_v23 = vpop.f32.mrb[17].mxu0 }
0x1fba   : > { %v11187_v9 = vadd.f32 %v11164_v23, %v11107_v1  ;;  %v17890_v34 = vpop.f32.mrb[18].mxu0 }
0x1fbb   : > { %v11195_v59 = vadd.f32 %v11189_v37, %v11186_v14  ;;  %v11167_v30 = vpop.f32.mrb[19].mxu0  ;;  %v11258_v37 = vrot.slane %v22479_v26, %v20612_v18  ;;  %v18398_v18 = vld [vmem:[%s22887_s20 + $0xc8] sm:$0xff]  }
0x1fbc   : > { %v11193_v42 = vadd.f32 %v11187_v9, %v11184_v33  ;;  %v11188_v56 = vadd.f32 %v11167_v30, %v11110_v40 }
0x1fbd   : > { %v11198_v54 = vadd.f32 %v11195_v59, %v11192_v52 }
0x1fbe   : > { %v11196_v61 = vadd.f32 %v11193_v42, %v11190_v7  ;;  %v11194_v48 = vadd.f32 %v11188_v56, %v11185_v35 }
0x1fbf   : > { %v11205_v5 = vadd.f32 %v11202_v22, %v11198_v54  ;;  %v18397_v54 = vld [vmem:[%s22887_s20 + $0xc0] sm:$0xff]  }
0x1fc0   : > { %v11203_v47 = vadd.f32 %v11202_v22, %v11196_v61  ;;  %v11197_v39 = vadd.f32 %v11194_v48, %v11191_v29  ;;  %v18396_v29 = vld [vmem:[#allocation4 + $0x38] sm:$0xff]   ;;  %17899 = vmatprep.subr.bf16.mxu0 %v18397_v54  ;;  %v18399_v61 = vld [vmem:[%s22887_s20 + $0xd0] sm:$0xff]  }
0x1fc1   : > { %v22492_v12 = vadd.f32 %v11205_v5, %v21947_v57  ;;  %17893 = vmatprep.subr.bf16.mxu1 %v18396_v29  ;;  %17900 = vmatpush3.bf16.msra.mxu0 %v18397_v54  ;;  %v18400_v48 = vld [vmem:[%s22887_s20 + $0xd8] sm:$0xff]   ;;  %v18401_v5 = vld [vmem:[%s22887_s20 + $0xe0] sm:$0xff]  }
0x1fc2   : > { %v11204_v32 = vadd.f32 %v11202_v22, %v11197_v39  ;;  %v22484_v50 = vadd.f32 %v11203_v47, %v21944_v3  ;;  %17894 = vmatpush3.bf16.msra.mxu1 %v18396_v29  ;;  %17901 = vmatprep.subr.bf16.mxu0 %v18398_v18  ;;  %v18402_v47 = vld [vmem:[%s22887_s20 + $0xe8] sm:$0xff]   ;;  %v18403_v39 = vld [vmem:[%s22887_s20 + $0xf0] sm:$0xff]  }
0x1fc3   : > { %v11215_v55 = vsel %vm772_vm1, %v22492_v12, 0.0 }
0x1fc4   : > { %v11209_v6 = vsel %vm765_vm0, %v22484_v50, 0.0  ;;  %v22489_v11 = vadd.f32 %v11204_v32, %v21949_v31  ;;  %v18404_v32 = vld [vmem:[%s22887_s20 + $0xf8] sm:$0xff]  }
0x1fc5   : > { %11210 = vadd.xlane.f32.xlu0 %v11209_v6  ;;  %17902 = vmatpush3.bf16.msra.mxu0 %v18398_v18  ;;  %v15715_v6 = vld [vmem:[#allocation6 + $0x3] ss:$0 sm:$0xff] }
0x1fc6   : > { %v11212_v43 = vsel %vm765_vm0, %v22489_v11, 0.0  ;;  %17903 = vmatprep.subr.bf16.mxu0 %v18399_v61 }
0x1fc7   : > { %11213 = vadd.xlane.f32.xlu1 %v11212_v43 }
0x1fc9   : > { %11216 = vadd.xlane.f32.xlu0 %v11215_v55  ;;  %17904 = vmatpush3.bf16.msra.mxu0 %v18399_v61 }
0x1fca   : > { %17905 = vmatprep.subr.bf16.mxu0 %v18400_v48 }
0x1fcd   : > { %17906 = vmatpush3.bf16.msra.mxu0 %v18400_v48 }
0x1fce   : > { %17907 = vmatprep.subr.bf16.mxu0 %v18401_v5 }
0x1fd1   : > { %17908 = vmatpush3.bf16.msra.mxu0 %v18401_v5 }
0x1fd2   : > { %17909 = vmatprep.subr.bf16.mxu0 %v18402_v47 }
0x1fd5   : > { %17910 = vmatpush3.bf16.msra.mxu0 %v18402_v47 }
0x1fd6   : > { %17911 = vmatprep.subr.bf16.mxu0 %v18403_v39 }
0x1fd9   : > { %17912 = vmatpush3.bf16.msra.mxu0 %v18403_v39 }
0x1fda   : > { %17913 = vmatprep.subr.bf16.mxu0 %v18404_v32 }
0x1fdd   : > { %17914 = vmatpush3.bf16.msra.mxu0 %v18404_v32 }
0x2052   : > { %v11211_v3 = vpop.xlane.xlu0 %11210 }
0x2053   : > { %v11218_v63 = vmul.f32 0.03125, %v11211_v3 }
0x2054   : > { %v11214_v41 = vpop.xlane.xlu1 %11213 }
0x2055   : > { %v11221_v24 = vsub.f32 %v22484_v50, %v11218_v63  ;;  %v11219_v58 = vmul.f32 0.03125, %v11214_v41 }
0x2056   : > { %v11217_v31 = vpop.xlane.xlu0 %11216 }
0x2057   : > { %v11222_v15 = vsub.f32 %v22489_v11, %v11219_v58  ;;  %v11220_v57 = vmul.f32 0.03125, %v11217_v31  ;;  %v11224_v13 = vmul.f32 %v11221_v24, %v11221_v24 }
0x2059   : > { %v11223_v38 = vsub.f32 %v22492_v12, %v11220_v57  ;;  %v11227_v49 = vsel %vm765_vm0, %v11224_v13, 0.0  ;;  %v11225_v21 = vmul.f32 %v11222_v15, %v11222_v15 }
0x205a   : > { %11228 = vadd.xlane.f32.xlu1 %v11227_v49 }
0x205b   : > { %v11230_v52 = vsel %vm765_vm0, %v11225_v21, 0.0  ;;  %v11226_v51 = vmul.f32 %v11223_v38, %v11223_v38 }
0x205c   : > { %11231 = vadd.xlane.f32.xlu0 %v11230_v52 }
0x205d   : > { %v11233_v7 = vsel %vm772_vm1, %v11226_v51, 0.0 }
0x205e   : > { %11234 = vadd.xlane.f32.xlu1 %v11233_v7 }
0x20e7   : > { %v11229_v10 = vpop.xlane.xlu1 %11228 }
0x20e8   : > { %v11236_v17 = vmul.f32 0.03125, %v11229_v10 }
0x20e9   : > { %v11232_v4 = vpop.xlane.xlu0 %11231 }
0x20ea   : > { %v11239_v2 = vadd.f32 1e-05, %v11236_v17  ;;  %v11237_v25 = vmul.f32 0.03125, %v11232_v4 }
0x20eb   : > { %v11235_v14 = vpop.xlane.xlu1 %11234 }
0x20ec   : > { %19103 = vrsqrt.f32 %v11239_v2  ;;  %v11240_v20 = vadd.f32 1e-05, %v11237_v25  ;;  %v11238_v33 = vmul.f32 0.03125, %v11235_v14 }
0x20ee   : > { %19105 = vrsqrt.f32 %v11240_v20  ;;  %v11241_v0 = vadd.f32 1e-05, %v11238_v33 }
0x20f0   : > { %19107 = vrsqrt.f32 %v11241_v0 }
0x20f6   : > { %v19104_v35 = vpop.eup %19103 }
0x20f7   : > { %v11245_v44 = vmul.f32 %v19104_v35, %v11221_v24 }
0x20f8   : > { %v19106_v1 = vpop.eup %19105 }
0x20f9   : > { %v11246_v27 = vmul.f32 %v19106_v1, %v11222_v15  ;;  %v11252_v36 = vmul.f32 %v11251_v16, %v11245_v44 }
0x20fa   : > { %v19108_v40 = vpop.eup %19107 }
0x20fb   : > { %v11247_v23 = vmul.f32 %v19108_v40, %v11223_v38  ;;  %v11253_v9 = vmul.f32 %v11251_v16, %v11246_v27  ;;  %v11259_v59 = vadd.f32 %v11258_v37, %v11252_v36 }
0x20fd   : > { %v11254_v34 = vmul.f32 %v11251_v16, %v11247_v23  ;;  %v11260_v30 = vadd.f32 %v11258_v37, %v11253_v9 }
0x20ff   : > { %v11261_v22 = vadd.f32 %v11258_v37, %v11254_v34  ;;  %v11267_v42 = vpack.c.bf16 %v11260_v30, %v11259_v59 }
0x2101   : > { %v11268_v56 = vpack.c.bf16 %v11261_v22, %v11261_v22  ;;  %17895 = vmatprep.mubr.msk.bf16.mxu1 %vm765_vm0, %v11267_v42 }
0x2103   : > { %17896 = vmatmul.mubr.msk.bf16.vlgmr.msra.gmra.mrb[4].mxu1 %vm765_vm0, %v11268_v56 }
0x21d6   : > { %v17897_v43 = vpop.f32.mrb[4].mxu1 }
0x21d7   : > { %v22534_v55 = vadd.f32 %v17897_v43, %v15715_v6  ;;  %v11329_v3 = vpop.f32.mrb[5].mxu1 }
0x21d8   : > { %v22536_v63 = vadd.f32 %v15715_v6, %v11329_v3  ;;  %v17898_v41 = vpop.f32.mrb[6].mxu1 }
0x21d9   : > { %v22539_v24 = vmul.f32 0.70710677, %v22534_v55  ;;  %v11332_v58 = vpop.f32.mrb[7].mxu1 }
0x21da   : > { %v22542_v31 = vmul.f32 0.70710677, %v22536_v63  ;;  %v22544_v15 = vadd.f32 %v15715_v6, %v11332_v58 }
0x21db   : > { %vm11351_vm14 = vcmp.ge.f32.partialorder %v22539_v24, 0.0  ;;  %v11354_v57 = vsub.f32 0.0, %v22539_v24 }
0x21dc   : > { %vm11349_vm15 = vcmp.ge.f32.partialorder %v22542_v31, 0.0  ;;  %v11352_v13 = vsub.f32 0.0, %v22542_v31  ;;  %v22554_v49 = vmul.f32 0.70710677, %v22544_v15 }
0x21dd   : > { %v11357_v38 = vsel %vm11351_vm14, %v22539_v24, %v11354_v57  ;;  %v11343_v24 = vmul.f32 0.5, %v22536_v63 }
0x21de   : > { %v11363_v21 = vmul.f32 0.3275911, %v11357_v38  ;;  %v11355_v52 = vsel %vm11349_vm15, %v22542_v31, %v11352_v13  ;;  %vm11350_vm2 = vcmp.ge.f32.partialorder %v22554_v49, 0.0  ;;  %v11353_v7 = vsub.f32 0.0, %v22554_v49 }
0x21df   : > { %v11361_v51 = vmul.f32 0.3275911, %v11355_v52  ;;  %v11402_v2 = vsub.f32 0.0, %v11357_v38  ;;  %v11400_v25 = vsub.f32 0.0, %v11355_v52 }
0x21e0   : > { %v11366_v19 = vadd.f32 1.0, %v11363_v21  ;;  %v11356_v10 = vsel %vm11350_vm2, %v22554_v49, %v11353_v7 }
0x21e1   : > { %v11364_v29 = vadd.f32 1.0, %v11361_v51  ;;  %v11362_v17 = vmul.f32 0.3275911, %v11356_v10  ;;  %v11405_v20 = vmul.f32 %v11402_v2, %v11357_v38  ;;  %v11401_v33 = vsub.f32 0.0, %v11356_v10 }
0x21e2   : > { %19109 = vrcp.f32 %v11366_v19  ;;  %v11403_v35 = vmul.f32 %v11400_v25, %v11355_v52  ;;  %v11358_v25 = vsel %vm11349_vm15, 1.0, %v22888_v45 }
0x21e3   : > { %19111 = vrcp.f32 %v11364_v29  ;;  %v11365_v4 = vadd.f32 1.0, %v11362_v17  ;;  %v11410_v36 = vmul.f32 1.442695, %v11405_v20  ;;  %v11404_v40 = vmul.f32 %v11401_v33, %v11356_v10 }
0x21e4   : > { %v11406_v9 = vmul.f32 1.442695, %v11403_v35  ;;  %v11360_v17 = vsel %vm11351_vm14, 1.0, %v22888_v45 }
0x21e5   : > { %19113 = vrcp.f32 %v11365_v4  ;;  %v11408_v56 = vmul.f32 1.442695, %v11404_v40 }
0x21e6   : > { %19115 = vpow2.f32 %v11410_v36 }
0x21e7   : > { %19117 = vpow2.f32 %v11406_v9 }
0x21e8   : > { %19119 = vpow2.f32 %v11408_v56 }
0x21ec   : > { %v19110_v14 = vpop.eup %19109 }
0x21ed   : > { %v19112_v0 = vpop.eup %19111  ;;  %v11375_v16 = vmul.f32 1.0614054, %v19110_v14 }
0x21ee   : > { %v11373_v44 = vmul.f32 1.0614054, %v19112_v0 }
0x21ef   : > { %v11378_v1 = vadd.f32 -1.4531521, %v11375_v16  ;;  %v19114_v27 = vpop.eup %19113  ;;  %v11359_v16 = vsel %vm11350_vm2, 1.0, %v22888_v45  ;;  %v11548_v45 = vrot.slane %v22479_v26, %v20685_v60 }
0x21f0   : > { %v11376_v37 = vadd.f32 -1.4531521, %v11373_v44  ;;  %v11374_v34 = vmul.f32 1.0614054, %v19114_v27  ;;  %v19116_v13 = vpop.eup %19115 }
0x21f1   : > { %v11381_v23 = vmul.f32 %v19110_v14, %v11378_v1  ;;  %v19118_v21 = vpop.eup %19117  ;;  %v11345_v1 = vmul.f32 0.5, %v22534_v55 }
0x21f2   : > { %v11379_v59 = vmul.f32 %v19112_v0, %v11376_v37  ;;  %v11377_v22 = vadd.f32 -1.4531521, %v11374_v34  ;;  %v19120_v10 = vpop.eup %19119 }
0x21f3   : > { %v11384_v30 = vadd.f32 1.4214138, %v11381_v23 }
0x21f4   : > { %v11382_v42 = vadd.f32 1.4214138, %v11379_v59  ;;  %v11380_v18 = vmul.f32 %v19114_v27, %v11377_v22 }
0x21f5   : > { %v11387_v54 = vmul.f32 %v19110_v14, %v11384_v30 }
0x21f6   : > { %v11385_v61 = vmul.f32 %v19112_v0, %v11382_v42  ;;  %v11383_v5 = vadd.f32 1.4214138, %v11380_v18 }
0x21f7   : > { %v11390_v48 = vadd.f32 -0.28449672, %v11387_v54 }
0x21f8   : > { %v11388_v47 = vadd.f32 -0.28449672, %v11385_v61  ;;  %v11386_v32 = vmul.f32 %v19114_v27, %v11383_v5 }
0x21f9   : > { %v11393_v39 = vmul.f32 %v19110_v14, %v11390_v48 }
0x21fa   : > { %v11391_v6 = vmul.f32 %v19112_v0, %v11388_v47  ;;  %v11389_v3 = vadd.f32 -0.28449672, %v11386_v32 }
0x21fb   : > { %v11396_v43 = vadd.f32 0.2548296, %v11393_v39 }
0x21fc   : > { %v11394_v41 = vadd.f32 0.2548296, %v11391_v6  ;;  %v11392_v57 = vmul.f32 %v19114_v27, %v11389_v3 }
0x21fd   : > { %v11399_v58 = vmul.f32 %v19110_v14, %v11396_v43 }
0x21fe   : > { %v11397_v38 = vmul.f32 %v19112_v0, %v11394_v41  ;;  %v11395_v51 = vadd.f32 0.2548296, %v11392_v57  ;;  %v19496_v57 = vmov 0.0  }
0x21ff   : > { %v11414_v52 = vmul.f32 %v19116_v13, %v11399_v58  ;;  %17919 = vmatprep.subr.bf16.mxu1 %v19496_v57  ;;  %17951 = vmatprep.subr.bf16.mxu0 %v19496_v57 }
0x2200   : > { %v11412_v7 = vmul.f32 %v19118_v21, %v11397_v38  ;;  %v11398_v29 = vmul.f32 %v19114_v27, %v11395_v51  ;;  %v11344_v27 = vmul.f32 0.5, %v22544_v15  ;;  %17923 = vmatprep.mubr.msk.bf16.mxu1 %vm19497_vm4, %v19496_v57 }
0x2201   : > { %v11417_v19 = vsub.f32 1.0, %v11414_v52 }
0x2202   : > { %v11415_v4 = vsub.f32 1.0, %v11412_v7  ;;  %v11413_v14 = vmul.f32 %v19120_v10, %v11398_v29 }
0x2203   : > { %v11420_v2 = vmul.f32 %v11417_v19, %v11360_v17  ;;  %v11552_v17 = vld [vmem:[#allocation7] sm:$0x3] }
0x2204   : > { %v11418_v20 = vmul.f32 %v11415_v4, %v11358_v25  ;;  %v11416_v33 = vsub.f32 1.0, %v11413_v14  ;;  %v11595_v4 = vrot.slane %v11552_v17, %v20007_v62 }
0x2205   : > { %v11423_v0 = vadd.f32 1.0, %v11420_v2 }
0x2206   : > { %v11421_v35 = vadd.f32 1.0, %v11418_v20  ;;  %v11419_v44 = vmul.f32 %v11416_v33, %v11359_v16  ;;  %v11602_v20 = vrot.slane %v11552_v17, %v20022_v8 }
0x2207   : > { %v11426_v37 = vmul.f32 %v11423_v0, %v11345_v1 }
0x2208   : > { %v11422_v36 = vadd.f32 1.0, %v11419_v44  ;;  %v11424_v31 = vmul.f32 %v11421_v35, %v11343_v24 }
0x2209   : > { %v11445_v9 = vpack.c.bf16 %v11426_v37, %v11426_v37 }
0x220a   : > { %v11425_v40 = vmul.f32 %v11422_v36, %v11344_v27 }
0x220c   : > { %v11444_v23 = vpack.c.bf16 %v11425_v40, %v11424_v31 }
0x220e   : > { %17915 = vmatprep.mubr.bf16.mxu0 %v11444_v23  ;;  %v18405_v23 = vld [vmem:[%s22891_s30] sm:$0xff]  }
0x220f   : > { %17916 = vmatmul.mubr.bf16.vlgmr.msra.gmra.mrb[20].mxu0 %v11445_v9  ;;  %v18406_v9 = vld [vmem:[%s22891_s30 + $0x20] sm:$0xff]  }
0x2210   : > { %17955 = vmatprep.mubr.msk.bf16.mxu0 %vm19497_vm4, %v19496_v57 }
0x22e2   : > { %v17917_v34 = vpop.f32.mrb[20].mxu0 }
0x22e3   : > { %v11528_v49 = vpop.f32.mrb[21].mxu0  ;;  %v11544_v59 = vadd.f32 %v17917_v34, %v22492_v12  ;;  %v18408_v34 = vld [vmem:[%s22891_s30 + $0x30] sm:$0xff]  }
0x22e4   : > { %v11542_v55 = vadd.f32 %v11528_v49, %v22484_v50  ;;  %v17918_v63 = vpop.f32.mrb[22].mxu0  ;;  %v18413_v49 = vld [vmem:[%s22891_s30 + $0x40] sm:$0xff]  }
0x22e5   : > { %v11531_v30 = vpop.f32.mrb[23].mxu0  ;;  %v11551_v42 = vadd.f32 %v11548_v45, %v11544_v59  ;;  %v22892_v59 = vmov 0   ;;  %v18411_v63 = vld [vmem:[%s22891_s30 + $0x28] sm:$0xff]  }
0x22e6   : > { %v11549_v15 = vadd.f32 %v11548_v45, %v11542_v55  ;;  %v11543_v22 = vadd.f32 %v11531_v30, %v22489_v11  ;;  %v18410_v55 = vld [vmem:[%s22891_s30 + $0x18] sm:$0xff]  }
0x22e7   : > { %v11559_v60 = vsel %vm772_vm1, %v11551_v42, 0.0  ;;  %v18416_v30 = vld [vmem:[#allocation10 + $0x4] ss:$8 sps:$4 sm:$0xff]  }
0x22e8   : > { %v11550_v56 = vadd.f32 %v11548_v45, %v11543_v22  ;;  %v11553_v54 = vsel %vm765_vm0, %v11549_v15, 0.0  ;;  %v18409_v45 = vld [vmem:[%s22891_s30 + $0x10] sm:$0xff]  }
0x22e9   : > { %11554 = vadd.xlane.f32.xlu0 %v11553_v54  ;;  %v18414_v22 = vld [vmem:[#allocation10] ss:$8 sps:$4 sm:$0xff]   ;;  %v18422_v54 = vld [vmem:[#allocation10 + $0x24] ss:$8 sps:$4 sm:$0xff]  }
0x22ea   : > { %v11556_v18 = vsel %vm765_vm0, %v11550_v56, 0.0 }
0x22eb   : > { %11557 = vadd.xlane.f32.xlu1 %v11556_v18 }
0x22ed   : > { %11560 = vadd.xlane.f32.xlu0 %v11559_v60 }
0x2376   : > { %v11555_v26 = vpop.xlane.xlu0 %11554 }
0x2377   : > { %v11562_v12 = vmul.f32 0.03125, %v11555_v26 }
0x2378   : > { %v11558_v61 = vpop.xlane.xlu1 %11557 }
0x2379   : > { %v11565_v50 = vsub.f32 %v11549_v15, %v11562_v12  ;;  %v11563_v48 = vmul.f32 0.03125, %v11558_v61  ;;  %v18412_v15 = vld [vmem:[%s22891_s30 + $0x38] sm:$0xff]  }
0x237a   : > { %v11561_v5 = vpop.xlane.xlu0 %11560 }
0x237b   : > { %v11566_v47 = vsub.f32 %v11550_v56, %v11563_v48  ;;  %v11564_v39 = vmul.f32 0.03125, %v11561_v5  ;;  %v11568_v11 = vmul.f32 %v11565_v50, %v11565_v50  ;;  %v18417_v56 = vld [vmem:[#allocation10 + $0x10] ss:$8 sps:$4 sm:$0xff]  }
0x237d   : > { %v11567_v32 = vsub.f32 %v11551_v42, %v11564_v39  ;;  %v11571_v6 = vsel %vm765_vm0, %v11568_v11, 0.0  ;;  %v11569_v43 = vmul.f32 %v11566_v47, %v11566_v47  ;;  %v18419_v42 = vld [vmem:[#allocation10 + $0x14] ss:$8 sps:$4 sm:$0xff]  }
0x237e   : > { %11572 = vadd.xlane.f32.xlu1 %v11571_v6  ;;  %v18425_v39 = vld [vmem:[#allocation10 + $0x34] ss:$8 sps:$4 sm:$0xff]   ;;  %v18423_v6 = vld [vmem:[#allocation10 + $0x30] ss:$8 sps:$4 sm:$0xff]  }
0x237f   : > { %v11574_v3 = vsel %vm765_vm0, %v11569_v43, 0.0  ;;  %v11570_v41 = vmul.f32 %v11567_v32, %v11567_v32  ;;  %v18428_v43 = vld [vmem:[#allocation10 + $0x44] ss:$8 sps:$4 sm:$0xff]  }
0x2380   : > { %11575 = vadd.xlane.f32.xlu0 %v11574_v3 }
0x2381   : > { %v11577_v58 = vsel %vm772_vm1, %v11570_v41, 0.0 }
0x2382   : > { %11578 = vadd.xlane.f32.xlu1 %v11577_v58 }
0x240b   : > { %v11573_v13 = vpop.xlane.xlu1 %11572 }
0x240c   : > { %v11580_v38 = vmul.f32 0.03125, %v11573_v13 }
0x240d   : > { %v11576_v21 = vpop.xlane.xlu0 %11575 }
0x240e   : > { %v11583_v52 = vadd.f32 1e-05, %v11580_v38  ;;  %v11581_v51 = vmul.f32 0.03125, %v11576_v21 }
0x240f   : > { %v11579_v7 = vpop.xlane.xlu1 %11578 }
0x2410   : > { %19121 = vrsqrt.f32 %v11583_v52  ;;  %v11584_v19 = vadd.f32 1e-05, %v11581_v51  ;;  %v11582_v29 = vmul.f32 0.03125, %v11579_v7 }
0x2412   : > { %19123 = vrsqrt.f32 %v11584_v19  ;;  %v11585_v10 = vadd.f32 1e-05, %v11582_v29  ;;  %v18426_v29 = vld [vmem:[#allocation10 + $0x40] ss:$8 sps:$4 sm:$0xff]  }
0x2414   : > { %19125 = vrsqrt.f32 %v11585_v10  ;;  %v18431_v10 = vld [vmem:[#allocation10 + $0x54] ss:$8 sps:$4 sm:$0xff]  }
0x241a   : > { %v19122_v2 = vpop.eup %19121 }
0x241b   : > { %v11589_v25 = vmul.f32 %v19122_v2, %v11565_v50  ;;  %v18420_v50 = vld [vmem:[#allocation10 + $0x20] ss:$8 sps:$4 sm:$0xff]  }
0x241c   : > { %v19124_v14 = vpop.eup %19123 }
0x241d   : > { %v11596_v33 = vmul.f32 %v11595_v4, %v11589_v25  ;;  %v11590_v0 = vmul.f32 %v19124_v14, %v11566_v47 }
0x241e   : > { %v19126_v16 = vpop.eup %19125 }
0x241f   : > { %v11597_v35 = vmul.f32 %v11595_v4, %v11590_v0  ;;  %v11591_v44 = vmul.f32 %v19126_v16, %v11567_v32  ;;  %v11603_v1 = vadd.f32 %v11602_v20, %v11596_v33 }
0x2421   : > { %v11604_v24 = vadd.f32 %v11602_v20, %v11597_v35  ;;  %v11598_v27 = vmul.f32 %v11595_v4, %v11591_v44  ;;  %v18434_v35 = vld [vmem:[#allocation10 + $0x64] ss:$8 sps:$4 sm:$0xff]  }
0x2423   : > { %v11662_v36 = vpack.c.bf16 %v11604_v24, %v11603_v1  ;;  %v11605_v37 = vadd.f32 %v11602_v20, %v11598_v27  ;;  %v18429_v20 = vld [vmem:[#allocation10 + $0x50] ss:$8 sps:$4 sm:$0xff]  }
0x2425   : > { %v11663_v31 = vpack.c.bf16 %v11605_v37, %v11605_v37  ;;  %17920 = vmatpush3.bf16.msra.mxu1 %v11662_v36  ;;  %17952 = vmatpush3.bf16.msra.mxu0 %v11662_v36 }
0x2426   : > { %17921 = vmatprep.subr.bf16.mxu1 %v19496_v57  ;;  %17953 = vmatprep.subr.bf16.mxu0 %v19496_v57 }
0x2427   : > { %v11673_v40 = vand.u32 %v11663_v31, %v20357_v46  ;;  %v18407_v46 = vld [vmem:[%s22891_s30 + $0x8] sm:$0xff]  }
0x2429   : > { %17922 = vmatpush3.bf16.msra.mxu1 %v11673_v40  ;;  %17954 = vmatpush3.bf16.msra.mxu0 %v11673_v40 }
0x242a   : > { %17927 = vmatprep.subr.bf16.mxu1 %v19496_v57  ;;  %17967 = vmatprep.subr.bf16.mxu0 %v19496_v57 }
0x242c   : > { %17924 = vmatmul.mubr.msk.bf16.vlgmr.msra.gmra.mrb[8].mxu1 %vm1921_vm3, %v18405_v23  ;;  %17956 = vmatmul.mubr.msk.bf16.vlgmr.msra.gmra.mrb[24].mxu0 %vm1921_vm3, %v18406_v9  ;;  %v18437_v23 = vld [vmem:[#allocation10 + $0x74] ss:$8 sps:$4 sm:$0xff]   ;;  %v18435_v9 = vld [vmem:[#allocation10 + $0x70] ss:$8 sps:$4 sm:$0xff]  }
0x242d   : > { %17928 = vmatpush3.bf16.msra.mxu1 %v11662_v36  ;;  %17968 = vmatpush3.bf16.msra.mxu0 %v11662_v36 }
0x242e   : > { %17929 = vmatprep.subr.bf16.mxu1 %v19496_v57  ;;  %17969 = vmatprep.subr.bf16.mxu0 %v19496_v57 }
0x242f   : > { %17931 = vmatprep.mubr.msk.bf16.mxu1 %vm19497_vm4, %v19496_v57  ;;  %17971 = vmatprep.mubr.msk.bf16.mxu0 %vm19497_vm4, %v19496_v57 }
0x2431   : > { %17930 = vmatpush3.bf16.msra.mxu1 %v11673_v40  ;;  %17970 = vmatpush3.bf16.msra.mxu0 %v11673_v40 }
0x2432   : > { %17935 = vmatprep.subr.bf16.mxu1 %v19496_v57  ;;  %17983 = vmatprep.subr.bf16.mxu0 %v19496_v57 }
0x2434   : > { %17932 = vmatmul.mubr.msk.bf16.vlgmr.msra.gmra.mrb[12].mxu1 %vm1921_vm3, %v18407_v46  ;;  %17972 = vmatmul.mubr.msk.bf16.vlgmr.msra.gmra.mrb[28].mxu0 %vm1921_vm3, %v18408_v34  ;;  %v18440_v46 = vld [vmem:[#allocation10 + $0x84] ss:$8 sps:$4 sm:$0xff]  }
0x2435   : > { %17936 = vmatpush3.bf16.msra.mxu1 %v11662_v36  ;;  %17984 = vmatpush3.bf16.msra.mxu0 %v11662_v36 }
0x2436   : > { %17937 = vmatprep.subr.bf16.mxu1 %v19496_v57  ;;  %17985 = vmatprep.subr.bf16.mxu0 %v19496_v57 }
0x2437   : > { %17939 = vmatprep.mubr.msk.bf16.mxu1 %vm19497_vm4, %v19496_v57  ;;  %17987 = vmatprep.mubr.msk.bf16.mxu0 %vm19497_vm4, %v19496_v57 }
0x2439   : > { %17938 = vmatpush3.bf16.msra.mxu1 %v11673_v40  ;;  %17986 = vmatpush3.bf16.msra.mxu0 %v11673_v40 }
0x243a   : > { %17943 = vmatprep.subr.bf16.mxu1 %v19496_v57 }
0x243c   : > { %17940 = vmatmul.mubr.msk.bf16.vlgmr.msra.gmra.mrb[16].mxu1 %vm1921_vm3, %v18409_v45  ;;  %17988 = vmatmul.mubr.msk.bf16.vlgmr.msra.gmra.mrb[32].mxu0 %vm1921_vm3, %v18413_v49 }
0x243d   : > { %17944 = vmatpush3.bf16.msra.mxu1 %v11662_v36  ;;  %17947 = vmatprep.mubr.msk.bf16.mxu1 %vm19497_vm4, %v19496_v57 }
0x243e   : > { %17945 = vmatprep.subr.bf16.mxu1 %v19496_v57  ;;  %13141 = vmatprep.mubr.bf16.mxu0 %v22892_v59 }
0x2441   : > { %17946 = vmatpush3.bf16.msra.mxu1 %v11673_v40 }
0x2442   : > { %17959 = vmatprep.subr.bf16.mxu1 %v19496_v57 }
0x2444   : > { %17948 = vmatmul.mubr.msk.bf16.vlgmr.msra.gmra.mrb[20].mxu1 %vm1921_vm3, %v18410_v55 }
0x2445   : > { %17960 = vmatpush3.bf16.msra.mxu1 %v11662_v36  ;;  %17963 = vmatprep.mubr.msk.bf16.mxu1 %vm19497_vm4, %v19496_v57 }
0x2446   : > { %17961 = vmatprep.subr.bf16.mxu1 %v19496_v57 }
0x2449   : > { %17962 = vmatpush3.bf16.msra.mxu1 %v11673_v40 }
0x244a   : > { %17975 = vmatprep.subr.bf16.mxu1 %v19496_v57 }
0x244c   : > { %17964 = vmatmul.mubr.msk.bf16.vlgmr.msra.gmra.mrb[24].mxu1 %vm1921_vm3, %v18411_v63 }
0x244d   : > { %17976 = vmatpush3.bf16.msra.mxu1 %v11662_v36  ;;  %17979 = vmatprep.mubr.msk.bf16.mxu1 %vm19497_vm4, %v19496_v57  ;;  %v18432_v36 = vld [vmem:[#allocation10 + $0x60] ss:$8 sps:$4 sm:$0xff]  }
0x244e   : > { %17977 = vmatprep.subr.bf16.mxu1 %v19496_v57 }
0x2451   : > { %17978 = vmatpush3.bf16.msra.mxu1 %v11673_v40 }
0x2452   : > { %12140 = vmatprep.subr.bf16.mxu1 %v18416_v30  ;;  %v18438_v30 = vld [vmem:[#allocation10 + $0x80] ss:$8 sps:$4 sm:$0xff]  }
0x2454   : > { %17980 = vmatmul.mubr.msk.bf16.vlgmr.msra.gmra.mrb[28].mxu1 %vm1921_vm3, %v18412_v15  ;;  %v18443_v15 = vld [vmem:[#allocation10 + $0x94] ss:$8 sps:$4 sm:$0xff]  }
0x2455   : > { %12141 = vmatpush1.bf16.msra.mxu1 %v18414_v22  ;;  %12172 = vmatprep.mubr.bf16.mxu1 %v22892_v59 }
0x2456   : > { %12142 = vmatprep.subr.bf16.mxu1 %v18419_v42 }
0x2459   : > { %12143 = vmatpush1.bf16.msra.mxu1 %v18417_v56  ;;  %v18441_v56 = vld [vmem:[#allocation10 + $0x90] ss:$8 sps:$4 sm:$0xff]  }
0x245a   : > { %12206 = vmatprep.subr.bf16.mxu1 %v18422_v54 }
0x24ff   : > { %v11709_v18 = vpop.f32.mrb[8].mxu1  ;;  %v22664_v60 = vpop.f32.mrb[24].mxu0 }
0x2500   : > { %v17925_v26 = vpop.f32.mrb[9].mxu1  ;;  %v17957_v12 = vpop.f32.mrb[25].mxu0 }
0x2501   : > { %v11712_v61 = vpop.f32.mrb[10].mxu1  ;;  %v22666_v48 = vpop.f32.mrb[26].mxu0 }
0x2502   : > { %v12108_v5 = vpack.c.bf16 %v11712_v61, %v11709_v18  ;;  %v17926_v47 = vpop.f32.mrb[11].mxu1  ;;  %v12112_v11 = vpack.c.bf16 %v22666_v48, %v22664_v60  ;;  %v17958_v32 = vpop.f32.mrb[27].mxu0  ;;  %v18446_v18 = vld [vmem:[#allocation10 + $0xa4] ss:$8 sps:$4 sm:$0xff]   ;;  %v18444_v61 = vld [vmem:[#allocation10 + $0xa0] ss:$8 sps:$4 sm:$0xff]  }
0x2503   : > { %v18452_v47 = vld [vmem:[#allocation10 + $0xc4] ss:$8 sps:$4 sm:$0xff]   ;;  %v18455_v32 = vld [vmem:[#allocation10 + $0xd4] ss:$8 sps:$4 sm:$0xff]   ;;  %v18456_v48 = vld [vmem:[#allocation10 + $0xe0] ss:$8 sps:$4 sm:$0xff]  }
0x2504   : > { %15766 = vmatmul.mubr.msk.bf16.vlgmr.msra.gmra.mrb[32].mxu1 %vm765_vm0, %v12108_v5  ;;  %v18447_v5 = vld [vmem:[#allocation10 + $0xb0] ss:$8 sps:$4 sm:$0xff]   ;;  %v18458_v60 = vld [vmem:[#allocation10 + $0xe4] ss:$8 sps:$4 sm:$0xff]  }
0x2505   : > { %12207 = vmatpush1.bf16.msra.mxu1 %v18420_v50  ;;  %12238 = vmatprep.mubr.bf16.mxu1 %v22892_v59  ;;  %v18449_v50 = vld [vmem:[#allocation10 + $0xb4] ss:$8 sps:$4 sm:$0xff]  }
0x2506   : > { %12208 = vmatprep.subr.bf16.mxu1 %v18425_v39  ;;  %v18450_v39 = vld [vmem:[#allocation10 + $0xc0] ss:$8 sps:$4 sm:$0xff]  }
0x2507   : > { %v11758_v3 = vpop.f32.mrb[12].mxu1  ;;  %v22672_v41 = vpop.f32.mrb[28].mxu0 }
0x2508   : > { %v17933_v58 = vpop.f32.mrb[13].mxu1  ;;  %v17973_v13 = vpop.f32.mrb[29].mxu0 }
0x2509   : > { %v11761_v38 = vpop.f32.mrb[14].mxu1  ;;  %12209 = vmatpush1.bf16.msra.mxu1 %v18423_v6  ;;  %v22674_v21 = vpop.f32.mrb[30].mxu0  ;;  %v18453_v6 = vld [vmem:[#allocation10 + $0xd0] ss:$8 sps:$4 sm:$0xff]   ;;  %v18462_v58 = vld [vmem:[#allocation10 + $0x100] ss:$8 sps:$4 sm:$0xff]  }
0x250a   : > { %v12109_v52 = vpack.c.bf16 %v11761_v38, %v11758_v3  ;;  %v17934_v51 = vpop.f32.mrb[15].mxu1  ;;  %12272 = vmatprep.subr.bf16.mxu1 %v18428_v43  ;;  %v12114_v7 = vpack.c.bf16 %v22674_v21, %v22672_v41  ;;  %v17974_v19 = vpop.f32.mrb[31].mxu0  ;;  %v18459_v43 = vld [vmem:[#allocation10 + $0xf0] ss:$8 sps:$4 sm:$0xff]   ;;  %v18464_v3 = vld [vmem:[#allocation10 + $0x104] ss:$8 sps:$4 sm:$0xff]  }
0x250b   : > { %v18467_v13 = vld [vmem:[#allocation10 + $0x114] ss:$8 sps:$4 sm:$0xff]   ;;  %v18465_v38 = vld [vmem:[#allocation10 + $0x110] ss:$8 sps:$4 sm:$0xff]   ;;  %v18477_v41 = vld [vmem:[#allocation13 + $0x40] sm:$0xff]  }
0x250c   : > { %v18478_v21 = vld [vmem:[#allocation13] sm:$0xff]   ;;  %v18480_v51 = vld [vmem:[#allocation13 + $0x8] sm:$0xff]   ;;  %v18483_v19 = vld [vmem:[#allocation13 + $0x10] sm:$0xff]  }
0x250f   : > { %v11807_v17 = vpop.f32.mrb[16].mxu1  ;;  %v22678_v4 = vpop.f32.mrb[32].mxu0 }
0x2510   : > { %15771 = vmatmul.mubr.msk.bf16.vlgmr.msra.gmra.mrb[32].mxu1 %vm765_vm0, %v12109_v52  ;;  %v17941_v2 = vpop.f32.mrb[17].mxu1  ;;  %v17989_v25 = vpop.f32.mrb[33].mxu0  ;;  %v18479_v52 = vld [vmem:[#allocation13 + $0x48] sm:$0xff]  }
0x2511   : > { %12273 = vmatpush1.bf16.msra.mxu1 %v18426_v29  ;;  %v11810_v14 = vpop.f32.mrb[18].mxu1  ;;  %12304 = vmatprep.mubr.bf16.mxu1 %v22892_v59  ;;  %v22682_v33 = vpop.f32.mrb[34].mxu0  ;;  %v18485_v29 = vld [vmem:[#allocation13 + $0x58] sm:$0xff]   ;;  %v18493_v2 = vld [vmem:[#allocation13 + $0x68] sm:$0xff]  }
0x2512   : > { %v12110_v0 = vpack.c.bf16 %v11810_v14, %v11807_v17  ;;  %v17942_v16 = vpop.f32.mrb[19].mxu1  ;;  %12274 = vmatprep.subr.bf16.mxu1 %v18431_v10  ;;  %v12116_v44 = vpack.c.bf16 %v22682_v33, %v22678_v4  ;;  %v17990_v1 = vpop.f32.mrb[35].mxu0  ;;  %v18487_v10 = vld [vmem:[#allocation13 + $0x18] sm:$0xff]   ;;  %v18489_v17 = vld [vmem:[#allocation13 + $0x60] sm:$0xff]   ;;  %v18495_v25 = vld [vmem:[#allocation13 + $0x28] sm:$0xff]  }
0x2513   : > { %v18491_v4 = vld [vmem:[#allocation13 + $0x20] sm:$0xff]   ;;  %v18497_v14 = vld [vmem:[#allocation13 + $0x70] sm:$0xff]   ;;  %v11606_v33 = vld [vmem:[#allocation12] sm:$0xf] }
0x2514   : > { %v12751_v16 = vrot.slane %v11606_v33, %v20576_v28 }
0x2515   : > { %12275 = vmatpush1.bf16.msra.mxu1 %v18429_v20  ;;  %v18499_v20 = vld [vmem:[#allocation13 + $0x30] sm:$0xff]  }
0x2516   : > { %12338 = vmatprep.subr.bf16.mxu1 %v18434_v35  ;;  %v12769_v35 = vrot.slane %v11606_v33, %v20022_v8 }
0x2517   : > { %v11856_v24 = vpop.f32.mrb[20].mxu1 }
0x2518   : > { %v17949_v27 = vpop.f32.mrb[21].mxu1 }
0x2519   : > { %v11859_v37 = vpop.f32.mrb[22].mxu1  ;;  %v12779_v27 = vrot.slane %v12769_v35, %v20022_v8 }
0x251a   : > { %v12111_v31 = vpack.c.bf16 %v11859_v37, %v11856_v24  ;;  %v17950_v40 = vpop.f32.mrb[23].mxu1  ;;  %v12761_v24 = vrot.slane %v12751_v16, %v20007_v62  ;;  %v18510_v16 = vld [vmem:[#allocation13 + $0x148] sm:$0xff]  }
0x251c   : > { %15776 = vmatmul.mubr.msk.bf16.vlgmr.msra.gmra.mrb[32].mxu1 %vm765_vm0, %v12110_v0  ;;  %v12747_v0 = vrot.slane %v11606_v33, %v20007_v62 }
0x251d   : > { %12339 = vmatpush1.bf16.msra.mxu1 %v18432_v36  ;;  %12370 = vmatprep.mubr.bf16.mxu1 %v22892_v59 }
0x251e   : > { %12340 = vmatprep.subr.bf16.mxu1 %v18437_v23  ;;  %v12757_v1 = vrot.slane %v12747_v0, %v20007_v62  ;;  %v18508_v0 = vld [vmem:[#allocation13 + $0x100] sm:$0xff]  }
0x251f   : > { %v11954_v34 = vpop.f32.mrb[24].mxu1 }
0x2520   : > { %v17965_v45 = vpop.f32.mrb[25].mxu1 }
0x2521   : > { %12341 = vmatpush1.bf16.msra.mxu1 %v18435_v9  ;;  %v11957_v49 = vpop.f32.mrb[26].mxu1 }
0x2522   : > { %12404 = vmatprep.subr.bf16.mxu1 %v18440_v46  ;;  %v12113_v55 = vpack.c.bf16 %v11957_v49, %v11954_v34  ;;  %v17966_v63 = vpop.f32.mrb[27].mxu1 }
0x2527   : > { %v12052_v22 = vpop.f32.mrb[28].mxu1 }
0x2528   : > { %15781 = vmatmul.mubr.msk.bf16.vlgmr.msra.gmra.mrb[32].mxu1 %vm765_vm0, %v12111_v31  ;;  %v17981_v42 = vpop.f32.mrb[29].mxu1 }
0x2529   : > { %12405 = vmatpush1.bf16.msra.mxu1 %v18438_v30  ;;  %12436 = vmatprep.mubr.bf16.mxu1 %v22892_v59  ;;  %v12055_v54 = vpop.f32.mrb[30].mxu1 }
0x252a   : > { %12406 = vmatprep.subr.bf16.mxu1 %v18443_v15  ;;  %v12115_v26 = vpack.c.bf16 %v12055_v54, %v12052_v22  ;;  %v17982_v12 = vpop.f32.mrb[31].mxu1  ;;  %v18468_v54 = vld [vmem:[#allocation9] sm:$0xff]  }
0x252b   : > { %v18471_v12 = vld [vmem:[#allocation9 + $0x18] sm:$0xff]  }
0x252d   : > { %12407 = vmatpush1.bf16.msra.mxu1 %v18441_v56 }
0x252e   : > { %12470 = vmatprep.subr.bf16.mxu1 %v18446_v18  ;;  %v18469_v18 = vld [vmem:[#allocation9 + $0x8] sm:$0xff]  }
0x2534   : > { %15786 = vmatmul.mubr.msk.bf16.vlgmr.msra.gmra.mrb[32].mxu1 %vm765_vm0, %v12112_v11  ;;  %v18461_v11 = vld [vmem:[#allocation10 + $0xf4] ss:$8 sps:$4 sm:$0xff]  }
0x2535   : > { %12471 = vmatpush1.bf16.msra.mxu1 %v18444_v61  ;;  %12502 = vmatprep.mubr.bf16.mxu1 %v22892_v59  ;;  %v18472_v61 = vld [vmem:[#allocation9 + $0x20] sm:$0xff]  }
0x2536   : > { %12472 = vmatprep.subr.bf16.mxu1 %v18449_v50  ;;  %v18473_v50 = vld [vmem:[#allocation9 + $0x28] sm:$0xff]  }
0x2539   : > { %12473 = vmatpush1.bf16.msra.mxu1 %v18447_v5  ;;  %v18474_v5 = vld [vmem:[#allocation9 + $0x30] sm:$0xff]  }
0x253a   : > { %12536 = vmatprep.subr.bf16.mxu1 %v18452_v47  ;;  %v18475_v47 = vld [vmem:[#allocation9 + $0x38] sm:$0xff]  }
0x2540   : > { %15791 = vmatmul.mubr.msk.bf16.vlgmr.msra.gmra.mrb[32].mxu1 %vm765_vm0, %v12113_v55 }
0x2541   : > { %12537 = vmatpush1.bf16.msra.mxu1 %v18450_v39  ;;  %12568 = vmatprep.mubr.bf16.mxu1 %v22892_v59  ;;  %v18482_v39 = vld [vmem:[#allocation13 + $0xc0] sm:$0xff]  }
0x2542   : > { %12538 = vmatprep.subr.bf16.mxu1 %v18455_v32  ;;  %v18476_v32 = vld [vmem:[#allocation9 + $0x40] sm:$0xff]  }
0x2545   : > { %12539 = vmatpush1.bf16.msra.mxu1 %v18453_v6  ;;  %v18484_v6 = vld [vmem:[#allocation13 + $0x80] sm:$0xff]  }
0x2546   : > { %12602 = vmatprep.subr.bf16.mxu1 %v18458_v60  ;;  %v18486_v60 = vld [vmem:[#allocation13 + $0xc8] sm:$0xff]  }
0x254c   : > { %15796 = vmatmul.mubr.msk.bf16.vlgmr.msra.gmra.mrb[32].mxu1 %vm765_vm0, %v12114_v7  ;;  %v18481_v7 = vld [vmem:[#allocation13 + $0x50] sm:$0xff]  }
0x254d   : > { %12603 = vmatpush1.bf16.msra.mxu1 %v18456_v48  ;;  %12634 = vmatprep.mubr.bf16.mxu1 %v22892_v59  ;;  %v18488_v48 = vld [vmem:[#allocation13 + $0x88] sm:$0xff]  }
0x254e   : > { %12604 = vmatprep.subr.bf16.mxu1 %v18461_v11  ;;  %v18490_v11 = vld [vmem:[#allocation13 + $0xd0] sm:$0xff]  }
0x2551   : > { %12605 = vmatpush1.bf16.msra.mxu1 %v18459_v43  ;;  %v18492_v43 = vld [vmem:[#allocation13 + $0x90] sm:$0xff]  }
0x2552   : > { %12668 = vmatprep.subr.bf16.mxu1 %v18464_v3  ;;  %v18494_v3 = vld [vmem:[#allocation13 + $0xd8] sm:$0xff]  }
0x2558   : > { %15801 = vmatmul.mubr.msk.bf16.vlgmr.msra.gmra.mrb[32].mxu1 %vm765_vm0, %v12115_v26  ;;  %v18470_v26 = vld [vmem:[#allocation9 + $0x10] sm:$0xff]  }
0x2559   : > { %12669 = vmatpush1.bf16.msra.mxu1 %v18462_v58  ;;  %12700 = vmatprep.mubr.bf16.mxu1 %v22892_v59  ;;  %v18496_v58 = vld [vmem:[#allocation13 + $0x98] sm:$0xff]  }
0x255a   : > { %12670 = vmatprep.subr.bf16.mxu1 %v18467_v13  ;;  %v18498_v13 = vld [vmem:[#allocation13 + $0xe0] sm:$0xff]  }
0x255d   : > { %12671 = vmatpush1.bf16.msra.mxu1 %v18465_v38  ;;  %v18501_v38 = vld [vmem:[#allocation13 + $0x78] sm:$0xff]  }
0x255e   : > { %16576 = vmatprep.subr.bf16.mxu1 %v18477_v41  ;;  %v18502_v41 = vld [vmem:[#allocation13 + $0xe8] sm:$0xff]  }
0x2564   : > { %15806 = vmatmul.mubr.msk.bf16.vlgmr.msra.gmra.mrb[32].mxu1 %vm765_vm0, %v12116_v44  ;;  %v12773_v44 = vrot.slane %v11606_v33, %v20607_v53  ;;  %vm13105_vm0 = vcmask 130048  }
0x2565   : > { %16577 = vmatpush3.bf16.msra.mxu1 %v18478_v21  ;;  %v18503_v21 = vld [vmem:[#allocation13 + $0x38] sm:$0xff]  }
0x2566   : > { %16578 = vmatprep.subr.bf16.mxu1 %v18479_v52  ;;  %v12783_v37 = vrot.slane %v12773_v44, %v20022_v8  ;;  %v18504_v52 = vld [vmem:[#allocation13 + $0xa8] sm:$0xff]  }
0x2567   : > { %v18512_v44 = vld [vmem:[#allocation13 + $0x108] sm:$0xff]  }
0x2569   : > { %16579 = vmatpush3.bf16.msra.mxu1 %v18480_v51  ;;  %v18505_v51 = vld [vmem:[#allocation13 + $0xf0] sm:$0xff]  }
0x256a   : > { %16580 = vmatprep.subr.bf16.mxu1 %v18481_v7  ;;  %v18506_v7 = vld [vmem:[#allocation13 + $0x140] sm:$0xff]  }
0x256d   : > { %16581 = vmatpush3.bf16.msra.mxu1 %v18483_v19  ;;  %v18507_v19 = vld [vmem:[#allocation13 + $0xb0] sm:$0xff]  }
0x256e   : > { %16582 = vmatprep.subr.bf16.mxu1 %v18485_v29  ;;  %v18509_v29 = vld [vmem:[#allocation13 + $0xf8] sm:$0xff]  }
0x2571   : > { %16583 = vmatpush3.bf16.msra.mxu1 %v18487_v10  ;;  %v18511_v10 = vld [vmem:[#allocation13 + $0xb8] sm:$0xff]  }
0x2572   : > { %16584 = vmatprep.subr.bf16.mxu1 %v18489_v17  ;;  %v18514_v17 = vld [vmem:[#allocation13 + $0x1c0] sm:$0xff]  }
0x2575   : > { %16585 = vmatpush3.bf16.msra.mxu1 %v18491_v4 }
0x2576   : > { %16586 = vmatprep.subr.bf16.mxu1 %v18493_v2 }
0x2579   : > { %16587 = vmatpush3.bf16.msra.mxu1 %v18495_v25 }
0x257a   : > { %16588 = vmatprep.subr.bf16.mxu1 %v18497_v14 }
0x257d   : > { %16589 = vmatpush3.bf16.msra.mxu1 %v18499_v20 }
0x257e   : > { %16590 = vmatprep.subr.bf16.mxu1 %v18501_v38  ;;  %v18537_v38 = vld [vmem:[#allocation13 + $0x1f0] sm:$0xff]  }
0x2581   : > { %16591 = vmatpush3.bf16.msra.mxu1 %v18503_v21 }
0x2582   : > { %16620 = vmatprep.subr.bf16.mxu1 %v18506_v7 }
0x2637   : > { %v12702_v36 = vpop.f32.mrb[32].mxu1 }
0x2638   : > { %v12762_v31 = vmul.f32 %v12757_v1, %v12702_v36  ;;  %v12704_v40 = vpop.f32.mrb[33].mxu1 }
0x2639   : > { %v12763_v23 = vmul.f32 %v12761_v24, %v12704_v40  ;;  %v12706_v9 = vpop.f32.mrb[34].mxu1  ;;  %v18515_v40 = vld [vmem:[#allocation13 + $0x110] sm:$0xff]  }
0x263a   : > { %v12784_v46 = vadd.f32 %v12779_v27, %v12762_v31  ;;  %v12764_v34 = vmul.f32 %v12757_v1, %v12706_v9  ;;  %v12708_v28 = vpop.f32.mrb[35].mxu1  ;;  %v18517_v9 = vld [vmem:[#allocation13 + $0x158] sm:$0xff]  }
0x263b   : > { %v12785_v45 = vadd.f32 %v12783_v37, %v12763_v23  ;;  %v12765_v49 = vmul.f32 %v12761_v24, %v12708_v28  ;;  %v18513_v24 = vld [vmem:[#allocation13 + $0x150] sm:$0xff]   ;;  %v18516_v23 = vld [vmem:[#allocation13 + $0x180] sm:$0xff]   ;;  %v18520_v28 = vld [vmem:[#allocation13 + $0x188] sm:$0xff]  }
0x263c   : > { %v12786_v55 = vadd.f32 %v12779_v27, %v12764_v34  ;;  %v12788_v63 = vmax.f32 %v12784_v46, 0.0  ;;  %v18518_v46 = vld [vmem:[#allocation13 + $0x1c8] sm:$0xff]   ;;  %v18519_v34 = vld [vmem:[#allocation13 + $0x118] sm:$0xff]  }
0x263d   : > { %v12787_v53 = vadd.f32 %v12783_v37, %v12765_v49  ;;  %v12789_v15 = vmax.f32 %v12785_v45, 0.0  ;;  %v18521_v49 = vld [vmem:[#allocation13 + $0x160] sm:$0xff]  }
0x263e   : > { %v12790_v30 = vmax.f32 %v12786_v55, 0.0  ;;  %v18522_v55 = vld [vmem:[#allocation13 + $0x1d0] sm:$0xff]  }
0x263f   : > { %v12791_v22 = vmax.f32 %v12787_v53, 0.0 }
0x2640   : > { %v13098_v42 = vpack.c.bf16 %v12790_v30, %v12788_v63 }
0x2641   : > { %v13099_v56 = vpack.c.bf16 %v12791_v22, %v12789_v15  ;;  %v18523_v22 = vld [vmem:[#allocation13 + $0x120] sm:$0xff]  }
0x2643   : > { %13109 = vmatprep.subr.bf16.mxu0 %v13099_v56 }
0x2644   : > { %13110 = vmatpush1.bf16.msra.mxu0 %v13098_v42 }
0x2645   : > { %13160 = vmatprep.subr.bf16.mxu0 %v13099_v56 }
0x2647   : > { %15808 = vmatmul.mubr.msk.bf16.vlgmr.msra.gmra.mrb[36].mxu0 %vm13105_vm0, %v18468_v54  ;;  %v18525_v54 = vld [vmem:[#allocation13 + $0x168] sm:$0xff]  }
0x2648   : > { %13161 = vmatpush1.bf16.msra.mxu0 %v13098_v42  ;;  %13192 = vmatprep.mubr.bf16.mxu0 %v22892_v59 }
0x2649   : > { %13211 = vmatprep.subr.bf16.mxu0 %v13099_v56 }
0x264f   : > { %15810 = vmatmul.mubr.msk.bf16.vlgmr.msra.gmra.mrb[40].mxu0 %vm13105_vm0, %v18469_v18  ;;  %v18526_v18 = vld [vmem:[#allocation13 + $0x1d8] sm:$0xff]  }
0x2650   : > { %13212 = vmatpush1.bf16.msra.mxu0 %v13098_v42  ;;  %13243 = vmatprep.mubr.bf16.mxu0 %v22892_v59 }
0x2651   : > { %13262 = vmatprep.subr.bf16.mxu0 %v13099_v56 }
0x2657   : > { %15812 = vmatmul.mubr.msk.bf16.vlgmr.msra.gmra.mrb[44].mxu0 %vm13105_vm0, %v18470_v26  ;;  %v18527_v26 = vld [vmem:[#allocation13 + $0x128] sm:$0xff]  }
0x2658   : > { %13263 = vmatpush1.bf16.msra.mxu0 %v13098_v42  ;;  %13294 = vmatprep.mubr.bf16.mxu0 %v22892_v59 }
0x2659   : > { %13313 = vmatprep.subr.bf16.mxu0 %v13099_v56 }
0x265f   : > { %15814 = vmatmul.mubr.msk.bf16.vlgmr.msra.gmra.mrb[48].mxu0 %vm13105_vm0, %v18471_v12  ;;  %v18528_v12 = vld [vmem:[#allocation13 + $0x198] sm:$0xff]  }
0x2660   : > { %13314 = vmatpush1.bf16.msra.mxu0 %v13098_v42  ;;  %13345 = vmatprep.mubr.bf16.mxu0 %v22892_v59 }
0x2661   : > { %13364 = vmatprep.subr.bf16.mxu0 %v13099_v56 }
0x2667   : > { %15816 = vmatmul.mubr.msk.bf16.vlgmr.msra.gmra.mrb[52].mxu0 %vm13105_vm0, %v18472_v61 }
0x2668   : > { %13365 = vmatpush1.bf16.msra.mxu0 %v13098_v42  ;;  %13396 = vmatprep.mubr.bf16.mxu0 %v22892_v59 }
0x2669   : > { %13415 = vmatprep.subr.bf16.mxu0 %v13099_v56 }
0x266f   : > { %15818 = vmatmul.mubr.msk.bf16.vlgmr.msra.gmra.mrb[56].mxu0 %vm13105_vm0, %v18473_v50  ;;  %v18529_v50 = vld [vmem:[#allocation13 + $0x170] sm:$0xff]  }
0x2670   : > { %13416 = vmatpush1.bf16.msra.mxu0 %v13098_v42  ;;  %13447 = vmatprep.mubr.bf16.mxu0 %v22892_v59 }
0x2671   : > { %13466 = vmatprep.subr.bf16.mxu0 %v13099_v56 }
0x2677   : > { %15820 = vmatmul.mubr.msk.bf16.vlgmr.msra.gmra.mrb[60].mxu0 %vm13105_vm0, %v18474_v5  ;;  %v18530_v5 = vld [vmem:[#allocation13 + $0x1e0] sm:$0xff]  }
0x2678   : > { %13467 = vmatpush1.bf16.msra.mxu0 %v13098_v42  ;;  %13498 = vmatprep.mubr.bf16.mxu0 %v22892_v59 }
0x2679   : > { %13517 = vmatprep.subr.bf16.mxu0 %v13099_v56 }
0x267f   : > { %15822 = vmatmul.mubr.msk.bf16.vlgmr.msra.gmra.mrb[64].mxu0 %vm13105_vm0, %v18475_v47 }
0x2680   : > { %13518 = vmatpush1.bf16.msra.mxu0 %v13098_v42  ;;  %13549 = vmatprep.mubr.bf16.mxu0 %v22892_v59  ;;  %v18500_v59 = vld [vmem:[#allocation13 + $0xa0] sm:$0xff]   ;;  %v18524_v42 = vld [vmem:[#allocation13 + $0x190] sm:$0xff]  }
0x2681   : > { %16598 = vmatprep.subr.bf16.mxu0 %v18482_v39 }
0x2687   : > { %15824 = vmatmul.mubr.msk.bf16.vlgmr.msra.gmra.mrb[68].mxu0 %vm13105_vm0, %v18476_v32 }
0x2688   : > { %16599 = vmatpush3.bf16.msra.mxu0 %v18484_v6 }
0x2689   : > { %16600 = vmatprep.subr.bf16.mxu0 %v18486_v60  ;;  %v18531_v60 = vld [vmem:[#allocation13 + $0x130] sm:$0xff]  }
0x268c   : > { %16601 = vmatpush3.bf16.msra.mxu0 %v18488_v48  ;;  %v18532_v48 = vld [vmem:[#allocation13 + $0x1a0] sm:$0xff]  }
0x268d   : > { %16602 = vmatprep.subr.bf16.mxu0 %v18490_v11 }
0x2690   : > { %16603 = vmatpush3.bf16.msra.mxu0 %v18492_v43  ;;  %v18533_v43 = vld [vmem:[#allocation13 + $0x178] sm:$0xff]  }
0x2691   : > { %16604 = vmatprep.subr.bf16.mxu0 %v18494_v3  ;;  %v18534_v3 = vld [vmem:[#allocation13 + $0x1e8] sm:$0xff]  }
0x2694   : > { %16605 = vmatpush3.bf16.msra.mxu0 %v18496_v58  ;;  %v18535_v58 = vld [vmem:[#allocation13 + $0x138] sm:$0xff]  }
0x2695   : > { %16606 = vmatprep.subr.bf16.mxu0 %v18498_v13  ;;  %v18536_v13 = vld [vmem:[#allocation13 + $0x1a8] sm:$0xff]  }
0x2698   : > { %16607 = vmatpush3.bf16.msra.mxu0 %v18500_v59 }
0x2699   : > { %16608 = vmatprep.subr.bf16.mxu0 %v18502_v41  ;;  %v18538_v41 = vld [vmem:[#allocation13 + $0x240] sm:$0xff]  }
0x269c   : > { %16609 = vmatpush3.bf16.msra.mxu0 %v18504_v52 }
0x269d   : > { %16610 = vmatprep.subr.bf16.mxu0 %v18505_v51 }
0x26a0   : > { %16611 = vmatpush3.bf16.msra.mxu0 %v18507_v19  ;;  %v18539_v19 = vld [vmem:[#allocation13 + $0x1b0] sm:$0xff]  }
0x26a1   : > { %16612 = vmatprep.subr.bf16.mxu0 %v18509_v29  ;;  %v18540_v29 = vld [vmem:[#allocation13 + $0x200] sm:$0xff]  }
0x26a4   : > { %16613 = vmatpush3.bf16.msra.mxu0 %v18511_v10 }
0x26a5   : > { %16642 = vmatprep.subr.bf16.mxu0 %v18514_v17  ;;  %v18541_v17 = vld [vmem:[#allocation13 + $0x1f8] sm:$0xff]  }
0x271a   : > { %v13143_v4 = vpop.f32.mrb[36].mxu0 }
0x271b   : > { %v13145_v2 = vpop.f32.mrb[37].mxu0 }
0x271c   : > { %v13147_v25 = vpop.f32.mrb[38].mxu0 }
0x271d   : > { %v13560_v14 = vpack.c.bf16 %v13147_v25, %v13143_v4  ;;  %v13149_v20 = vpop.f32.mrb[39].mxu0  ;;  %v18542_v4 = vld [vmem:[#allocation13 + $0x248] sm:$0xff]  }
0x271e   : > { %v13561_v33 = vpack.c.bf16 %v13149_v20, %v13145_v2  ;;  %v18543_v2 = vld [vmem:[#allocation13 + $0x1b8] sm:$0xff]   ;;  %v18544_v25 = vld [vmem:[#allocation13 + $0x208] sm:$0xff]   ;;  %v18545_v20 = vld [vmem:[#allocation13 + $0x250] sm:$0xff]  }
0x2720   : > { %13706 = vmatprep.mubr.bf16.mxu1 %v13561_v33  ;;  %v18546_v33 = vld [vmem:[#allocation13 + $0x2c0] sm:$0xff]  }
0x2721   : > { %13707 = vmatmul.mubr.bf16.vlgmr.msra.gmra.mrb[36].mxu1 %v13560_v14 }
0x2722   : > { %16621 = vmatpush3.bf16.msra.mxu1 %v18508_v0  ;;  %v13194_v35 = vpop.f32.mrb[40].mxu0 }
0x2723   : > { %v13196_v1 = vpop.f32.mrb[41].mxu0  ;;  %16622 = vmatprep.subr.bf16.mxu1 %v18510_v16 }
0x2724   : > { %v13198_v27 = vpop.f32.mrb[42].mxu0 }
0x2725   : > { %v13562_v36 = vpack.c.bf16 %v13198_v27, %v13194_v35  ;;  %v13200_v37 = vpop.f32.mrb[43].mxu0 }
0x2726   : > { %v13563_v31 = vpack.c.bf16 %v13200_v37, %v13196_v1  ;;  %16623 = vmatpush3.bf16.msra.mxu1 %v18512_v44  ;;  %v18547_v1 = vld [vmem:[#allocation13 + $0x210] sm:$0xff]   ;;  %v18550_v37 = vld [vmem:[#allocation13 + $0x2c8] sm:$0xff]  }
0x2727   : > { %16624 = vmatprep.subr.bf16.mxu1 %v18513_v24  ;;  %v18548_v24 = vld [vmem:[#allocation13 + $0x280] sm:$0xff]  }
0x2728   : > { %13843 = vmatprep.mubr.bf16.mxu0 %v13563_v31  ;;  %v18551_v31 = vld [vmem:[#allocation13 + $0x218] sm:$0xff]  }
0x2729   : > { %13844 = vmatmul.mubr.bf16.vlgmr.msra.gmra.mrb[72].mxu0 %v13562_v36  ;;  %v18549_v36 = vld [vmem:[#allocation13 + $0x258] sm:$0xff]  }
0x272a   : > { %16625 = vmatpush3.bf16.msra.mxu1 %v18515_v40  ;;  %16643 = vmatpush3.bf16.msra.mxu0 %v18516_v23  ;;  %v22733_v45 = vpop.f32.mrb[44].mxu0  ;;  %v18552_v40 = vld [vmem:[#allocation13 + $0x288] sm:$0xff]  }
0x272b   : > { %16626 = vmatprep.subr.bf16.mxu1 %v18517_v9  ;;  %16644 = vmatprep.subr.bf16.mxu0 %v18518_v46  ;;  %v13247_v53 = vpop.f32.mrb[45].mxu0  ;;  %v18553_v9 = vld [vmem:[#allocation13 + $0x260] sm:$0xff]   ;;  %v18554_v46 = vld [vmem:[#allocation13 + $0x2d0] sm:$0xff]  }
0x272c   : > { %v13249_v63 = vpop.f32.mrb[46].mxu0 }
0x272d   : > { %v13564_v30 = vpack.c.bf16 %v13249_v63, %v22733_v45  ;;  %v13251_v15 = vpop.f32.mrb[47].mxu0 }
0x272e   : > { %16627 = vmatpush3.bf16.msra.mxu1 %v18519_v34  ;;  %16645 = vmatpush3.bf16.msra.mxu0 %v18520_v28  ;;  %v13565_v56 = vpack.c.bf16 %v13251_v15, %v13247_v53  ;;  %v18556_v53 = vld [vmem:[#allocation13 + $0x290] sm:$0xff]   ;;  %v18558_v15 = vld [vmem:[#allocation13 + $0x2d8] sm:$0xff]  }
0x272f   : > { %16628 = vmatprep.subr.bf16.mxu1 %v18521_v49  ;;  %16646 = vmatprep.subr.bf16.mxu0 %v18522_v55  ;;  %v18555_v55 = vld [vmem:[#allocation13 + $0x220] sm:$0xff]  }
0x2730   : > { %13980 = vmatprep.mubr.bf16.mxu1 %v13565_v56 }
0x2732   : > { %16629 = vmatpush3.bf16.msra.mxu1 %v18523_v22  ;;  %16647 = vmatpush3.bf16.msra.mxu0 %v18524_v42  ;;  %v22736_v61 = vpop.f32.mrb[48].mxu0  ;;  %v18559_v22 = vld [vmem:[#allocation13 + $0x228] sm:$0xff]   ;;  %v18560_v42 = vld [vmem:[#allocation13 + $0x298] sm:$0xff]  }
0x2733   : > { %16630 = vmatprep.subr.bf16.mxu1 %v18525_v54  ;;  %16648 = vmatprep.subr.bf16.mxu0 %v18526_v18  ;;  %v13298_v47 = vpop.f32.mrb[49].mxu0  ;;  %v18561_v54 = vld [vmem:[#allocation13 + $0x270] sm:$0xff]   ;;  %v18562_v18 = vld [vmem:[#allocation13 + $0x2e0] sm:$0xff]  }
0x2734   : > { %v13300_v39 = vpop.f32.mrb[50].mxu0 }
0x2735   : > { %v13566_v32 = vpack.c.bf16 %v13300_v39, %v22736_v61  ;;  %v13302_v6 = vpop.f32.mrb[51].mxu0 }
0x2736   : > { %16631 = vmatpush3.bf16.msra.mxu1 %v18527_v26  ;;  %16649 = vmatpush3.bf16.msra.mxu0 %v18528_v12  ;;  %v13567_v11 = vpack.c.bf16 %v13302_v6, %v13298_v47  ;;  %v18564_v47 = vld [vmem:[#allocation13 + $0x2a0] sm:$0xff]   ;;  %v18566_v6 = vld [vmem:[#allocation13 + $0x2e8] sm:$0xff]  }
0x2737   : > { %16632 = vmatprep.subr.bf16.mxu1 %v18529_v50  ;;  %16650 = vmatprep.subr.bf16.mxu0 %v18530_v5  ;;  %v18563_v5 = vld [vmem:[#allocation13 + $0x230] sm:$0xff]  }
0x2738   : > { %14117 = vmatprep.mubr.bf16.mxu0 %v13567_v11 }
0x273a   : > { %16633 = vmatpush3.bf16.msra.mxu1 %v18531_v60  ;;  %16651 = vmatpush3.bf16.msra.mxu0 %v18532_v48  ;;  %v22739_v59 = vpop.f32.mrb[52].mxu0  ;;  %v18567_v60 = vld [vmem:[#allocation13 + $0x238] sm:$0xff]   ;;  %v18568_v48 = vld [vmem:[#allocation13 + $0x2a8] sm:$0xff]  }
0x273b   : > { %16634 = vmatprep.subr.bf16.mxu1 %v18533_v43  ;;  %16652 = vmatprep.subr.bf16.mxu0 %v18534_v3  ;;  %v13349_v21 = vpop.f32.mrb[53].mxu0  ;;  %v18569_v43 = vld [vmem:[#allocation13 + $0x2f0] sm:$0xff]   ;;  %v18570_v3 = vld [vmem:[#allocation13 + $0x340] sm:$0xff]  }
0x273c   : > { %v22741_v52 = vpop.f32.mrb[54].mxu0 }
0x273d   : > { %v13568_v51 = vpack.c.bf16 %v22741_v52, %v22739_v59  ;;  %v13353_v7 = vpop.f32.mrb[55].mxu0  ;;  %v18583_v59 = vld [vmem:[#allocation13 + $0x318] sm:$0xff]   ;;  %v18584_v52 = vld [vmem:[#allocation13 + $0x388] sm:$0xff]  }
0x273e   : > { %16635 = vmatpush3.bf16.msra.mxu1 %v18535_v58  ;;  %16653 = vmatpush3.bf16.msra.mxu0 %v18536_v13  ;;  %v13569_v10 = vpack.c.bf16 %v13353_v7, %v13349_v21  ;;  %v18571_v21 = vld [vmem:[#allocation13 + $0x2b0] sm:$0xff]   ;;  %v18572_v7 = vld [vmem:[#allocation13 + $0x300] sm:$0xff]  }
0x273f   : > { %16654 = vmatprep.subr.bf16.mxu0 %v18537_v38  ;;  %16664 = vmatprep.subr.bf16.mxu1 %v18538_v41 }
0x2741   : > { %13981 = vmatmul.mubr.bf16.vlgmr.msra.gmra.mrb[40].mxu1 %v13564_v30  ;;  %v18557_v30 = vld [vmem:[#allocation13 + $0x268] sm:$0xff]  }
0x2742   : > { %16655 = vmatpush3.bf16.msra.mxu0 %v18539_v19  ;;  %16665 = vmatpush3.bf16.msra.mxu1 %v18540_v29  ;;  %v22745_v14 = vpop.f32.mrb[56].mxu0  ;;  %v18573_v29 = vld [vmem:[#allocation13 + $0x2f8] sm:$0xff]  }
0x2743   : > { %16656 = vmatprep.subr.bf16.mxu0 %v18541_v17  ;;  %16666 = vmatprep.subr.bf16.mxu1 %v18542_v4  ;;  %v13400_v0 = vpop.f32.mrb[57].mxu0  ;;  %v18575_v17 = vld [vmem:[#allocation13 + $0x2b8] sm:$0xff]   ;;  %v18576_v4 = vld [vmem:[#allocation13 + $0x308] sm:$0xff]  }
0x2744   : > { %14254 = vmatprep.mubr.bf16.mxu1 %v13569_v10  ;;  %v22747_v16 = vpop.f32.mrb[58].mxu0  ;;  %v18574_v10 = vld [vmem:[#allocation13 + $0x348] sm:$0xff]  }
0x2745   : > { %v13570_v35 = vpack.c.bf16 %v22747_v16, %v22745_v14  ;;  %v13404_v44 = vpop.f32.mrb[59].mxu0  ;;  %v18591_v14 = vld [vmem:[#allocation13 + $0x328] sm:$0xff]   ;;  %v18592_v16 = vld [vmem:[#allocation13 + $0x398] sm:$0xff]  }
0x2746   : > { %16657 = vmatpush3.bf16.msra.mxu0 %v18543_v2  ;;  %16667 = vmatpush3.bf16.msra.mxu1 %v18544_v25  ;;  %v13571_v27 = vpack.c.bf16 %v13404_v44, %v13400_v0  ;;  %v18577_v2 = vld [vmem:[#allocation13 + $0x350] sm:$0xff]   ;;  %v18578_v25 = vld [vmem:[#allocation13 + $0x3c0] sm:$0xff]   ;;  %v18581_v0 = vld [vmem:[#allocation13 + $0x358] sm:$0xff]  }
0x2747   : > { %16668 = vmatprep.subr.bf16.mxu1 %v18545_v20  ;;  %16686 = vmatprep.subr.bf16.mxu0 %v18546_v33  ;;  %v18579_v20 = vld [vmem:[#allocation13 + $0x310] sm:$0xff]   ;;  %v18580_v33 = vld [vmem:[#allocation13 + $0x380] sm:$0xff]   ;;  %v18582_v44 = vld [vmem:[#allocation13 + $0x3c8] sm:$0xff]  }
0x2749   : > { %14118 = vmatmul.mubr.bf16.vlgmr.msra.gmra.mrb[76].mxu0 %v13566_v32  ;;  %v18565_v32 = vld [vmem:[#allocation13 + $0x278] sm:$0xff]  }
0x274a   : > { %16669 = vmatpush3.bf16.msra.mxu1 %v18547_v1  ;;  %16687 = vmatpush3.bf16.msra.mxu0 %v18548_v24  ;;  %v22751_v23 = vpop.f32.mrb[60].mxu0  ;;  %v18586_v1 = vld [vmem:[#allocation13 + $0x3d0] sm:$0xff]   ;;  %v18587_v24 = vld [vmem:[#allocation13 + $0x320] sm:$0xff]  }
0x274b   : > { %16670 = vmatprep.subr.bf16.mxu1 %v18549_v36  ;;  %16688 = vmatprep.subr.bf16.mxu0 %v18550_v37  ;;  %v22753_v34 = vpop.f32.mrb[61].mxu0  ;;  %v18589_v36 = vld [vmem:[#allocation13 + $0x368] sm:$0xff]   ;;  %v18590_v37 = vld [vmem:[#allocation13 + $0x3d8] sm:$0xff]  }
0x274c   : > { %14391 = vmatprep.mubr.bf16.mxu0 %v13571_v27  ;;  %v22755_v28 = vpop.f32.mrb[62].mxu0  ;;  %v18588_v27 = vld [vmem:[#allocation13 + $0x390] sm:$0xff]  }
0x274d   : > { %v13572_v45 = vpack.c.bf16 %v22755_v28, %v22751_v23  ;;  %v22759_v49 = vpop.f32.mrb[63].mxu0  ;;  %v18612_v23 = vld [vmem:[#allocation13 + $0x418] sm:$0xff]   ;;  %v18613_v28 = vld [vmem:[#allocation13 + $0x460] sm:$0xff]  }
0x274e   : > { %16671 = vmatpush3.bf16.msra.mxu1 %v18551_v31  ;;  %16689 = vmatpush3.bf16.msra.mxu0 %v18552_v40  ;;  %v13573_v63 = vpack.c.bf16 %v22759_v49, %v22753_v34  ;;  %v18594_v31 = vld [vmem:[#allocation13 + $0x3e0] sm:$0xff]   ;;  %v18595_v40 = vld [vmem:[#allocation13 + $0x330] sm:$0xff]   ;;  %v18598_v34 = vld [vmem:[#allocation13 + $0x3e8] sm:$0xff]  }
0x274f   : > { %16672 = vmatprep.subr.bf16.mxu1 %v18553_v9  ;;  %16690 = vmatprep.subr.bf16.mxu0 %v18554_v46  ;;  %v18596_v9 = vld [vmem:[#allocation13 + $0x3a0] sm:$0xff]   ;;  %v18597_v46 = vld [vmem:[#allocation13 + $0x378] sm:$0xff]  }
0x2750   : > { %v18599_v49 = vld [vmem:[#allocation13 + $0x338] sm:$0xff]  }
0x2752   : > { %16673 = vmatpush3.bf16.msra.mxu1 %v18555_v55  ;;  %16691 = vmatpush3.bf16.msra.mxu0 %v18556_v53  ;;  %v22763_v56 = vpop.f32.mrb[64].mxu0  ;;  %v18600_v55 = vld [vmem:[#allocation13 + $0x3a8] sm:$0xff]   ;;  %v18601_v53 = vld [vmem:[#allocation13 + $0x3f0] sm:$0xff]  }
0x2753   : > { %16674 = vmatprep.subr.bf16.mxu1 %v18557_v30  ;;  %16692 = vmatprep.subr.bf16.mxu0 %v18558_v15  ;;  %v13502_v26 = vpop.f32.mrb[65].mxu0  ;;  %v18603_v30 = vld [vmem:[#allocation13 + $0x3b0] sm:$0xff]   ;;  %v18604_v15 = vld [vmem:[#allocation13 + $0x400] sm:$0xff]  }
0x2754   : > { %v22765_v12 = vpop.f32.mrb[66].mxu0 }
0x2755   : > { %v13574_v61 = vpack.c.bf16 %v22765_v12, %v22763_v56  ;;  %v13506_v50 = vpop.f32.mrb[67].mxu0  ;;  %v18619_v56 = vld [vmem:[#allocation13 + $0x478] sm:$0xff]  }
0x2756   : > { %16675 = vmatpush3.bf16.msra.mxu1 %v18559_v22  ;;  %16693 = vmatpush3.bf16.msra.mxu0 %v18560_v42  ;;  %v13575_v39 = vpack.c.bf16 %v13506_v50, %v13502_v26  ;;  %v18605_v22 = vld [vmem:[#allocation13 + $0x3f8] sm:$0xff]   ;;  %v18606_v42 = vld [vmem:[#allocation13 + $0x448] sm:$0xff]   ;;  %v18609_v26 = vld [vmem:[#allocation13 + $0x450] sm:$0xff]  }
0x2757   : > { %16676 = vmatprep.subr.bf16.mxu1 %v18561_v54  ;;  %16694 = vmatprep.subr.bf16.mxu0 %v18562_v18  ;;  %v18607_v54 = vld [vmem:[#allocation13 + $0x3b8] sm:$0xff]   ;;  %v18608_v18 = vld [vmem:[#allocation13 + $0x408] sm:$0xff]   ;;  %v18610_v50 = vld [vmem:[#allocation13 + $0x410] sm:$0xff]  }
0x2758   : > { %v18620_v12 = vld [vmem:[#allocation13 + $0x438] sm:$0xff]  }
0x275a   : > { %16677 = vmatpush3.bf16.msra.mxu1 %v18563_v5  ;;  %16695 = vmatpush3.bf16.msra.mxu0 %v18564_v47  ;;  %v22769_v11 = vpop.f32.mrb[68].mxu0  ;;  %v18611_v5 = vld [vmem:[#allocation13 + $0x458] sm:$0xff]   ;;  %v18615_v47 = vld [vmem:[#allocation13 + $0x468] sm:$0xff]  }
0x275b   : > { %16678 = vmatprep.subr.bf16.mxu1 %v18565_v32  ;;  %16696 = vmatprep.subr.bf16.mxu0 %v18566_v6  ;;  %v22771_v58 = vpop.f32.mrb[69].mxu0  ;;  %v18617_v32 = vld [vmem:[#allocation13 + $0x470] sm:$0xff]  }
0x275c   : > { %v22773_v13 = vpop.f32.mrb[70].mxu0  ;;  %v18618_v6 = vld [vmem:[#allocation13 + $0x430] sm:$0xff]  }
0x275d   : > { %v13576_v38 = vpack.c.bf16 %v22773_v13, %v22769_v11  ;;  %v22777_v41 = vpop.f32.mrb[71].mxu0 }
0x275e   : > { %16679 = vmatpush3.bf16.msra.mxu1 %v18567_v60  ;;  %16697 = vmatpush3.bf16.msra.mxu0 %v18568_v48  ;;  %v13577_v19 = vpack.c.bf16 %v22777_v41, %v22771_v58  ;;  %v18622_v60 = vld [vmem:[#allocation16 + $0x8] sm:$0xff]   ;;  %v18623_v48 = vld [vmem:[#allocation16 + $0x10] sm:$0xff]  }
0x275f   : > { %16698 = vmatprep.subr.bf16.mxu0 %v18569_v43  ;;  %16708 = vmatprep.subr.bf16.mxu1 %v18570_v3  ;;  %v18624_v43 = vld [vmem:[#allocation16 + $0x18] sm:$0xff]   ;;  %v18625_v3 = vld [vmem:[#allocation16 + $0x20] sm:$0xff]  }
0x2761   : > { %14255 = vmatmul.mubr.bf16.vlgmr.msra.gmra.mrb[44].mxu1 %v13568_v51  ;;  %v18585_v51 = vld [vmem:[#allocation13 + $0x360] sm:$0xff]  }
0x2762   : > { %16699 = vmatpush3.bf16.msra.mxu0 %v18571_v21  ;;  %16709 = vmatpush3.bf16.msra.mxu1 %v18572_v7  ;;  %v18626_v21 = vld [vmem:[#allocation16 + $0x28] sm:$0xff]  }
0x2763   : > { %16700 = vmatprep.subr.bf16.mxu0 %v18573_v29  ;;  %16710 = vmatprep.subr.bf16.mxu1 %v18574_v10 }
0x2764   : > { %14528 = vmatprep.mubr.bf16.mxu1 %v13573_v63  ;;  %v18602_v63 = vld [vmem:[#allocation13 + $0x440] sm:$0xff]  }
0x2766   : > { %16701 = vmatpush3.bf16.msra.mxu0 %v18575_v17  ;;  %16711 = vmatpush3.bf16.msra.mxu1 %v18576_v4 }
0x2767   : > { %16712 = vmatprep.subr.bf16.mxu1 %v18577_v2  ;;  %16730 = vmatprep.subr.bf16.mxu0 %v18578_v25  ;;  %v18628_v25 = vld [vmem:[#allocation16 + $0x38] sm:$0xff]  }
0x2769   : > { %14392 = vmatmul.mubr.bf16.vlgmr.msra.gmra.mrb[80].mxu0 %v13570_v35  ;;  %v18593_v35 = vld [vmem:[#allocation13 + $0x370] sm:$0xff]  }
0x276a   : > { %16713 = vmatpush3.bf16.msra.mxu1 %v18579_v20  ;;  %16731 = vmatpush3.bf16.msra.mxu0 %v18580_v33 }
0x276b   : > { %16714 = vmatprep.subr.bf16.mxu1 %v18581_v0  ;;  %16732 = vmatprep.subr.bf16.mxu0 %v18582_v44 }
0x276c   : > { %14665 = vmatprep.mubr.bf16.mxu0 %v13575_v39  ;;  %v18616_v39 = vld [vmem:[#allocation13 + $0x428] sm:$0xff]  }
0x276e   : > { %16715 = vmatpush3.bf16.msra.mxu1 %v18583_v59  ;;  %16733 = vmatpush3.bf16.msra.mxu0 %v18584_v52 }
0x276f   : > { %16716 = vmatprep.subr.bf16.mxu1 %v18585_v51  ;;  %16734 = vmatprep.subr.bf16.mxu0 %v18586_v1 }
0x2772   : > { %16717 = vmatpush3.bf16.msra.mxu1 %v18587_v24  ;;  %16735 = vmatpush3.bf16.msra.mxu0 %v18588_v27 }
0x2773   : > { %16718 = vmatprep.subr.bf16.mxu1 %v18589_v36  ;;  %16736 = vmatprep.subr.bf16.mxu0 %v18590_v37 }
0x2776   : > { %16719 = vmatpush3.bf16.msra.mxu1 %v18591_v14  ;;  %16737 = vmatpush3.bf16.msra.mxu0 %v18592_v16 }
0x2777   : > { %16720 = vmatprep.subr.bf16.mxu1 %v18593_v35  ;;  %16738 = vmatprep.subr.bf16.mxu0 %v18594_v31 }
0x277a   : > { %16721 = vmatpush3.bf16.msra.mxu1 %v18595_v40  ;;  %16739 = vmatpush3.bf16.msra.mxu0 %v18596_v9 }
0x277b   : > { %16722 = vmatprep.subr.bf16.mxu1 %v18597_v46  ;;  %16740 = vmatprep.subr.bf16.mxu0 %v18598_v34 }
0x277e   : > { %16723 = vmatpush3.bf16.msra.mxu1 %v18599_v49  ;;  %16741 = vmatpush3.bf16.msra.mxu0 %v18600_v55 }
0x277f   : > { %16742 = vmatprep.subr.bf16.mxu0 %v18601_v53  ;;  %16752 = vmatprep.subr.bf16.mxu1 %v18602_v63 }
0x2781   : > { %14529 = vmatmul.mubr.bf16.vlgmr.msra.gmra.mrb[48].mxu1 %v13572_v45  ;;  %v18614_v45 = vld [vmem:[#allocation13 + $0x420] sm:$0xff]  }
0x2782   : > { %16743 = vmatpush3.bf16.msra.mxu0 %v18603_v30  ;;  %16753 = vmatpush3.bf16.msra.mxu1 %v18604_v15 }
0x2783   : > { %16744 = vmatprep.subr.bf16.mxu0 %v18605_v22  ;;  %16754 = vmatprep.subr.bf16.mxu1 %v18606_v42 }
0x2784   : > { %14802 = vmatprep.mubr.bf16.mxu1 %v13577_v19  ;;  %v18627_v19 = vld [vmem:[#allocation16 + $0x30] sm:$0xff]  }
0x2786   : > { %16745 = vmatpush3.bf16.msra.mxu0 %v18607_v54  ;;  %16755 = vmatpush3.bf16.msra.mxu1 %v18608_v18 }
0x2787   : > { %16756 = vmatprep.subr.bf16.mxu1 %v18609_v26  ;;  %17991 = vmatprep.subr.bf16.mxu0 %v19496_v57 }
0x2789   : > { %14666 = vmatmul.mubr.bf16.vlgmr.msra.gmra.mrb[84].mxu0 %v13574_v61  ;;  %v18621_v61 = vld [vmem:[#allocation16] sm:$0xff]  }
0x278a   : > { %16757 = vmatpush3.bf16.msra.mxu1 %v18610_v50  ;;  %18007 = vmatprep.mubr.msk.bf16.mxu0 %vm19497_vm4, %v19496_v57 }
0x278b   : > { %16758 = vmatprep.subr.bf16.mxu1 %v18611_v5  ;;  %17992 = vmatpush3.bf16.msra.mxu0 %v18621_v61 }
0x278c   : > { %17993 = vmatprep.subr.bf16.mxu0 %v19496_v57 }
0x278e   : > { %16759 = vmatpush3.bf16.msra.mxu1 %v18612_v23 }
0x278f   : > { %16760 = vmatprep.subr.bf16.mxu1 %v18613_v28  ;;  %17994 = vmatpush3.bf16.msra.mxu0 %v18622_v60 }
0x2790   : > { %17995 = vmatprep.subr.bf16.mxu0 %v19496_v57 }
0x2792   : > { %16761 = vmatpush3.bf16.msra.mxu1 %v18614_v45 }
0x2793   : > { %16762 = vmatprep.subr.bf16.mxu1 %v18615_v47  ;;  %17996 = vmatpush3.bf16.msra.mxu0 %v18623_v48 }
0x2794   : > { %17997 = vmatprep.subr.bf16.mxu0 %v19496_v57 }
0x2796   : > { %16763 = vmatpush3.bf16.msra.mxu1 %v18616_v39 }
0x2797   : > { %16764 = vmatprep.subr.bf16.mxu1 %v18617_v32  ;;  %17998 = vmatpush3.bf16.msra.mxu0 %v18624_v43 }
0x2798   : > { %17999 = vmatprep.subr.bf16.mxu0 %v19496_v57 }
0x279a   : > { %16765 = vmatpush3.bf16.msra.mxu1 %v18618_v6 }
0x279b   : > { %16766 = vmatprep.subr.bf16.mxu1 %v18619_v56  ;;  %18000 = vmatpush3.bf16.msra.mxu0 %v18625_v3 }
0x279c   : > { %18001 = vmatprep.subr.bf16.mxu0 %v19496_v57 }
0x279e   : > { %16767 = vmatpush3.bf16.msra.mxu1 %v18620_v12 }
0x279f   : > { %18002 = vmatpush3.bf16.msra.mxu0 %v18626_v21 }
0x27a0   : > { %18003 = vmatprep.subr.bf16.mxu0 %v19496_v57 }
0x27a1   : > { %14803 = vmatmul.mubr.bf16.vlgmr.msra.gmra.mrb[52].mxu1 %v13576_v38 }
0x27a3   : > { %18004 = vmatpush3.bf16.msra.mxu0 %v18627_v19 }
0x27a4   : > { %18005 = vmatprep.subr.bf16.mxu0 %v19496_v57 }
0x27a7   : > { %18006 = vmatpush3.bf16.msra.mxu0 %v18628_v25 }
0x27f4   : > { %v16592_v58 = vpop.f32.mrb[36].mxu1 }
0x27f5   : > { %v16593_v11 = vpop.f32.mrb[37].mxu1 }
0x27f6   : > { %v16594_v13 = vadd.f32 %v16593_v11, %v16592_v58  ;;  %v16595_v38 = vpop.f32.mrb[38].mxu1 }
0x27f7   : > { %v16596_v41 = vpop.f32.mrb[39].mxu1 }
0x27f8   : > { %v16597_v7 = vadd.f32 %v16596_v41, %v16595_v38  ;;  %v11607_v38 = vld [vmem:[#allocation15] sm:$0x3] }
0x27f9   : > { %v14830_v19 = vrot.slane %v11607_v38, %v20007_v62 }
0x27fc   : > { %v16614_v29 = vpop.f32.mrb[72].mxu0 }
0x27fd   : > { %v16615_v10 = vpop.f32.mrb[73].mxu0 }
0x27fe   : > { %v16616_v17 = vadd.f32 %v16615_v10, %v16614_v29  ;;  %v16617_v4 = vpop.f32.mrb[74].mxu0 }
0x27ff   : > { %v16618_v2 = vpop.f32.mrb[75].mxu0 }
0x2800   : > { %v14811_v20 = vadd.f32 %v16616_v17, %v16594_v13  ;;  %v16619_v33 = vadd.f32 %v16618_v2, %v16617_v4  ;;  %v14836_v4 = vrot.slane %v11607_v38, %v20022_v8 }
0x2802   : > { %v14812_v0 = vadd.f32 %v16619_v33, %v16597_v7 }
0x2814   : > { %v16636_v44 = vpop.f32.mrb[40].mxu1 }
0x2815   : > { %v16637_v59 = vpop.f32.mrb[41].mxu1 }
0x2816   : > { %v16638_v52 = vadd.f32 %v16637_v59, %v16636_v44  ;;  %v16639_v51 = vpop.f32.mrb[42].mxu1 }
0x2817   : > { %v16640_v1 = vpop.f32.mrb[43].mxu1 }
0x2818   : > { %v16641_v24 = vadd.f32 %v16640_v1, %v16639_v51  ;;  %v15969_v1 = vld [vmem:[#allocation18] ss:$0 sm:$0xff] }
0x281c   : > { %v16658_v27 = vpop.f32.mrb[76].mxu0 }
0x281d   : > { %v16659_v36 = vpop.f32.mrb[77].mxu0 }
0x281e   : > { %v16660_v37 = vadd.f32 %v16659_v36, %v16658_v27  ;;  %v16661_v14 = vpop.f32.mrb[78].mxu0 }
0x281f   : > { %v16662_v16 = vpop.f32.mrb[79].mxu0 }
0x2820   : > { %v14813_v35 = vadd.f32 %v16660_v37, %v16638_v52  ;;  %v16663_v31 = vadd.f32 %v16662_v16, %v16661_v14 }
0x2822   : > { %v14819_v57 = vadd.f32 %v14813_v35, %v14811_v20  ;;  %v14814_v40 = vadd.f32 %v16663_v31, %v16641_v24 }
0x2824   : > { %v14820_v9 = vadd.f32 %v14814_v40, %v14812_v0 }
0x2834   : > { %v16680_v46 = vpop.f32.mrb[44].mxu1 }
0x2835   : > { %v16681_v34 = vpop.f32.mrb[45].mxu1 }
0x2836   : > { %v16682_v49 = vadd.f32 %v16681_v34, %v16680_v46  ;;  %v16683_v55 = vpop.f32.mrb[46].mxu1 }
0x2837   : > { %v16684_v53 = vpop.f32.mrb[47].mxu1 }
0x2838   : > { %v16685_v63 = vadd.f32 %v16684_v53, %v16683_v55 }
0x283c   : > { %v16702_v30 = vpop.f32.mrb[80].mxu0 }
0x283d   : > { %v16703_v15 = vpop.f32.mrb[81].mxu0 }
0x283e   : > { %v16704_v22 = vadd.f32 %v16703_v15, %v16702_v30  ;;  %v16705_v42 = vpop.f32.mrb[82].mxu0 }
0x283f   : > { %v16706_v54 = vpop.f32.mrb[83].mxu0 }
0x2840   : > { %v14815_v18 = vadd.f32 %v16704_v22, %v16682_v49  ;;  %v16707_v26 = vadd.f32 %v16706_v54, %v16705_v42 }
0x2842   : > { %v14816_v50 = vadd.f32 %v16707_v26, %v16685_v63 }
0x2854   : > { %v16724_v5 = vpop.f32.mrb[48].mxu1 }
0x2855   : > { %v16725_v23 = vpop.f32.mrb[49].mxu1 }
0x2856   : > { %v16726_v28 = vadd.f32 %v16725_v23, %v16724_v5  ;;  %v16727_v45 = vpop.f32.mrb[50].mxu1 }
0x2857   : > { %v16728_v47 = vpop.f32.mrb[51].mxu1 }
0x2858   : > { %v16729_v39 = vadd.f32 %v16728_v47, %v16727_v45 }
0x285c   : > { %v16746_v32 = vpop.f32.mrb[84].mxu0 }
0x285d   : > { %v16747_v6 = vpop.f32.mrb[85].mxu0 }
0x285e   : > { %v16748_v56 = vadd.f32 %v16747_v6, %v16746_v32  ;;  %v16749_v12 = vpop.f32.mrb[86].mxu0 }
0x285f   : > { %v16750_v61 = vpop.f32.mrb[87].mxu0 }
0x2860   : > { %v14817_v60 = vadd.f32 %v16748_v56, %v16726_v28  ;;  %v16751_v48 = vadd.f32 %v16750_v61, %v16749_v12 }
0x2862   : > { %v14821_v43 = vadd.f32 %v14817_v60, %v14815_v18  ;;  %v14818_v3 = vadd.f32 %v16751_v48, %v16729_v39 }
0x2864   : > { %v14822_v58 = vadd.f32 %v14818_v3, %v14816_v50  ;;  %v14823_v11 = vadd.f32 %v14821_v43, %v14819_v57 }
0x2866   : > { %v14824_v13 = vadd.f32 %v14822_v58, %v14820_v9 }
0x2874   : > { %v16768_v41 = vpop.f32.mrb[52].mxu1 }
0x2875   : > { %v16769_v21 = vpop.f32.mrb[53].mxu1 }
0x2876   : > { %v16770_v7 = vadd.f32 %v16769_v21, %v16768_v41  ;;  %v16771_v29 = vpop.f32.mrb[54].mxu1 }
0x2877   : > { %v16772_v10 = vpop.f32.mrb[55].mxu1 }
0x2878   : > { %v14825_v17 = vadd.f32 %v16770_v7, %v14823_v11  ;;  %v16773_v2 = vadd.f32 %v16772_v10, %v16771_v29 }
0x287a   : > { %v14831_v25 = vmul.f32 %v14830_v19, %v14825_v17  ;;  %v14826_v20 = vadd.f32 %v16773_v2, %v14824_v13 }
0x287c   : > { %v14837_v33 = vadd.f32 %v14836_v4, %v14831_v25  ;;  %v14832_v0 = vmul.f32 %v14830_v19, %v14826_v20 }
0x287e   : > { %v14838_v44 = vadd.f32 %v14836_v4, %v14832_v0  ;;  %v14839_v59 = vmax.f32 %v14837_v33, 0.0 }
0x2880   : > { %v14840_v52 = vmax.f32 %v14838_v44, 0.0 }
0x2882   : > { %v14857_v51 = vpack.c.bf16 %v14840_v52, %v14839_v59 }
0x2884   : > { %18008 = vmatmul.mubr.bf16.vlgmr.msra.gmra.mrb[88].mxu0 %v14857_v51 }
0x2957   : > { %v14947_v62 = vpop.f32.mrb[88].mxu0 }
0x2958   : > { %v14948_v24 = vadd.f32 %v15969_v1, %v14947_v62  ;;  %v18009_v27 = vpop.f32.mrb[89].mxu0 }
0x2959   : > { %v14950_v8 = vpop.f32.mrb[90].mxu0 }
0x295a   : > { %14954 = vst [vmem:[%s747_s10] sm:$0xff] %v14948_v24  ;;  %v14951_v36 = vadd.f32 %v15969_v1, %v14950_v8  ;;  %v18010_v37 = vpop.f32.mrb[91].mxu0 }
0x295c   : > { %14955 = vst [vmem:[%s747_s10 + $0x8] sm:$0xff] %v14951_v36 }
0x295d PF: > { %s22894_s26 = sld [smem:[#allocation25_spill]] }
0x2963   : > { %s34_s27 = sadd.s32 1, %s22894_s26  }
0x2964   : > { %p31_p13 = scmp.ge.s32.totalorder %s34_s27, 4  }
0x2966   :  { %33 = sbr.rel (!%p31_p13) target bundleno = 15 (0xf), region = 188 }
0x296d   :  { %14977 = vsyncpa [#allocation3], 1 }
0x296e   :  { %14979 = vsyncpa [#allocation3 + $0x1], 1 }
0x296f   :  { %14980 = vsyncpa [#allocation5], 1 }
0x2970   :  { %14981 = vsyncpa [#allocation8], 1 }
0x2971   :  { %14982 = vsyncpa [#allocation11], 1 }
0x2972   :  { %14983 = vsyncpa [#allocation14], 1 }
0x2973   :  { %14984 = vsyncpa [#allocation17], 1 }

</bundles_post_ra>
